<compile_context>
chip_gen: v7x
topology: tpu7x:2x2x1
jax: 0.10.0
libtpu: 0.0.40
codegen_flags: <defaults>
</compile_context>

<pallas_src>
import functools

import numpy as np

import jax
import jax.numpy as jnp
from jax.experimental import pallas as pl
from jax.experimental.pallas import tpu as pltpu

LEAKY_SLOPE = 0.2
IN_EPS = 1e-5          # PyTorch InstanceNorm2d default
KSIZE = 4
STRIDE = 2


# -----------------------------------------------------------------------------
# Fused Pallas kernel: the whole discriminator for one sample per grid step.
# -----------------------------------------------------------------------------
def _disc_kernel(*refs, layers):
    """refs = [x, per-layer operands..., w_final, b_final, out].

    Per (non-final) layer operands, in order:
      M     (4, Co*Ho, Ci*H) bf16   row-tap weight-banded matrices (one per kj)
      S     (4, W,     Wo)   bf16   column-tap 0/1 selection matrices
      [bias (Co*Ho, 1) f32]                                 if use_bias
      [gamma (Co,1), beta (Co,1), Srow (Co,Co*Ho), SrowT (Co*Ho,Co)]  if use_in
    """
    *ins, out_ref = refs
    it = iter(ins)
    acts = next(it)[0].astype(jnp.float32)            # (Ci0*H0, W0)

    hi = jax.lax.Precision.HIGHEST
    for use_bias, use_in, use_lrelu, ho, wo in layers:
        m_ref = next(it)
        s_ref = next(it)
        xb = acts.astype(jnp.bfloat16)                # conv inputs are bf16
        z = None
        for kj in range(4):                           # 4 column taps (static)
            # exact 0/1 gather of the kj-th column tap, then weight matmul
            xg = jnp.dot(xb, s_ref[kj], preferred_element_type=jnp.float32)
            part = jnp.dot(m_ref[kj], xg.astype(jnp.bfloat16),
                           preferred_element_type=jnp.float32)
            z = part if z is None else z + part       # (Co*Ho, Wo) f32
        if use_bias:
            z = z + next(it)[...]                     # (Co*Ho, 1) broadcast
        if use_in:
            g = next(it)[...]                         # (Co, 1)
            bt = next(it)[...]                        # (Co, 1)
            srow = next(it)[...]                      # (Co, Co*Ho) 0/1
            srow_t = next(it)[...]                    # (Co*Ho, Co) 0/1
            inv_cnt = 1.0 / float(ho * wo)
            # one-pass stats: block sums of z and z*z, per (channel) row block
            rs1 = jnp.dot(srow, z, precision=hi,
                          preferred_element_type=jnp.float32)       # (Co, Wo)
            rs2 = jnp.dot(srow, z * z, precision=hi,
                          preferred_element_type=jnp.float32)       # (Co, Wo)
            mean = jnp.sum(rs1, axis=1, keepdims=True) * inv_cnt    # (Co, 1)
            var = jnp.sum(rs2, axis=1, keepdims=True) * inv_cnt - mean * mean
            scale = g * jax.lax.rsqrt(var + IN_EPS)                 # (Co, 1)
            shift = bt - mean * scale                               # (Co, 1)
            scale_f = jnp.dot(srow_t, scale, precision=hi,
                              preferred_element_type=jnp.float32)   # (Co*Ho,1)
            shift_f = jnp.dot(srow_t, shift, precision=hi,
                              preferred_element_type=jnp.float32)
            z = z * scale_f + shift_f
        if use_lrelu:
            z = jnp.where(z > 0, z, LEAKY_SLOPE * z)
        acts = z

    # Final 4x4/s2/p0 conv covers the whole remaining map -> multiply-reduce.
    w4 = next(it)[...].astype(jnp.float32)            # (Ci4*4, 4)
    b4 = next(it)[...]                                # (1, 1)
    prod = acts.astype(jnp.bfloat16).astype(jnp.float32) * w4
    s = jnp.sum(jnp.sum(prod, axis=1, keepdims=True), axis=0, keepdims=True)
    out_ref[0] = (s + b4).astype(out_ref.dtype)       # (1, 1)


# -----------------------------------------------------------------------------
# Structure-matrix builders (shape-only, numpy -> constants)
# -----------------------------------------------------------------------------
def _col_select(w_in, w_out, pad):
    """(4, W, Wo) 0/1: S[kj, w, ow] = 1 iff w == 2*ow + kj - pad (in range)."""
    s = np.zeros((4, w_in, w_out), np.float32)
    for kj in range(4):
        for ow in range(w_out):
            w = STRIDE * ow + kj - pad
            if 0 <= w < w_in:
                s[kj, w, ow] = 1.0
    return s


def _row_indicator(h_in, h_out, pad):
    """(4, Ho, H) 0/1: R[ki, oh, h] = 1 iff h == 2*oh + ki - pad (in range)."""
    r = np.zeros((4, h_out, h_in), np.float32)
    for ki in range(4):
        for oh in range(h_out):
            h = STRIDE * oh + ki - pad
            if 0 <= h < h_in:
                r[ki, oh, h] = 1.0
    return r


def _const_spec(shape):
    """Full-array block with a constant index_map (staged once across grid)."""
    shape = tuple(int(d) for d in shape)
    origin = (0,) * len(shape)
    return pl.BlockSpec(shape, lambda i: origin)


# -----------------------------------------------------------------------------
# Parameters (deterministic, in-script)
# -----------------------------------------------------------------------------
def layer_configs(channels_img, features_d):
    # (C_in, C_out, pad, use_bias, use_in, use_lrelu) for all 5 convs.
    return [
        (channels_img + 1, features_d,     1, True,  False, True),
        (features_d,       features_d * 2, 1, False, True,  True),
        (features_d * 2,   features_d * 4, 1, False, True,  True),
        (features_d * 4,   features_d * 8, 1, False, True,  True),
        (features_d * 8,   1,              0, True,  False, False),
    ]


def init_params(key, channels_img, features_d, num_classes, img_size):
    cfgs = layer_configs(channels_img, features_d)
    params = {}
    keys = jax.random.split(key, 3 * len(cfgs) + 1)
    params["embed_w"] = (0.1 * jax.random.normal(
        keys[0], (num_classes, img_size * img_size))).astype(jnp.float32)
    ki = 1
    for i, (cin, cout, *_rest) in enumerate(cfgs):
        params[f"w{i}"] = (0.02 * jax.random.normal(
            keys[ki], (cout, cin, 4, 4))).astype(jnp.float32)
        params[f"b{i}"] = (0.02 * jax.random.normal(
            keys[ki + 1], (1, cout))).astype(jnp.float32)
        params[f"g{i}"] = (1.0 + 0.1 * jax.random.normal(
            keys[ki + 2], (1, cout))).astype(jnp.float32)
        params[f"bt{i}"] = jnp.zeros((1, cout), jnp.float32)
        ki += 3
    return params


# -----------------------------------------------------------------------------
# Discriminator forward (single fused pallas_call)
# -----------------------------------------------------------------------------
def discriminator_forward(params, x, labels, channels_img, features_d, img_size):
    N = x.shape[0]
    cfgs = layer_configs(channels_img, features_d)

    # Plain-JAX prologue: label-embedding gather + channel concat + relayout.
    emb = params["embed_w"][labels].reshape(N, 1, img_size, img_size)
    h0 = jnp.concatenate([x, emb], axis=1)                 # (N, Ci0, H, W)
    ci0 = channels_img + 1
    xrep = h0.reshape(N, ci0 * img_size, img_size).astype(jnp.bfloat16)

    operands = [xrep]
    in_specs = [pl.BlockSpec((1, ci0 * img_size, img_size),
                             lambda i: (i, 0, 0))]
    layers_meta = []

    h_cur = w_cur = img_size
    for idx, (cin, cout, pad, use_bias, use_in, use_lrelu) in enumerate(cfgs):
        ho = (h_cur + 2 * pad - KSIZE) // STRIDE + 1
        wo = (w_cur + 2 * pad - KSIZE) // STRIDE + 1
        last = idx == len(cfgs) - 1
        if last:
            # Final conv must reduce the whole remaining map to a 1x1 logit.
            assert (ho, wo, cout) == (1, 1, 1) and use_bias and not use_in
            w4 = params[f"w{idx}"][0].reshape(cin * h_cur, w_cur)
            operands += [w4.astype(jnp.bfloat16),
                         params[f"b{idx}"].reshape(1, 1).astype(jnp.float32)]
            in_specs += [_const_spec((cin * h_cur, w_cur)), _const_spec((1, 1))]
        else:
            # Banded row/channel weight matrices (one per column tap kj).
            r_ind = _row_indicator(h_cur, ho, pad)                  # (4,Ho,H)
            m = jnp.einsum("ocij,iah->joach", params[f"w{idx}"], r_ind)
            m = m.reshape(4, cout * ho, cin * h_cur).astype(jnp.bfloat16)
            s = jnp.asarray(_col_select(w_cur, wo, pad), jnp.bfloat16)
            operands += [m, s]
            in_specs += [_const_spec(m.shape), _const_spec(s.shape)]
            if use_bias:
                brep = jnp.repeat(params[f"b{idx}"].reshape(-1), ho)[:, None]
                operands.append(brep.astype(jnp.float32))
                in_specs.append(_const_spec((cout * ho, 1)))
            if use_in:
                gamma = params[f"g{idx}"].reshape(cout, 1).astype(jnp.float32)
                beta = params[f"bt{idx}"].reshape(cout, 1).astype(jnp.float32)
                srow = np.kron(np.eye(cout, dtype=np.float32),
                               np.ones((1, ho), np.float32))        # (Co,Co*Ho)
                operands += [gamma, beta,
                             jnp.asarray(srow), jnp.asarray(srow.T.copy())]
                in_specs += [_const_spec((cout, 1)), _const_spec((cout, 1)),
                             _const_spec(srow.shape), _const_spec(srow.T.shape)]
            layers_meta.append((use_bias, use_in, use_lrelu, ho, wo))
        h_cur, w_cur = ho, wo

    kernel = functools.partial(_disc_kernel, layers=tuple(layers_meta))
    out = pl.pallas_call(
        kernel,
        out_shape=jax.ShapeDtypeStruct((N, 1, 1), jnp.float32),
        grid=(N,),
        in_specs=in_specs,
        out_specs=pl.BlockSpec((1, 1, 1), lambda i: (i, 0, 0)),
        compiler_params=pltpu.CompilerParams(
            dimension_semantics=("parallel",)),
    )(*operands)
    return out.reshape(N, 1, 1, 1)


# -----------------------------------------------------------------------------
# Pure-JAX reference (bf16 conv inputs / f32 accumulation, f32 InstanceNorm)
# -----------------------------------------------------------------------------
def discriminator_reference(params, x, labels, channels_img, features_d, img_size):
    N = x.shape[0]
    emb = params["embed_w"][labels].reshape(N, 1, img_size, img_size)
    h = jnp.concatenate([x, emb], axis=1)
    for i, (_, cout, pad, use_bias, use_in, use_lrelu) in enumerate(
            layer_configs(channels_img, features_d)):
        h = jax.lax.conv_general_dilated(
            h.astype(jnp.bfloat16), params[f"w{i}"].astype(jnp.bfloat16),
            (2, 2), ((pad, pad), (pad, pad)),
            dimension_numbers=("NCHW", "OIHW", "NCHW"),
            preferred_element_type=jnp.float32)
        if use_bias:
            h = h + params[f"b{i}"].reshape(1, cout, 1, 1)
        if use_in:
            mean = h.mean(axis=(2, 3), keepdims=True)
            var = ((h - mean) ** 2).mean(axis=(2, 3), keepdims=True)
            h = (h - mean) / jnp.sqrt(var + IN_EPS)
            h = h * params[f"g{i}"].reshape(1, cout, 1, 1) \
                  + params[f"bt{i}"].reshape(1, cout, 1, 1)
        if use_lrelu:
            h = jnp.where(h > 0, h, LEAKY_SLOPE * h)
    return h


if __name__ == "__main__":
    # img_size=64 is the minimum that the five stride-2 convs of this DCGAN
    # discriminator support (the size at which the last conv output is 1x1).
    batch, channels_img, features_d, num_classes, img_size = 2, 1, 4, 10, 64

    key = jax.random.PRNGKey(0)
    k_par, k_x, k_lab = jax.random.split(key, 3)
    params = init_params(k_par, channels_img, features_d, num_classes, img_size)
    x = jax.random.normal(k_x, (batch, channels_img, img_size, img_size),
                          dtype=jnp.float32)
    labels = jax.random.randint(k_lab, (batch,), 0, num_classes)

    fwd = jax.jit(functools.partial(discriminator_forward,
                                    channels_img=channels_img,
                                    features_d=features_d,
                                    img_size=img_size))
    out = jax.block_until_ready(fwd(params, x, labels))

    ref = discriminator_reference(params, x, labels, channels_img, features_d,
                                  img_size)
    assert out.shape == (batch, 1, 1, 1), out.shape
    # bf16 conv inputs + f32 accumulation in both paths; small slack for
    # accumulation-order differences across the fused layers.
    assert jnp.allclose(out, ref, rtol=1e-2, atol=3e-3), (out, ref)

    print("KERNEL_OK")
</pallas_src>

<mosaic_0001>
module attributes {stable_mosaic.version = 11 : i64} {
  func.func @_disc_kernel(%arg0: i32, %arg1: memref<1x128x64xbf16, #tpu.memory_space<vmem>>, %arg2: memref<4x128x128xbf16, #tpu.memory_space<vmem>>, %arg3: memref<4x64x32xbf16, #tpu.memory_space<vmem>>, %arg4: memref<128x1xf32, #tpu.memory_space<vmem>>, %arg5: memref<4x128x128xbf16, #tpu.memory_space<vmem>>, %arg6: memref<4x32x16xbf16, #tpu.memory_space<vmem>>, %arg7: memref<8x1xf32, #tpu.memory_space<vmem>>, %arg8: memref<8x1xf32, #tpu.memory_space<vmem>>, %arg9: memref<8x128xf32, #tpu.memory_space<vmem>>, %arg10: memref<128x8xf32, #tpu.memory_space<vmem>>, %arg11: memref<4x128x128xbf16, #tpu.memory_space<vmem>>, %arg12: memref<4x16x8xbf16, #tpu.memory_space<vmem>>, %arg13: memref<16x1xf32, #tpu.memory_space<vmem>>, %arg14: memref<16x1xf32, #tpu.memory_space<vmem>>, %arg15: memref<16x128xf32, #tpu.memory_space<vmem>>, %arg16: memref<128x16xf32, #tpu.memory_space<vmem>>, %arg17: memref<4x128x128xbf16, #tpu.memory_space<vmem>>, %arg18: memref<4x8x4xbf16, #tpu.memory_space<vmem>>, %arg19: memref<32x1xf32, #tpu.memory_space<vmem>>, %arg20: memref<32x1xf32, #tpu.memory_space<vmem>>, %arg21: memref<32x128xf32, #tpu.memory_space<vmem>>, %arg22: memref<128x32xf32, #tpu.memory_space<vmem>>, %arg23: memref<128x4xbf16, #tpu.memory_space<vmem>>, %arg24: memref<1x1xf32, #tpu.memory_space<vmem>>, %arg25: memref<1x1x1xf32, #tpu.memory_space<vmem>>) attributes {dimension_semantics = [#tpu.dimension_semantics<parallel>], iteration_bounds = array<i64: 2>, scalar_prefetch = 0 : i64, scratch_operands = 0 : i64, tpu.core_type = #tpu.core_type<tc>, window_params = [{transform_indices = @transform_0, window_bounds = array<i64: 1, 128, 64>}, {pipeline_mode = #tpu.pipeline_mode<synchronous>, transform_indices = @transform_1, window_bounds = array<i64: 4, 128, 128>}, {pipeline_mode = #tpu.pipeline_mode<synchronous>, transform_indices = @transform_2, window_bounds = array<i64: 4, 64, 32>}, {pipeline_mode = #tpu.pipeline_mode<synchronous>, transform_indices = @transform_3, window_bounds = array<i64: 128, 1>}, {pipeline_mode = #tpu.pipeline_mode<synchronous>, transform_indices = @transform_4, window_bounds = array<i64: 4, 128, 128>}, {pipeline_mode = #tpu.pipeline_mode<synchronous>, transform_indices = @transform_5, window_bounds = array<i64: 4, 32, 16>}, {pipeline_mode = #tpu.pipeline_mode<synchronous>, transform_indices = @transform_6, window_bounds = array<i64: 8, 1>}, {pipeline_mode = #tpu.pipeline_mode<synchronous>, transform_indices = @transform_7, window_bounds = array<i64: 8, 1>}, {pipeline_mode = #tpu.pipeline_mode<synchronous>, transform_indices = @transform_8, window_bounds = array<i64: 8, 128>}, {pipeline_mode = #tpu.pipeline_mode<synchronous>, transform_indices = @transform_9, window_bounds = array<i64: 128, 8>}, {pipeline_mode = #tpu.pipeline_mode<synchronous>, transform_indices = @transform_10, window_bounds = array<i64: 4, 128, 128>}, {pipeline_mode = #tpu.pipeline_mode<synchronous>, transform_indices = @transform_11, window_bounds = array<i64: 4, 16, 8>}, {pipeline_mode = #tpu.pipeline_mode<synchronous>, transform_indices = @transform_12, window_bounds = array<i64: 16, 1>}, {pipeline_mode = #tpu.pipeline_mode<synchronous>, transform_indices = @transform_13, window_bounds = array<i64: 16, 1>}, {pipeline_mode = #tpu.pipeline_mode<synchronous>, transform_indices = @transform_14, window_bounds = array<i64: 16, 128>}, {pipeline_mode = #tpu.pipeline_mode<synchronous>, transform_indices = @transform_15, window_bounds = array<i64: 128, 16>}, {pipeline_mode = #tpu.pipeline_mode<synchronous>, transform_indices = @transform_16, window_bounds = array<i64: 4, 128, 128>}, {pipeline_mode = #tpu.pipeline_mode<synchronous>, transform_indices = @transform_17, window_bounds = array<i64: 4, 8, 4>}, {pipeline_mode = #tpu.pipeline_mode<synchronous>, transform_indices = @transform_18, window_bounds = array<i64: 32, 1>}, {pipeline_mode = #tpu.pipeline_mode<synchronous>, transform_indices = @transform_19, window_bounds = array<i64: 32, 1>}, {pipeline_mode = #tpu.pipeline_mode<synchronous>, transform_indices = @transform_20, window_bounds = array<i64: 32, 128>}, {pipeline_mode = #tpu.pipeline_mode<synchronous>, transform_indices = @transform_21, window_bounds = array<i64: 128, 32>}, {pipeline_mode = #tpu.pipeline_mode<synchronous>, transform_indices = @transform_22, window_bounds = array<i64: 128, 4>}, {pipeline_mode = #tpu.pipeline_mode<synchronous>, transform_indices = @transform_23, window_bounds = array<i64: 1, 1>}, {transform_indices = @transform_24, window_bounds = array<i64: 1, 1, 1>}]} {
    %c0 = arith.constant 0 : index
    %c0_0 = arith.constant 0 : index
    %c0_1 = arith.constant 0 : index
    %0 = vector.load %arg1[%c0, %c0_0, %c0_1] : memref<1x128x64xbf16, #tpu.memory_space<vmem>>, vector<1x128x64xbf16>
    %1 = vector.shape_cast %0 : vector<1x128x64xbf16> to vector<128x64xbf16>
    %2 = arith.extf %1 : vector<128x64xbf16> to vector<128x64xf32>
    %3 = arith.truncf %2 : vector<128x64xf32> to vector<128x64xbf16>
    %c0_2 = arith.constant 0 : index
    %c0_3 = arith.constant 0 : index
    %c0_4 = arith.constant 0 : index
    %4 = vector.load %arg3[%c0_2, %c0_3, %c0_4] : memref<4x64x32xbf16, #tpu.memory_space<vmem>>, vector<1x64x32xbf16>
    %5 = vector.shape_cast %4 : vector<1x64x32xbf16> to vector<64x32xbf16>
    %cst = arith.constant dense<0.000000e+00> : vector<128x32xf32>
    %6 = tpu.matmul %3, %5, %cst {dimension_numbers = #tpu.dot_dimension_numbers<[1], [0], [0], [1], [0, 0, 1, 1], [], []>} : vector<128x64xbf16>, vector<64x32xbf16>, vector<128x32xf32> -> vector<128x32xf32>
    %c0_5 = arith.constant 0 : index
    %c0_6 = arith.constant 0 : index
    %c0_7 = arith.constant 0 : index
    %7 = vector.load %arg2[%c0_5, %c0_6, %c0_7] : memref<4x128x128xbf16, #tpu.memory_space<vmem>>, vector<1x128x128xbf16>
    %8 = vector.shape_cast %7 : vector<1x128x128xbf16> to vector<128x128xbf16>
    %9 = arith.truncf %6 : vector<128x32xf32> to vector<128x32xbf16>
    %cst_8 = arith.constant dense<0.000000e+00> : vector<128x32xf32>
    %10 = tpu.matmul %8, %9, %cst_8 {dimension_numbers = #tpu.dot_dimension_numbers<[1], [0], [0], [1], [0, 0, 1, 1], [], []>} : vector<128x128xbf16>, vector<128x32xbf16>, vector<128x32xf32> -> vector<128x32xf32>
    %c1 = arith.constant 1 : index
    %c0_9 = arith.constant 0 : index
    %c0_10 = arith.constant 0 : index
    %11 = vector.load %arg3[%c1, %c0_9, %c0_10] : memref<4x64x32xbf16, #tpu.memory_space<vmem>>, vector<1x64x32xbf16>
    %12 = vector.shape_cast %11 : vector<1x64x32xbf16> to vector<64x32xbf16>
    %cst_11 = arith.constant dense<0.000000e+00> : vector<128x32xf32>
    %13 = tpu.matmul %3, %12, %cst_11 {dimension_numbers = #tpu.dot_dimension_numbers<[1], [0], [0], [1], [0, 0, 1, 1], [], []>} : vector<128x64xbf16>, vector<64x32xbf16>, vector<128x32xf32> -> vector<128x32xf32>
    %c1_12 = arith.constant 1 : index
    %c0_13 = arith.constant 0 : index
    %c0_14 = arith.constant 0 : index
    %14 = vector.load %arg2[%c1_12, %c0_13, %c0_14] : memref<4x128x128xbf16, #tpu.memory_space<vmem>>, vector<1x128x128xbf16>
    %15 = vector.shape_cast %14 : vector<1x128x128xbf16> to vector<128x128xbf16>
    %16 = arith.truncf %13 : vector<128x32xf32> to vector<128x32xbf16>
    %cst_15 = arith.constant dense<0.000000e+00> : vector<128x32xf32>
    %17 = tpu.matmul %15, %16, %cst_15 {dimension_numbers = #tpu.dot_dimension_numbers<[1], [0], [0], [1], [0, 0, 1, 1], [], []>} : vector<128x128xbf16>, vector<128x32xbf16>, vector<128x32xf32> -> vector<128x32xf32>
    %18 = arith.addf %10, %17 : vector<128x32xf32>
    %c2 = arith.constant 2 : index
    %c0_16 = arith.constant 0 : index
    %c0_17 = arith.constant 0 : index
    %19 = vector.load %arg3[%c2, %c0_16, %c0_17] : memref<4x64x32xbf16, #tpu.memory_space<vmem>>, vector<1x64x32xbf16>
    %20 = vector.shape_cast %19 : vector<1x64x32xbf16> to vector<64x32xbf16>
    %cst_18 = arith.constant dense<0.000000e+00> : vector<128x32xf32>
    %21 = tpu.matmul %3, %20, %cst_18 {dimension_numbers = #tpu.dot_dimension_numbers<[1], [0], [0], [1], [0, 0, 1, 1], [], []>} : vector<128x64xbf16>, vector<64x32xbf16>, vector<128x32xf32> -> vector<128x32xf32>
    %c2_19 = arith.constant 2 : index
    %c0_20 = arith.constant 0 : index
    %c0_21 = arith.constant 0 : index
    %22 = vector.load %arg2[%c2_19, %c0_20, %c0_21] : memref<4x128x128xbf16, #tpu.memory_space<vmem>>, vector<1x128x128xbf16>
    %23 = vector.shape_cast %22 : vector<1x128x128xbf16> to vector<128x128xbf16>
    %24 = arith.truncf %21 : vector<128x32xf32> to vector<128x32xbf16>
    %cst_22 = arith.constant dense<0.000000e+00> : vector<128x32xf32>
    %25 = tpu.matmul %23, %24, %cst_22 {dimension_numbers = #tpu.dot_dimension_numbers<[1], [0], [0], [1], [0, 0, 1, 1], [], []>} : vector<128x128xbf16>, vector<128x32xbf16>, vector<128x32xf32> -> vector<128x32xf32>
    %26 = arith.addf %18, %25 : vector<128x32xf32>
    %c3 = arith.constant 3 : index
    %c0_23 = arith.constant 0 : index
    %c0_24 = arith.constant 0 : index
    %27 = vector.load %arg3[%c3, %c0_23, %c0_24] : memref<4x64x32xbf16, #tpu.memory_space<vmem>>, vector<1x64x32xbf16>
    %28 = vector.shape_cast %27 : vector<1x64x32xbf16> to vector<64x32xbf16>
    %cst_25 = arith.constant dense<0.000000e+00> : vector<128x32xf32>
    %29 = tpu.matmul %3, %28, %cst_25 {dimension_numbers = #tpu.dot_dimension_numbers<[1], [0], [0], [1], [0, 0, 1, 1], [], []>} : vector<128x64xbf16>, vector<64x32xbf16>, vector<128x32xf32> -> vector<128x32xf32>
    %c3_26 = arith.constant 3 : index
    %c0_27 = arith.constant 0 : index
    %c0_28 = arith.constant 0 : index
    %30 = vector.load %arg2[%c3_26, %c0_27, %c0_28] : memref<4x128x128xbf16, #tpu.memory_space<vmem>>, vector<1x128x128xbf16>
    %31 = vector.shape_cast %30 : vector<1x128x128xbf16> to vector<128x128xbf16>
    %32 = arith.truncf %29 : vector<128x32xf32> to vector<128x32xbf16>
    %cst_29 = arith.constant dense<0.000000e+00> : vector<128x32xf32>
    %33 = tpu.matmul %31, %32, %cst_29 {dimension_numbers = #tpu.dot_dimension_numbers<[1], [0], [0], [1], [0, 0, 1, 1], [], []>} : vector<128x128xbf16>, vector<128x32xbf16>, vector<128x32xf32> -> vector<128x32xf32>
    %34 = arith.addf %26, %33 : vector<128x32xf32>
    %c0_30 = arith.constant 0 : index
    %c0_31 = arith.constant 0 : index
    %35 = vector.load %arg4[%c0_30, %c0_31] : memref<128x1xf32, #tpu.memory_space<vmem>>, vector<128x1xf32>
    %36 = vector.broadcast %35 : vector<128x1xf32> to vector<128x32xf32>
    %37 = arith.addf %34, %36 : vector<128x32xf32>
    %cst_32 = arith.constant 0.000000e+00 : f32
    %38 = vector.broadcast %cst_32 : f32 to vector<128x32xf32>
    %39 = arith.cmpf ogt, %37, %38 : vector<128x32xf32>
    %cst_33 = arith.constant 2.000000e-01 : f32
    %40 = vector.broadcast %cst_33 : f32 to vector<128x32xf32>
    %41 = arith.mulf %40, %37 : vector<128x32xf32>
    %42 = arith.select %39, %37, %41 : vector<128x32xi1>, vector<128x32xf32>
    %43 = arith.truncf %42 : vector<128x32xf32> to vector<128x32xbf16>
    %c0_34 = arith.constant 0 : index
    %c0_35 = arith.constant 0 : index
    %c0_36 = arith.constant 0 : index
    %44 = vector.load %arg6[%c0_34, %c0_35, %c0_36] : memref<4x32x16xbf16, #tpu.memory_space<vmem>>, vector<1x32x16xbf16>
    %45 = vector.shape_cast %44 : vector<1x32x16xbf16> to vector<32x16xbf16>
    %cst_37 = arith.constant dense<0.000000e+00> : vector<128x16xf32>
    %46 = tpu.matmul %43, %45, %cst_37 {dimension_numbers = #tpu.dot_dimension_numbers<[1], [0], [0], [1], [0, 0, 1, 1], [], []>} : vector<128x32xbf16>, vector<32x16xbf16>, vector<128x16xf32> -> vector<128x16xf32>
    %c0_38 = arith.constant 0 : index
    %c0_39 = arith.constant 0 : index
    %c0_40 = arith.constant 0 : index
    %47 = vector.load %arg5[%c0_38, %c0_39, %c0_40] : memref<4x128x128xbf16, #tpu.memory_space<vmem>>, vector<1x128x128xbf16>
    %48 = vector.shape_cast %47 : vector<1x128x128xbf16> to vector<128x128xbf16>
    %49 = arith.truncf %46 : vector<128x16xf32> to vector<128x16xbf16>
    %cst_41 = arith.constant dense<0.000000e+00> : vector<128x16xf32>
    %50 = tpu.matmul %48, %49, %cst_41 {dimension_numbers = #tpu.dot_dimension_numbers<[1], [0], [0], [1], [0, 0, 1, 1], [], []>} : vector<128x128xbf16>, vector<128x16xbf16>, vector<128x16xf32> -> vector<128x16xf32>
    %c1_42 = arith.constant 1 : index
    %c0_43 = arith.constant 0 : index
    %c0_44 = arith.constant 0 : index
    %51 = vector.load %arg6[%c1_42, %c0_43, %c0_44] : memref<4x32x16xbf16, #tpu.memory_space<vmem>>, vector<1x32x16xbf16>
    %52 = vector.shape_cast %51 : vector<1x32x16xbf16> to vector<32x16xbf16>
    %cst_45 = arith.constant dense<0.000000e+00> : vector<128x16xf32>
    %53 = tpu.matmul %43, %52, %cst_45 {dimension_numbers = #tpu.dot_dimension_numbers<[1], [0], [0], [1], [0, 0, 1, 1], [], []>} : vector<128x32xbf16>, vector<32x16xbf16>, vector<128x16xf32> -> vector<128x16xf32>
    %c1_46 = arith.constant 1 : index
    %c0_47 = arith.constant 0 : index
    %c0_48 = arith.constant 0 : index
    %54 = vector.load %arg5[%c1_46, %c0_47, %c0_48] : memref<4x128x128xbf16, #tpu.memory_space<vmem>>, vector<1x128x128xbf16>
    %55 = vector.shape_cast %54 : vector<1x128x128xbf16> to vector<128x128xbf16>
    %56 = arith.truncf %53 : vector<128x16xf32> to vector<128x16xbf16>
    %cst_49 = arith.constant dense<0.000000e+00> : vector<128x16xf32>
    %57 = tpu.matmul %55, %56, %cst_49 {dimension_numbers = #tpu.dot_dimension_numbers<[1], [0], [0], [1], [0, 0, 1, 1], [], []>} : vector<128x128xbf16>, vector<128x16xbf16>, vector<128x16xf32> -> vector<128x16xf32>
    %58 = arith.addf %50, %57 : vector<128x16xf32>
    %c2_50 = arith.constant 2 : index
    %c0_51 = arith.constant 0 : index
    %c0_52 = arith.constant 0 : index
    %59 = vector.load %arg6[%c2_50, %c0_51, %c0_52] : memref<4x32x16xbf16, #tpu.memory_space<vmem>>, vector<1x32x16xbf16>
    %60 = vector.shape_cast %59 : vector<1x32x16xbf16> to vector<32x16xbf16>
    %cst_53 = arith.constant dense<0.000000e+00> : vector<128x16xf32>
    %61 = tpu.matmul %43, %60, %cst_53 {dimension_numbers = #tpu.dot_dimension_numbers<[1], [0], [0], [1], [0, 0, 1, 1], [], []>} : vector<128x32xbf16>, vector<32x16xbf16>, vector<128x16xf32> -> vector<128x16xf32>
    %c2_54 = arith.constant 2 : index
    %c0_55 = arith.constant 0 : index
    %c0_56 = arith.constant 0 : index
    %62 = vector.load %arg5[%c2_54, %c0_55, %c0_56] : memref<4x128x128xbf16, #tpu.memory_space<vmem>>, vector<1x128x128xbf16>
    %63 = vector.shape_cast %62 : vector<1x128x128xbf16> to vector<128x128xbf16>
    %64 = arith.truncf %61 : vector<128x16xf32> to vector<128x16xbf16>
    %cst_57 = arith.constant dense<0.000000e+00> : vector<128x16xf32>
    %65 = tpu.matmul %63, %64, %cst_57 {dimension_numbers = #tpu.dot_dimension_numbers<[1], [0], [0], [1], [0, 0, 1, 1], [], []>} : vector<128x128xbf16>, vector<128x16xbf16>, vector<128x16xf32> -> vector<128x16xf32>
    %66 = arith.addf %58, %65 : vector<128x16xf32>
    %c3_58 = arith.constant 3 : index
    %c0_59 = arith.constant 0 : index
    %c0_60 = arith.constant 0 : index
    %67 = vector.load %arg6[%c3_58, %c0_59, %c0_60] : memref<4x32x16xbf16, #tpu.memory_space<vmem>>, vector<1x32x16xbf16>
    %68 = vector.shape_cast %67 : vector<1x32x16xbf16> to vector<32x16xbf16>
    %cst_61 = arith.constant dense<0.000000e+00> : vector<128x16xf32>
    %69 = tpu.matmul %43, %68, %cst_61 {dimension_numbers = #tpu.dot_dimension_numbers<[1], [0], [0], [1], [0, 0, 1, 1], [], []>} : vector<128x32xbf16>, vector<32x16xbf16>, vector<128x16xf32> -> vector<128x16xf32>
    %c3_62 = arith.constant 3 : index
    %c0_63 = arith.constant 0 : index
    %c0_64 = arith.constant 0 : index
    %70 = vector.load %arg5[%c3_62, %c0_63, %c0_64] : memref<4x128x128xbf16, #tpu.memory_space<vmem>>, vector<1x128x128xbf16>
    %71 = vector.shape_cast %70 : vector<1x128x128xbf16> to vector<128x128xbf16>
    %72 = arith.truncf %69 : vector<128x16xf32> to vector<128x16xbf16>
    %cst_65 = arith.constant dense<0.000000e+00> : vector<128x16xf32>
    %73 = tpu.matmul %71, %72, %cst_65 {dimension_numbers = #tpu.dot_dimension_numbers<[1], [0], [0], [1], [0, 0, 1, 1], [], []>} : vector<128x128xbf16>, vector<128x16xbf16>, vector<128x16xf32> -> vector<128x16xf32>
    %74 = arith.addf %66, %73 : vector<128x16xf32>
    %c0_66 = arith.constant 0 : index
    %c0_67 = arith.constant 0 : index
    %75 = vector.load %arg7[%c0_66, %c0_67] : memref<8x1xf32, #tpu.memory_space<vmem>>, vector<8x1xf32>
    %c0_68 = arith.constant 0 : index
    %c0_69 = arith.constant 0 : index
    %76 = vector.load %arg8[%c0_68, %c0_69] : memref<8x1xf32, #tpu.memory_space<vmem>>, vector<8x1xf32>
    %c0_70 = arith.constant 0 : index
    %c0_71 = arith.constant 0 : index
    %77 = vector.load %arg9[%c0_70, %c0_71] : memref<8x128xf32, #tpu.memory_space<vmem>>, vector<8x128xf32>
    %c0_72 = arith.constant 0 : index
    %c0_73 = arith.constant 0 : index
    %78 = vector.load %arg10[%c0_72, %c0_73] : memref<128x8xf32, #tpu.memory_space<vmem>>, vector<128x8xf32>
    %cst_74 = arith.constant dense<0.000000e+00> : vector<8x16xf32>
    %79 = tpu.matmul %77, %74, %cst_74 {dimension_numbers = #tpu.dot_dimension_numbers<[1], [0], [0], [1], [0, 0, 1, 1], [], []>, precision = #tpu.contract_precision<fp32>} : vector<8x128xf32>, vector<128x16xf32>, vector<8x16xf32> -> vector<8x16xf32>
    %80 = arith.mulf %74, %74 : vector<128x16xf32>
    %cst_75 = arith.constant dense<0.000000e+00> : vector<8x16xf32>
    %81 = tpu.matmul %77, %80, %cst_75 {dimension_numbers = #tpu.dot_dimension_numbers<[1], [0], [0], [1], [0, 0, 1, 1], [], []>, precision = #tpu.contract_precision<fp32>} : vector<8x128xf32>, vector<128x16xf32>, vector<8x16xf32> -> vector<8x16xf32>
    %cst_76 = arith.constant dense<0.000000e+00> : vector<8xf32>
    %82 = vector.multi_reduction <add>, %79, %cst_76 [1] : vector<8x16xf32> to vector<8xf32>
    %83 = vector.shape_cast %82 : vector<8xf32> to vector<8x1xf32>
    %cst_77 = arith.constant 3.906250e-03 : f32
    %84 = vector.broadcast %cst_77 : f32 to vector<8x1xf32>
    %85 = arith.mulf %83, %84 : vector<8x1xf32>
    %cst_78 = arith.constant dense<0.000000e+00> : vector<8xf32>
    %86 = vector.multi_reduction <add>, %81, %cst_78 [1] : vector<8x16xf32> to vector<8xf32>
    %87 = vector.shape_cast %86 : vector<8xf32> to vector<8x1xf32>
    %cst_79 = arith.constant 3.906250e-03 : f32
    %88 = vector.broadcast %cst_79 : f32 to vector<8x1xf32>
    %89 = arith.mulf %87, %88 : vector<8x1xf32>
    %90 = arith.mulf %85, %85 : vector<8x1xf32>
    %91 = arith.subf %89, %90 : vector<8x1xf32>
    %cst_80 = arith.constant 9.99999974E-6 : f32
    %92 = vector.broadcast %cst_80 : f32 to vector<8x1xf32>
    %93 = arith.addf %91, %92 : vector<8x1xf32>
    %94 = math.rsqrt %93 : vector<8x1xf32>
    %95 = arith.mulf %75, %94 : vector<8x1xf32>
    %96 = arith.mulf %85, %95 : vector<8x1xf32>
    %97 = arith.subf %76, %96 : vector<8x1xf32>
    %cst_81 = arith.constant dense<0.000000e+00> : vector<128x1xf32>
    %98 = tpu.matmul %78, %95, %cst_81 {dimension_numbers = #tpu.dot_dimension_numbers<[1], [0], [0], [1], [0, 0, 1, 1], [], []>, precision = #tpu.contract_precision<fp32>} : vector<128x8xf32>, vector<8x1xf32>, vector<128x1xf32> -> vector<128x1xf32>
    %cst_82 = arith.constant dense<0.000000e+00> : vector<128x1xf32>
    %99 = tpu.matmul %78, %97, %cst_82 {dimension_numbers = #tpu.dot_dimension_numbers<[1], [0], [0], [1], [0, 0, 1, 1], [], []>, precision = #tpu.contract_precision<fp32>} : vector<128x8xf32>, vector<8x1xf32>, vector<128x1xf32> -> vector<128x1xf32>
    %100 = vector.broadcast %98 : vector<128x1xf32> to vector<128x16xf32>
    %101 = arith.mulf %74, %100 : vector<128x16xf32>
    %102 = vector.broadcast %99 : vector<128x1xf32> to vector<128x16xf32>
    %103 = arith.addf %101, %102 : vector<128x16xf32>
    %cst_83 = arith.constant 0.000000e+00 : f32
    %104 = vector.broadcast %cst_83 : f32 to vector<128x16xf32>
    %105 = arith.cmpf ogt, %103, %104 : vector<128x16xf32>
    %cst_84 = arith.constant 2.000000e-01 : f32
    %106 = vector.broadcast %cst_84 : f32 to vector<128x16xf32>
    %107 = arith.mulf %106, %103 : vector<128x16xf32>
    %108 = arith.select %105, %103, %107 : vector<128x16xi1>, vector<128x16xf32>
    %109 = arith.truncf %108 : vector<128x16xf32> to vector<128x16xbf16>
    %c0_85 = arith.constant 0 : index
    %c0_86 = arith.constant 0 : index
    %c0_87 = arith.constant 0 : index
    %110 = vector.load %arg12[%c0_85, %c0_86, %c0_87] : memref<4x16x8xbf16, #tpu.memory_space<vmem>>, vector<1x16x8xbf16>
    %111 = vector.shape_cast %110 : vector<1x16x8xbf16> to vector<16x8xbf16>
    %cst_88 = arith.constant dense<0.000000e+00> : vector<128x8xf32>
    %112 = tpu.matmul %109, %111, %cst_88 {dimension_numbers = #tpu.dot_dimension_numbers<[1], [0], [0], [1], [0, 0, 1, 1], [], []>} : vector<128x16xbf16>, vector<16x8xbf16>, vector<128x8xf32> -> vector<128x8xf32>
    %c0_89 = arith.constant 0 : index
    %c0_90 = arith.constant 0 : index
    %c0_91 = arith.constant 0 : index
    %113 = vector.load %arg11[%c0_89, %c0_90, %c0_91] : memref<4x128x128xbf16, #tpu.memory_space<vmem>>, vector<1x128x128xbf16>
    %114 = vector.shape_cast %113 : vector<1x128x128xbf16> to vector<128x128xbf16>
    %115 = arith.truncf %112 : vector<128x8xf32> to vector<128x8xbf16>
    %cst_92 = arith.constant dense<0.000000e+00> : vector<128x8xf32>
    %116 = tpu.matmul %114, %115, %cst_92 {dimension_numbers = #tpu.dot_dimension_numbers<[1], [0], [0], [1], [0, 0, 1, 1], [], []>} : vector<128x128xbf16>, vector<128x8xbf16>, vector<128x8xf32> -> vector<128x8xf32>
    %c1_93 = arith.constant 1 : index
    %c0_94 = arith.constant 0 : index
    %c0_95 = arith.constant 0 : index
    %117 = vector.load %arg12[%c1_93, %c0_94, %c0_95] : memref<4x16x8xbf16, #tpu.memory_space<vmem>>, vector<1x16x8xbf16>
    %118 = vector.shape_cast %117 : vector<1x16x8xbf16> to vector<16x8xbf16>
    %cst_96 = arith.constant dense<0.000000e+00> : vector<128x8xf32>
    %119 = tpu.matmul %109, %118, %cst_96 {dimension_numbers = #tpu.dot_dimension_numbers<[1], [0], [0], [1], [0, 0, 1, 1], [], []>} : vector<128x16xbf16>, vector<16x8xbf16>, vector<128x8xf32> -> vector<128x8xf32>
    %c1_97 = arith.constant 1 : index
    %c0_98 = arith.constant 0 : index
    %c0_99 = arith.constant 0 : index
    %120 = vector.load %arg11[%c1_97, %c0_98, %c0_99] : memref<4x128x128xbf16, #tpu.memory_space<vmem>>, vector<1x128x128xbf16>
    %121 = vector.shape_cast %120 : vector<1x128x128xbf16> to vector<128x128xbf16>
    %122 = arith.truncf %119 : vector<128x8xf32> to vector<128x8xbf16>
    %cst_100 = arith.constant dense<0.000000e+00> : vector<128x8xf32>
    %123 = tpu.matmul %121, %122, %cst_100 {dimension_numbers = #tpu.dot_dimension_numbers<[1], [0], [0], [1], [0, 0, 1, 1], [], []>} : vector<128x128xbf16>, vector<128x8xbf16>, vector<128x8xf32> -> vector<128x8xf32>
    %124 = arith.addf %116, %123 : vector<128x8xf32>
    %c2_101 = arith.constant 2 : index
    %c0_102 = arith.constant 0 : index
    %c0_103 = arith.constant 0 : index
    %125 = vector.load %arg12[%c2_101, %c0_102, %c0_103] : memref<4x16x8xbf16, #tpu.memory_space<vmem>>, vector<1x16x8xbf16>
    %126 = vector.shape_cast %125 : vector<1x16x8xbf16> to vector<16x8xbf16>
    %cst_104 = arith.constant dense<0.000000e+00> : vector<128x8xf32>
    %127 = tpu.matmul %109, %126, %cst_104 {dimension_numbers = #tpu.dot_dimension_numbers<[1], [0], [0], [1], [0, 0, 1, 1], [], []>} : vector<128x16xbf16>, vector<16x8xbf16>, vector<128x8xf32> -> vector<128x8xf32>
    %c2_105 = arith.constant 2 : index
    %c0_106 = arith.constant 0 : index
    %c0_107 = arith.constant 0 : index
    %128 = vector.load %arg11[%c2_105, %c0_106, %c0_107] : memref<4x128x128xbf16, #tpu.memory_space<vmem>>, vector<1x128x128xbf16>
    %129 = vector.shape_cast %128 : vector<1x128x128xbf16> to vector<128x128xbf16>
    %130 = arith.truncf %127 : vector<128x8xf32> to vector<128x8xbf16>
    %cst_108 = arith.constant dense<0.000000e+00> : vector<128x8xf32>
    %131 = tpu.matmul %129, %130, %cst_108 {dimension_numbers = #tpu.dot_dimension_numbers<[1], [0], [0], [1], [0, 0, 1, 1], [], []>} : vector<128x128xbf16>, vector<128x8xbf16>, vector<128x8xf32> -> vector<128x8xf32>
    %132 = arith.addf %124, %131 : vector<128x8xf32>
    %c3_109 = arith.constant 3 : index
    %c0_110 = arith.constant 0 : index
    %c0_111 = arith.constant 0 : index
    %133 = vector.load %arg12[%c3_109, %c0_110, %c0_111] : memref<4x16x8xbf16, #tpu.memory_space<vmem>>, vector<1x16x8xbf16>
    %134 = vector.shape_cast %133 : vector<1x16x8xbf16> to vector<16x8xbf16>
    %cst_112 = arith.constant dense<0.000000e+00> : vector<128x8xf32>
    %135 = tpu.matmul %109, %134, %cst_112 {dimension_numbers = #tpu.dot_dimension_numbers<[1], [0], [0], [1], [0, 0, 1, 1], [], []>} : vector<128x16xbf16>, vector<16x8xbf16>, vector<128x8xf32> -> vector<128x8xf32>
    %c3_113 = arith.constant 3 : index
    %c0_114 = arith.constant 0 : index
    %c0_115 = arith.constant 0 : index
    %136 = vector.load %arg11[%c3_113, %c0_114, %c0_115] : memref<4x128x128xbf16, #tpu.memory_space<vmem>>, vector<1x128x128xbf16>
    %137 = vector.shape_cast %136 : vector<1x128x128xbf16> to vector<128x128xbf16>
    %138 = arith.truncf %135 : vector<128x8xf32> to vector<128x8xbf16>
    %cst_116 = arith.constant dense<0.000000e+00> : vector<128x8xf32>
    %139 = tpu.matmul %137, %138, %cst_116 {dimension_numbers = #tpu.dot_dimension_numbers<[1], [0], [0], [1], [0, 0, 1, 1], [], []>} : vector<128x128xbf16>, vector<128x8xbf16>, vector<128x8xf32> -> vector<128x8xf32>
    %140 = arith.addf %132, %139 : vector<128x8xf32>
    %c0_117 = arith.constant 0 : index
    %c0_118 = arith.constant 0 : index
    %141 = vector.load %arg13[%c0_117, %c0_118] : memref<16x1xf32, #tpu.memory_space<vmem>>, vector<16x1xf32>
    %c0_119 = arith.constant 0 : index
    %c0_120 = arith.constant 0 : index
    %142 = vector.load %arg14[%c0_119, %c0_120] : memref<16x1xf32, #tpu.memory_space<vmem>>, vector<16x1xf32>
    %c0_121 = arith.constant 0 : index
    %c0_122 = arith.constant 0 : index
    %143 = vector.load %arg15[%c0_121, %c0_122] : memref<16x128xf32, #tpu.memory_space<vmem>>, vector<16x128xf32>
    %c0_123 = arith.constant 0 : index
    %c0_124 = arith.constant 0 : index
    %144 = vector.load %arg16[%c0_123, %c0_124] : memref<128x16xf32, #tpu.memory_space<vmem>>, vector<128x16xf32>
    %cst_125 = arith.constant dense<0.000000e+00> : vector<16x8xf32>
    %145 = tpu.matmul %143, %140, %cst_125 {dimension_numbers = #tpu.dot_dimension_numbers<[1], [0], [0], [1], [0, 0, 1, 1], [], []>, precision = #tpu.contract_precision<fp32>} : vector<16x128xf32>, vector<128x8xf32>, vector<16x8xf32> -> vector<16x8xf32>
    %146 = arith.mulf %140, %140 : vector<128x8xf32>
    %cst_126 = arith.constant dense<0.000000e+00> : vector<16x8xf32>
    %147 = tpu.matmul %143, %146, %cst_126 {dimension_numbers = #tpu.dot_dimension_numbers<[1], [0], [0], [1], [0, 0, 1, 1], [], []>, precision = #tpu.contract_precision<fp32>} : vector<16x128xf32>, vector<128x8xf32>, vector<16x8xf32> -> vector<16x8xf32>
    %cst_127 = arith.constant dense<0.000000e+00> : vector<16xf32>
    %148 = vector.multi_reduction <add>, %145, %cst_127 [1] : vector<16x8xf32> to vector<16xf32>
    %149 = vector.shape_cast %148 : vector<16xf32> to vector<16x1xf32>
    %cst_128 = arith.constant 1.562500e-02 : f32
    %150 = vector.broadcast %cst_128 : f32 to vector<16x1xf32>
    %151 = arith.mulf %149, %150 : vector<16x1xf32>
    %cst_129 = arith.constant dense<0.000000e+00> : vector<16xf32>
    %152 = vector.multi_reduction <add>, %147, %cst_129 [1] : vector<16x8xf32> to vector<16xf32>
    %153 = vector.shape_cast %152 : vector<16xf32> to vector<16x1xf32>
    %cst_130 = arith.constant 1.562500e-02 : f32
    %154 = vector.broadcast %cst_130 : f32 to vector<16x1xf32>
    %155 = arith.mulf %153, %154 : vector<16x1xf32>
    %156 = arith.mulf %151, %151 : vector<16x1xf32>
    %157 = arith.subf %155, %156 : vector<16x1xf32>
    %cst_131 = arith.constant 9.99999974E-6 : f32
    %158 = vector.broadcast %cst_131 : f32 to vector<16x1xf32>
    %159 = arith.addf %157, %158 : vector<16x1xf32>
    %160 = math.rsqrt %159 : vector<16x1xf32>
    %161 = arith.mulf %141, %160 : vector<16x1xf32>
    %162 = arith.mulf %151, %161 : vector<16x1xf32>
    %163 = arith.subf %142, %162 : vector<16x1xf32>
    %cst_132 = arith.constant dense<0.000000e+00> : vector<128x1xf32>
    %164 = tpu.matmul %144, %161, %cst_132 {dimension_numbers = #tpu.dot_dimension_numbers<[1], [0], [0], [1], [0, 0, 1, 1], [], []>, precision = #tpu.contract_precision<fp32>} : vector<128x16xf32>, vector<16x1xf32>, vector<128x1xf32> -> vector<128x1xf32>
    %cst_133 = arith.constant dense<0.000000e+00> : vector<128x1xf32>
    %165 = tpu.matmul %144, %163, %cst_133 {dimension_numbers = #tpu.dot_dimension_numbers<[1], [0], [0], [1], [0, 0, 1, 1], [], []>, precision = #tpu.contract_precision<fp32>} : vector<128x16xf32>, vector<16x1xf32>, vector<128x1xf32> -> vector<128x1xf32>
    %166 = vector.broadcast %164 : vector<128x1xf32> to vector<128x8xf32>
    %167 = arith.mulf %140, %166 : vector<128x8xf32>
    %168 = vector.broadcast %165 : vector<128x1xf32> to vector<128x8xf32>
    %169 = arith.addf %167, %168 : vector<128x8xf32>
    %cst_134 = arith.constant 0.000000e+00 : f32
    %170 = vector.broadcast %cst_134 : f32 to vector<128x8xf32>
    %171 = arith.cmpf ogt, %169, %170 : vector<128x8xf32>
    %cst_135 = arith.constant 2.000000e-01 : f32
    %172 = vector.broadcast %cst_135 : f32 to vector<128x8xf32>
    %173 = arith.mulf %172, %169 : vector<128x8xf32>
    %174 = arith.select %171, %169, %173 : vector<128x8xi1>, vector<128x8xf32>
    %175 = arith.truncf %174 : vector<128x8xf32> to vector<128x8xbf16>
    %c0_136 = arith.constant 0 : index
    %c0_137 = arith.constant 0 : index
    %c0_138 = arith.constant 0 : index
    %176 = vector.load %arg18[%c0_136, %c0_137, %c0_138] : memref<4x8x4xbf16, #tpu.memory_space<vmem>>, vector<1x8x4xbf16>
    %177 = vector.shape_cast %176 : vector<1x8x4xbf16> to vector<8x4xbf16>
    %cst_139 = arith.constant dense<0.000000e+00> : vector<128x4xf32>
    %178 = tpu.matmul %175, %177, %cst_139 {dimension_numbers = #tpu.dot_dimension_numbers<[1], [0], [0], [1], [0, 0, 1, 1], [], []>} : vector<128x8xbf16>, vector<8x4xbf16>, vector<128x4xf32> -> vector<128x4xf32>
    %c0_140 = arith.constant 0 : index
    %c0_141 = arith.constant 0 : index
    %c0_142 = arith.constant 0 : index
    %179 = vector.load %arg17[%c0_140, %c0_141, %c0_142] : memref<4x128x128xbf16, #tpu.memory_space<vmem>>, vector<1x128x128xbf16>
    %180 = vector.shape_cast %179 : vector<1x128x128xbf16> to vector<128x128xbf16>
    %181 = arith.truncf %178 : vector<128x4xf32> to vector<128x4xbf16>
    %cst_143 = arith.constant dense<0.000000e+00> : vector<128x4xf32>
    %182 = tpu.matmul %180, %181, %cst_143 {dimension_numbers = #tpu.dot_dimension_numbers<[1], [0], [0], [1], [0, 0, 1, 1], [], []>} : vector<128x128xbf16>, vector<128x4xbf16>, vector<128x4xf32> -> vector<128x4xf32>
    %c1_144 = arith.constant 1 : index
    %c0_145 = arith.constant 0 : index
    %c0_146 = arith.constant 0 : index
    %183 = vector.load %arg18[%c1_144, %c0_145, %c0_146] : memref<4x8x4xbf16, #tpu.memory_space<vmem>>, vector<1x8x4xbf16>
    %184 = vector.shape_cast %183 : vector<1x8x4xbf16> to vector<8x4xbf16>
    %cst_147 = arith.constant dense<0.000000e+00> : vector<128x4xf32>
    %185 = tpu.matmul %175, %184, %cst_147 {dimension_numbers = #tpu.dot_dimension_numbers<[1], [0], [0], [1], [0, 0, 1, 1], [], []>} : vector<128x8xbf16>, vector<8x4xbf16>, vector<128x4xf32> -> vector<128x4xf32>
    %c1_148 = arith.constant 1 : index
    %c0_149 = arith.constant 0 : index
    %c0_150 = arith.constant 0 : index
    %186 = vector.load %arg17[%c1_148, %c0_149, %c0_150] : memref<4x128x128xbf16, #tpu.memory_space<vmem>>, vector<1x128x128xbf16>
    %187 = vector.shape_cast %186 : vector<1x128x128xbf16> to vector<128x128xbf16>
    %188 = arith.truncf %185 : vector<128x4xf32> to vector<128x4xbf16>
    %cst_151 = arith.constant dense<0.000000e+00> : vector<128x4xf32>
    %189 = tpu.matmul %187, %188, %cst_151 {dimension_numbers = #tpu.dot_dimension_numbers<[1], [0], [0], [1], [0, 0, 1, 1], [], []>} : vector<128x128xbf16>, vector<128x4xbf16>, vector<128x4xf32> -> vector<128x4xf32>
    %190 = arith.addf %182, %189 : vector<128x4xf32>
    %c2_152 = arith.constant 2 : index
    %c0_153 = arith.constant 0 : index
    %c0_154 = arith.constant 0 : index
    %191 = vector.load %arg18[%c2_152, %c0_153, %c0_154] : memref<4x8x4xbf16, #tpu.memory_space<vmem>>, vector<1x8x4xbf16>
    %192 = vector.shape_cast %191 : vector<1x8x4xbf16> to vector<8x4xbf16>
    %cst_155 = arith.constant dense<0.000000e+00> : vector<128x4xf32>
    %193 = tpu.matmul %175, %192, %cst_155 {dimension_numbers = #tpu.dot_dimension_numbers<[1], [0], [0], [1], [0, 0, 1, 1], [], []>} : vector<128x8xbf16>, vector<8x4xbf16>, vector<128x4xf32> -> vector<128x4xf32>
    %c2_156 = arith.constant 2 : index
    %c0_157 = arith.constant 0 : index
    %c0_158 = arith.constant 0 : index
    %194 = vector.load %arg17[%c2_156, %c0_157, %c0_158] : memref<4x128x128xbf16, #tpu.memory_space<vmem>>, vector<1x128x128xbf16>
    %195 = vector.shape_cast %194 : vector<1x128x128xbf16> to vector<128x128xbf16>
    %196 = arith.truncf %193 : vector<128x4xf32> to vector<128x4xbf16>
    %cst_159 = arith.constant dense<0.000000e+00> : vector<128x4xf32>
    %197 = tpu.matmul %195, %196, %cst_159 {dimension_numbers = #tpu.dot_dimension_numbers<[1], [0], [0], [1], [0, 0, 1, 1], [], []>} : vector<128x128xbf16>, vector<128x4xbf16>, vector<128x4xf32> -> vector<128x4xf32>
    %198 = arith.addf %190, %197 : vector<128x4xf32>
    %c3_160 = arith.constant 3 : index
    %c0_161 = arith.constant 0 : index
    %c0_162 = arith.constant 0 : index
    %199 = vector.load %arg18[%c3_160, %c0_161, %c0_162] : memref<4x8x4xbf16, #tpu.memory_space<vmem>>, vector<1x8x4xbf16>
    %200 = vector.shape_cast %199 : vector<1x8x4xbf16> to vector<8x4xbf16>
    %cst_163 = arith.constant dense<0.000000e+00> : vector<128x4xf32>
    %201 = tpu.matmul %175, %200, %cst_163 {dimension_numbers = #tpu.dot_dimension_numbers<[1], [0], [0], [1], [0, 0, 1, 1], [], []>} : vector<128x8xbf16>, vector<8x4xbf16>, vector<128x4xf32> -> vector<128x4xf32>
    %c3_164 = arith.constant 3 : index
    %c0_165 = arith.constant 0 : index
    %c0_166 = arith.constant 0 : index
    %202 = vector.load %arg17[%c3_164, %c0_165, %c0_166] : memref<4x128x128xbf16, #tpu.memory_space<vmem>>, vector<1x128x128xbf16>
    %203 = vector.shape_cast %202 : vector<1x128x128xbf16> to vector<128x128xbf16>
    %204 = arith.truncf %201 : vector<128x4xf32> to vector<128x4xbf16>
    %cst_167 = arith.constant dense<0.000000e+00> : vector<128x4xf32>
    %205 = tpu.matmul %203, %204, %cst_167 {dimension_numbers = #tpu.dot_dimension_numbers<[1], [0], [0], [1], [0, 0, 1, 1], [], []>} : vector<128x128xbf16>, vector<128x4xbf16>, vector<128x4xf32> -> vector<128x4xf32>
    %206 = arith.addf %198, %205 : vector<128x4xf32>
    %c0_168 = arith.constant 0 : index
    %c0_169 = arith.constant 0 : index
    %207 = vector.load %arg19[%c0_168, %c0_169] : memref<32x1xf32, #tpu.memory_space<vmem>>, vector<32x1xf32>
    %c0_170 = arith.constant 0 : index
    %c0_171 = arith.constant 0 : index
    %208 = vector.load %arg20[%c0_170, %c0_171] : memref<32x1xf32, #tpu.memory_space<vmem>>, vector<32x1xf32>
    %c0_172 = arith.constant 0 : index
    %c0_173 = arith.constant 0 : index
    %209 = vector.load %arg21[%c0_172, %c0_173] : memref<32x128xf32, #tpu.memory_space<vmem>>, vector<32x128xf32>
    %c0_174 = arith.constant 0 : index
    %c0_175 = arith.constant 0 : index
    %210 = vector.load %arg22[%c0_174, %c0_175] : memref<128x32xf32, #tpu.memory_space<vmem>>, vector<128x32xf32>
    %cst_176 = arith.constant dense<0.000000e+00> : vector<32x4xf32>
    %211 = tpu.matmul %209, %206, %cst_176 {dimension_numbers = #tpu.dot_dimension_numbers<[1], [0], [0], [1], [0, 0, 1, 1], [], []>, precision = #tpu.contract_precision<fp32>} : vector<32x128xf32>, vector<128x4xf32>, vector<32x4xf32> -> vector<32x4xf32>
    %212 = arith.mulf %206, %206 : vector<128x4xf32>
    %cst_177 = arith.constant dense<0.000000e+00> : vector<32x4xf32>
    %213 = tpu.matmul %209, %212, %cst_177 {dimension_numbers = #tpu.dot_dimension_numbers<[1], [0], [0], [1], [0, 0, 1, 1], [], []>, precision = #tpu.contract_precision<fp32>} : vector<32x128xf32>, vector<128x4xf32>, vector<32x4xf32> -> vector<32x4xf32>
    %cst_178 = arith.constant dense<0.000000e+00> : vector<32xf32>
    %214 = vector.multi_reduction <add>, %211, %cst_178 [1] : vector<32x4xf32> to vector<32xf32>
    %215 = vector.shape_cast %214 : vector<32xf32> to vector<32x1xf32>
    %cst_179 = arith.constant 6.250000e-02 : f32
    %216 = vector.broadcast %cst_179 : f32 to vector<32x1xf32>
    %217 = arith.mulf %215, %216 : vector<32x1xf32>
    %cst_180 = arith.constant dense<0.000000e+00> : vector<32xf32>
    %218 = vector.multi_reduction <add>, %213, %cst_180 [1] : vector<32x4xf32> to vector<32xf32>
    %219 = vector.shape_cast %218 : vector<32xf32> to vector<32x1xf32>
    %cst_181 = arith.constant 6.250000e-02 : f32
    %220 = vector.broadcast %cst_181 : f32 to vector<32x1xf32>
    %221 = arith.mulf %219, %220 : vector<32x1xf32>
    %222 = arith.mulf %217, %217 : vector<32x1xf32>
    %223 = arith.subf %221, %222 : vector<32x1xf32>
    %cst_182 = arith.constant 9.99999974E-6 : f32
    %224 = vector.broadcast %cst_182 : f32 to vector<32x1xf32>
    %225 = arith.addf %223, %224 : vector<32x1xf32>
    %226 = math.rsqrt %225 : vector<32x1xf32>
    %227 = arith.mulf %207, %226 : vector<32x1xf32>
    %228 = arith.mulf %217, %227 : vector<32x1xf32>
    %229 = arith.subf %208, %228 : vector<32x1xf32>
    %cst_183 = arith.constant dense<0.000000e+00> : vector<128x1xf32>
    %230 = tpu.matmul %210, %227, %cst_183 {dimension_numbers = #tpu.dot_dimension_numbers<[1], [0], [0], [1], [0, 0, 1, 1], [], []>, precision = #tpu.contract_precision<fp32>} : vector<128x32xf32>, vector<32x1xf32>, vector<128x1xf32> -> vector<128x1xf32>
    %cst_184 = arith.constant dense<0.000000e+00> : vector<128x1xf32>
    %231 = tpu.matmul %210, %229, %cst_184 {dimension_numbers = #tpu.dot_dimension_numbers<[1], [0], [0], [1], [0, 0, 1, 1], [], []>, precision = #tpu.contract_precision<fp32>} : vector<128x32xf32>, vector<32x1xf32>, vector<128x1xf32> -> vector<128x1xf32>
    %232 = vector.broadcast %230 : vector<128x1xf32> to vector<128x4xf32>
    %233 = arith.mulf %206, %232 : vector<128x4xf32>
    %234 = vector.broadcast %231 : vector<128x1xf32> to vector<128x4xf32>
    %235 = arith.addf %233, %234 : vector<128x4xf32>
    %cst_185 = arith.constant 0.000000e+00 : f32
    %236 = vector.broadcast %cst_185 : f32 to vector<128x4xf32>
    %237 = arith.cmpf ogt, %235, %236 : vector<128x4xf32>
    %cst_186 = arith.constant 2.000000e-01 : f32
    %238 = vector.broadcast %cst_186 : f32 to vector<128x4xf32>
    %239 = arith.mulf %238, %235 : vector<128x4xf32>
    %240 = arith.select %237, %235, %239 : vector<128x4xi1>, vector<128x4xf32>
    %c0_187 = arith.constant 0 : index
    %c0_188 = arith.constant 0 : index
    %241 = vector.load %arg23[%c0_187, %c0_188] : memref<128x4xbf16, #tpu.memory_space<vmem>>, vector<128x4xbf16>
    %242 = arith.extf %241 : vector<128x4xbf16> to vector<128x4xf32>
    %c0_189 = arith.constant 0 : index
    %c0_190 = arith.constant 0 : index
    %243 = vector.load %arg24[%c0_189, %c0_190] : memref<1x1xf32, #tpu.memory_space<vmem>>, vector<1x1xf32>
    %244 = arith.truncf %240 : vector<128x4xf32> to vector<128x4xbf16>
    %245 = arith.extf %244 : vector<128x4xbf16> to vector<128x4xf32>
    %246 = arith.mulf %245, %242 : vector<128x4xf32>
    %cst_191 = arith.constant dense<0.000000e+00> : vector<128xf32>
    %247 = vector.multi_reduction <add>, %246, %cst_191 [1] : vector<128x4xf32> to vector<128xf32>
    %248 = vector.shape_cast %247 : vector<128xf32> to vector<128x1xf32>
    %cst_192 = arith.constant dense<0.000000e+00> : vector<1xf32>
    %249 = vector.multi_reduction <add>, %248, %cst_192 [0] : vector<128x1xf32> to vector<1xf32>
    %250 = vector.shape_cast %249 : vector<1xf32> to vector<1x1xf32>
    %251 = arith.addf %250, %243 : vector<1x1xf32>
    %c0_193 = arith.constant 0 : index
    %c0_194 = arith.constant 0 : index
    %c0_195 = arith.constant 0 : index
    %252 = vector.load %arg25[%c0_193, %c0_194, %c0_195] : memref<1x1x1xf32, #tpu.memory_space<vmem>>, vector<1x1x1xf32>
    %253 = vector.shape_cast %252 : vector<1x1x1xf32> to vector<1x1xf32>
    %254 = vector.shape_cast %251 : vector<1x1xf32> to vector<1x1x1xf32>
    tpu.vector_store %arg25[%c0_193, %c0_194, %c0_195], %254 {strides = array<i32>} : memref<1x1x1xf32, #tpu.memory_space<vmem>>, vector<1x1x1xf32>,
    return
  }
  func.func @transform_0(%arg0: i32) -> (i32, i32, i32) {
    %c0_i32 = arith.constant 0 : i32
    %c0_i32_0 = arith.constant 0 : i32
    %c0_i32_1 = arith.constant 0 : i32
    return %arg0, %c0_i32, %c0_i32_0 : i32, i32, i32
  }
  func.func @transform_1(%arg0: i32) -> (i32, i32, i32) {
    %c0_i32 = arith.constant 0 : i32
    %c0_i32_0 = arith.constant 0 : i32
    %c0_i32_1 = arith.constant 0 : i32
    %c0_i32_2 = arith.constant 0 : i32
    return %c0_i32, %c0_i32_0, %c0_i32_1 : i32, i32, i32
  }
  func.func @transform_2(%arg0: i32) -> (i32, i32, i32) {
    %c0_i32 = arith.constant 0 : i32
    %c0_i32_0 = arith.constant 0 : i32
    %c0_i32_1 = arith.constant 0 : i32
    %c0_i32_2 = arith.constant 0 : i32
    return %c0_i32, %c0_i32_0, %c0_i32_1 : i32, i32, i32
  }
  func.func @transform_3(%arg0: i32) -> (i32, i32) {
    %c0_i32 = arith.constant 0 : i32
    %c0_i32_0 = arith.constant 0 : i32
    %c0_i32_1 = arith.constant 0 : i32
    return %c0_i32, %c0_i32_0 : i32, i32
  }
  func.func @transform_4(%arg0: i32) -> (i32, i32, i32) {
    %c0_i32 = arith.constant 0 : i32
    %c0_i32_0 = arith.constant 0 : i32
    %c0_i32_1 = arith.constant 0 : i32
    %c0_i32_2 = arith.constant 0 : i32
    return %c0_i32, %c0_i32_0, %c0_i32_1 : i32, i32, i32
  }
  func.func @transform_5(%arg0: i32) -> (i32, i32, i32) {
    %c0_i32 = arith.constant 0 : i32
    %c0_i32_0 = arith.constant 0 : i32
    %c0_i32_1 = arith.constant 0 : i32
    %c0_i32_2 = arith.constant 0 : i32
    return %c0_i32, %c0_i32_0, %c0_i32_1 : i32, i32, i32
  }
  func.func @transform_6(%arg0: i32) -> (i32, i32) {
    %c0_i32 = arith.constant 0 : i32
    %c0_i32_0 = arith.constant 0 : i32
    %c0_i32_1 = arith.constant 0 : i32
    return %c0_i32, %c0_i32_0 : i32, i32
  }
  func.func @transform_7(%arg0: i32) -> (i32, i32) {
    %c0_i32 = arith.constant 0 : i32
    %c0_i32_0 = arith.constant 0 : i32
    %c0_i32_1 = arith.constant 0 : i32
    return %c0_i32, %c0_i32_0 : i32, i32
  }
  func.func @transform_8(%arg0: i32) -> (i32, i32) {
    %c0_i32 = arith.constant 0 : i32
    %c0_i32_0 = arith.constant 0 : i32
    %c0_i32_1 = arith.constant 0 : i32
    return %c0_i32, %c0_i32_0 : i32, i32
  }
  func.func @transform_9(%arg0: i32) -> (i32, i32) {
    %c0_i32 = arith.constant 0 : i32
    %c0_i32_0 = arith.constant 0 : i32
    %c0_i32_1 = arith.constant 0 : i32
    return %c0_i32, %c0_i32_0 : i32, i32
  }
  func.func @transform_10(%arg0: i32) -> (i32, i32, i32) {
    %c0_i32 = arith.constant 0 : i32
    %c0_i32_0 = arith.constant 0 : i32
    %c0_i32_1 = arith.constant 0 : i32
    %c0_i32_2 = arith.constant 0 : i32
    return %c0_i32, %c0_i32_0, %c0_i32_1 : i32, i32, i32
  }
  func.func @transform_11(%arg0: i32) -> (i32, i32, i32) {
    %c0_i32 = arith.constant 0 : i32
    %c0_i32_0 = arith.constant 0 : i32
    %c0_i32_1 = arith.constant 0 : i32
    %c0_i32_2 = arith.constant 0 : i32
    return %c0_i32, %c0_i32_0, %c0_i32_1 : i32, i32, i32
  }
  func.func @transform_12(%arg0: i32) -> (i32, i32) {
    %c0_i32 = arith.constant 0 : i32
    %c0_i32_0 = arith.constant 0 : i32
    %c0_i32_1 = arith.constant 0 : i32
    return %c0_i32, %c0_i32_0 : i32, i32
  }
  func.func @transform_13(%arg0: i32) -> (i32, i32) {
    %c0_i32 = arith.constant 0 : i32
    %c0_i32_0 = arith.constant 0 : i32
    %c0_i32_1 = arith.constant 0 : i32
    return %c0_i32, %c0_i32_0 : i32, i32
  }
  func.func @transform_14(%arg0: i32) -> (i32, i32) {
    %c0_i32 = arith.constant 0 : i32
    %c0_i32_0 = arith.constant 0 : i32
    %c0_i32_1 = arith.constant 0 : i32
    return %c0_i32, %c0_i32_0 : i32, i32
  }
  func.func @transform_15(%arg0: i32) -> (i32, i32) {
    %c0_i32 = arith.constant 0 : i32
    %c0_i32_0 = arith.constant 0 : i32
    %c0_i32_1 = arith.constant 0 : i32
    return %c0_i32, %c0_i32_0 : i32, i32
  }
  func.func @transform_16(%arg0: i32) -> (i32, i32, i32) {
    %c0_i32 = arith.constant 0 : i32
    %c0_i32_0 = arith.constant 0 : i32
    %c0_i32_1 = arith.constant 0 : i32
    %c0_i32_2 = arith.constant 0 : i32
    return %c0_i32, %c0_i32_0, %c0_i32_1 : i32, i32, i32
  }
  func.func @transform_17(%arg0: i32) -> (i32, i32, i32) {
    %c0_i32 = arith.constant 0 : i32
    %c0_i32_0 = arith.constant 0 : i32
    %c0_i32_1 = arith.constant 0 : i32
    %c0_i32_2 = arith.constant 0 : i32
    return %c0_i32, %c0_i32_0, %c0_i32_1 : i32, i32, i32
  }
  func.func @transform_18(%arg0: i32) -> (i32, i32) {
    %c0_i32 = arith.constant 0 : i32
    %c0_i32_0 = arith.constant 0 : i32
    %c0_i32_1 = arith.constant 0 : i32
    return %c0_i32, %c0_i32_0 : i32, i32
  }
  func.func @transform_19(%arg0: i32) -> (i32, i32) {
    %c0_i32 = arith.constant 0 : i32
    %c0_i32_0 = arith.constant 0 : i32
    %c0_i32_1 = arith.constant 0 : i32
    return %c0_i32, %c0_i32_0 : i32, i32
  }
  func.func @transform_20(%arg0: i32) -> (i32, i32) {
    %c0_i32 = arith.constant 0 : i32
    %c0_i32_0 = arith.constant 0 : i32
    %c0_i32_1 = arith.constant 0 : i32
    return %c0_i32, %c0_i32_0 : i32, i32
  }
  func.func @transform_21(%arg0: i32) -> (i32, i32) {
    %c0_i32 = arith.constant 0 : i32
    %c0_i32_0 = arith.constant 0 : i32
    %c0_i32_1 = arith.constant 0 : i32
    return %c0_i32, %c0_i32_0 : i32, i32
  }
  func.func @transform_22(%arg0: i32) -> (i32, i32) {
    %c0_i32 = arith.constant 0 : i32
    %c0_i32_0 = arith.constant 0 : i32
    %c0_i32_1 = arith.constant 0 : i32
    return %c0_i32, %c0_i32_0 : i32, i32
  }
  func.func @transform_23(%arg0: i32) -> (i32, i32) {
    %c0_i32 = arith.constant 0 : i32
    %c0_i32_0 = arith.constant 0 : i32
    %c0_i32_1 = arith.constant 0 : i32
    return %c0_i32, %c0_i32_0 : i32, i32
  }
  func.func @transform_24(%arg0: i32) -> (i32, i32, i32) {
    %c0_i32 = arith.constant 0 : i32
    %c0_i32_0 = arith.constant 0 : i32
    %c0_i32_1 = arith.constant 0 : i32
    return %arg0, %c0_i32, %c0_i32_0 : i32, i32, i32
  }
}

</mosaic_0001>

<bundles_post_ra>
// kernel: discriminator_forward.1
= control target key start
LH: loop header
LB: loop body
LE: loop exit
PB: predicated region body
PF: predicated region fallthrough
CT: control target
= control target key end

     0   :  { %s25607_s27 = smov 0   ;;  %s30267_s0 = inlined_call_operand.vmem [shape: bf16[2,128,64], index: 0, kind: input, shape index: {}]   ;;  %s30268_s1 = inlined_call_operand.vmem [shape: bf16[4,128,128], index: 1, kind: input, shape index: {}]   ;;  %s30269_s2 = inlined_call_operand.vmem [shape: bf16[4,64,32], index: 2, kind: input, shape index: {}]   ;;  %s30270_s3 = inlined_call_operand.vmem [shape: f32[128,1], index: 3, kind: input, shape index: {}]   ;;  %s30271_s4 = inlined_call_operand.vmem [shape: bf16[4,128,128], index: 4, kind: input, shape index: {}]   ;;  %s30272_s5 = inlined_call_operand.vmem [shape: bf16[4,32,16], index: 5, kind: input, shape index: {}]   ;;  %s30273_s6 = inlined_call_operand.vmem [shape: f32[8,1], index: 6, kind: input, shape index: {}]   ;;  %s30274_s7 = inlined_call_operand.vmem [shape: f32[8,1], index: 7, kind: input, shape index: {}]   ;;  %s30275_s8 = inlined_call_operand.vmem [shape: f32[8,128], index: 8, kind: input, shape index: {}]   ;;  %s30276_s9 = inlined_call_operand.vmem [shape: f32[128,8], index: 9, kind: input, shape index: {}]   ;;  %s30277_s10 = inlined_call_operand.vmem [shape: bf16[4,128,128], index: 10, kind: input, shape index: {}]   ;;  %s30278_s11 = inlined_call_operand.vmem [shape: bf16[4,16,8], index: 11, kind: input, shape index: {}]   ;;  %s30279_s12 = inlined_call_operand.vmem [shape: f32[16,1], index: 12, kind: input, shape index: {}]   ;;  %s30280_s13 = inlined_call_operand.vmem [shape: f32[16,1], index: 13, kind: input, shape index: {}]   ;;  %s30281_s14 = inlined_call_operand.vmem [shape: f32[16,128], index: 14, kind: input, shape index: {}]   ;;  %s30282_s15 = inlined_call_operand.vmem [shape: f32[128,16], index: 15, kind: input, shape index: {}]   ;;  %s30283_s16 = inlined_call_operand.vmem [shape: bf16[4,128,128], index: 16, kind: input, shape index: {}]   ;;  %s30284_s17 = inlined_call_operand.vmem [shape: bf16[4,8,4], index: 17, kind: input, shape index: {}]   ;;  %s30285_s18 = inlined_call_operand.vmem [shape: f32[32,1], index: 18, kind: input, shape index: {}]   ;;  %s30286_s19 = inlined_call_operand.vmem [shape: f32[32,1], index: 19, kind: input, shape index: {}]   ;;  %s30287_s20 = inlined_call_operand.vmem [shape: f32[32,128], index: 20, kind: input, shape index: {}]   ;;  %s30288_s21 = inlined_call_operand.vmem [shape: f32[128,32], index: 21, kind: input, shape index: {}]   ;;  %s30289_s22 = inlined_call_operand.vmem [shape: bf16[128,4], index: 22, kind: input, shape index: {}]   ;;  %s30290_s23 = inlined_call_operand.<no memory space> [shape: f32[1,1], index: 23, kind: input, shape index: {}]   ;;  %s30291_s24 = inlined_call_operand.vmem [shape: f32[2,1,1], index: 24, kind: output, shape index: {}]  }
   0x1   :  { %30595 = sst [smem:[#allocation49_spill]] %s30267_s0  ;;  %v29_v0 = vstv %s30290_s23 }
   0x2   :  { %30596 = sst [smem:[#allocation50_spill]] %s30268_s1  ;;  %30 = vst [vmem:[#allocation2] sm:$0x1] %v29_v0 }
   0x3   :  { %30597 = sst [smem:[#allocation51_spill]] %s30269_s2 }
   0x4   :  { %30598 = sst [smem:[#allocation52_spill]] %s30270_s3 }
   0x5   :  { %30599 = sst [smem:[#allocation53_spill]] %s30271_s4 }
   0x6   :  { %30600 = sst [smem:[#allocation54_spill]] %s30272_s5 }
   0x7   :  { %30601 = sst [smem:[#allocation55_spill]] %s30273_s6 }
   0x8   :  { %30602 = sst [smem:[#allocation56_spill]] %s30274_s7 }
   0x9   :  { %30603 = sst [smem:[#allocation57_spill]] %s30275_s8 }
   0xa LB: > { %s17845_s28 = sadd.s32 4294967295, %s25473_s27   ;;  %p17849_p0 = scmp.ge.s32.totalorder %s25473_s27, 1  ;;  %s25473_s27 = sphi %s25607_s27, %s36_s27  }
   0xb   : > { %p664_p1 = scmp.lt.s32.totalorder %s25473_s27, 3 }
   0xd   : > { %p665_p2 = pnand %p17849_p0, %p664_p1 }
   0xf   : > { %668 = sbr.rel (%p665_p2) target bundleno = 6201 (0x1839), region = 116 }
  0x16   : > { %s30604_s29 = sld [smem:[#allocation51_spill]]  ;;  %p728_p3 = scmp.lt.s32.totalorder %s17845_s28, 1  ;;  %vm825_vm0 = vcmask 523264   ;;  %vm2232_vm5 = vcmask 261120  }
  0x17   : > { %s30605_s4 = sld [smem:[#allocation49_spill]]  ;;  %s30607_s6 = sld [smem:[#allocation52_spill]] }
  0x18   : > { %s31014_s28 = smov (!%p728_p3, %s17845_s28), 1  ;;  %s30610_s8 = sld [smem:[#allocation57_spill]] }
  0x19   : > { %s18383_s3 = sshll.u32 %s31014_s28, 6  ;;  %s30717_s2 = sld [smem:[#allocation55_spill]] }
  0x1a   : > { %s735_s5 = scalar_lea.vmem %s30291_s24, %s31014_s28 }
  0x1c   : > { %v25289_v1 = vld [vmem:[%s30604_s29 + $0x20] sm:$0xff]   ;;  %v25290_v2 = vld [vmem:[%s30604_s29 + $0x28] sm:$0xff]   ;;  %v25291_v3 = vld [vmem:[%s30604_s29 + $0x30] sm:$0xff]  }
  0x1d   : > { %20183 = vmatprep.subr.bf16.mxu1 %v25289_v1  ;;  %s732_s1 = scalar_lea.vmem %s30605_s4, %s18383_s3  ;;  %v25292_v5 = vld [vmem:[%s30604_s29 + $0x38] sm:$0xff]   ;;  %v25301_v13 = vld [vmem:[%s30604_s29] sm:$0xff]   ;;  %v25302_v14 = vld [vmem:[%s30604_s29 + $0x8] sm:$0xff]   ;;  %s30608_s3 = sld [smem:[#allocation54_spill]] }
  0x1e   : > { %20184 = vmatpush3.bf16.msra.mxu1 %v25289_v1  ;;  %v25630_v4 = vld [vmem:[%s732_s1] sm:$0xff]   ;;  %v25639_v6 = vld [vmem:[%s732_s1 + $0x8] sm:$0xff]   ;;  %v25641_v7 = vld [vmem:[%s732_s1 + $0x10] sm:$0xff]   ;;  %20159 = vmatprep.subr.bf16.mxu0 %v25301_v13  ;;  %s30609_s4 = sld [smem:[#allocation53_spill]] }
  0x1f   : > { %20185 = vmatprep.subr.bf16.mxu1 %v25290_v2  ;;  %20191 = vmatprep.mubr.msk.bf16.mxu1 %vm825_vm0, %v25630_v4  ;;  %v25647_v8 = vld [vmem:[%s732_s1 + $0x18] sm:$0xff]   ;;  %v25649_v9 = vld [vmem:[%s732_s1 + $0x20] sm:$0xff]   ;;  %v25655_v10 = vld [vmem:[%s732_s1 + $0x28] sm:$0xff]  }
  0x20   : > { %20167 = vmatprep.mubr.msk.bf16.mxu0 %vm825_vm0, %v25630_v4  ;;  %v25657_v11 = vld [vmem:[%s732_s1 + $0x30] sm:$0xff]   ;;  %v25663_v12 = vld [vmem:[%s732_s1 + $0x38] sm:$0xff]   ;;  %20160 = vmatpush3.bf16.msra.mxu0 %v25301_v13  ;;  %s30606_s1 = sld [smem:[#allocation50_spill]]  ;;  %v25307_v42 = vld [vmem:[%s30604_s29 + $0x40] sm:$0xff]  }
  0x21   : > { %20161 = vmatprep.subr.bf16.mxu0 %v25302_v14  ;;  %v25303_v15 = vld [vmem:[%s30604_s29 + $0x10] sm:$0xff]   ;;  %v25304_v16 = vld [vmem:[%s30604_s29 + $0x18] sm:$0xff]   ;;  %v25310_v45 = vld [vmem:[%s30604_s29 + $0x48] sm:$0xff]  }
  0x22   : > { %20186 = vmatpush3.bf16.msra.mxu1 %v25290_v2  ;;  %v25313_v46 = vld [vmem:[%s30604_s29 + $0x50] sm:$0xff]   ;;  %v25316_v49 = vld [vmem:[%s30604_s29 + $0x58] sm:$0xff]   ;;  %v25317_v50 = vld [vmem:[%s30604_s29 + $0x60] sm:$0xff]  }
  0x23   : > { %20187 = vmatprep.subr.bf16.mxu1 %v25291_v3  ;;  %v25318_v54 = vld [vmem:[%s30604_s29 + $0x68] sm:$0xff]   ;;  %v25319_v55 = vld [vmem:[%s30604_s29 + $0x70] sm:$0xff]   ;;  %v25320_v56 = vld [vmem:[%s30604_s29 + $0x78] sm:$0xff]  }
  0x24   : > { %20162 = vmatpush3.bf16.msra.mxu0 %v25302_v14 }
  0x25   : > { %20163 = vmatprep.subr.bf16.mxu0 %v25303_v15 }
  0x26   : > { %20188 = vmatpush3.bf16.msra.mxu1 %v25291_v3  ;;  %v25305_v17 = vld [vmem:[%s30606_s1 + $0x40] sm:$0xff]   ;;  %v25306_v43 = vld [vmem:[%s30606_s1 + $0x48] sm:$0xff]   ;;  %v25308_v44 = vld [vmem:[%s30606_s1 + $0x50] sm:$0xff]  }
  0x27   : > { %20189 = vmatprep.subr.bf16.mxu1 %v25292_v5  ;;  %v25309_v47 = vld [vmem:[%s30606_s1 + $0x58] sm:$0xff]   ;;  %v25311_v48 = vld [vmem:[%s30606_s1 + $0x60] sm:$0xff]   ;;  %v25312_v51 = vld [vmem:[%s30606_s1 + $0x68] sm:$0xff]  }
  0x28   : > { %20164 = vmatpush3.bf16.msra.mxu0 %v25303_v15  ;;  %v25314_v52 = vld [vmem:[%s30606_s1 + $0x70] sm:$0xff]   ;;  %v25315_v53 = vld [vmem:[%s30606_s1 + $0x78] sm:$0xff]  }
  0x29   : > { %20165 = vmatprep.subr.bf16.mxu0 %v25304_v16 }
  0x2a   : > { %20190 = vmatpush3.bf16.msra.mxu1 %v25292_v5 }
  0x2c   : > { %20166 = vmatpush3.bf16.msra.mxu0 %v25304_v16 }
  0x2d   : > { %20192 = vmatmul.mubr.msk.bf16.vlgmr.msra.gmra.mrb[0].mxu1 %vm825_vm0, %v25639_v6 }
  0x2e   : > { %20195 = vmatprep.mubr.msk.bf16.mxu1 %vm825_vm0, %v25641_v7 }
  0x2f   : > { %20168 = vmatmul.mubr.msk.bf16.vlgmr.msra.gmra.mrb[0].mxu0 %vm825_vm0, %v25639_v6 }
  0x30   : > { %20171 = vmatprep.mubr.msk.bf16.mxu0 %vm825_vm0, %v25641_v7 }
  0x35   : > { %20196 = vmatmul.mubr.msk.bf16.gmra.mrb[4].mxu1 %vm825_vm0, %v25647_v8 }
  0x36   : > { %20199 = vmatprep.mubr.msk.bf16.mxu1 %vm825_vm0, %v25649_v9 }
  0x37   : > { %20172 = vmatmul.mubr.msk.bf16.gmra.mrb[4].mxu0 %vm825_vm0, %v25647_v8 }
  0x38   : > { %20175 = vmatprep.mubr.msk.bf16.mxu0 %vm825_vm0, %v25649_v9 }
  0x3d   : > { %20200 = vmatmul.mubr.msk.bf16.gmra.mrb[8].mxu1 %vm825_vm0, %v25655_v10 }
  0x3e   : > { %20203 = vmatprep.mubr.msk.bf16.mxu1 %vm825_vm0, %v25657_v11 }
  0x3f   : > { %20176 = vmatmul.mubr.msk.bf16.gmra.mrb[8].mxu0 %vm825_vm0, %v25655_v10 }
  0x40   : > { %20179 = vmatprep.mubr.msk.bf16.mxu0 %vm825_vm0, %v25657_v11 }
  0x45   : > { %20204 = vmatmul.mubr.msk.bf16.gmra.mrb[12].mxu1 %vm825_vm0, %v25663_v12 }
  0x46   : > { %20223 = vmatprep.mubr.bf16.mxu1 %v25305_v17  ;;  %v25321_v17 = vld [vmem:[%s30606_s1] sm:$0xff]  }
  0x47   : > { %20180 = vmatmul.mubr.msk.bf16.gmra.mrb[12].mxu0 %vm825_vm0, %v25663_v12 }
  0x48   : > { %20255 = vmatprep.mubr.bf16.mxu0 %v25321_v17 }
 0x100   : > { %v20193_v18 = vpop.f32.mrb[0].mxu1 }
 0x101   : > { %v1038_v19 = vpop.f32.mrb[1].mxu1 }
 0x102   : > { %v20194_v20 = vpop.f32.mrb[2].mxu1  ;;  %v20169_v57 = vpop.f32.mrb[0].mxu0 }
 0x103   : > { %v1119_v21 = vpack.c.bf16 %v20194_v20, %v20193_v18  ;;  %v1041_v22 = vpop.f32.mrb[3].mxu1  ;;  %v884_v58 = vpop.f32.mrb[1].mxu0  ;;  %v25322_v18 = vld [vmem:[%s30606_s1 + $0x8] sm:$0xff]   ;;  %v25324_v20 = vld [vmem:[%s30606_s1 + $0x18] sm:$0xff]  }
 0x104   : > { %v1118_v23 = vpack.c.bf16 %v1041_v22, %v1038_v19  ;;  %v20170_v59 = vpop.f32.mrb[2].mxu0  ;;  %v25323_v19 = vld [vmem:[%s30606_s1 + $0x10] sm:$0xff]   ;;  %v25326_v22 = vld [vmem:[%s30606_s1 + $0x28] sm:$0xff]  }
 0x105   : > { %v964_v60 = vpack.c.bf16 %v20170_v59, %v20169_v57  ;;  %v887_v61 = vpop.f32.mrb[3].mxu0  ;;  %v2063_v57 = vld [vmem:[%s30607_s6 + $0x78] sm:$0xff] }
 0x106   : > { %20207 = vmatprep.subr.bf16.mxu1 %v1118_v23  ;;  %v963_v62 = vpack.c.bf16 %v887_v61, %v884_v58 }
 0x107   : > { %20208 = vmatpush3.bf16.msra.mxu1 %v1118_v23  ;;  %v25327_v23 = vld [vmem:[%s30606_s1 + $0x30] sm:$0xff]  }
 0x108   : > { %v20197_v24 = vpop.f32.mrb[4].mxu1  ;;  %20209 = vmatprep.subr.bf16.mxu1 %v1119_v21  ;;  %20239 = vmatprep.subr.bf16.mxu0 %v963_v62 }
 0x109   : > { %v1054_v25 = vpop.f32.mrb[5].mxu1  ;;  %20240 = vmatpush3.bf16.msra.mxu0 %v963_v62 }
 0x10a   : > { %v20198_v26 = vpop.f32.mrb[6].mxu1  ;;  %v20173_v63 = vpop.f32.mrb[4].mxu0  ;;  %20241 = vmatprep.subr.bf16.mxu0 %v964_v60 }
 0x10b   : > { %v1121_v27 = vpack.c.bf16 %v20198_v26, %v20197_v24  ;;  %v1057_v28 = vpop.f32.mrb[7].mxu1  ;;  %20210 = vmatpush3.bf16.msra.mxu1 %v1119_v21  ;;  %v900_v0 = vpop.f32.mrb[5].mxu0  ;;  %v25325_v21 = vld [vmem:[%s30606_s1 + $0x20] sm:$0xff]   ;;  %v25328_v24 = vld [vmem:[%s30606_s1 + $0x38] sm:$0xff]  }
 0x10c   : > { %v1120_v29 = vpack.c.bf16 %v1057_v28, %v1054_v25  ;;  %v20174_v1 = vpop.f32.mrb[6].mxu0  ;;  %v25329_v25 = vld [vmem:[%s30606_s1 + $0x80] sm:$0xff]   ;;  %v25475_v28 = vmov 0  }
 0x10d   : > { %v966_v2 = vpack.c.bf16 %v20174_v1, %v20173_v63  ;;  %v903_v3 = vpop.f32.mrb[7].mxu0  ;;  %20242 = vmatpush3.bf16.msra.mxu0 %v964_v60  ;;  %v2048_v26 = vld [vmem:[%s30607_s6] sm:$0xff]  ;;  %25287 = vset.pattern.permute.xlu0 %v25475_v28 }
 0x10e   : > { %20211 = vmatprep.subr.bf16.mxu1 %v1120_v29  ;;  %25288 = vset.pattern.permute.xlu1 %v25475_v28 }
 0x10f   : > { %20212 = vmatpush3.bf16.msra.mxu1 %v1120_v29  ;;  %2066 = vperm.xlu0 %25287, %v2048_v26   ;;  %v25331_v26 = vld [vmem:[%s30606_s1 + $0x90] sm:$0xff]  }
 0x110   : > { %v20201_v30 = vpop.f32.mrb[8].mxu1  ;;  %20213 = vmatprep.subr.bf16.mxu1 %v1121_v27 }
 0x111   : > { %v1070_v31 = vpop.f32.mrb[9].mxu1 }
 0x112   : > { %v20202_v32 = vpop.f32.mrb[10].mxu1  ;;  %v20177_v5 = vpop.f32.mrb[8].mxu0 }
 0x113   : > { %v1123_v33 = vpack.c.bf16 %v20202_v32, %v20201_v30  ;;  %v1073_v34 = vpop.f32.mrb[11].mxu1  ;;  %20214 = vmatpush3.bf16.msra.mxu1 %v1121_v27  ;;  %v2050_v27 = vld [vmem:[%s30607_s6 + $0x10] sm:$0xff]  ;;  %v2051_v32 = vld [vmem:[%s30607_s6 + $0x18] sm:$0xff] }
 0x114   : > { %v1122_v35 = vpack.c.bf16 %v1073_v34, %v1070_v31  ;;  %2076 = vperm.xlu1 %25288, %v2050_v27   ;;  %v2049_v31 = vld [vmem:[%s30607_s6 + $0x8] sm:$0xff] }
 0x115   : > { %2071 = vperm.xlu0 %25287, %v2049_v31  }
 0x116   : > { %20215 = vmatprep.subr.bf16.mxu1 %v1122_v35 }
 0x117   : > { %20216 = vmatpush3.bf16.msra.mxu1 %v1122_v35  ;;  %v2052_v35 = vld [vmem:[%s30607_s6 + $0x20] sm:$0xff] }
 0x118   : > { %v20205_v36 = vpop.f32.mrb[12].mxu1  ;;  %20217 = vmatprep.subr.bf16.mxu1 %v1123_v33  ;;  %2081 = vperm.xlu1 %25288, %v2051_v32  }
 0x119   : > { %v1086_v37 = vpop.f32.mrb[13].mxu1  ;;  %2086 = vperm.xlu0 %25287, %v2052_v35   ;;  %v25332_v35 = vld [vmem:[%s30606_s1 + $0x98] sm:$0xff]  }
 0x11a   : > { %v20206_v38 = vpop.f32.mrb[14].mxu1 }
 0x11b   : > { %v1125_v39 = vpack.c.bf16 %v20206_v38, %v20205_v36  ;;  %v1089_v40 = vpop.f32.mrb[15].mxu1  ;;  %20218 = vmatpush3.bf16.msra.mxu1 %v1123_v33  ;;  %v2053_v36 = vld [vmem:[%s30607_s6 + $0x28] sm:$0xff] }
 0x11c   : > { %v1124_v41 = vpack.c.bf16 %v1089_v40, %v1086_v37  ;;  %2091 = vperm.xlu1 %25288, %v2053_v36   ;;  %v2055_v40 = vld [vmem:[%s30607_s6 + $0x38] sm:$0xff] }
 0x11e   : > { %20219 = vmatprep.subr.bf16.mxu1 %v1124_v41 }
 0x11f   : > { %20220 = vmatpush3.bf16.msra.mxu1 %v1124_v41 }
 0x120   : > { %20221 = vmatprep.subr.bf16.mxu1 %v1125_v39  ;;  %2101 = vperm.xlu1 %25288, %v2055_v40   ;;  %v25333_v40 = vld [vmem:[%s30606_s1 + $0xa0] sm:$0xff]  }
 0x123   : > { %20222 = vmatpush3.bf16.msra.mxu1 %v1125_v39  ;;  %v2054_v39 = vld [vmem:[%s30607_s6 + $0x30] sm:$0xff] }
 0x124   : > { %20271 = vmatprep.subr.bf16.mxu1 %v25307_v42  ;;  %2096 = vperm.xlu0 %25287, %v2054_v39  }
 0x126   : > { %20224 = vmatmul.mubr.bf16.vlgmr.msra.gmra.mrb[16].mxu1 %v25306_v43  ;;  %v25345_v43 = vld [vmem:[%s30608_s3] sm:$0xff]  }
 0x127   : > { %20227 = vmatprep.mubr.bf16.mxu1 %v25308_v44  ;;  %20272 = vmatpush3.bf16.msra.mxu1 %v25307_v42  ;;  %v2056_v44 = vld [vmem:[%s30607_s6 + $0x40] sm:$0xff] }
 0x128   : > { %20273 = vmatprep.subr.bf16.mxu1 %v25310_v45  ;;  %2106 = vperm.xlu0 %25287, %v2056_v44  }
 0x12b   : > { %20274 = vmatpush3.bf16.msra.mxu1 %v25310_v45  ;;  %v2057_v45 = vld [vmem:[%s30607_s6 + $0x48] sm:$0xff] }
 0x12c   : > { %20275 = vmatprep.subr.bf16.mxu1 %v25313_v46  ;;  %2111 = vperm.xlu1 %25288, %v2057_v45  }
 0x12e   : > { %20228 = vmatmul.mubr.bf16.gmra.mrb[20].mxu1 %v25309_v47 }
 0x12f   : > { %20231 = vmatprep.mubr.bf16.mxu1 %v25311_v48  ;;  %20276 = vmatpush3.bf16.msra.mxu1 %v25313_v46  ;;  %v2058_v48 = vld [vmem:[%s30607_s6 + $0x50] sm:$0xff] }
 0x130   : > { %20277 = vmatprep.subr.bf16.mxu1 %v25316_v49  ;;  %2116 = vperm.xlu0 %25287, %v2058_v48  }
 0x133   : > { %20278 = vmatpush3.bf16.msra.mxu1 %v25316_v49  ;;  %v2059_v49 = vld [vmem:[%s30607_s6 + $0x58] sm:$0xff] }
 0x134   : > { %20327 = vmatprep.subr.bf16.mxu1 %v25317_v50  ;;  %2121 = vperm.xlu1 %25288, %v2059_v49   ;;  %v25334_v49 = vld [vmem:[%s30606_s1 + $0xa8] sm:$0xff]  }
 0x136   : > { %20232 = vmatmul.mubr.bf16.gmra.mrb[24].mxu1 %v25312_v51 }
 0x137   : > { %20235 = vmatprep.mubr.bf16.mxu1 %v25314_v52  ;;  %v2060_v52 = vld [vmem:[%s30607_s6 + $0x60] sm:$0xff] }
 0x138   : > { %2126 = vperm.xlu0 %25287, %v2060_v52  }
 0x13e   : > { %20236 = vmatmul.mubr.bf16.gmra.mrb[28].mxu1 %v25315_v53  ;;  %v2061_v53 = vld [vmem:[%s30607_s6 + $0x68] sm:$0xff] }
 0x13f   : > { %20279 = vmatprep.mubr.msk.bf16.mxu1 %vm825_vm0, %v25630_v4  ;;  %2131 = vperm.xlu1 %25288, %v2061_v53  }
 0x143   : > { %2141 = vperm.xlu1 %25288, %v2063_v57  }
 0x146   : > { %20280 = vmatmul.mubr.msk.bf16.vlgmr.msra.gmra.mrb[32].mxu1 %vm825_vm0, %v25639_v6 }
 0x147   : > { %20283 = vmatprep.mubr.msk.bf16.mxu1 %vm825_vm0, %v25641_v7  ;;  %20328 = vmatpush3.bf16.msra.mxu1 %v25317_v50 }
 0x148   : > { %20329 = vmatprep.subr.bf16.mxu1 %v25318_v54 }
 0x14b   : > { %20330 = vmatpush3.bf16.msra.mxu1 %v25318_v54 }
 0x14c   : > { %20331 = vmatprep.subr.bf16.mxu1 %v25319_v55 }
 0x14e   : > { %20284 = vmatmul.mubr.msk.bf16.gmra.mrb[36].mxu1 %vm825_vm0, %v25647_v8 }
 0x14f   : > { %20287 = vmatprep.mubr.msk.bf16.mxu1 %vm825_vm0, %v25649_v9  ;;  %20332 = vmatpush3.bf16.msra.mxu1 %v25319_v55 }
 0x150   : > { %20333 = vmatprep.subr.bf16.mxu1 %v25320_v56 }
 0x153   : > { %20334 = vmatpush3.bf16.msra.mxu1 %v25320_v56  ;;  %v2062_v56 = vld [vmem:[%s30607_s6 + $0x70] sm:$0xff] }
 0x154   : > { %20383 = vmatprep.subr.bf16.mxu1 %v25345_v43  ;;  %2136 = vperm.xlu0 %25287, %v2062_v56   ;;  %v25335_v56 = vld [vmem:[%s30606_s1 + $0xb0] sm:$0xff]  }
 0x156   : > { %20288 = vmatmul.mubr.msk.bf16.gmra.mrb[40].mxu1 %vm825_vm0, %v25655_v10 }
 0x157   : > { %20291 = vmatprep.mubr.msk.bf16.mxu1 %vm825_vm0, %v25657_v11 }
 0x15e   : > { %20292 = vmatmul.mubr.msk.bf16.gmra.mrb[44].mxu1 %vm825_vm0, %v25663_v12 }
 0x15f   : > { %20335 = vmatprep.mubr.msk.bf16.mxu1 %vm825_vm0, %v25630_v4  ;;  %v965_v4 = vpack.c.bf16 %v903_v3, %v900_v0 }
 0x161   : > { %20243 = vmatprep.subr.bf16.mxu0 %v965_v4 }
 0x162   : > { %20244 = vmatpush3.bf16.msra.mxu0 %v965_v4 }
 0x163   : > { %20245 = vmatprep.subr.bf16.mxu0 %v966_v2 }
 0x166   : > { %20336 = vmatmul.mubr.msk.bf16.vlgmr.msra.gmra.mrb[48].mxu1 %vm825_vm0, %v25639_v6  ;;  %v916_v6 = vpop.f32.mrb[9].mxu0  ;;  %20246 = vmatpush3.bf16.msra.mxu0 %v966_v2 }
 0x167   : > { %20339 = vmatprep.mubr.msk.bf16.mxu1 %vm825_vm0, %v25641_v7  ;;  %v20178_v7 = vpop.f32.mrb[10].mxu0  ;;  %20384 = vmatpush3.bf16.msra.mxu1 %v25345_v43 }
 0x16e   : > { %20340 = vmatmul.mubr.msk.bf16.gmra.mrb[52].mxu1 %vm825_vm0, %v25647_v8  ;;  %v968_v8 = vpack.c.bf16 %v20178_v7, %v20177_v5 }
 0x16f   : > { %20343 = vmatprep.mubr.msk.bf16.mxu1 %vm825_vm0, %v25649_v9  ;;  %v919_v9 = vpop.f32.mrb[11].mxu0 }
 0x176   : > { %20344 = vmatmul.mubr.msk.bf16.gmra.mrb[56].mxu1 %vm825_vm0, %v25655_v10  ;;  %v967_v10 = vpack.c.bf16 %v919_v9, %v916_v6 }
 0x177   : > { %20347 = vmatprep.mubr.msk.bf16.mxu1 %vm825_vm0, %v25657_v11  ;;  %v20181_v11 = vpop.f32.mrb[12].mxu0 }
 0x178   : > { %20247 = vmatprep.subr.bf16.mxu0 %v967_v10  ;;  %v932_v13 = vpop.f32.mrb[13].mxu0 }
 0x179   : > { %20248 = vmatpush3.bf16.msra.mxu0 %v967_v10  ;;  %v20182_v14 = vpop.f32.mrb[14].mxu0 }
 0x17a   : > { %20249 = vmatprep.subr.bf16.mxu0 %v968_v8  ;;  %v970_v15 = vpack.c.bf16 %v20182_v14, %v20181_v11  ;;  %v935_v16 = vpop.f32.mrb[15].mxu0 }
 0x17d   : > { %20250 = vmatpush3.bf16.msra.mxu0 %v968_v8 }
 0x17e   : > { %20348 = vmatmul.mubr.msk.bf16.gmra.mrb[60].mxu1 %vm825_vm0, %v25663_v12  ;;  %v969_v12 = vpack.c.bf16 %v935_v16, %v932_v13 }
 0x180   : > { %20251 = vmatprep.subr.bf16.mxu0 %v969_v12 }
 0x181   : > { %20252 = vmatpush3.bf16.msra.mxu0 %v969_v12 }
 0x182   : > { %20253 = vmatprep.subr.bf16.mxu0 %v970_v15 }
 0x185   : > { %20254 = vmatpush3.bf16.msra.mxu0 %v970_v15 }
 0x188   : > { %20256 = vmatmul.mubr.bf16.vlgmr.msra.gmra.mrb[16].mxu0 %v25322_v18 }
 0x189   : > { %20259 = vmatprep.mubr.bf16.mxu0 %v25323_v19 }
 0x190   : > { %20260 = vmatmul.mubr.bf16.gmra.mrb[20].mxu0 %v25324_v20 }
 0x191   : > { %20263 = vmatprep.mubr.bf16.mxu0 %v25325_v21 }
 0x198   : > { %20264 = vmatmul.mubr.bf16.gmra.mrb[24].mxu0 %v25326_v22 }
 0x199   : > { %20267 = vmatprep.mubr.bf16.mxu0 %v25327_v23  ;;  %v25330_v23 = vld [vmem:[%s30606_s1 + $0x88] sm:$0xff]  }
 0x1a0   : > { %20268 = vmatmul.mubr.bf16.gmra.mrb[28].mxu0 %v25328_v24 }
 0x1a1   : > { %20311 = vmatprep.mubr.bf16.mxu0 %v25329_v25 }
 0x1f9   : > { %v25806_v29 = vpop.f32.mrb[16].mxu1 }
 0x1fa   : > { %v25808_v30 = vpop.f32.mrb[17].mxu1 }
 0x1fb   : > { %v25816_v33 = vpop.f32.mrb[18].mxu1 }
 0x1fc   : > { %v25818_v34 = vpop.f32.mrb[19].mxu1 }
 0x201   : > { %v25826_v37 = vpop.f32.mrb[20].mxu1 }
 0x202   : > { %v25828_v38 = vpop.f32.mrb[21].mxu1 }
 0x203   : > { %v25836_v41 = vpop.f32.mrb[22].mxu1 }
 0x204   : > { %v25838_v42 = vpop.f32.mrb[23].mxu1 }
 0x209   : > { %v25849_v46 = vpop.f32.mrb[24].mxu1 }
 0x20a   : > { %v25851_v47 = vpop.f32.mrb[25].mxu1 }
 0x20b   : > { %v25859_v50 = vpop.f32.mrb[26].mxu1 }
 0x20c   : > { %v25861_v51 = vpop.f32.mrb[27].mxu1 }
 0x211   : > { %v25869_v54 = vpop.f32.mrb[28].mxu1 }
 0x212   : > { %v25871_v55 = vpop.f32.mrb[29].mxu1 }
 0x213   : > { %v25879_v58 = vpop.f32.mrb[30].mxu1 }
 0x214   : > { %v25881_v59 = vpop.f32.mrb[31].mxu1 }
 0x219   : > { %v20281_v60 = vpop.f32.mrb[32].mxu1 }
 0x21a   : > { %v1483_v61 = vpop.f32.mrb[33].mxu1 }
 0x21b   : > { %v20282_v62 = vpop.f32.mrb[34].mxu1 }
 0x21c   : > { %v1564_v63 = vpack.c.bf16 %v20282_v62, %v20281_v60  ;;  %v1486_v0 = vpop.f32.mrb[35].mxu1 }
 0x21d   : > { %v1563_v1 = vpack.c.bf16 %v1486_v0, %v1483_v61 }
 0x21f   : > { %20295 = vmatprep.subr.bf16.mxu0 %v1563_v1 }
 0x220   : > { %20296 = vmatpush3.bf16.msra.mxu0 %v1563_v1 }
 0x221   : > { %v20285_v2 = vpop.f32.mrb[36].mxu1  ;;  %20297 = vmatprep.subr.bf16.mxu0 %v1564_v63 }
 0x222   : > { %v1499_v3 = vpop.f32.mrb[37].mxu1 }
 0x223   : > { %v20286_v4 = vpop.f32.mrb[38].mxu1 }
 0x224   : > { %v1502_v5 = vpop.f32.mrb[39].mxu1  ;;  %20298 = vmatpush3.bf16.msra.mxu0 %v1564_v63  ;;  %v1566_v6 = vpack.c.bf16 %v20286_v4, %v20285_v2  ;;  %v25336_v63 = vld [vmem:[%s30606_s1 + $0xb8] sm:$0xff]   ;;  %v25337_v2 = vld [vmem:[%s30606_s1 + $0xc0] sm:$0xff]   ;;  %v25338_v4 = vld [vmem:[%s30606_s1 + $0xc8] sm:$0xff]  }
 0x225   : > { %v1565_v7 = vpack.c.bf16 %v1502_v5, %v1499_v3  ;;  %v25339_v5 = vld [vmem:[%s30606_s1 + $0xd0] sm:$0xff]  }
 0x227   : > { %20299 = vmatprep.subr.bf16.mxu0 %v1565_v7 }
 0x228   : > { %20300 = vmatpush3.bf16.msra.mxu0 %v1565_v7  ;;  %v25341_v7 = vld [vmem:[%s30606_s1 + $0xe0] sm:$0xff]  }
 0x229   : > { %v20289_v8 = vpop.f32.mrb[40].mxu1  ;;  %20301 = vmatprep.subr.bf16.mxu0 %v1566_v6 }
 0x22a   : > { %v1515_v9 = vpop.f32.mrb[41].mxu1 }
 0x22b   : > { %v20290_v10 = vpop.f32.mrb[42].mxu1 }
 0x22c   : > { %v1518_v11 = vpop.f32.mrb[43].mxu1  ;;  %20302 = vmatpush3.bf16.msra.mxu0 %v1566_v6  ;;  %v1568_v13 = vpack.c.bf16 %v20290_v10, %v20289_v8  ;;  %v25340_v6 = vld [vmem:[%s30606_s1 + $0xd8] sm:$0xff]   ;;  %v25342_v8 = vld [vmem:[%s30606_s1 + $0xe8] sm:$0xff]  }
 0x22d   : > { %v1567_v14 = vpack.c.bf16 %v1518_v11, %v1515_v9  ;;  %v25343_v9 = vld [vmem:[%s30606_s1 + $0xf0] sm:$0xff]   ;;  %v25344_v10 = vld [vmem:[%s30606_s1 + $0xf8] sm:$0xff]   ;;  %v25346_v11 = vld [vmem:[%s30608_s3 + $0x8] sm:$0xff]  }
 0x22e   : > { %20385 = vmatprep.subr.bf16.mxu1 %v25346_v11 }
 0x22f   : > { %20303 = vmatprep.subr.bf16.mxu0 %v1567_v14  ;;  %20386 = vmatpush3.bf16.msra.mxu1 %v25346_v11 }
 0x230   : > { %20304 = vmatpush3.bf16.msra.mxu0 %v1567_v14  ;;  %v2067_v14 = vpop.permute.xlu0 %2066 }
 0x231   : > { %v20293_v15 = vpop.f32.mrb[44].mxu1  ;;  %20305 = vmatprep.subr.bf16.mxu0 %v1568_v13 }
 0x232   : > { %v1531_v16 = vpop.f32.mrb[45].mxu1 }
 0x233   : > { %v20294_v12 = vpop.f32.mrb[46].mxu1 }
 0x234   : > { %v1534_v17 = vpop.f32.mrb[47].mxu1  ;;  %20306 = vmatpush3.bf16.msra.mxu0 %v1568_v13  ;;  %v1570_v18 = vpack.c.bf16 %v20294_v12, %v20293_v15  ;;  %v25347_v13 = vld [vmem:[%s30608_s3 + $0x10] sm:$0xff]   ;;  %v2077_v15 = vpop.permute.xlu1 %2076 }
 0x235   : > { %v1569_v19 = vpack.c.bf16 %v1534_v17, %v1531_v16  ;;  %20403 = vmatprep.subr.bf16.mxu1 %v25347_v13  ;;  %v2072_v16 = vpop.permute.xlu0 %2071 }
 0x237   : > { %20307 = vmatprep.subr.bf16.mxu0 %v1569_v19 }
 0x238   : > { %20308 = vmatpush3.bf16.msra.mxu0 %v1569_v19  ;;  %v2082_v12 = vpop.permute.xlu1 %2081 }
 0x239   : > { %20309 = vmatprep.subr.bf16.mxu0 %v1570_v18  ;;  %v20337_v20 = vpop.f32.mrb[48].mxu1  ;;  %v2087_v17 = vpop.permute.xlu0 %2086 }
 0x23a   : > { %v1799_v21 = vpop.f32.mrb[49].mxu1 }
 0x23b   : > { %v20338_v22 = vpop.f32.mrb[50].mxu1 }
 0x23c   : > { %20310 = vmatpush3.bf16.msra.mxu0 %v1570_v18  ;;  %v1802_v24 = vpop.f32.mrb[51].mxu1  ;;  %v1880_v25 = vpack.c.bf16 %v20338_v22, %v20337_v20  ;;  %v2092_v18 = vpop.permute.xlu1 %2091 }
 0x23d   : > { %v1879_v27 = vpack.c.bf16 %v1802_v24, %v1799_v21  ;;  %v2097_v22 = vpop.permute.xlu0 %2096 }
 0x23f   : > { %20312 = vmatmul.mubr.bf16.vlgmr.msra.gmra.mrb[16].mxu0 %v25330_v23  ;;  %20351 = vmatprep.subr.bf16.mxu0 %v1879_v27 }
 0x240   : > { %20352 = vmatpush3.bf16.msra.mxu0 %v1879_v27  ;;  %20315 = vmatprep.mubr.bf16.mxu0 %v25331_v26 }
 0x241   : > { %v20341_v28 = vpop.f32.mrb[52].mxu1  ;;  %20353 = vmatprep.subr.bf16.mxu0 %v1880_v25 }
 0x242   : > { %v1815_v31 = vpop.f32.mrb[53].mxu1 }
 0x243   : > { %v20342_v32 = vpop.f32.mrb[54].mxu1 }
 0x244   : > { %v1818_v36 = vpop.f32.mrb[55].mxu1  ;;  %20354 = vmatpush3.bf16.msra.mxu0 %v1880_v25  ;;  %v1882_v39 = vpack.c.bf16 %v20342_v32, %v20341_v28  ;;  %v2102_v28 = vpop.permute.xlu1 %2101 }
 0x245   : > { %v1881_v43 = vpack.c.bf16 %v1818_v36, %v1815_v31 }
 0x247   : > { %20316 = vmatmul.mubr.bf16.gmra.mrb[20].mxu0 %v25332_v35  ;;  %20355 = vmatprep.subr.bf16.mxu0 %v1881_v43 }
 0x248   : > { %20356 = vmatpush3.bf16.msra.mxu0 %v1881_v43  ;;  %20319 = vmatprep.mubr.bf16.mxu0 %v25333_v40  ;;  %v2107_v43 = vpop.permute.xlu0 %2106 }
 0x249   : > { %v20345_v44 = vpop.f32.mrb[56].mxu1  ;;  %20357 = vmatprep.subr.bf16.mxu0 %v1882_v39 }
 0x24a   : > { %v1831_v45 = vpop.f32.mrb[57].mxu1 }
 0x24b   : > { %v20346_v48 = vpop.f32.mrb[58].mxu1 }
 0x24c   : > { %v1884_v52 = vpack.c.bf16 %v20346_v48, %v20345_v44  ;;  %v1834_v53 = vpop.f32.mrb[59].mxu1  ;;  %20358 = vmatpush3.bf16.msra.mxu0 %v1882_v39 }
 0x24d   : > { %v1883_v57 = vpack.c.bf16 %v1834_v53, %v1831_v45 }
 0x24f   : > { %20320 = vmatmul.mubr.bf16.gmra.mrb[24].mxu0 %v25334_v49  ;;  %20359 = vmatprep.subr.bf16.mxu0 %v1883_v57 }
 0x250   : > { %20360 = vmatpush3.bf16.msra.mxu0 %v1883_v57  ;;  %20323 = vmatprep.mubr.bf16.mxu0 %v25335_v56 }
 0x251   : > { %v20349_v60 = vpop.f32.mrb[60].mxu1  ;;  %20361 = vmatprep.subr.bf16.mxu0 %v1884_v52 }
 0x252   : > { %v1847_v61 = vpop.f32.mrb[61].mxu1 }
 0x253   : > { %v20350_v62 = vpop.f32.mrb[62].mxu1 }
 0x254   : > { %v1886_v0 = vpack.c.bf16 %v20350_v62, %v20349_v60  ;;  %v1850_v1 = vpop.f32.mrb[63].mxu1  ;;  %20362 = vmatpush3.bf16.msra.mxu0 %v1884_v52  ;;  %v2112_v52 = vpop.permute.xlu1 %2111 }
 0x255   : > { %v1885_v3 = vpack.c.bf16 %v1850_v1, %v1847_v61 }
 0x257   : > { %20324 = vmatmul.mubr.bf16.gmra.mrb[28].mxu0 %v25336_v63  ;;  %20363 = vmatprep.subr.bf16.mxu0 %v1885_v3 }
 0x258   : > { %20364 = vmatpush3.bf16.msra.mxu0 %v1885_v3  ;;  %20367 = vmatprep.mubr.bf16.mxu0 %v25337_v2 }
 0x259   : > { %20365 = vmatprep.subr.bf16.mxu0 %v1886_v0 }
 0x25c   : > { %20366 = vmatpush3.bf16.msra.mxu0 %v1886_v0 }
 0x25f   : > { %20368 = vmatmul.mubr.bf16.vlgmr.msra.gmra.mrb[16].mxu0 %v25338_v4 }
 0x260   : > { %20371 = vmatprep.mubr.bf16.mxu0 %v25339_v5 }
 0x267   : > { %20372 = vmatmul.mubr.bf16.gmra.mrb[20].mxu0 %v25340_v6 }
 0x268   : > { %20375 = vmatprep.mubr.bf16.mxu0 %v25341_v7 }
 0x26f   : > { %20376 = vmatmul.mubr.bf16.gmra.mrb[24].mxu0 %v25342_v8 }
 0x270   : > { %20379 = vmatprep.mubr.bf16.mxu0 %v25343_v9  ;;  %v25956_v9 = vld [vmem:[%s30608_s3 + $0x20] sm:$0xff]  }
 0x277   : > { %20380 = vmatmul.mubr.bf16.gmra.mrb[28].mxu0 %v25344_v10 }
 0x332   : > { %v20369_v19 = vpop.f32.mrb[16].mxu0 }
 0x333   : > { %v24519_v20 = vadd.f32 %v20369_v19, %v25806_v29  ;;  %v1969_v21 = vpop.f32.mrb[17].mxu0 }
 0x334   : > { %v24520_v23 = vadd.f32 %v1969_v21, %v25808_v30  ;;  %v20370_v24 = vpop.f32.mrb[18].mxu0 }
 0x335   : > { %v2146_v25 = vadd.f32 %v24519_v20, %v2077_v15  ;;  %v24521_v26 = vadd.f32 %v20370_v24, %v25816_v33  ;;  %v1972_v27 = vpop.f32.mrb[19].mxu0 }
 0x336   : > { %v2144_v31 = vadd.f32 %v24520_v23, %v2067_v14  ;;  %v24522_v32 = vadd.f32 %v1972_v27, %v25818_v34 }
 0x337   : > { %v2178_v35 = vmul.f32 0.2, %v2146_v25  ;;  %v2147_v36 = vadd.f32 %v24521_v26, %v2082_v12  ;;  %vm2162_vm1 = vcmp.gt.f32.partialorder %v2146_v25, 0.0 }
 0x338   : > { %v2176_v39 = vmul.f32 0.2, %v2144_v31  ;;  %v2145_v40 = vadd.f32 %v24522_v32, %v2072_v16  ;;  %vm2160_vm2 = vcmp.gt.f32.partialorder %v2144_v31, 0.0 }
 0x339   : > { %vm2163_vm3 = vcmp.gt.f32.partialorder %v2147_v36, 0.0  ;;  %v2179_v29 = vmul.f32 0.2, %v2147_v36  ;;  %v2194_v45 = vsel %vm2162_vm1, %v2146_v25, %v2178_v35 }
 0x33a   : > { %vm2161_vm4 = vcmp.gt.f32.partialorder %v2145_v40, 0.0  ;;  %v2177_v30 = vmul.f32 0.2, %v2145_v40  ;;  %v20373_v44 = vpop.f32.mrb[20].mxu0  ;;  %v2192_v34 = vsel %vm2160_vm2, %v2144_v31, %v2176_v39  ;;  %vm25477_vm2 = vmmov 0  }
 0x33b   : > { %v2195_v48 = vsel %vm2163_vm3, %v2147_v36, %v2179_v29  ;;  %v24523_v33 = vadd.f32 %v20373_v44, %v25826_v37  ;;  %v1985_v49 = vpop.f32.mrb[21].mxu0  ;;  %v25348_v37 = vld [vmem:[%s30608_s3 + $0x18] sm:$0xff]   ;;  %vm4724_vm3 = vcmask 130048  }
 0x33c   : > { %v25939_v53 = vpack.c.bf16 %v2195_v48, %v2194_v45  ;;  %v2193_v56 = vsel %vm2161_vm4, %v2145_v40, %v2177_v30  ;;  %v24524_v57 = vadd.f32 %v1985_v49, %v25828_v38  ;;  %v20374_v60 = vpop.f32.mrb[22].mxu0  ;;  %v2117_v38 = vpop.permute.xlu0 %2116  ;;  %vm4740_vm4 = vcmask 64512  }
 0x33d   : > { %v2150_v61 = vadd.f32 %v24523_v33, %v2097_v22  ;;  %v24525_v62 = vadd.f32 %v20374_v60, %v25836_v41  ;;  %v1988_v63 = vpop.f32.mrb[23].mxu0  ;;  %v25943_v0 = vpack.c.bf16 %v2193_v56, %v2192_v34 }
 0x33e   : > { %v2148_v1 = vadd.f32 %v24524_v57, %v2087_v17  ;;  %v24526_v2 = vadd.f32 %v1988_v63, %v25838_v42  ;;  %v2122_v42 = vpop.permute.xlu1 %2121 }
 0x33f   : > { %v2182_v3 = vmul.f32 0.2, %v2150_v61  ;;  %v2151_v4 = vadd.f32 %v24525_v62, %v2102_v28  ;;  %20387 = vmatprep.mubr.msk.bf16.mxu1 %vm2232_vm5, %v25943_v0  ;;  %vm2166_vm6 = vcmp.gt.f32.partialorder %v2150_v61, 0.0 }
 0x340   : > { %v2180_v5 = vmul.f32 0.2, %v2148_v1  ;;  %v2149_v6 = vadd.f32 %v24526_v2, %v2092_v18  ;;  %20388 = vmatmul.mubr.msk.bf16.vlgmr.msra.gmra.mrb[64].mxu1 %vm2232_vm5, %v25939_v53  ;;  %vm2164_vm7 = vcmp.gt.f32.partialorder %v2148_v1, 0.0  ;;  %v2127_v23 = vpop.permute.xlu0 %2126 }
 0x341   : > { %vm2167_vm8 = vcmp.gt.f32.partialorder %v2151_v4, 0.0  ;;  %v2183_v41 = vmul.f32 0.2, %v2151_v4  ;;  %20404 = vmatpush3.bf16.msra.mxu1 %v25347_v13  ;;  %v2198_v10 = vsel %vm2166_vm6, %v2150_v61, %v2182_v3 }
 0x342   : > { %vm2165_vm9 = vcmp.gt.f32.partialorder %v2149_v6, 0.0  ;;  %v2181_v7 = vmul.f32 0.2, %v2149_v6  ;;  %v20377_v8 = vpop.f32.mrb[24].mxu0  ;;  %20405 = vmatprep.subr.bf16.mxu1 %v25348_v37  ;;  %v2196_v16 = vsel %vm2164_vm7, %v2148_v1, %v2180_v5  ;;  %v25352_v5 = vld [vmem:[%s30608_s3 + $0x38] sm:$0xff]  }
 0x343   : > { %v2199_v11 = vsel %vm2167_vm8, %v2151_v4, %v2183_v41  ;;  %v24527_v14 = vadd.f32 %v20377_v8, %v25849_v46  ;;  %v2001_v15 = vpop.f32.mrb[25].mxu0  ;;  %v25350_v4 = vld [vmem:[%s30608_s3 + $0x28] sm:$0xff]  }
 0x344   : > { %v2197_v12 = vsel %vm2165_vm9, %v2149_v6, %v2181_v7  ;;  %v24528_v17 = vadd.f32 %v2001_v15, %v25851_v47  ;;  %v20378_v13 = vpop.f32.mrb[26].mxu0  ;;  %v25960_v18 = vpack.c.bf16 %v2199_v11, %v2198_v10  ;;  %v2132_v47 = vpop.permute.xlu1 %2131 }
 0x345   : > { %v2154_v19 = vadd.f32 %v24527_v14, %v2117_v38  ;;  %v24529_v20 = vadd.f32 %v20378_v13, %v25859_v50  ;;  %v2004_v21 = vpop.f32.mrb[27].mxu0  ;;  %v25963_v22 = vpack.c.bf16 %v2197_v12, %v2196_v16  ;;  %20406 = vmatpush3.bf16.msra.mxu1 %v25348_v37  ;;  %v2137_v40 = vpop.permute.xlu0 %2136  ;;  %v25351_v38 = vld [vmem:[%s30608_s3 + $0x30] sm:$0xff]  }
 0x346   : > { %v2152_v24 = vadd.f32 %v24528_v17, %v2107_v43  ;;  %v24530_v25 = vadd.f32 %v2004_v21, %v25861_v51  ;;  %20487 = vmatprep.subr.bf16.mxu1 %v25956_v9 }
 0x347   : > { %v2186_v46 = vmul.f32 0.2, %v2154_v19  ;;  %v2155_v26 = vadd.f32 %v24529_v20, %v2122_v42  ;;  %20391 = vmatprep.mubr.msk.bf16.mxu1 %vm2232_vm5, %v25963_v22  ;;  %vm2170_vm10 = vcmp.gt.f32.partialorder %v2154_v19, 0.0 }
 0x348   : > { %v2184_v27 = vmul.f32 0.2, %v2152_v24  ;;  %v2153_v28 = vadd.f32 %v24530_v25, %v2112_v52  ;;  %20392 = vmatmul.mubr.msk.bf16.gmra.mrb[68].mxu1 %vm2232_vm5, %v25960_v18  ;;  %vm2168_vm11 = vcmp.gt.f32.partialorder %v2152_v24, 0.0  ;;  %v2142_v34 = vpop.permute.xlu1 %2141 }
 0x349   : > { %vm2171_vm12 = vcmp.gt.f32.partialorder %v2155_v26, 0.0  ;;  %v2187_v50 = vmul.f32 0.2, %v2155_v26  ;;  %v2202_v32 = vsel %vm2170_vm10, %v2154_v19, %v2186_v46 }
 0x34a   : > { %vm2169_vm13 = vcmp.gt.f32.partialorder %v2153_v28, 0.0  ;;  %v2185_v31 = vmul.f32 0.2, %v2153_v28  ;;  %v20381_v51 = vpop.f32.mrb[28].mxu0  ;;  %v2200_v29 = vsel %vm2168_vm11, %v2152_v24, %v2184_v27 }
 0x34b   : > { %v2203_v35 = vsel %vm2171_vm12, %v2155_v26, %v2187_v50  ;;  %v24531_v36 = vadd.f32 %v20381_v51, %v25869_v54  ;;  %v2017_v39 = vpop.f32.mrb[29].mxu0 }
 0x34c   : > { %v2201_v43 = vsel %vm2169_vm13, %v2153_v28, %v2185_v31  ;;  %v24532_v30 = vadd.f32 %v2017_v39, %v25871_v55  ;;  %v20382_v44 = vpop.f32.mrb[30].mxu0  ;;  %v2213_v45 = vpack.c.bf16 %v2203_v35, %v2202_v32 }
 0x34d   : > { %v2158_v48 = vadd.f32 %v24531_v36, %v2137_v40  ;;  %v24533_v33 = vadd.f32 %v20382_v44, %v25879_v58  ;;  %v2020_v49 = vpop.f32.mrb[31].mxu0  ;;  %v2212_v52 = vpack.c.bf16 %v2201_v43, %v2200_v29 }
 0x34e   : > { %v2156_v56 = vadd.f32 %v24532_v30, %v2127_v23  ;;  %v24534_v57 = vadd.f32 %v2020_v49, %v25881_v59 }
 0x34f   : > { %v2190_v60 = vmul.f32 0.2, %v2158_v48  ;;  %v2159_v61 = vadd.f32 %v24533_v33, %v2142_v34  ;;  %20395 = vmatprep.mubr.msk.bf16.mxu1 %vm2232_vm5, %v2212_v52  ;;  %vm2174_vm14 = vcmp.gt.f32.partialorder %v2158_v48, 0.0 }
 0x350   : > { %v2188_v54 = vmul.f32 0.2, %v2156_v56  ;;  %v2157_v62 = vadd.f32 %v24534_v57, %v2132_v47  ;;  %20396 = vmatmul.mubr.msk.bf16.gmra.mrb[72].mxu1 %vm2232_vm5, %v2213_v45  ;;  %vm2172_vm15 = vcmp.gt.f32.partialorder %v2156_v56, 0.0 }
 0x351   : > { %vm2175_vm0 = vcmp.gt.f32.partialorder %v2159_v61, 0.0  ;;  %v2191_v55 = vmul.f32 0.2, %v2159_v61  ;;  %v2206_v63 = vsel %vm2174_vm14, %v2158_v48, %v2190_v60 }
 0x352   : > { %vm2173_vm1 = vcmp.gt.f32.partialorder %v2157_v62, 0.0  ;;  %v2189_v58 = vmul.f32 0.2, %v2157_v62  ;;  %v2204_v2 = vsel %vm2172_vm15, %v2156_v56, %v2188_v54 }
 0x353   : > { %v2207_v1 = vsel %vm2175_vm0, %v2159_v61, %v2191_v55 }
 0x354   : > { %v2205_v37 = vsel %vm2173_vm1, %v2157_v62, %v2189_v58  ;;  %v2215_v3 = vpack.c.bf16 %v2207_v1, %v2206_v63  ;;  %v25354_v62 = vld [vmem:[%s30609_s4 + $0x48] sm:$0xff]   ;;  %v25355_v63 = vld [vmem:[%s30609_s4 + $0x50] sm:$0xff]  }
 0x355   : > { %v2214_v59 = vpack.c.bf16 %v2205_v37, %v2204_v2 }
 0x357   : > { %20399 = vmatprep.mubr.msk.bf16.mxu1 %vm2232_vm5, %v2214_v59 }
 0x358   : > { %20400 = vmatmul.mubr.msk.bf16.gmra.mrb[76].mxu1 %vm2232_vm5, %v2215_v3 }
 0x359   : > { %20407 = vmatprep.mubr.msk.bf16.mxu1 %vm2232_vm5, %v25943_v0 }
 0x360   : > { %20408 = vmatmul.mubr.msk.bf16.vlgmr.msra.gmra.mrb[80].mxu1 %vm2232_vm5, %v25939_v53 }
 0x361   : > { %20411 = vmatprep.mubr.msk.bf16.mxu1 %vm2232_vm5, %v25963_v22  ;;  %20488 = vmatpush3.bf16.msra.mxu1 %v25956_v9 }
 0x362   : > { %20489 = vmatprep.subr.bf16.mxu1 %v25350_v4 }
 0x365   : > { %20490 = vmatpush3.bf16.msra.mxu1 %v25350_v4 }
 0x366   : > { %20539 = vmatprep.subr.bf16.mxu1 %v25351_v38 }
 0x368   : > { %20412 = vmatmul.mubr.msk.bf16.gmra.mrb[84].mxu1 %vm2232_vm5, %v25960_v18 }
 0x369   : > { %20415 = vmatprep.mubr.msk.bf16.mxu1 %vm2232_vm5, %v2212_v52 }
 0x370   : > { %20416 = vmatmul.mubr.msk.bf16.gmra.mrb[88].mxu1 %vm2232_vm5, %v2213_v45 }
 0x371   : > { %20419 = vmatprep.mubr.msk.bf16.mxu1 %vm2232_vm5, %v2214_v59 }
 0x378   : > { %20420 = vmatmul.mubr.msk.bf16.gmra.mrb[92].mxu1 %vm2232_vm5, %v2215_v3 }
 0x379   : > { %20491 = vmatprep.mubr.msk.bf16.mxu1 %vm2232_vm5, %v25943_v0 }
 0x380   : > { %20492 = vmatmul.mubr.msk.bf16.vlgmr.msra.gmra.mrb[96].mxu1 %vm2232_vm5, %v25939_v53 }
 0x381   : > { %20495 = vmatprep.mubr.msk.bf16.mxu1 %vm2232_vm5, %v25963_v22  ;;  %20540 = vmatpush3.bf16.msra.mxu1 %v25351_v38 }
 0x382   : > { %20541 = vmatprep.subr.bf16.mxu1 %v25352_v5 }
 0x385   : > { %20542 = vmatpush3.bf16.msra.mxu1 %v25352_v5  ;;  %v25357_v5 = vld [vmem:[%s30609_s4 + $0x60] sm:$0xff]  }
 0x388   : > { %20496 = vmatmul.mubr.msk.bf16.gmra.mrb[100].mxu1 %vm2232_vm5, %v25960_v18 }
 0x389   : > { %20499 = vmatprep.mubr.msk.bf16.mxu1 %vm2232_vm5, %v2212_v52 }
 0x390   : > { %20500 = vmatmul.mubr.msk.bf16.gmra.mrb[104].mxu1 %vm2232_vm5, %v2213_v45 }
 0x391   : > { %20503 = vmatprep.mubr.msk.bf16.mxu1 %vm2232_vm5, %v2214_v59 }
 0x398   : > { %20504 = vmatmul.mubr.msk.bf16.gmra.mrb[108].mxu1 %vm2232_vm5, %v2215_v3 }
 0x399   : > { %20543 = vmatprep.mubr.msk.bf16.mxu1 %vm2232_vm5, %v25943_v0  ;;  %v25353_v0 = vld [vmem:[%s30609_s4 + $0x40] sm:$0xff]  }
 0x39a   : > { %20439 = vmatprep.mubr.bf16.mxu0 %v25353_v0 }
 0x3a0   : > { %20544 = vmatmul.mubr.msk.bf16.vlgmr.msra.gmra.mrb[112].mxu1 %vm2232_vm5, %v25939_v53 }
 0x3a1   : > { %20547 = vmatprep.mubr.msk.bf16.mxu1 %vm2232_vm5, %v25963_v22 }
 0x3a8   : > { %20548 = vmatmul.mubr.msk.bf16.gmra.mrb[116].mxu1 %vm2232_vm5, %v25960_v18 }
 0x3a9   : > { %20551 = vmatprep.mubr.msk.bf16.mxu1 %vm2232_vm5, %v2212_v52 }
 0x3b0   : > { %20552 = vmatmul.mubr.msk.bf16.gmra.mrb[120].mxu1 %vm2232_vm5, %v2213_v45 }
 0x3b1   : > { %20555 = vmatprep.mubr.msk.bf16.mxu1 %vm2232_vm5, %v2214_v59  ;;  %v25356_v59 = vld [vmem:[%s30609_s4 + $0x58] sm:$0xff]  }
 0x3b8   : > { %20556 = vmatmul.mubr.msk.bf16.gmra.mrb[124].mxu1 %vm2232_vm5, %v2215_v3 }
 0x413   : > { %v20389_v53 = vpop.f32.mrb[64].mxu1 }
 0x414   : > { %v2291_v6 = vpop.f32.mrb[65].mxu1 }
 0x415   : > { %v20390_v41 = vpop.f32.mrb[66].mxu1 }
 0x416   : > { %v26028_v42 = vpack.c.bf16 %v20390_v41, %v20389_v53  ;;  %v2294_v7 = vpop.f32.mrb[67].mxu1 }
 0x417   : > { %v26030_v8 = vpack.c.bf16 %v2294_v7, %v2291_v6 }
 0x41b   : > { %v20393_v9 = vpop.f32.mrb[68].mxu1 }
 0x41c   : > { %v2307_v10 = vpop.f32.mrb[69].mxu1 }
 0x41d   : > { %v20394_v11 = vpop.f32.mrb[70].mxu1 }
 0x41e   : > { %v26032_v14 = vpack.c.bf16 %v20394_v11, %v20393_v9  ;;  %v2310_v15 = vpop.f32.mrb[71].mxu1  ;;  %v25359_v9 = vld [vmem:[%s30609_s4 + $0x70] sm:$0xff]  }
 0x41f   : > { %v26034_v16 = vpack.c.bf16 %v2310_v15, %v2307_v10 }
 0x423   : > { %v20397_v12 = vpop.f32.mrb[72].mxu1 }
 0x424   : > { %v2323_v17 = vpop.f32.mrb[73].mxu1 }
 0x425   : > { %v20398_v13 = vpop.f32.mrb[74].mxu1 }
 0x426   : > { %v26036_v18 = vpack.c.bf16 %v20398_v13, %v20397_v12  ;;  %v2326_v19 = vpop.f32.mrb[75].mxu1  ;;  %v25361_v13 = vld [vmem:[%s30609_s4] sm:$0xff]  }
 0x427   : > { %v26038_v20 = vpack.c.bf16 %v2326_v19, %v2323_v17 }
 0x42b   : > { %v20401_v21 = vpop.f32.mrb[76].mxu1 }
 0x42c   : > { %v2339_v22 = vpop.f32.mrb[77].mxu1 }
 0x42d   : > { %v20402_v23 = vpop.f32.mrb[78].mxu1 }
 0x42e   : > { %v26040_v24 = vpack.c.bf16 %v20402_v23, %v20401_v21  ;;  %v2342_v25 = vpop.f32.mrb[79].mxu1 }
 0x42f   : > { %v26042_v46 = vpack.c.bf16 %v2342_v25, %v2339_v22 }
 0x433   : > { %v20409_v26 = vpop.f32.mrb[80].mxu1 }
 0x434   : > { %v2429_v47 = vpop.f32.mrb[81].mxu1 }
 0x435   : > { %v20410_v27 = vpop.f32.mrb[82].mxu1 }
 0x436   : > { %v2510_v28 = vpack.c.bf16 %v20410_v27, %v20409_v26  ;;  %v2432_v50 = vpop.f32.mrb[83].mxu1  ;;  %v25363_v26 = vld [vmem:[%s30609_s4 + $0x10] sm:$0xff]  }
 0x437   : > { %v2509_v31 = vpack.c.bf16 %v2432_v50, %v2429_v47  ;;  %v25364_v50 = vld [vmem:[%s30609_s4 + $0x18] sm:$0xff]  }
 0x439   : > { %20423 = vmatprep.subr.bf16.mxu0 %v2509_v31 }
 0x43a   : > { %20424 = vmatpush3.bf16.msra.mxu0 %v2509_v31 }
 0x43b   : > { %v20413_v51 = vpop.f32.mrb[84].mxu1  ;;  %20425 = vmatprep.subr.bf16.mxu0 %v2510_v28 }
 0x43c   : > { %v2445_v32 = vpop.f32.mrb[85].mxu1 }
 0x43d   : > { %v20414_v35 = vpop.f32.mrb[86].mxu1 }
 0x43e   : > { %v2512_v36 = vpack.c.bf16 %v20414_v35, %v20413_v51  ;;  %v2448_v39 = vpop.f32.mrb[87].mxu1  ;;  %20426 = vmatpush3.bf16.msra.mxu0 %v2510_v28  ;;  %v25365_v51 = vld [vmem:[%s30609_s4 + $0x20] sm:$0xff]  }
 0x43f   : > { %v2511_v40 = vpack.c.bf16 %v2448_v39, %v2445_v32 }
 0x441   : > { %20427 = vmatprep.subr.bf16.mxu0 %v2511_v40 }
 0x442   : > { %20428 = vmatpush3.bf16.msra.mxu0 %v2511_v40  ;;  %v25366_v40 = vld [vmem:[%s30609_s4 + $0x28] sm:$0xff]  }
 0x443   : > { %v20417_v29 = vpop.f32.mrb[88].mxu1  ;;  %20429 = vmatprep.subr.bf16.mxu0 %v2512_v36 }
 0x444   : > { %v2461_v43 = vpop.f32.mrb[89].mxu1 }
 0x445   : > { %v20418_v30 = vpop.f32.mrb[90].mxu1 }
 0x446   : > { %v2514_v44 = vpack.c.bf16 %v20418_v30, %v20417_v29  ;;  %v2464_v45 = vpop.f32.mrb[91].mxu1  ;;  %20430 = vmatpush3.bf16.msra.mxu0 %v2512_v36  ;;  %v25367_v30 = vld [vmem:[%s30609_s4 + $0x30] sm:$0xff]  }
 0x447   : > { %v2513_v48 = vpack.c.bf16 %v2464_v45, %v2461_v43 }
 0x449   : > { %20431 = vmatprep.subr.bf16.mxu0 %v2513_v48 }
 0x44a   : > { %20432 = vmatpush3.bf16.msra.mxu0 %v2513_v48 }
 0x44b   : > { %v20421_v33 = vpop.f32.mrb[92].mxu1  ;;  %20433 = vmatprep.subr.bf16.mxu0 %v2514_v44 }
 0x44c   : > { %v2477_v49 = vpop.f32.mrb[93].mxu1 }
 0x44d   : > { %v20422_v52 = vpop.f32.mrb[94].mxu1 }
 0x44e   : > { %v2516_v34 = vpack.c.bf16 %v20422_v52, %v20421_v33  ;;  %v2480_v56 = vpop.f32.mrb[95].mxu1  ;;  %20434 = vmatpush3.bf16.msra.mxu0 %v2514_v44 }
 0x44f   : > { %v2515_v57 = vpack.c.bf16 %v2480_v56, %v2477_v49  ;;  %v25368_v49 = vld [vmem:[%s30609_s4 + $0x38] sm:$0xff]   ;;  %v25369_v56 = vld [vmem:[%s30609_s4 + $0x80] sm:$0xff]  }
 0x451   : > { %20435 = vmatprep.subr.bf16.mxu0 %v2515_v57 }
 0x452   : > { %20436 = vmatpush3.bf16.msra.mxu0 %v2515_v57 }
 0x453   : > { %20437 = vmatprep.subr.bf16.mxu0 %v2516_v34  ;;  %v20493_v60 = vpop.f32.mrb[96].mxu1 }
 0x454   : > { %v2858_v61 = vpop.f32.mrb[97].mxu1 }
 0x455   : > { %v20494_v54 = vpop.f32.mrb[98].mxu1 }
 0x456   : > { %v26047_v55 = vpack.c.bf16 %v20494_v54, %v20493_v60  ;;  %20438 = vmatpush3.bf16.msra.mxu0 %v2516_v34  ;;  %v2861_v58 = vpop.f32.mrb[99].mxu1  ;;  %v25370_v60 = vld [vmem:[%s30609_s4 + $0x88] sm:$0xff]   ;;  %v25372_v54 = vld [vmem:[%s30609_s4 + $0x98] sm:$0xff]  }
 0x457   : > { %v2938_v1 = vpack.c.bf16 %v2861_v58, %v2858_v61  ;;  %20455 = vmatprep.subr.bf16.mxu0 %v26030_v8  ;;  %v25371_v61 = vld [vmem:[%s30609_s4 + $0x90] sm:$0xff]  }
 0x458   : > { %v25375_v58 = vld [vmem:[%s30609_s4 + $0xb0] sm:$0xff]  }
 0x459   : > { %20440 = vmatmul.mubr.bf16.vlgmr.msra.gmra.mrb[32].mxu0 %v25354_v62  ;;  %v25373_v62 = vld [vmem:[%s30609_s4 + $0xa0] sm:$0xff]  }
 0x45a   : > { %20456 = vmatpush3.bf16.msra.mxu0 %v26030_v8  ;;  %20443 = vmatprep.mubr.bf16.mxu0 %v25355_v63  ;;  %v25376_v63 = vld [vmem:[%s30609_s4 + $0xb8] sm:$0xff]  }
 0x45b   : > { %20457 = vmatprep.subr.bf16.mxu0 %v26028_v42  ;;  %v20497_v2 = vpop.f32.mrb[100].mxu1 }
 0x45c   : > { %v2874_v37 = vpop.f32.mrb[101].mxu1 }
 0x45d   : > { %v20498_v3 = vpop.f32.mrb[102].mxu1 }
 0x45e   : > { %v26058_v4 = vpack.c.bf16 %v20498_v3, %v20497_v2  ;;  %20458 = vmatpush3.bf16.msra.mxu0 %v26028_v42  ;;  %v2877_v38 = vpop.f32.mrb[103].mxu1  ;;  %v25358_v42 = vld [vmem:[%s30609_s4 + $0x68] sm:$0xff]   ;;  %v25380_v3 = vld [vmem:[%s30609_s4 + $0xd8] sm:$0xff]  }
 0x45f   : > { %v2940_v0 = vpack.c.bf16 %v2877_v38, %v2874_v37  ;;  %20459 = vmatprep.subr.bf16.mxu0 %v26034_v16  ;;  %v25378_v2 = vld [vmem:[%s30609_s4 + $0xc8] sm:$0xff]   ;;  %v25379_v37 = vld [vmem:[%s30609_s4 + $0xd0] sm:$0xff]  }
 0x460   : > { %v25383_v38 = vld [vmem:[%s30609_s4 + $0xf0] sm:$0xff]  }
 0x461   : > { %20444 = vmatmul.mubr.bf16.gmra.mrb[36].mxu0 %v25356_v59  ;;  %v25381_v59 = vld [vmem:[%s30609_s4 + $0xe0] sm:$0xff]  }
 0x462   : > { %20460 = vmatpush3.bf16.msra.mxu0 %v26034_v16  ;;  %20447 = vmatprep.mubr.bf16.mxu0 %v25357_v5  ;;  %v25384_v5 = vld [vmem:[%s30609_s4 + $0xf8] sm:$0xff]  }
 0x463   : > { %20461 = vmatprep.subr.bf16.mxu0 %v26032_v14  ;;  %v20501_v53 = vpop.f32.mrb[104].mxu1 }
 0x464   : > { %v2890_v6 = vpop.f32.mrb[105].mxu1 }
 0x465   : > { %v20502_v41 = vpop.f32.mrb[106].mxu1 }
 0x466   : > { %v26070_v7 = vpack.c.bf16 %v20502_v41, %v20501_v53  ;;  %20462 = vmatpush3.bf16.msra.mxu0 %v26032_v14  ;;  %v2893_v8 = vpop.f32.mrb[107].mxu1  ;;  %v25360_v14 = vld [vmem:[%s30609_s4 + $0x78] sm:$0xff]   ;;  %v30302_v53 = vmov 0.0  }
 0x467   : > { %v2942_v10 = vpack.c.bf16 %v2893_v8, %v2890_v6  ;;  %20463 = vmatprep.subr.bf16.mxu0 %v26038_v20  ;;  %20623 = vmatprep.mubr.msk.f32.mxu1 %vm25477_vm2, %v30302_v53  ;;  %v3409_v6 = vld [vmem:[%s30610_s8] sm:$0xff]  ;;  %s30718_s8 = sld [smem:[#allocation56_spill]] }
 0x468   : > { %v26178_v41 = vand.u32 4294901760, %v3409_v6 }
 0x469   : > { %20448 = vmatmul.mubr.bf16.gmra.mrb[40].mxu0 %v25358_v42 }
 0x46a   : > { %20464 = vmatpush3.bf16.msra.mxu0 %v26038_v20  ;;  %20451 = vmatprep.mubr.bf16.mxu0 %v25359_v9  ;;  %30611 = vst [vmem:[#allocation3_spill] sm:$0xff] %v26178_v41  ;;  %v26181_v42 = vsub.f32 %v3409_v6, %v26178_v41 }
 0x46b   : > { %20465 = vmatprep.subr.bf16.mxu0 %v26036_v18  ;;  %v20505_v11 = vpop.f32.mrb[108].mxu1 }
 0x46c   : > { %v2906_v15 = vpop.f32.mrb[109].mxu1  ;;  %30612 = vst [vmem:[#allocation4_spill] sm:$0xff] %v26181_v42 }
 0x46d   : > { %v20506_v16 = vpop.f32.mrb[110].mxu1 }
 0x46e   : > { %v26082_v12 = vpack.c.bf16 %v20506_v16, %v20505_v11  ;;  %20466 = vmatpush3.bf16.msra.mxu0 %v26036_v18  ;;  %v2909_v17 = vpop.f32.mrb[111].mxu1  ;;  %v25362_v18 = vld [vmem:[%s30609_s4 + $0x8] sm:$0xff]  }
 0x46f   : > { %v2944_v19 = vpack.c.bf16 %v2909_v17, %v2906_v15  ;;  %20467 = vmatprep.subr.bf16.mxu0 %v26042_v46 }
 0x471   : > { %20452 = vmatmul.mubr.bf16.gmra.mrb[44].mxu0 %v25360_v14 }
 0x472   : > { %20468 = vmatpush3.bf16.msra.mxu0 %v26042_v46  ;;  %20471 = vmatprep.mubr.bf16.mxu0 %v25361_v13 }
 0x473   : > { %20469 = vmatprep.subr.bf16.mxu0 %v26040_v24  ;;  %v20545_v20 = vpop.f32.mrb[112].mxu1 }
 0x474   : > { %v3158_v21 = vpop.f32.mrb[113].mxu1 }
 0x475   : > { %v20546_v22 = vpop.f32.mrb[114].mxu1 }
 0x476   : > { %v3239_v23 = vpack.c.bf16 %v20546_v22, %v20545_v20  ;;  %20470 = vmatpush3.bf16.msra.mxu0 %v26040_v24  ;;  %v3161_v25 = vpop.f32.mrb[115].mxu1 }
 0x477   : > { %v3238_v47 = vpack.c.bf16 %v3161_v25, %v3158_v21  ;;  %20507 = vmatprep.subr.bf16.mxu0 %v2938_v1 }
 0x479   : > { %20472 = vmatmul.mubr.bf16.vlgmr.msra.gmra.mrb[32].mxu0 %v25362_v18 }
 0x47a   : > { %20508 = vmatpush3.bf16.msra.mxu0 %v2938_v1  ;;  %20475 = vmatprep.mubr.bf16.mxu0 %v25363_v26  ;;  %v25377_v1 = vld [vmem:[%s30609_s4 + $0xc0] sm:$0xff]  }
 0x47b   : > { %20509 = vmatprep.subr.bf16.mxu0 %v26047_v55  ;;  %v20549_v46 = vpop.f32.mrb[116].mxu1 }
 0x47c   : > { %v3174_v27 = vpop.f32.mrb[117].mxu1 }
 0x47d   : > { %v20550_v28 = vpop.f32.mrb[118].mxu1 }
 0x47e   : > { %v3241_v24 = vpack.c.bf16 %v20550_v28, %v20549_v46  ;;  %20510 = vmatpush3.bf16.msra.mxu0 %v26047_v55  ;;  %v3177_v31 = vpop.f32.mrb[119].mxu1  ;;  %v25374_v55 = vld [vmem:[%s30609_s4 + $0xa8] sm:$0xff]  }
 0x47f   : > { %v3240_v32 = vpack.c.bf16 %v3177_v31, %v3174_v27  ;;  %20511 = vmatprep.subr.bf16.mxu0 %v2940_v0 }
 0x481   : > { %20476 = vmatmul.mubr.bf16.gmra.mrb[36].mxu0 %v25364_v50 }
 0x482   : > { %20512 = vmatpush3.bf16.msra.mxu0 %v2940_v0  ;;  %20479 = vmatprep.mubr.bf16.mxu0 %v25365_v51  ;;  %v30304_v0 = vmov 0.0|0.0  }
 0x483   : > { %20513 = vmatprep.subr.bf16.mxu0 %v26058_v4  ;;  %v20553_v35 = vpop.f32.mrb[120].mxu1  ;;  %23319 = vmatprep.subr.bf16.mxu1 %v30304_v0 }
 0x484   : > { %v3190_v36 = vpop.f32.mrb[121].mxu1 }
 0x485   : > { %v20554_v39 = vpop.f32.mrb[122].mxu1 }
 0x486   : > { %v3243_v29 = vpack.c.bf16 %v20554_v39, %v20553_v35  ;;  %20514 = vmatpush3.bf16.msra.mxu0 %v26058_v4  ;;  %v3193_v43 = vpop.f32.mrb[123].mxu1  ;;  %v25382_v4 = vld [vmem:[%s30609_s4 + $0xe8] sm:$0xff]  }
 0x487   : > { %v3242_v44 = vpack.c.bf16 %v3193_v43, %v3190_v36  ;;  %20515 = vmatprep.subr.bf16.mxu0 %v2942_v10 }
 0x489   : > { %20480 = vmatmul.mubr.bf16.gmra.mrb[40].mxu0 %v25366_v40 }
 0x48a   : > { %20516 = vmatpush3.bf16.msra.mxu0 %v2942_v10  ;;  %20483 = vmatprep.mubr.bf16.mxu0 %v25367_v30 }
 0x48b   : > { %20517 = vmatprep.subr.bf16.mxu0 %v26070_v7  ;;  %v20557_v45 = vpop.f32.mrb[124].mxu1 }
 0x48c   : > { %v3206_v48 = vpop.f32.mrb[125].mxu1 }
 0x48d   : > { %v20558_v33 = vpop.f32.mrb[126].mxu1 }
 0x48e   : > { %v3245_v52 = vpack.c.bf16 %v20558_v33, %v20557_v45  ;;  %20518 = vmatpush3.bf16.msra.mxu0 %v26070_v7  ;;  %v3209_v34 = vpop.f32.mrb[127].mxu1  ;;  %v26184_v7 = vand.u32 4294901760, %v26181_v42 }
 0x48f   : > { %v3244_v57 = vpack.c.bf16 %v3209_v34, %v3206_v48  ;;  %20519 = vmatprep.subr.bf16.mxu0 %v2944_v19 }
 0x490   : > { %30613 = vst [vmem:[#allocation5_spill] sm:$0xff] %v26184_v7  ;;  %v3510_v8 = vsub.f32 %v26181_v42, %v26184_v7 }
 0x491   : > { %20484 = vmatmul.mubr.bf16.gmra.mrb[44].mxu0 %v25368_v49 }
 0x492   : > { %20520 = vmatpush3.bf16.msra.mxu0 %v2944_v19  ;;  %20523 = vmatprep.mubr.bf16.mxu0 %v25369_v56  ;;  %v26200_v17 = vand.u32 4294901760, %v3510_v8 }
 0x493   : > { %20521 = vmatprep.subr.bf16.mxu0 %v26082_v12 }
 0x496   : > { %20522 = vmatpush3.bf16.msra.mxu0 %v26082_v12 }
 0x497   : > { %20559 = vmatprep.subr.bf16.mxu0 %v3238_v47 }
 0x499   : > { %20524 = vmatmul.mubr.bf16.vlgmr.msra.gmra.mrb[32].mxu0 %v25370_v60 }
 0x49a   : > { %20560 = vmatpush3.bf16.msra.mxu0 %v3238_v47  ;;  %20527 = vmatprep.mubr.bf16.mxu0 %v25371_v61 }
 0x49b   : > { %20561 = vmatprep.subr.bf16.mxu0 %v3239_v23 }
 0x49e   : > { %20562 = vmatpush3.bf16.msra.mxu0 %v3239_v23 }
 0x49f   : > { %20563 = vmatprep.subr.bf16.mxu0 %v3240_v32 }
 0x4a1   : > { %20528 = vmatmul.mubr.bf16.gmra.mrb[36].mxu0 %v25372_v54 }
 0x4a2   : > { %20564 = vmatpush3.bf16.msra.mxu0 %v3240_v32  ;;  %20531 = vmatprep.mubr.bf16.mxu0 %v25373_v62 }
 0x4a3   : > { %20565 = vmatprep.subr.bf16.mxu0 %v3241_v24 }
 0x4a6   : > { %20566 = vmatpush3.bf16.msra.mxu0 %v3241_v24 }
 0x4a7   : > { %20567 = vmatprep.subr.bf16.mxu0 %v3242_v44 }
 0x4a9   : > { %20532 = vmatmul.mubr.bf16.gmra.mrb[40].mxu0 %v25374_v55 }
 0x4aa   : > { %20568 = vmatpush3.bf16.msra.mxu0 %v3242_v44  ;;  %20535 = vmatprep.mubr.bf16.mxu0 %v25375_v58 }
 0x4ab   : > { %20569 = vmatprep.subr.bf16.mxu0 %v3243_v29 }
 0x4ae   : > { %20570 = vmatpush3.bf16.msra.mxu0 %v3243_v29 }
 0x4af   : > { %20571 = vmatprep.subr.bf16.mxu0 %v3244_v57 }
 0x4b1   : > { %20536 = vmatmul.mubr.bf16.gmra.mrb[44].mxu0 %v25376_v63 }
 0x4b2   : > { %20572 = vmatpush3.bf16.msra.mxu0 %v3244_v57  ;;  %20575 = vmatprep.mubr.bf16.mxu0 %v25377_v1 }
 0x4b3   : > { %20573 = vmatprep.subr.bf16.mxu0 %v3245_v52 }
 0x4b6   : > { %20574 = vmatpush3.bf16.msra.mxu0 %v3245_v52 }
 0x4b7   : > { %23463 = vmatprep.subr.bf16.mxu0 %v30304_v0 }
 0x4b9   : > { %20576 = vmatmul.mubr.bf16.vlgmr.msra.gmra.mrb[32].mxu0 %v25378_v2 }
 0x4ba   : > { %20579 = vmatprep.mubr.bf16.mxu0 %v25379_v37 }
 0x4c1   : > { %20580 = vmatmul.mubr.bf16.gmra.mrb[36].mxu0 %v25380_v3 }
 0x4c2   : > { %20583 = vmatprep.mubr.bf16.mxu0 %v25381_v59 }
 0x4c9   : > { %20584 = vmatmul.mubr.bf16.gmra.mrb[40].mxu0 %v25382_v4 }
 0x4ca   : > { %20587 = vmatprep.mubr.bf16.mxu0 %v25383_v38 }
 0x4d1   : > { %20588 = vmatmul.mubr.bf16.gmra.mrb[44].mxu0 %v25384_v5 }
 0x4d2   : > { %20833 = vmatprep.mubr.msk.f32.mxu0 %vm25477_vm2, %v30302_v53 }
 0x58c   : > { %v26188_v9 = vpop.f32.mrb[32].mxu0 }
 0x58d   : > { %30614 = vst [vmem:[#allocation6_spill] sm:$0xff] %v26188_v9  ;;  %v3433_v10 = vand.u32 4294901760, %v26188_v9  ;;  %v4069_v11 = vmul.f32 %v26188_v9, %v26188_v9  ;;  %v26193_v15 = vpop.f32.mrb[33].mxu0 }
 0x58e   : > { %30615 = vst [vmem:[#allocation7_spill] sm:$0xff] %v26193_v15  ;;  %v3427_v16 = vand.u32 4294901760, %v26193_v15  ;;  %v4067_v14 = vmul.f32 %v26193_v15, %v26193_v15  ;;  %v26198_v12 = vpop.f32.mrb[34].mxu0 }
 0x58f   : > { %30616 = vst [vmem:[#allocation8_spill] sm:$0xff] %v26198_v12  ;;  %v26203_v13 = vsub.f32 %v26188_v9, %v3433_v10  ;;  %v4090_v19 = vand.u32 4294901760, %v4069_v11  ;;  %v3436_v20 = vand.u32 4294901760, %v26198_v12  ;;  %v4070_v21 = vmul.f32 %v26198_v12, %v26198_v12  ;;  %v26208_v22 = vpop.f32.mrb[35].mxu0 }
 0x590   : > { %30617 = vst [vmem:[#allocation9_spill] sm:$0xff] %v26208_v22  ;;  %v26211_v18 = vsub.f32 %v26193_v15, %v3427_v16  ;;  %v4084_v23 = vand.u32 4294901760, %v4067_v14  ;;  %v3430_v25 = vand.u32 4294901760, %v26208_v22  ;;  %v4068_v26 = vmul.f32 %v26208_v22, %v26208_v22 }
 0x591   : > { %v26217_v46 = vsub.f32 %v4069_v11, %v4090_v19  ;;  %v26220_v27 = vsub.f32 %v26198_v12, %v3436_v20  ;;  %v4093_v28 = vand.u32 4294901760, %v4070_v21  ;;  %v26233_v39 = vpack.c.bf16 %v3436_v20, %v3433_v10 }
 0x592   : > { %v30301_v50 = vand.u32 4294901760, %v26211_v18  ;;  %v26223_v24 = vsub.f32 %v4067_v14, %v4084_v23  ;;  %v26226_v31 = vsub.f32 %v26208_v22, %v3430_v25  ;;  %v4087_v51 = vand.u32 4294901760, %v4068_v26 }
 0x593   : > { %v26229_v35 = vsub.f32 %v4070_v21, %v4093_v28  ;;  %v26231_v36 = vpack.c.bf16 %v3430_v25, %v3427_v16  ;;  %30619 = vst [vmem:[#allocation11_spill] sm:$0xff] %v26233_v39  ;;  %v26242_v44 = vpack.c.bf16 %v4093_v28, %v4090_v19 }
 0x594   : > { %v30299_v40 = vand.u32 4294901760, %v26226_v31  ;;  %v26236_v29 = vsub.f32 %v4068_v26, %v4087_v51  ;;  %v26238_v43 = vpop.f32.mrb[36].mxu0  ;;  %v26240_v30 = vpack.c.bf16 %v4087_v51, %v4084_v23  ;;  %v26253_v49 = vsub.f32 %v26211_v18, %v30301_v50 }
 0x595   : > { %30618 = vst [vmem:[#allocation10_spill] sm:$0xff] %v26231_v36  ;;  %30620 = vst [vmem:[#allocation12_spill] sm:$0xff] %v26238_v43  ;;  %v3445_v45 = vand.u32 4294901760, %v26238_v43  ;;  %v4073_v48 = vmul.f32 %v26238_v43, %v26238_v43  ;;  %23321 = vmatpush3.bf16.msra.mxu1 %v26231_v36  ;;  %v26248_v33 = vpop.f32.mrb[37].mxu0  ;;  %v30298_v52 = vand.u32 4294901760, %v26223_v24  ;;  %v30665_v36 = vand.u32 4294901760, %v26226_v31 }
 0x596   : > { %30621 = vst [vmem:[#allocation13_spill] sm:$0xff] %v26240_v30  ;;  %30622 = vst [vmem:[#allocation14_spill] sm:$0xff] %v26242_v44  ;;  %v3439_v34 = vand.u32 4294901760, %v26248_v33  ;;  %v4071_v56 = vmul.f32 %v26248_v33, %v26248_v33  ;;  %v26259_v57 = vpop.f32.mrb[38].mxu0  ;;  %23465 = vmatpush3.bf16.msra.mxu0 %v26240_v30  ;;  %23322 = vmatprep.subr.bf16.mxu1 %v30304_v0  ;;  %v26266_v60 = vsub.f32 %v26226_v31, %v30299_v40 }
 0x597   : > { %30623 = vst [vmem:[#allocation15_spill] sm:$0xff] %v26248_v33  ;;  %30624 = vst [vmem:[#allocation16_spill] sm:$0xff] %v26259_v57  ;;  %v30300_v61 = vand.u32 4294901760, %v26236_v29  ;;  %v26270_v54 = vsub.f32 %v26238_v43, %v3445_v45  ;;  %v4102_v62 = vand.u32 4294901760, %v4073_v48  ;;  %v3448_v55 = vand.u32 4294901760, %v26259_v57  ;;  %v26275_v63 = vpop.f32.mrb[39].mxu0  ;;  %23466 = vmatprep.subr.bf16.mxu0 %v30304_v0 }
 0x598   : > { %v4074_v58 = vmul.f32 %v26259_v57, %v26259_v57  ;;  %30625 = vst [vmem:[#allocation17_spill] sm:$0xff] %v26275_v63  ;;  %v26279_v1 = vsub.f32 %v26248_v33, %v3439_v34  ;;  %v4096_v2 = vand.u32 4294901760, %v4071_v56  ;;  %v3442_v37 = vand.u32 4294901760, %v26275_v63 }
 0x599   : > { %v4072_v3 = vmul.f32 %v26275_v63, %v26275_v63  ;;  %v26285_v4 = vsub.f32 %v4073_v48, %v4102_v62  ;;  %v26288_v38 = vsub.f32 %v26259_v57, %v3448_v55  ;;  %23324 = vmatpush3.bf16.msra.mxu1 %v26233_v39  ;;  %v26305_v20 = vpack.c.bf16 %v3448_v55, %v3445_v45 }
 0x59a   : > { %v4105_v5 = vand.u32 4294901760, %v4074_v58  ;;  %v26292_v8 = vsub.f32 %v4071_v56, %v4096_v2  ;;  %v26295_v10 = vsub.f32 %v26275_v63, %v3442_v37  ;;  %23468 = vmatpush3.bf16.msra.mxu0 %v26242_v44  ;;  %23325 = vmatprep.subr.bf16.mxu1 %v30304_v0  ;;  %v26302_v19 = vpack.c.bf16 %v3442_v37, %v3439_v34 }
 0x59b   : > { %v4099_v11 = vand.u32 4294901760, %v4072_v3  ;;  %23469 = vmatprep.subr.bf16.mxu0 %v30304_v0  ;;  %30627 = vst [vmem:[#allocation19_spill] sm:$0xff] %v26305_v20  ;;  %v3522_v45 = vand.u32 4294901760, %v26253_v49  ;;  %v3529_v56 = vand.u32 4294901760, %v26266_v60  ;;  %v26339_v49 = vsub.f32 %v26236_v29, %v30300_v61 }
 0x59c   : > { %v26300_v14 = vsub.f32 %v4074_v58, %v4105_v5  ;;  %30626 = vst [vmem:[#allocation18_spill] sm:$0xff] %v26302_v19  ;;  %v26310_v25 = vpop.f32.mrb[40].mxu0  ;;  %v26314_v28 = vpack.c.bf16 %v4105_v5, %v4102_v62  ;;  %v23371_v44 = vpack.c.bf16 %v26220_v27, %v26203_v13  ;;  %v30664_v30 = vand.u32 4294901760, %v26211_v18 }
 0x59d   : > { %v26308_v23 = vsub.f32 %v4072_v3, %v4099_v11  ;;  %30628 = vst [vmem:[#allocation20_spill] sm:$0xff] %v26310_v25  ;;  %v26312_v26 = vpack.c.bf16 %v4099_v11, %v4096_v2  ;;  %v3457_v51 = vand.u32 4294901760, %v26310_v25  ;;  %v4077_v48 = vmul.f32 %v26310_v25, %v26310_v25  ;;  %23327 = vmatpush3.bf16.msra.mxu1 %v26302_v19  ;;  %v26320_v34 = vpop.f32.mrb[41].mxu0 }
 0x59e   : > { %30630 = vst [vmem:[#allocation22_spill] sm:$0xff] %v26314_v28  ;;  %30631 = vst [vmem:[#allocation23_spill] sm:$0xff] %v26320_v34  ;;  %v3451_v55 = vand.u32 4294901760, %v26320_v34  ;;  %v4075_v58 = vmul.f32 %v26320_v34, %v26320_v34  ;;  %v26327_v62 = vpop.f32.mrb[42].mxu0  ;;  %23328 = vmatprep.subr.bf16.mxu1 %v30304_v0  ;;  %v26334_v2 = vsub.f32 %v26223_v24, %v30298_v52  ;;  %v30666_v42 = vand.u32 4294901760, %v26223_v24 }
 0x59f   : > { %30629 = vst [vmem:[#allocation21_spill] sm:$0xff] %v26312_v26  ;;  %30632 = vst [vmem:[#allocation24_spill] sm:$0xff] %v26327_v62  ;;  %23471 = vmatpush3.bf16.msra.mxu0 %v26312_v26  ;;  %v26342_v60 = vsub.f32 %v26310_v25, %v3457_v51  ;;  %v4114_v37 = vand.u32 4294901760, %v4077_v48  ;;  %v3460_v3 = vand.u32 4294901760, %v26327_v62  ;;  %v4078_v5 = vmul.f32 %v26327_v62, %v26327_v62  ;;  %v26347_v11 = vpop.f32.mrb[43].mxu0 }
 0x5a0   : > { %30633 = vst [vmem:[#allocation25_spill] sm:$0xff] %v26347_v11  ;;  %23472 = vmatprep.subr.bf16.mxu0 %v30304_v0  ;;  %v26351_v52 = vsub.f32 %v26320_v34, %v3451_v55  ;;  %v4108_v40 = vand.u32 4294901760, %v4075_v58  ;;  %v3454_v61 = vand.u32 4294901760, %v26347_v11  ;;  %v4076_v50 = vmul.f32 %v26347_v11, %v26347_v11 }
 0x5a1   : > { %v26357_v16 = vsub.f32 %v4077_v48, %v4114_v37  ;;  %v26360_v59 = vsub.f32 %v26327_v62, %v3460_v3  ;;  %v4117_v21 = vand.u32 4294901760, %v4078_v5  ;;  %23330 = vmatpush3.bf16.msra.mxu1 %v26305_v20  ;;  %v30634_v25 = vmov 0.0|0.0  }
 0x5a2   : > { %v26364_v32 = vsub.f32 %v4075_v58, %v4108_v40  ;;  %v26367_v47 = vsub.f32 %v26347_v11, %v3454_v61  ;;  %v4111_v0 = vand.u32 4294901760, %v4076_v50  ;;  %23331 = vmatprep.subr.bf16.mxu1 %v30634_v25  ;;  %v26374_v62 = vpack.c.bf16 %v3454_v61, %v3451_v55 }
 0x5a3   : > { %23474 = vmatpush3.bf16.msra.mxu0 %v26314_v28  ;;  %v26372_v53 = vsub.f32 %v4078_v5, %v4117_v21  ;;  %v26377_v34 = vpack.c.bf16 %v3460_v3, %v3457_v51  ;;  %v26386_v57 = vpack.c.bf16 %v4117_v21, %v4114_v37  ;;  %v26394_v51 = vpack.c.bf16 %v3529_v56, %v3522_v45 }
 0x5a4   : > { %30635 = vst [vmem:[#allocation26_spill] sm:$0xff] %v26374_v62  ;;  %23475 = vmatprep.subr.bf16.mxu0 %v30634_v25  ;;  %v26380_v6 = vsub.f32 %v4076_v50, %v4111_v0  ;;  %v26382_v11 = vpop.f32.mrb[44].mxu0  ;;  %v26384_v43 = vpack.c.bf16 %v4111_v0, %v4108_v40  ;;  %v4179_v50 = vand.u32 4294901760, %v26334_v2  ;;  %v4186_v21 = vand.u32 4294901760, %v26339_v49 }
 0x5a5   : > { %30636 = vst [vmem:[#allocation27_spill] sm:$0xff] %v26377_v34  ;;  %30637 = vst [vmem:[#allocation28_spill] sm:$0xff] %v26382_v11  ;;  %v3469_v48 = vand.u32 4294901760, %v26382_v11  ;;  %v4081_v61 = vmul.f32 %v26382_v11, %v26382_v11  ;;  %23333 = vmatpush3.bf16.msra.mxu1 %v26374_v62  ;;  %v26392_v55 = vpop.f32.mrb[45].mxu0  ;;  %v30642_v37 = vand.u32 4294901760, %v26203_v13 }
 0x5a6   : > { %30638 = vst [vmem:[#allocation29_spill] sm:$0xff] %v26384_v43  ;;  %30639 = vst [vmem:[#allocation30_spill] sm:$0xff] %v26386_v57  ;;  %v3463_v3 = vand.u32 4294901760, %v26392_v55  ;;  %v4079_v0 = vmul.f32 %v26392_v55, %v26392_v55  ;;  %v26400_v40 = vpop.f32.mrb[46].mxu0  ;;  %23334 = vmatprep.subr.bf16.mxu1 %v30634_v25 }
 0x5a7   : > { %30640 = vst [vmem:[#allocation31_spill] sm:$0xff] %v26392_v55  ;;  %30641 = vst [vmem:[#allocation32_spill] sm:$0xff] %v26400_v40  ;;  %23477 = vmatpush3.bf16.msra.mxu0 %v26384_v43  ;;  %v3535_v45 = vsub.f32 %v26203_v13, %v30642_v37  ;;  %v26409_v56 = vsub.f32 %v26382_v11, %v3469_v48  ;;  %v4126_v2 = vand.u32 4294901760, %v4081_v61  ;;  %v3472_v5 = vand.u32 4294901760, %v26400_v40  ;;  %v26414_v33 = vpop.f32.mrb[47].mxu0 }
 0x5a8   : > { %v4082_v58 = vmul.f32 %v26400_v40, %v26400_v40  ;;  %30643 = vst [vmem:[#allocation33_spill] sm:$0xff] %v26414_v33  ;;  %23478 = vmatprep.subr.bf16.mxu0 %v30634_v25  ;;  %v26418_v63 = vsub.f32 %v26392_v55, %v3463_v3  ;;  %v4120_v49 = vand.u32 4294901760, %v4079_v0  ;;  %v3466_v9 = vand.u32 4294901760, %v26414_v33 }
 0x5a9   : > { %v4080_v37 = vmul.f32 %v26414_v33, %v26414_v33  ;;  %v26424_v12 = vsub.f32 %v4081_v61, %v4126_v2  ;;  %v26427_v15 = vsub.f32 %v26400_v40, %v3472_v5  ;;  %23336 = vmatpush3.bf16.msra.mxu1 %v26377_v34  ;;  %v26444_v34 = vpack.c.bf16 %v3472_v5, %v3469_v48 }
 0x5aa   : > { %v4129_v22 = vand.u32 4294901760, %v4082_v58  ;;  %v26431_v55 = vsub.f32 %v4079_v0, %v4120_v49  ;;  %v26434_v43 = vsub.f32 %v26414_v33, %v3466_v9  ;;  %23337 = vmatprep.subr.bf16.mxu1 %v30634_v25  ;;  %v26441_v40 = vpack.c.bf16 %v3466_v9, %v3463_v3 }
 0x5ab   : > { %30644 = vst [vmem:[#allocation34_spill] sm:$0xff] %v26427_v15  ;;  %v4123_v62 = vand.u32 4294901760, %v4080_v37  ;;  %23480 = vmatpush3.bf16.msra.mxu0 %v26386_v57  ;;  %30646 = vst [vmem:[#allocation36_spill] sm:$0xff] %v26444_v34  ;;  %v23488_v57 = vpack.c.bf16 %v4186_v21, %v4179_v50  ;;  %v3536_v61 = vand.u32 4294901760, %v3535_v45  ;;  %v30336_v3 = vand.u32 4294901760, %v26217_v46 }
 0x5ac   : > { %v26439_v11 = vsub.f32 %v4082_v58, %v4129_v22  ;;  %30645 = vst [vmem:[#allocation35_spill] sm:$0xff] %v26441_v40  ;;  %23481 = vmatprep.subr.bf16.mxu0 %v30634_v25  ;;  %v26451_v28 = vpack.c.bf16 %v4129_v22, %v4126_v2  ;;  %v30649_v58 = vand.u32 4294901760, %v26220_v27  ;;  %v30341_v48 = vand.u32 4294901760, %v26229_v35 }
 0x5ad   : > { %v26447_v7 = vsub.f32 %v4080_v37, %v4123_v62  ;;  %v26449_v33 = vpack.c.bf16 %v4123_v62, %v4120_v49  ;;  %23339 = vmatpush3.bf16.msra.mxu1 %v26441_v40  ;;  %v30650_v62 = vand.u32 4294901760, %v26279_v1  ;;  %v30651_v2 = vand.u32 4294901760, %v26295_v10 }
 0x5ae   : > { %30648 = vst [vmem:[#allocation38_spill] sm:$0xff] %v26451_v28  ;;  %v3542_v9 = vsub.f32 %v26220_v27, %v30649_v58  ;;  %23340 = vmatprep.subr.bf16.mxu1 %v30634_v25  ;;  %v30342_v21 = vand.u32 4294901760, %v26292_v8  ;;  %v4192_v5 = vsub.f32 %v26217_v46, %v30336_v3  ;;  %v30343_v49 = vand.u32 4294901760, %v26308_v23 }
 0x5af   : > { %30647 = vst [vmem:[#allocation37_spill] sm:$0xff] %v26449_v33  ;;  %23483 = vmatpush3.bf16.msra.mxu0 %v26449_v33  ;;  %v3549_v22 = vsub.f32 %v26279_v1, %v30650_v62  ;;  %v3556_v50 = vsub.f32 %v26295_v10, %v30651_v2  ;;  %v30652_v37 = vand.u32 4294901760, %v26270_v54  ;;  %v4199_v62 = vsub.f32 %v26229_v35, %v30341_v48 }
 0x5b0   : > { %23484 = vmatprep.subr.bf16.mxu0 %v30634_v25  ;;  %v3543_v45 = vand.u32 4294901760, %v3542_v9  ;;  %v4206_v9 = vsub.f32 %v26292_v8, %v30342_v21  ;;  %v4193_v3 = vand.u32 4294901760, %v4192_v5  ;;  %v4213_v40 = vsub.f32 %v26308_v23, %v30343_v49 }
 0x5b1   : > { %v3563_v58 = vsub.f32 %v26270_v54, %v30652_v37  ;;  %v3550_v2 = vand.u32 4294901760, %v3549_v22  ;;  %v3557_v0 = vand.u32 4294901760, %v3556_v50  ;;  %23342 = vmatpush3.bf16.msra.mxu1 %v26444_v34  ;;  %v4200_v37 = vand.u32 4294901760, %v4199_v62 }
 0x5b2   : > { %v23347_v33 = vpack.c.bf16 %v3543_v45, %v3536_v61  ;;  %23343 = vmatprep.subr.bf16.mxu1 %v30634_v25  ;;  %v4207_v50 = vand.u32 4294901760, %v4206_v9  ;;  %v30653_v48 = vand.u32 4294901760, %v26288_v38  ;;  %v4214_v61 = vand.u32 4294901760, %v4213_v40 }
 0x5b3   : > { %v3564_v20 = vand.u32 4294901760, %v3563_v58  ;;  %23486 = vmatpush3.bf16.msra.mxu0 %v26451_v28  ;;  %v23350_v22 = vpack.c.bf16 %v3557_v0, %v3550_v2  ;;  %v30344_v45 = vand.u32 4294901760, %v26285_v4  ;;  %v30654_v58 = vand.u32 4294901760, %v26351_v52 }
 0x5b4   : > { %v3570_v21 = vsub.f32 %v26288_v38, %v30653_v48  ;;  %23487 = vmatprep.subr.bf16.mxu0 %v30634_v25  ;;  %20624 = vmatmul.mubr.f32.vlgmr.msra.gmra.mrb[128].mxu1 %v26200_v17  ;;  %v23491_v62 = vpack.c.bf16 %v4200_v37, %v4193_v3  ;;  %v30655_v2 = vand.u32 4294901760, %v26367_v47  ;;  %v30345_v48 = vand.u32 4294901760, %v26364_v32 }
 0x5b5   : > { %v3577_v49 = vsub.f32 %v26351_v52, %v30654_v58  ;;  %23345 = vmatpush3.bf16.msra.mxu1 %v26394_v51  ;;  %v23494_v40 = vpack.c.bf16 %v4214_v61, %v4207_v50  ;;  %v4220_v5 = vsub.f32 %v26285_v4, %v30344_v45  ;;  %v30656_v58 = vand.u32 4294901760, %v26300_v14 }
 0x5b6   : > { %v3571_v0 = vand.u32 4294901760, %v3570_v21  ;;  %v3584_v9 = vsub.f32 %v26367_v47, %v30655_v2  ;;  %20834 = vmatmul.mubr.f32.vlgmr.msra.gmra.mrb[48].mxu0 %v26200_v17  ;;  %23346 = vmatprep.subr.bf16.mxu1 %v30634_v25  ;;  %v4234_v51 = vsub.f32 %v26364_v32, %v30345_v48  ;;  %v30348_v17 = vand.u32 4294901760, %v26380_v6 }
 0x5b7   : > { %v4227_v3 = vsub.f32 %v26300_v14, %v30656_v58  ;;  %v3578_v21 = vand.u32 4294901760, %v3577_v49  ;;  %23489 = vmatpush3.bf16.msra.mxu0 %v23488_v57  ;;  %v4221_v50 = vand.u32 4294901760, %v4220_v5  ;;  %v30657_v45 = vand.u32 4294901760, %v26342_v60 }
 0x5b8   : > { %v23353_v37 = vpack.c.bf16 %v3571_v0, %v3564_v20  ;;  %v3585_v2 = vand.u32 4294901760, %v3584_v9  ;;  %23490 = vmatprep.subr.bf16.mxu0 %v30634_v25  ;;  %v30658_v57 = vand.u32 4294901760, %v26360_v59  ;;  %v30659_v20 = vmov 0.0  }
 0x5b9   : > { %v4228_v61 = vand.u32 4294901760, %v4227_v3  ;;  %v3591_v58 = vsub.f32 %v26342_v60, %v30657_v45  ;;  %20658 = vmatprep.mubr.msk.f32.mxu1 %vm25477_vm2, %v30659_v20  ;;  %v4235_v9 = vand.u32 4294901760, %v4234_v51  ;;  %v4241_v48 = vsub.f32 %v26380_v6, %v30348_v17  ;;  %20868 = vmatprep.mubr.msk.f32.mxu0 %vm25477_vm2, %v30659_v20 }
 0x5ba   : > { %v3598_v49 = vsub.f32 %v26360_v59, %v30658_v57  ;;  %v26524_v0 = vpack.c.bf16 %v3585_v2, %v3578_v21  ;;  %v30351_v5 = vand.u32 4294901760, %v26357_v16  ;;  %23348 = vmatpush3.bf16.msra.mxu1 %v23347_v33  ;;  %v30354_v57 = vand.u32 4294901760, %v26372_v53 }
 0x5bb   : > { %v23497_v45 = vpack.c.bf16 %v4228_v61, %v4221_v50  ;;  %v3592_v3 = vand.u32 4294901760, %v3591_v58  ;;  %23492 = vmatpush3.bf16.msra.mxu0 %v23491_v62  ;;  %23349 = vmatprep.subr.bf16.mxu1 %v30634_v25  ;;  %v4242_v21 = vand.u32 4294901760, %v4241_v48  ;;  %v30660_v51 = vand.u32 4294901760, %v26418_v63 }
 0x5bc   : > { %v3599_v28 = vand.u32 4294901760, %v3598_v49  ;;  %v4248_v2 = vsub.f32 %v26357_v16, %v30351_v5  ;;  %v30661_v34 = vand.u32 4294901760, %v26434_v43  ;;  %23493 = vmatprep.subr.bf16.mxu0 %v30634_v25  ;;  %v4255_v62 = vsub.f32 %v26372_v53, %v30354_v57 }
 0x5bd   : > { %v3605_v17 = vsub.f32 %v26418_v63, %v30660_v51  ;;  %v30356_v48 = vand.u32 4294901760, %v26431_v55  ;;  %v30355_v61 = vand.u32 4294901760, %v26447_v7  ;;  %v23500_v58 = vpack.c.bf16 %v4242_v21, %v4235_v9 }
 0x5be   : > { %v3612_v33 = vsub.f32 %v26434_v43, %v30661_v34  ;;  %v26544_v50 = vpack.c.bf16 %v3599_v28, %v3592_v3  ;;  %v4249_v49 = vand.u32 4294901760, %v4248_v2  ;;  %23351 = vmatpush3.bf16.msra.mxu1 %v23350_v22  ;;  %v4256_v26 = vand.u32 4294901760, %v4255_v62 }
 0x5bf   : > { %v3606_v5 = vand.u32 4294901760, %v3605_v17  ;;  %v4262_v34 = vsub.f32 %v26431_v55, %v30356_v48  ;;  %v4269_v28 = vsub.f32 %v26447_v7, %v30355_v61  ;;  %v30662_v3 = vand.u32 4294901760, %v26409_v56  ;;  %23495 = vmatpush3.bf16.msra.mxu0 %v23494_v40  ;;  %23352 = vmatprep.subr.bf16.mxu1 %v30634_v25 }
 0x5c0   : > { %v3613_v51 = vand.u32 4294901760, %v3612_v33  ;;  %v30663_v17 = vand.u32 4294901760, %v26427_v15  ;;  %v4275_v21 = vand.u32 4294901760, %v26424_v12  ;;  %v4282_v2 = vand.u32 4294901760, %v26439_v11  ;;  %23496 = vmatprep.subr.bf16.mxu0 %v30634_v25 }
 0x5c1   : > { %v3619_v57 = vsub.f32 %v26409_v56, %v30662_v3  ;;  %v23503_v33 = vpack.c.bf16 %v4256_v26, %v4249_v49  ;;  %v4263_v62 = vand.u32 4294901760, %v4262_v34  ;;  %v4270_v61 = vand.u32 4294901760, %v4269_v28 }
 0x5c2   : > { %v23362_v9 = vpack.c.bf16 %v3613_v51, %v3606_v5  ;;  %v3626_v22 = vsub.f32 %v26427_v15, %v30663_v17  ;;  %v4276_v40 = vsub.f32 %v26424_v12, %v4275_v21  ;;  %v4283_v3 = vsub.f32 %v26439_v11, %v4282_v2  ;;  %23354 = vmatpush3.bf16.msra.mxu1 %v23353_v37 }
 0x5c3   : > { %v3620_v48 = vand.u32 4294901760, %v3619_v57  ;;  %v23368_v5 = vpack.c.bf16 %v26226_v31, %v26211_v18  ;;  %v23506_v51 = vpack.c.bf16 %v4270_v61, %v4263_v62  ;;  %v23512_v17 = vpack.c.bf16 %v26236_v29, %v26223_v24  ;;  %23498 = vmatpush3.bf16.msra.mxu0 %v23497_v45  ;;  %23355 = vmatprep.subr.bf16.mxu1 %v30634_v25 }
 0x5c4   : > { %v3627_v19 = vand.u32 4294901760, %v3626_v22  ;;  %v23515_v26 = vpack.c.bf16 %v26229_v35, %v26217_v46  ;;  %v4277_v49 = vand.u32 4294901760, %v4276_v40  ;;  %v4284_v34 = vand.u32 4294901760, %v4283_v3  ;;  %23499 = vmatprep.subr.bf16.mxu0 %v30634_v25 }
 0x5c5   : > { %v23374_v28 = vpack.c.bf16 %v26295_v10, %v26279_v1  ;;  %v23518_v37 = vpack.c.bf16 %v26308_v23, %v26292_v8  ;;  %v23377_v61 = vpack.c.bf16 %v26288_v38, %v26270_v54  ;;  %v23521_v22 = vpack.c.bf16 %v26300_v14, %v26285_v4 }
 0x5c6   : > { %v23365_v57 = vpack.c.bf16 %v3627_v19, %v3620_v48  ;;  %v23380_v45 = vpack.c.bf16 %v26367_v47, %v26351_v52  ;;  %v23509_v19 = vpack.c.bf16 %v4284_v34, %v4277_v49  ;;  %v23524_v48 = vpack.c.bf16 %v26380_v6, %v26364_v32  ;;  %23357 = vmatpush3.bf16.msra.mxu1 %v26524_v0 }
 0x5c7   : > { %v23383_v62 = vpack.c.bf16 %v26360_v59, %v26342_v60  ;;  %v23527_v40 = vpack.c.bf16 %v26372_v53, %v26357_v16  ;;  %v23386_v3 = vpack.c.bf16 %v26434_v43, %v26418_v63  ;;  %v23530_v39 = vpack.c.bf16 %v26447_v7, %v26431_v55  ;;  %23501 = vmatpush3.bf16.msra.mxu0 %v23500_v58 }
 0x5c8   : > { %23358 = vmatprep.subr.bf16.mxu1 %v30634_v25  ;;  %v26609_v0 = vpack.c.bf16 %v30665_v36, %v30664_v30  ;;  %v30667_v20 = vand.u32 4294901760, %v26236_v29  ;;  %v30668_v49 = vand.u32 4294901760, %v26203_v13  ;;  %v30669_v15 = vand.u32 4294901760, %v26220_v27  ;;  %23502 = vmatprep.subr.bf16.mxu0 %v30634_v25 }
 0x5c9   : > { %v30670_v18 = vand.u32 4294901760, %v26217_v46  ;;  %v30671_v31 = vand.u32 4294901760, %v26229_v35  ;;  %v30672_v24 = vand.u32 4294901760, %v26279_v1  ;;  %v30673_v29 = vand.u32 4294901760, %v26295_v10 }
 0x5ca   : > { %v26615_v41 = vpack.c.bf16 %v30667_v20, %v30666_v42  ;;  %v26621_v34 = vpack.c.bf16 %v30669_v15, %v30668_v49  ;;  %v30674_v13 = vand.u32 4294901760, %v26292_v8  ;;  %v30675_v27 = vand.u32 4294901760, %v26308_v23  ;;  %23360 = vmatpush3.bf16.msra.mxu1 %v26544_v50 }
 0x5cb   : > { %v26628_v36 = vpack.c.bf16 %v30671_v31, %v30670_v18  ;;  %v26634_v42 = vpack.c.bf16 %v30673_v29, %v30672_v24  ;;  %v30676_v30 = vand.u32 4294901760, %v26270_v54  ;;  %v30677_v46 = vand.u32 4294901760, %v26288_v38  ;;  %23504 = vmatpush3.bf16.msra.mxu0 %v23503_v33  ;;  %23361 = vmatprep.subr.bf16.mxu1 %v30634_v25  ;;  %v30707_v33 = vld [vmem:[#allocation22_spill] sm:$0xff] }
 0x5cc   : > { %v26640_v15 = vpack.c.bf16 %v30675_v27, %v30674_v13  ;;  %v30678_v35 = vand.u32 4294901760, %v26285_v4  ;;  %v30679_v1 = vand.u32 4294901760, %v26300_v14  ;;  %v30680_v10 = vand.u32 4294901760, %v26351_v52  ;;  %v30693_v13 = vld [vmem:[#allocation34_spill] sm:$0xff]  ;;  %23505 = vmatprep.subr.bf16.mxu0 %v30634_v25 }
 0x5cd   : > { %v26646_v20 = vpack.c.bf16 %v30677_v46, %v30676_v30  ;;  %v30681_v8 = vand.u32 4294901760, %v26367_v47  ;;  %v30682_v23 = vand.u32 4294901760, %v26364_v32  ;;  %v30683_v54 = vand.u32 4294901760, %v26380_v6  ;;  %v3411_v46 = vld [vmem:[%s30276_s9 + $0x8] sm:$0xff] }
 0x5ce   : > { %v26652_v58 = vpack.c.bf16 %v30679_v1, %v30678_v35  ;;  %v30684_v38 = vand.u32 4294901760, %v26342_v60  ;;  %v30685_v4 = vand.u32 4294901760, %v26360_v59  ;;  %v30686_v52 = vand.u32 4294901760, %v26357_v16  ;;  %23363 = vmatpush3.bf16.msra.mxu1 %v23362_v9  ;;  %v30700_v9 = vld [vmem:[#allocation10_spill] sm:$0xff]  ;;  %v3412_v1 = vld [vmem:[%s30276_s9 + $0x10] sm:$0xff] }
 0x5cf   : > { %v26658_v49 = vpack.c.bf16 %v30681_v8, %v30680_v10  ;;  %v26664_v18 = vpack.c.bf16 %v30683_v54, %v30682_v23  ;;  %v30687_v47 = vand.u32 4294901760, %v26372_v53  ;;  %v30688_v32 = vand.u32 4294901760, %v26418_v63  ;;  %23507 = vmatpush3.bf16.msra.mxu0 %v23506_v51  ;;  %23364 = vmatprep.subr.bf16.mxu1 %v30634_v25  ;;  %v30709_v51 = vld [vmem:[#allocation29_spill] sm:$0xff] }
 0x5d0   : > { %v26670_v31 = vpack.c.bf16 %v30685_v4, %v30684_v38  ;;  %v30689_v6 = vand.u32 4294901760, %v26434_v43  ;;  %v30690_v60 = vand.u32 4294901760, %v26431_v55  ;;  %v30691_v59 = vand.u32 4294901760, %v26447_v7  ;;  %23508 = vmatprep.subr.bf16.mxu0 %v30634_v25  ;;  %v30695_v7 = vld [vmem:[#allocation3_spill] sm:$0xff]  ;;  %v30699_v55 = vld [vmem:[#allocation4_spill] sm:$0xff]  ;;  %v3413_v23 = vld [vmem:[%s30276_s9 + $0x18] sm:$0xff] }
 0x5d1   : > { %v26677_v14 = vpack.c.bf16 %v30687_v47, %v30686_v52  ;;  %v30692_v50 = vand.u32 4294901760, %v26409_v56  ;;  %v30694_v16 = vand.u32 4294901760, %v30693_v13  ;;  %v26698_v53 = vpack.c.bf16 %v4282_v2, %v4275_v21  ;;  %v30705_v21 = vld [vmem:[#allocation21_spill] sm:$0xff]  ;;  %v30706_v2 = vld [vmem:[#allocation19_spill] sm:$0xff] }
 0x5d2   : > { %v26683_v24 = vpack.c.bf16 %v30689_v6, %v30688_v32  ;;  %v26689_v29 = vpack.c.bf16 %v30691_v59, %v30690_v60  ;;  %23366 = vmatpush3.bf16.msra.mxu1 %v23365_v57  ;;  %v30696_v43 = vmov 0.0   ;;  %v30698_v63 = vpack.c.bf16 %v26439_v11, %v26424_v12  ;;  %v30702_v12 = vld [vmem:[#allocation11_spill] sm:$0xff]  ;;  %v30703_v11 = vld [vmem:[#allocation14_spill] sm:$0xff] }
 0x5d3   : > { %v26695_v27 = vpack.c.bf16 %v30694_v16, %v30692_v50  ;;  %23510 = vmatpush3.bf16.msra.mxu0 %v23509_v19  ;;  %23367 = vmatprep.subr.bf16.mxu1 %v30634_v25  ;;  %v30712_v57 = vld [vmem:[#allocation35_spill] sm:$0xff]  ;;  %v4745_v8 = vsel %vm4740_vm4, %v3411_v46, 0  ;;  %v4751_v47 = vsel %vm4740_vm4, %v3413_v23, 0 }
 0x5d4   : > { %23511 = vmatprep.subr.bf16.mxu0 %v30634_v25  ;;  %v26877_v38 = vand.u32 4294901760, %v4745_v8  ;;  %v3415_v4 = vld [vmem:[%s30276_s9 + $0x28] sm:$0xff]  ;;  %v26893_v60 = vand.u32 4294901760, %v4751_v47  ;;  %v3418_v16 = vld [vmem:[%s30276_s9 + $0x40] sm:$0xff] }
 0x5d5   : > { %20659 = vmatmul.mubr.f32.vlgmr.msra.gmra.mrb[128].mxu1 %v30695_v7  ;;  %v4757_v6 = vsel %vm4740_vm4, %v3415_v4, 0  ;;  %v3423_v23 = vld [vmem:[%s30276_s9 + $0x68] sm:$0xff] }
 0x5d6   : > { %23369 = vmatpush3.bf16.msra.mxu1 %v23368_v5  ;;  %20869 = vmatmul.mubr.f32.vlgmr.msra.gmra.mrb[48].mxu0 %v30695_v7  ;;  %v30708_v5 = vld [vmem:[#allocation26_spill] sm:$0xff] }
 0x5d7   : > { %23513 = vmatpush3.bf16.msra.mxu0 %v23512_v17  ;;  %23370 = vmatprep.subr.bf16.mxu1 %v30634_v25  ;;  %v30710_v17 = vld [vmem:[#allocation27_spill] sm:$0xff] }
 0x5d8   : > { %23514 = vmatprep.subr.bf16.mxu0 %v30634_v25  ;;  %20693 = vmatprep.mubr.msk.f32.mxu1 %vm25477_vm2, %v30696_v43 }
 0x5d9   : > { %20903 = vmatprep.mubr.msk.f32.mxu0 %vm25477_vm2, %v30696_v43 }
 0x5da   : > { %23372 = vmatpush3.bf16.msra.mxu1 %v23371_v44  ;;  %v30697_v44 = vpack.c.bf16 %v30693_v13, %v26409_v56  ;;  %v30704_v56 = vld [vmem:[#allocation18_spill] sm:$0xff] }
 0x5db   : > { %23516 = vmatpush3.bf16.msra.mxu0 %v23515_v26  ;;  %23373 = vmatprep.subr.bf16.mxu1 %v30634_v25  ;;  %v30711_v26 = vld [vmem:[#allocation30_spill] sm:$0xff] }
 0x5dc   : > { %23517 = vmatprep.subr.bf16.mxu0 %v30634_v25  ;;  %v3417_v13 = vld [vmem:[%s30276_s9 + $0x38] sm:$0xff] }
 0x5de   : > { %23375 = vmatpush3.bf16.msra.mxu1 %v23374_v28  ;;  %v30713_v28 = vld [vmem:[#allocation37_spill] sm:$0xff] }
 0x5df   : > { %23519 = vmatpush3.bf16.msra.mxu0 %v23518_v37  ;;  %23376 = vmatprep.subr.bf16.mxu1 %v30634_v25  ;;  %v30714_v37 = vld [vmem:[#allocation36_spill] sm:$0xff] }
 0x5e0   : > { %23520 = vmatprep.subr.bf16.mxu0 %v30634_v25 }
 0x5e2   : > { %23378 = vmatpush3.bf16.msra.mxu1 %v23377_v61  ;;  %v30715_v61 = vld [vmem:[#allocation38_spill] sm:$0xff] }
 0x5e3   : > { %23522 = vmatpush3.bf16.msra.mxu0 %v23521_v22  ;;  %23379 = vmatprep.subr.bf16.mxu1 %v30634_v25  ;;  %v30716_v22 = vld [vmem:[#allocation5_spill] sm:$0xff] }
 0x5e4   : > { %23523 = vmatprep.subr.bf16.mxu0 %v30634_v25 }
 0x5e6   : > { %23381 = vmatpush3.bf16.msra.mxu1 %v23380_v45 }
 0x5e7   : > { %23525 = vmatpush3.bf16.msra.mxu0 %v23524_v48  ;;  %23382 = vmatprep.subr.bf16.mxu1 %v30634_v25 }
 0x5e8   : > { %23526 = vmatprep.subr.bf16.mxu0 %v30634_v25 }
 0x5ea   : > { %23384 = vmatpush3.bf16.msra.mxu1 %v23383_v62 }
 0x5eb   : > { %23528 = vmatpush3.bf16.msra.mxu0 %v23527_v40  ;;  %23385 = vmatprep.subr.bf16.mxu1 %v30634_v25 }
 0x5ec   : > { %23529 = vmatprep.subr.bf16.mxu0 %v30634_v25 }
 0x5ee   : > { %23387 = vmatpush3.bf16.msra.mxu1 %v23386_v3 }
 0x5ef   : > { %23531 = vmatpush3.bf16.msra.mxu0 %v23530_v39  ;;  %23388 = vmatprep.subr.bf16.mxu1 %v30634_v25  ;;  %v30701_v39 = vld [vmem:[#allocation13_spill] sm:$0xff] }
 0x5f0   : > { %23532 = vmatprep.subr.bf16.mxu0 %v30634_v25 }
 0x5f2   : > { %23390 = vmatpush3.bf16.msra.mxu1 %v30697_v44  ;;  %v4763_v44 = vsel %vm4740_vm4, %v3417_v13, 0 }
 0x5f3   : > { %23534 = vmatpush3.bf16.msra.mxu0 %v30698_v63  ;;  %23391 = vmatprep.subr.bf16.mxu1 %v30634_v25  ;;  %v4766_v63 = vsel %vm4740_vm4, %v3418_v16, 0 }
 0x5f4   : > { %23535 = vmatprep.subr.bf16.mxu0 %v30634_v25 }
 0x5f5   : > { %20694 = vmatmul.mubr.f32.vlgmr.msra.gmra.mrb[128].mxu1 %v30699_v55 }
 0x5f6   : > { %23393 = vmatpush3.bf16.msra.mxu1 %v30700_v9  ;;  %20904 = vmatmul.mubr.f32.vlgmr.msra.gmra.mrb[48].mxu0 %v30699_v55 }
 0x5f7   : > { %23537 = vmatpush3.bf16.msra.mxu0 %v30701_v39  ;;  %23394 = vmatprep.subr.bf16.mxu1 %v30634_v25 }
 0x5f8   : > { %23538 = vmatprep.subr.bf16.mxu0 %v30634_v25  ;;  %20728 = vmatprep.mubr.msk.f32.mxu1 %vm25477_vm2, %v30696_v43 }
 0x5f9   : > { %20938 = vmatprep.mubr.msk.f32.mxu0 %vm25477_vm2, %v30696_v43 }
 0x5fa   : > { %23396 = vmatpush3.bf16.msra.mxu1 %v30702_v12 }
 0x5fb   : > { %23540 = vmatpush3.bf16.msra.mxu0 %v30703_v11  ;;  %23397 = vmatprep.subr.bf16.mxu1 %v30634_v25 }
 0x5fc   : > { %23541 = vmatprep.subr.bf16.mxu0 %v30634_v25 }
 0x5fe   : > { %23399 = vmatpush3.bf16.msra.mxu1 %v30704_v56 }
 0x5ff   : > { %23543 = vmatpush3.bf16.msra.mxu0 %v30705_v21  ;;  %23400 = vmatprep.subr.bf16.mxu1 %v30634_v25 }
 0x600   : > { %23544 = vmatprep.subr.bf16.mxu0 %v30634_v25 }
 0x602   : > { %23402 = vmatpush3.bf16.msra.mxu1 %v30706_v2 }
 0x603   : > { %23546 = vmatpush3.bf16.msra.mxu0 %v30707_v33  ;;  %23403 = vmatprep.subr.bf16.mxu1 %v30634_v25 }
 0x604   : > { %23547 = vmatprep.subr.bf16.mxu0 %v30634_v25 }
 0x606   : > { %23405 = vmatpush3.bf16.msra.mxu1 %v30708_v5 }
 0x607   : > { %23549 = vmatpush3.bf16.msra.mxu0 %v30709_v51  ;;  %23406 = vmatprep.subr.bf16.mxu1 %v30634_v25 }
 0x608   : > { %23550 = vmatprep.subr.bf16.mxu0 %v30634_v25 }
 0x60a   : > { %23408 = vmatpush3.bf16.msra.mxu1 %v30710_v17 }
 0x60b   : > { %23552 = vmatpush3.bf16.msra.mxu0 %v30711_v26  ;;  %23409 = vmatprep.subr.bf16.mxu1 %v30634_v25 }
 0x60c   : > { %23553 = vmatprep.subr.bf16.mxu0 %v30634_v25 }
 0x60e   : > { %23411 = vmatpush3.bf16.msra.mxu1 %v30712_v57 }
 0x60f   : > { %23555 = vmatpush3.bf16.msra.mxu0 %v30713_v28  ;;  %23412 = vmatprep.subr.bf16.mxu1 %v30634_v25 }
 0x610   : > { %23556 = vmatprep.subr.bf16.mxu0 %v30634_v25 }
 0x612   : > { %23414 = vmatpush3.bf16.msra.mxu1 %v30714_v37 }
 0x613   : > { %23558 = vmatpush3.bf16.msra.mxu0 %v30715_v61  ;;  %23415 = vmatprep.subr.bf16.mxu1 %v30634_v25 }
 0x614   : > { %23559 = vmatprep.subr.bf16.mxu0 %v30634_v25 }
 0x615   : > { %20729 = vmatmul.mubr.f32.vlgmr.msra.gmra.mrb[128].mxu1 %v30716_v22 }
 0x616   : > { %23417 = vmatpush3.bf16.msra.mxu1 %v26609_v0  ;;  %20939 = vmatmul.mubr.f32.vlgmr.msra.gmra.mrb[48].mxu0 %v30716_v22 }
 0x617   : > { %23561 = vmatpush3.bf16.msra.mxu0 %v26615_v41  ;;  %23418 = vmatprep.subr.bf16.mxu1 %v30634_v25 }
 0x618   : > { %23562 = vmatprep.subr.bf16.mxu0 %v30634_v25  ;;  %20763 = vmatprep.mubr.msk.f32.mxu1 %vm25477_vm2, %v30696_v43 }
 0x619   : > { %20973 = vmatprep.mubr.msk.f32.mxu0 %vm25477_vm2, %v30696_v43 }
 0x61a   : > { %23420 = vmatpush3.bf16.msra.mxu1 %v26621_v34 }
 0x61b   : > { %23564 = vmatpush3.bf16.msra.mxu0 %v26628_v36  ;;  %23421 = vmatprep.subr.bf16.mxu1 %v30634_v25 }
 0x61c   : > { %23565 = vmatprep.subr.bf16.mxu0 %v30634_v25 }
 0x61e   : > { %23423 = vmatpush3.bf16.msra.mxu1 %v26634_v42 }
 0x61f   : > { %23567 = vmatpush3.bf16.msra.mxu0 %v26640_v15  ;;  %23424 = vmatprep.subr.bf16.mxu1 %v30634_v25 }
 0x620   : > { %23568 = vmatprep.subr.bf16.mxu0 %v30634_v25 }
 0x622   : > { %23426 = vmatpush3.bf16.msra.mxu1 %v26646_v20 }
 0x623   : > { %23570 = vmatpush3.bf16.msra.mxu0 %v26652_v58  ;;  %23427 = vmatprep.subr.bf16.mxu1 %v30634_v25 }
 0x624   : > { %23571 = vmatprep.subr.bf16.mxu0 %v30634_v25 }
 0x626   : > { %23429 = vmatpush3.bf16.msra.mxu1 %v26658_v49  ;;  %v4748_v49 = vsel %vm4740_vm4, %v3412_v1, 0 }
 0x627   : > { %23573 = vmatpush3.bf16.msra.mxu0 %v26664_v18  ;;  %23430 = vmatprep.subr.bf16.mxu1 %v30634_v25  ;;  %v3414_v18 = vld [vmem:[%s30276_s9 + $0x20] sm:$0xff]  ;;  %v26882_v52 = vand.u32 4294901760, %v4748_v49 }
 0x628   : > { %23574 = vmatprep.subr.bf16.mxu0 %v30634_v25  ;;  %v4754_v32 = vsel %vm4740_vm4, %v3414_v18, 0 }
 0x629   : > { %v26899_v50 = vand.u32 4294901760, %v4754_v32 }
 0x62a   : > { %23432 = vmatpush3.bf16.msra.mxu1 %v26670_v31 }
 0x62b   : > { %23576 = vmatpush3.bf16.msra.mxu0 %v26677_v14  ;;  %23433 = vmatprep.subr.bf16.mxu1 %v30634_v25  ;;  %v3416_v14 = vld [vmem:[%s30276_s9 + $0x30] sm:$0xff] }
 0x62c   : > { %23577 = vmatprep.subr.bf16.mxu0 %v30634_v25  ;;  %v4760_v59 = vsel %vm4740_vm4, %v3416_v14, 0 }
 0x62e   : > { %23435 = vmatpush3.bf16.msra.mxu1 %v26683_v24  ;;  %v26891_v24 = vsub.f32 %v4745_v8, %v26877_v38 }
 0x62f   : > { %23579 = vmatpush3.bf16.msra.mxu0 %v26689_v29  ;;  %23436 = vmatprep.subr.bf16.mxu1 %v30634_v25  ;;  %v26897_v29 = vsub.f32 %v4748_v49, %v26882_v52 }
 0x630   : > { %23580 = vmatprep.subr.bf16.mxu0 %v30634_v25 }
 0x631   : > { %v26920_v55 = vand.u32 4294901760, %v26897_v29 }
 0x632   : > { %23438 = vmatpush3.bf16.msra.mxu1 %v26695_v27  ;;  %v26907_v27 = vand.u32 4294901760, %v4757_v6 }
 0x633   : > { %23582 = vmatpush3.bf16.msra.mxu0 %v26698_v53  ;;  %23439 = vmatprep.subr.bf16.mxu1 %v30634_v25  ;;  %v26909_v53 = vand.u32 4294901760, %v4760_v59 }
 0x634   : > { %23583 = vmatprep.subr.bf16.mxu0 %v30634_v25 }
 0x635   : > { %20764 = vmatmul.mubr.f32.vlgmr.msra.gmra.mrb[128].mxu1 %v30695_v7 }
 0x636   : > { %23441 = vmatpush3.bf16.msra.mxu1 %v30700_v9  ;;  %20974 = vmatmul.mubr.f32.vlgmr.msra.gmra.mrb[48].mxu0 %v30695_v7  ;;  %v26923_v9 = vsub.f32 %v4754_v32, %v26899_v50 }
 0x637   : > { %23585 = vmatpush3.bf16.msra.mxu0 %v30701_v39  ;;  %23442 = vmatprep.subr.bf16.mxu1 %v30634_v25  ;;  %v3419_v39 = vld [vmem:[%s30276_s9 + $0x48] sm:$0xff] }
 0x638   : > { %23586 = vmatprep.subr.bf16.mxu0 %v30634_v25  ;;  %20798 = vmatprep.mubr.msk.f32.mxu1 %vm25477_vm2, %v30696_v43 }
 0x639   : > { %21008 = vmatprep.mubr.msk.f32.mxu0 %vm25477_vm2, %v30696_v43  ;;  %v26915_v43 = vsub.f32 %v4751_v47, %v26893_v60  ;;  %v3424_v47 = vld [vmem:[%s30276_s9 + $0x70] sm:$0xff] }
 0x63a   : > { %23444 = vmatpush3.bf16.msra.mxu1 %v30702_v12  ;;  %v26929_v12 = vsub.f32 %v4757_v6, %v26907_v27 }
 0x63b   : > { %23588 = vmatpush3.bf16.msra.mxu0 %v30703_v11  ;;  %23445 = vmatprep.subr.bf16.mxu1 %v30634_v25  ;;  %v3407_v11 = vld [vmem:[%s30717_s2] sm:$0xff] }
 0x63c   : > { %23589 = vmatprep.subr.bf16.mxu0 %v30634_v25 }
 0x63e   : > { %23447 = vmatpush3.bf16.msra.mxu1 %v30704_v56  ;;  %v26935_v56 = vsub.f32 %v4760_v59, %v26909_v53 }
 0x63f   : > { %23591 = vmatpush3.bf16.msra.mxu0 %v30705_v21  ;;  %23448 = vmatprep.subr.bf16.mxu1 %v30634_v25  ;;  %v26937_v21 = vand.u32 4294901760, %v4763_v44 }
 0x640   : > { %23592 = vmatprep.subr.bf16.mxu0 %v30634_v25 }
 0x642   : > { %23450 = vmatpush3.bf16.msra.mxu1 %v30706_v2  ;;  %v26939_v2 = vand.u32 4294901760, %v4766_v63 }
 0x643   : > { %23594 = vmatpush3.bf16.msra.mxu0 %v30707_v33  ;;  %23451 = vmatprep.subr.bf16.mxu1 %v30634_v25  ;;  %v3420_v33 = vld [vmem:[%s30276_s9 + $0x50] sm:$0xff] }
 0x644   : > { %23595 = vmatprep.subr.bf16.mxu0 %v30634_v25  ;;  %v4772_v22 = vsel %vm4740_vm4, %v3420_v33, 0 }
 0x645   : > { %v26985_v1 = vand.u32 4294901760, %v4772_v22 }
 0x646   : > { %23453 = vmatpush3.bf16.msra.mxu1 %v30708_v5 }
 0x647   : > { %23597 = vmatpush3.bf16.msra.mxu0 %v30709_v51  ;;  %23454 = vmatprep.subr.bf16.mxu1 %v30634_v25  ;;  %v26947_v51 = vand.u32 4294901760, %v26915_v43  ;;  %v27021_v16 = vsub.f32 %v4772_v22, %v26985_v1 }
 0x648   : > { %23598 = vmatprep.subr.bf16.mxu0 %v30634_v25 }
 0x64a   : > { %23456 = vmatpush3.bf16.msra.mxu1 %v30710_v17  ;;  %v4769_v17 = vsel %vm4740_vm4, %v3419_v39, 0 }
 0x64b   : > { %23600 = vmatpush3.bf16.msra.mxu0 %v30711_v26  ;;  %23457 = vmatprep.subr.bf16.mxu1 %v30634_v25 }
 0x64c   : > { %23601 = vmatprep.subr.bf16.mxu0 %v30634_v25 }
 0x64e   : > { %23459 = vmatpush3.bf16.msra.mxu1 %v30712_v57  ;;  %v4878_v57 = vsub.f32 %v26897_v29, %v26920_v55 }
 0x64f   : > { %23603 = vmatpush3.bf16.msra.mxu0 %v30713_v28  ;;  %23460 = vmatprep.subr.bf16.mxu1 %v30634_v25  ;;  %v26953_v28 = vand.u32 4294901760, %v26923_v9 }
 0x650   : > { %23604 = vmatprep.subr.bf16.mxu0 %v30634_v25  ;;  %v3410_v25 = vld [vmem:[%s30276_s9] sm:$0xff]  ;;  %v4879_v46 = vand.u32 4294901760, %v4878_v57 }
 0x651   : > { %v4742_v3 = vsel %vm4740_vm4, %v3410_v25, 0  ;;  %v3422_v25 = vld [vmem:[%s30276_s9 + $0x60] sm:$0xff] }
 0x652   : > { %23462 = vmatpush3.bf16.msra.mxu1 %v30714_v37  ;;  %v26853_v34 = vand.u32 4294901760, %v4742_v3  ;;  %v4778_v49 = vsel %vm4740_vm4, %v3422_v25, 0 }
 0x653   : > { %23606 = vmatpush3.bf16.msra.mxu0 %v30715_v61  ;;  %v26956_v61 = vand.u32 4294901760, %v26929_v12 }
 0x654   : > { %v26856_v0 = vsub.f32 %v4742_v3, %v26853_v34 }
 0x655   : > { %20799 = vmatmul.mubr.f32.vlgmr.msra.gmra.mrb[128].mxu1 %v30695_v7 }
 0x656   : > { %21009 = vmatmul.mubr.f32.vlgmr.msra.gmra.mrb[48].mxu0 %v30695_v7  ;;  %v26859_v36 = vand.u32 4294901760, %v26856_v0  ;;  %v26912_v7 = vand.u32 4294901760, %v26891_v24 }
 0x658   : > { %v4858_v42 = vsub.f32 %v26856_v0, %v26859_v36  ;;  %v4868_v5 = vsub.f32 %v26891_v24, %v26912_v7 }
 0x65a   : > { %v4859_v15 = vand.u32 4294901760, %v4858_v42 }
 0x65c   : > { %21013 = vmatprep.mubr.f32.mxu1 %v4859_v15  ;;  %21169 = vmatprep.mubr.f32.mxu0 %v4859_v15  ;;  %v4869_v15 = vand.u32 4294901760, %v4868_v5  ;;  %v4784_v5 = vsel %vm4740_vm4, %v3424_v47, 0 }
 0x728   : > { %v4063_v41 = vpop.f32.mrb[128].mxu1 }
 0x729   : > { %v20800_v45 = vpop.f32.mrb[129].mxu1  ;;  %v4720_v19 = vpop.f32.mrb[48].mxu0  ;;  %v4725_v48 = vsel %vm4724_vm3, %v4063_v41, 0.0  ;;  %v3421_v41 = vld [vmem:[%s30276_s9 + $0x58] sm:$0xff] }
 0x72a   : > { %4726 = vadd.xlane.f32.xlu0 %v4725_v48  ;;  %v21010_v62 = vpop.f32.mrb[49].mxu0  ;;  %v4729_v40 = vsel %vm4724_vm3, %v4720_v19, 0.0  ;;  %v3408_v45 = vld [vmem:[%s30718_s8] sm:$0xff]  ;;  %v26966_v19 = vand.u32 4294901760, %v26935_v56  ;;  %v26969_v48 = vsub.f32 %v4763_v44, %v26937_v21  ;;  %v27023_v44 = vand.u32 4294901760, %v4778_v49 }
 0x72b   : > { %4730 = vadd.xlane.f32.xlu1 %v4729_v40  ;;  %v26972_v62 = vsub.f32 %v4766_v63, %v26939_v2  ;;  %v26974_v40 = vand.u32 4294901760, %v4769_v17  ;;  %v4781_v63 = vsel %vm4740_vm4, %v3423_v23, 0 }
 0x72c   : > { %v27002_v18 = vand.u32 4294901760, %v26969_v48 }
 0x72d   : > { %v27005_v4 = vand.u32 4294901760, %v26972_v62 }
 0x72e   : > { %v4928_v57 = vsub.f32 %v26969_v48, %v27002_v18 }
 0x7b7   : > { %v4727_v30 = vpop.xlane.xlu0 %4726 }
 0x7b8   : > { %v4728_v20 = vmul.f32 0.00390625, %v4727_v30  ;;  %v4731_v35 = vpop.xlane.xlu1 %4730  ;;  %v4888_v30 = vsub.f32 %v26915_v43, %v26947_v51 }
 0x7b9   : > { %v4732_v58 = vmul.f32 0.00390625, %v4731_v35  ;;  %v4898_v35 = vsub.f32 %v26923_v9, %v26953_v28 }
 0x7ba   : > { %v4733_v10 = vmul.f32 %v4728_v20, %v4728_v20  ;;  %v4889_v32 = vand.u32 4294901760, %v4888_v30  ;;  %v27053_v30 = vand.u32 4294901760, %v27021_v16 }
 0x7bb   : > { %v4899_v13 = vand.u32 4294901760, %v4898_v35  ;;  %v27056_v35 = vsub.f32 %v4778_v49, %v27023_v44 }
 0x7bc   : > { %v4734_v54 = vsub.f32 %v4732_v58, %v4733_v10  ;;  %v4775_v58 = vsel %vm4740_vm4, %v3421_v41, 0  ;;  %30719 = vst [vmem:[#allocation34_spill] sm:$0xff] %v27053_v30 }
 0x7bd   : > { %v27018_v59 = vand.u32 4294901760, %v4775_v58 }
 0x7be   : > { %v4735_v31 = vadd.f32 1e-05, %v4734_v54  ;;  %v4918_v54 = vsub.f32 %v26935_v56, %v26966_v19 }
 0x7bf   : > { %v27048_v25 = vsub.f32 %v4775_v58, %v27018_v59  ;;  %v4929_v58 = vand.u32 4294901760, %v4928_v57  ;;  %v27077_v57 = vand.u32 4294901760, %v27056_v35 }
 0x7c0   : > { %25453 = vrsqrt.f32 %v4735_v31  ;;  %v27008_v31 = vsub.f32 %v4769_v17, %v26974_v40  ;;  %v3425_v17 = vld [vmem:[%s30276_s9 + $0x78] sm:$0xff] }
 0x7c1   : > { %v27067_v49 = vand.u32 4294901760, %v27048_v25 }
 0x7c2   : > { %v27042_v22 = vand.u32 4294901760, %v27008_v31 }
 0x7c3   : > { %30720 = vst [vmem:[#allocation3_spill] sm:$0xff] %v27067_v49 }
 0x7c4   : > { %v4948_v23 = vsub.f32 %v27008_v31, %v27042_v22 }
 0x7ca   : > { %v25454_v26 = vpop.eup %25453 }
 0x7cb   : > { %v4737_v37 = vmul.f32 %v25454_v26, %v3407_v11  ;;  %v4919_v26 = vand.u32 4294901760, %v4918_v54 }
 0x7cd   : > { %v4738_v3 = vmul.f32 %v4737_v37, %v4728_v20  ;;  %v26979_v42 = vand.u32 4294901760, %v4737_v37  ;;  %v4908_v20 = vsub.f32 %v26929_v12, %v26956_v61 }
 0x7cf   : > { %v4739_v10 = vsub.f32 %v3408_v45, %v4738_v3  ;;  %21011 = vmatprep.subr.mxu1 %v26979_v42  ;;  %v26990_v8 = vsub.f32 %v4737_v37, %v26979_v42  ;;  %v4909_v11 = vand.u32 4294901760, %v4908_v20  ;;  %v4938_v37 = vsub.f32 %v26972_v62, %v27005_v4 }
 0x7d0   : > { %21012 = vmatpush3.msra.mxu1 %v26979_v42  ;;  %v27050_v3 = vand.u32 4294901760, %v4781_v63 }
 0x7d1   : > { %21014 = vmatmul.mubr.f32.vlgmr.msra.gmra.mrb[130].mxu1 %v4869_v15  ;;  %v27013_v14 = vand.u32 4294901760, %v4739_v10  ;;  %v27016_v6 = vand.u32 4294901760, %v26990_v8 }
 0x7d2   : > { %21016 = vmatprep.mubr.f32.mxu1 %v4879_v46  ;;  %v27070_v54 = vsub.f32 %v4781_v63, %v27050_v3  ;;  %v4949_v63 = vand.u32 4294901760, %v4948_v23 }
 0x7d3   : > { %21167 = vmatprep.subr.mxu0 %v27013_v14  ;;  %v5019_v39 = vsub.f32 %v26990_v8, %v27016_v6  ;;  %v27030_v33 = vsub.f32 %v4739_v10, %v27013_v14  ;;  %v27058_v10 = vand.u32 4294901760, %v4784_v5 }
 0x7d4   : > { %21168 = vmatpush3.msra.mxu0 %v27013_v14 }
 0x7d5   : > { %21017 = vmatmul.mubr.f32.gmra.mrb[132].mxu1 %v4889_v32  ;;  %21170 = vmatmul.mubr.f32.vlgmr.msra.gmra.mrb[50].mxu0 %v4869_v15  ;;  %v5020_v41 = vand.u32 4294901760, %v5019_v39  ;;  %v27045_v45 = vand.u32 4294901760, %v27030_v33  ;;  %v4787_v15 = vsel %vm4740_vm4, %v3425_v17, 0  ;;  %v4939_v39 = vand.u32 4294901760, %v4938_v37 }
 0x7d6   : > { %21019 = vmatprep.mubr.f32.mxu1 %v4899_v13  ;;  %21172 = vmatprep.mubr.f32.mxu0 %v4879_v46  ;;  %v27072_v47 = vand.u32 4294901760, %v4787_v15  ;;  %v4958_v17 = vsub.f32 %v27021_v16, %v27053_v30  ;;  %v27086_v37 = vand.u32 4294901760, %v27070_v54 }
 0x7d7   : > { %21037 = vmatprep.subr.mxu1 %v5020_v41  ;;  %v6110_v20 = vsub.f32 %v27030_v33, %v27045_v45 }
 0x7d8   : > { %21038 = vmatpush3.msra.mxu1 %v5020_v41  ;;  %v27080_v41 = vsub.f32 %v4784_v5, %v27058_v10  ;;  %30721 = vst [vmem:[#allocation4_spill] sm:$0xff] %v27086_v37  ;;  %v4959_v5 = vand.u32 4294901760, %v4958_v17 }
 0x7d9   : > { %21020 = vmatmul.mubr.f32.gmra.mrb[134].mxu1 %v4909_v11  ;;  %21063 = vmatprep.subr.mxu1 %v26990_v8  ;;  %v6111_v46 = vand.u32 4294901760, %v6110_v20  ;;  %v27089_v20 = vsub.f32 %v4787_v15, %v27072_v47 }
 0x7da   : > { %21173 = vmatmul.mubr.f32.gmra.mrb[52].mxu0 %v4889_v32  ;;  %21022 = vmatprep.mubr.f32.mxu1 %v4919_v26  ;;  %v4968_v32 = vsub.f32 %v27048_v25, %v27067_v49  ;;  %v4988_v49 = vsub.f32 %v27070_v54, %v27086_v37 }
 0x7db   : > { %21193 = vmatprep.subr.mxu0 %v6111_v46  ;;  %21175 = vmatprep.mubr.f32.mxu0 %v4899_v13  ;;  %v4978_v13 = vsub.f32 %v27056_v35, %v27077_v57  ;;  %v27099_v30 = vand.u32 4294901760, %v27089_v20 }
 0x7dc   : > { %21194 = vmatpush3.msra.mxu0 %v6111_v46  ;;  %v27094_v46 = vand.u32 4294901760, %v27080_v41  ;;  %v4969_v23 = vand.u32 4294901760, %v4968_v32  ;;  %v4989_v17 = vand.u32 4294901760, %v4988_v49 }
 0x7dd   : > { %21023 = vmatmul.mubr.f32.gmra.mrb[136].mxu1 %v4929_v58  ;;  %21219 = vmatprep.subr.mxu0 %v27030_v33 }
 0x7de   : > { %21176 = vmatmul.mubr.f32.gmra.mrb[54].mxu0 %v4909_v11  ;;  %21025 = vmatprep.mubr.f32.mxu1 %v4939_v39  ;;  %v4979_v11 = vand.u32 4294901760, %v4978_v13  ;;  %v4998_v15 = vsub.f32 %v27080_v41, %v27094_v46 }
 0x7df   : > { %21178 = vmatprep.mubr.f32.mxu0 %v4919_v26  ;;  %v5008_v26 = vsub.f32 %v27089_v20, %v27099_v30 }
 0x7e0   : > { %v4999_v32 = vand.u32 4294901760, %v4998_v15 }
 0x7e1   : > { %21026 = vmatmul.mubr.f32.gmra.mrb[138].mxu1 %v4949_v63  ;;  %v5009_v37 = vand.u32 4294901760, %v5008_v26 }
 0x7e2   : > { %21179 = vmatmul.mubr.f32.gmra.mrb[56].mxu0 %v4929_v58  ;;  %21028 = vmatprep.mubr.f32.mxu1 %v4959_v5 }
 0x7e3   : > { %21181 = vmatprep.mubr.f32.mxu0 %v4939_v39  ;;  %v30727_v39 = vld [vmem:[#allocation8_spill] sm:$0xff] }
 0x7e5   : > { %21029 = vmatmul.mubr.f32.gmra.mrb[140].mxu1 %v4969_v23 }
 0x7e6   : > { %21182 = vmatmul.mubr.f32.gmra.mrb[58].mxu0 %v4949_v63  ;;  %21031 = vmatprep.mubr.f32.mxu1 %v4979_v11  ;;  %v30728_v63 = vld [vmem:[#allocation6_spill] sm:$0xff] }
 0x7e7   : > { %21184 = vmatprep.mubr.f32.mxu0 %v4959_v5 }
 0x7e9   : > { %21032 = vmatmul.mubr.f32.gmra.mrb[142].mxu1 %v4989_v17 }
 0x7ea   : > { %21185 = vmatmul.mubr.f32.gmra.mrb[60].mxu0 %v4969_v23  ;;  %21034 = vmatprep.mubr.f32.mxu1 %v4999_v32 }
 0x7eb   : > { %21187 = vmatprep.mubr.f32.mxu0 %v4979_v11 }
 0x7ed   : > { %21035 = vmatmul.mubr.f32.gmra.mrb[144].mxu1 %v5009_v37 }
 0x7ee   : > { %21188 = vmatmul.mubr.f32.gmra.mrb[62].mxu0 %v4989_v17  ;;  %21039 = vmatprep.mubr.f32.mxu1 %v26853_v34 }
 0x7ef   : > { %21190 = vmatprep.mubr.f32.mxu0 %v4999_v32 }
 0x7f1   : > { %21040 = vmatmul.mubr.f32.vlgmr.msra.gmra.mrb[130].mxu1 %v26877_v38 }
 0x7f2   : > { %21064 = vmatpush3.msra.mxu1 %v26990_v8  ;;  %21191 = vmatmul.mubr.f32.gmra.mrb[64].mxu0 %v5009_v37 }
 0x7f3   : > { %21089 = vmatprep.subr.mxu1 %v26979_v42  ;;  %21042 = vmatprep.mubr.f32.mxu1 %v26882_v52 }
 0x7f4   : > { %21195 = vmatprep.mubr.f32.mxu0 %v26853_v34 }
 0x7f5   : > { %21043 = vmatmul.mubr.f32.gmra.mrb[132].mxu1 %v26893_v60 }
 0x7f6   : > { %21196 = vmatmul.mubr.f32.vlgmr.msra.gmra.mrb[50].mxu0 %v26877_v38  ;;  %21045 = vmatprep.mubr.f32.mxu1 %v26899_v50 }
 0x7f7   : > { %21220 = vmatpush3.msra.mxu0 %v27030_v33  ;;  %21198 = vmatprep.mubr.f32.mxu0 %v26882_v52 }
 0x7f8   : > { %21245 = vmatprep.subr.mxu0 %v27013_v14 }
 0x7f9   : > { %21046 = vmatmul.mubr.f32.gmra.mrb[134].mxu1 %v26907_v27 }
 0x7fa   : > { %21199 = vmatmul.mubr.f32.gmra.mrb[52].mxu0 %v26893_v60  ;;  %21048 = vmatprep.mubr.f32.mxu1 %v26909_v53 }
 0x7fb   : > { %21201 = vmatprep.mubr.f32.mxu0 %v26899_v50 }
 0x7fd   : > { %21049 = vmatmul.mubr.f32.gmra.mrb[136].mxu1 %v26937_v21 }
 0x7fe   : > { %21202 = vmatmul.mubr.f32.gmra.mrb[54].mxu0 %v26907_v27  ;;  %21051 = vmatprep.mubr.f32.mxu1 %v26939_v2 }
 0x7ff   : > { %21204 = vmatprep.mubr.f32.mxu0 %v26909_v53 }
 0x801   : > { %21052 = vmatmul.mubr.f32.gmra.mrb[138].mxu1 %v26974_v40 }
 0x802   : > { %21205 = vmatmul.mubr.f32.gmra.mrb[56].mxu0 %v26937_v21  ;;  %21054 = vmatprep.mubr.f32.mxu1 %v26985_v1 }
 0x803   : > { %21207 = vmatprep.mubr.f32.mxu0 %v26939_v2 }
 0x805   : > { %21055 = vmatmul.mubr.f32.gmra.mrb[140].mxu1 %v27018_v59 }
 0x806   : > { %21208 = vmatmul.mubr.f32.gmra.mrb[58].mxu0 %v26974_v40  ;;  %21057 = vmatprep.mubr.f32.mxu1 %v27023_v44 }
 0x807   : > { %21210 = vmatprep.mubr.f32.mxu0 %v26985_v1 }
 0x809   : > { %21058 = vmatmul.mubr.f32.gmra.mrb[142].mxu1 %v27050_v3 }
 0x80a   : > { %21211 = vmatmul.mubr.f32.gmra.mrb[60].mxu0 %v27018_v59  ;;  %21060 = vmatprep.mubr.f32.mxu1 %v27058_v10 }
 0x80b   : > { %21213 = vmatprep.mubr.f32.mxu0 %v27023_v44 }
 0x80d   : > { %21061 = vmatmul.mubr.f32.gmra.mrb[144].mxu1 %v27072_v47 }
 0x80e   : > { %21214 = vmatmul.mubr.f32.gmra.mrb[62].mxu0 %v27050_v3  ;;  %21065 = vmatprep.mubr.f32.mxu1 %v26856_v0 }
 0x80f   : > { %21216 = vmatprep.mubr.f32.mxu0 %v27058_v10 }
 0x811   : > { %21066 = vmatmul.mubr.f32.vlgmr.msra.gmra.mrb[130].mxu1 %v26891_v24 }
 0x812   : > { %21090 = vmatpush3.msra.mxu1 %v26979_v42  ;;  %21217 = vmatmul.mubr.f32.gmra.mrb[64].mxu0 %v27072_v47 }
 0x813   : > { %21115 = vmatprep.subr.mxu1 %v27016_v6  ;;  %21068 = vmatprep.mubr.f32.mxu1 %v26897_v29 }
 0x814   : > { %21221 = vmatprep.mubr.f32.mxu0 %v26856_v0  ;;  %v30722_v0 = vld [vmem:[#allocation34_spill] sm:$0xff] }
 0x815   : > { %21069 = vmatmul.mubr.f32.gmra.mrb[132].mxu1 %v26915_v43 }
 0x816   : > { %21222 = vmatmul.mubr.f32.vlgmr.msra.gmra.mrb[50].mxu0 %v26891_v24  ;;  %21071 = vmatprep.mubr.f32.mxu1 %v26923_v9  ;;  %v30724_v24 = vld [vmem:[#allocation4_spill] sm:$0xff] }
 0x817   : > { %21246 = vmatpush3.msra.mxu0 %v27013_v14  ;;  %21224 = vmatprep.mubr.f32.mxu0 %v26897_v29 }
 0x818   : > { %21271 = vmatprep.subr.mxu0 %v27045_v45 }
 0x819   : > { %21072 = vmatmul.mubr.f32.gmra.mrb[134].mxu1 %v26929_v12 }
 0x81a   : > { %21225 = vmatmul.mubr.f32.gmra.mrb[52].mxu0 %v26915_v43  ;;  %21074 = vmatprep.mubr.f32.mxu1 %v26935_v56 }
 0x81b   : > { %21227 = vmatprep.mubr.f32.mxu0 %v26923_v9 }
 0x81d   : > { %21075 = vmatmul.mubr.f32.gmra.mrb[136].mxu1 %v26969_v48 }
 0x81e   : > { %21228 = vmatmul.mubr.f32.gmra.mrb[54].mxu0 %v26929_v12  ;;  %21077 = vmatprep.mubr.f32.mxu1 %v26972_v62 }
 0x81f   : > { %21230 = vmatprep.mubr.f32.mxu0 %v26935_v56 }
 0x821   : > { %21078 = vmatmul.mubr.f32.gmra.mrb[138].mxu1 %v27008_v31 }
 0x822   : > { %21231 = vmatmul.mubr.f32.gmra.mrb[56].mxu0 %v26969_v48  ;;  %21080 = vmatprep.mubr.f32.mxu1 %v27021_v16 }
 0x823   : > { %21233 = vmatprep.mubr.f32.mxu0 %v26972_v62 }
 0x825   : > { %21081 = vmatmul.mubr.f32.gmra.mrb[140].mxu1 %v27048_v25 }
 0x826   : > { %21234 = vmatmul.mubr.f32.gmra.mrb[58].mxu0 %v27008_v31  ;;  %21083 = vmatprep.mubr.f32.mxu1 %v27056_v35 }
 0x827   : > { %21236 = vmatprep.mubr.f32.mxu0 %v27021_v16 }
 0x829   : > { %21084 = vmatmul.mubr.f32.gmra.mrb[142].mxu1 %v27070_v54 }
 0x82a   : > { %21237 = vmatmul.mubr.f32.gmra.mrb[60].mxu0 %v27048_v25  ;;  %21086 = vmatprep.mubr.f32.mxu1 %v27080_v41 }
 0x82b   : > { %21239 = vmatprep.mubr.f32.mxu0 %v27056_v35  ;;  %v30726_v35 = vld [vmem:[#allocation7_spill] sm:$0xff] }
 0x82d   : > { %21087 = vmatmul.mubr.f32.gmra.mrb[144].mxu1 %v27089_v20 }
 0x82e   : > { %21240 = vmatmul.mubr.f32.gmra.mrb[62].mxu0 %v27070_v54  ;;  %21091 = vmatprep.mubr.f32.mxu1 %v26859_v36 }
 0x82f   : > { %21242 = vmatprep.mubr.f32.mxu0 %v27080_v41 }
 0x831   : > { %21092 = vmatmul.mubr.f32.vlgmr.msra.gmra.mrb[130].mxu1 %v26912_v7 }
 0x832   : > { %21116 = vmatpush3.msra.mxu1 %v27016_v6  ;;  %21243 = vmatmul.mubr.f32.gmra.mrb[64].mxu0 %v27089_v20 }
 0x833   : > { %21141 = vmatprep.subr.mxu1 %v26979_v42  ;;  %21094 = vmatprep.mubr.f32.mxu1 %v26920_v55 }
 0x834   : > { %21247 = vmatprep.mubr.f32.mxu0 %v26859_v36  ;;  %v30723_v36 = vld [vmem:[#allocation3_spill] sm:$0xff] }
 0x835   : > { %21095 = vmatmul.mubr.f32.gmra.mrb[132].mxu1 %v26947_v51 }
 0x836   : > { %21248 = vmatmul.mubr.f32.vlgmr.msra.gmra.mrb[50].mxu0 %v26912_v7  ;;  %21097 = vmatprep.mubr.f32.mxu1 %v26953_v28 }
 0x837   : > { %21272 = vmatpush3.msra.mxu0 %v27045_v45  ;;  %21250 = vmatprep.mubr.f32.mxu0 %v26920_v55 }
 0x838   : > { %21297 = vmatprep.subr.mxu0 %v27013_v14 }
 0x839   : > { %21098 = vmatmul.mubr.f32.gmra.mrb[134].mxu1 %v26956_v61 }
 0x83a   : > { %21251 = vmatmul.mubr.f32.gmra.mrb[52].mxu0 %v26947_v51  ;;  %21100 = vmatprep.mubr.f32.mxu1 %v26966_v19 }
 0x83b   : > { %21253 = vmatprep.mubr.f32.mxu0 %v26953_v28 }
 0x83d   : > { %21101 = vmatmul.mubr.f32.gmra.mrb[136].mxu1 %v27002_v18 }
 0x83e   : > { %21254 = vmatmul.mubr.f32.gmra.mrb[54].mxu0 %v26956_v61  ;;  %21103 = vmatprep.mubr.f32.mxu1 %v27005_v4  ;;  %v25385_v61 = vld [vmem:[%s30278_s11] sm:$0xff]  }
 0x83f   : > { %21256 = vmatprep.mubr.f32.mxu0 %v26966_v19 }
 0x841   : > { %21104 = vmatmul.mubr.f32.gmra.mrb[138].mxu1 %v27042_v22 }
 0x842   : > { %21257 = vmatmul.mubr.f32.gmra.mrb[56].mxu0 %v27002_v18  ;;  %21106 = vmatprep.mubr.f32.mxu1 %v30722_v0 }
 0x843   : > { %21259 = vmatprep.mubr.f32.mxu0 %v27005_v4 }
 0x845   : > { %21107 = vmatmul.mubr.f32.gmra.mrb[140].mxu1 %v30723_v36 }
 0x846   : > { %21260 = vmatmul.mubr.f32.gmra.mrb[58].mxu0 %v27042_v22  ;;  %21109 = vmatprep.mubr.f32.mxu1 %v27077_v57 }
 0x847   : > { %21262 = vmatprep.mubr.f32.mxu0 %v30722_v0 }
 0x849   : > { %21110 = vmatmul.mubr.f32.gmra.mrb[142].mxu1 %v30724_v24 }
 0x84a   : > { %21263 = vmatmul.mubr.f32.gmra.mrb[60].mxu0 %v30723_v36  ;;  %21112 = vmatprep.mubr.f32.mxu1 %v27094_v46 }
 0x84b   : > { %21265 = vmatprep.mubr.f32.mxu0 %v27077_v57 }
 0x84d   : > { %21113 = vmatmul.mubr.f32.gmra.mrb[144].mxu1 %v27099_v30 }
 0x84e   : > { %21266 = vmatmul.mubr.f32.gmra.mrb[62].mxu0 %v30724_v24  ;;  %21117 = vmatprep.mubr.f32.mxu1 %v26853_v34 }
 0x84f   : > { %21268 = vmatprep.mubr.f32.mxu0 %v27094_v46 }
 0x851   : > { %21118 = vmatmul.mubr.f32.vlgmr.msra.gmra.mrb[130].mxu1 %v26877_v38 }
 0x852   : > { %21142 = vmatpush3.msra.mxu1 %v26979_v42  ;;  %21269 = vmatmul.mubr.f32.gmra.mrb[64].mxu0 %v27099_v30 }
 0x853   : > { %21120 = vmatprep.mubr.f32.mxu1 %v26882_v52  ;;  %21273 = vmatprep.mubr.f32.mxu0 %v26853_v34 }
 0x854   : > { %21323 = vmatprep.subr.bf16.mxu1 %v25385_v61 }
 0x855   : > { %21121 = vmatmul.mubr.f32.gmra.mrb[132].mxu1 %v26893_v60 }
 0x856   : > { %21274 = vmatmul.mubr.f32.vlgmr.msra.gmra.mrb[50].mxu0 %v26877_v38  ;;  %21123 = vmatprep.mubr.f32.mxu1 %v26899_v50 }
 0x857   : > { %21298 = vmatpush3.msra.mxu0 %v27013_v14  ;;  %21276 = vmatprep.mubr.f32.mxu0 %v26882_v52 }
 0x859   : > { %21124 = vmatmul.mubr.f32.gmra.mrb[134].mxu1 %v26907_v27 }
 0x85a   : > { %21277 = vmatmul.mubr.f32.gmra.mrb[52].mxu0 %v26893_v60  ;;  %21126 = vmatprep.mubr.f32.mxu1 %v26909_v53 }
 0x85b   : > { %21279 = vmatprep.mubr.f32.mxu0 %v26899_v50 }
 0x85d   : > { %21127 = vmatmul.mubr.f32.gmra.mrb[136].mxu1 %v26937_v21 }
 0x85e   : > { %21280 = vmatmul.mubr.f32.gmra.mrb[54].mxu0 %v26907_v27  ;;  %21129 = vmatprep.mubr.f32.mxu1 %v26939_v2 }
 0x85f   : > { %21282 = vmatprep.mubr.f32.mxu0 %v26909_v53 }
 0x861   : > { %21130 = vmatmul.mubr.f32.gmra.mrb[138].mxu1 %v26974_v40 }
 0x862   : > { %21283 = vmatmul.mubr.f32.gmra.mrb[56].mxu0 %v26937_v21  ;;  %21132 = vmatprep.mubr.f32.mxu1 %v26985_v1 }
 0x863   : > { %21285 = vmatprep.mubr.f32.mxu0 %v26939_v2 }
 0x865   : > { %21133 = vmatmul.mubr.f32.gmra.mrb[140].mxu1 %v27018_v59 }
 0x866   : > { %21286 = vmatmul.mubr.f32.gmra.mrb[58].mxu0 %v26974_v40  ;;  %21135 = vmatprep.mubr.f32.mxu1 %v27023_v44 }
 0x867   : > { %21288 = vmatprep.mubr.f32.mxu0 %v26985_v1 }
 0x869   : > { %21136 = vmatmul.mubr.f32.gmra.mrb[142].mxu1 %v27050_v3 }
 0x86a   : > { %21289 = vmatmul.mubr.f32.gmra.mrb[60].mxu0 %v27018_v59  ;;  %21138 = vmatprep.mubr.f32.mxu1 %v27058_v10 }
 0x86b   : > { %21291 = vmatprep.mubr.f32.mxu0 %v27023_v44 }
 0x86d   : > { %21139 = vmatmul.mubr.f32.gmra.mrb[144].mxu1 %v27072_v47 }
 0x86e   : > { %21292 = vmatmul.mubr.f32.gmra.mrb[62].mxu0 %v27050_v3  ;;  %21143 = vmatprep.mubr.f32.mxu1 %v26853_v34 }
 0x86f   : > { %21294 = vmatprep.mubr.f32.mxu0 %v27058_v10 }
 0x871   : > { %21144 = vmatmul.mubr.f32.vlgmr.msra.gmra.mrb[130].mxu1 %v26877_v38 }
 0x872   : > { %21295 = vmatmul.mubr.f32.gmra.mrb[64].mxu0 %v27072_v47  ;;  %21146 = vmatprep.mubr.f32.mxu1 %v26882_v52 }
 0x873   : > { %21299 = vmatprep.mubr.f32.mxu0 %v26853_v34  ;;  %21324 = vmatpush3.bf16.msra.mxu1 %v25385_v61 }
 0x875   : > { %21147 = vmatmul.mubr.f32.gmra.mrb[132].mxu1 %v26893_v60 }
 0x876   : > { %21300 = vmatmul.mubr.f32.vlgmr.msra.gmra.mrb[50].mxu0 %v26877_v38  ;;  %21149 = vmatprep.mubr.f32.mxu1 %v26899_v50 }
 0x877   : > { %21302 = vmatprep.mubr.f32.mxu0 %v26882_v52 }
 0x879   : > { %21150 = vmatmul.mubr.f32.gmra.mrb[134].mxu1 %v26907_v27 }
 0x87a   : > { %21303 = vmatmul.mubr.f32.gmra.mrb[52].mxu0 %v26893_v60  ;;  %21152 = vmatprep.mubr.f32.mxu1 %v26909_v53 }
 0x87b   : > { %21305 = vmatprep.mubr.f32.mxu0 %v26899_v50 }
 0x87d   : > { %21153 = vmatmul.mubr.f32.gmra.mrb[136].mxu1 %v26937_v21 }
 0x87e   : > { %21306 = vmatmul.mubr.f32.gmra.mrb[54].mxu0 %v26907_v27  ;;  %21155 = vmatprep.mubr.f32.mxu1 %v26939_v2 }
 0x87f   : > { %21308 = vmatprep.mubr.f32.mxu0 %v26909_v53 }
 0x881   : > { %21156 = vmatmul.mubr.f32.gmra.mrb[138].mxu1 %v26974_v40 }
 0x882   : > { %21309 = vmatmul.mubr.f32.gmra.mrb[56].mxu0 %v26937_v21  ;;  %21158 = vmatprep.mubr.f32.mxu1 %v26985_v1 }
 0x883   : > { %21311 = vmatprep.mubr.f32.mxu0 %v26939_v2 }
 0x885   : > { %21159 = vmatmul.mubr.f32.gmra.mrb[140].mxu1 %v27018_v59 }
 0x886   : > { %21312 = vmatmul.mubr.f32.gmra.mrb[58].mxu0 %v26974_v40  ;;  %21161 = vmatprep.mubr.f32.mxu1 %v27023_v44 }
 0x887   : > { %21314 = vmatprep.mubr.f32.mxu0 %v26985_v1 }
 0x889   : > { %21162 = vmatmul.mubr.f32.gmra.mrb[142].mxu1 %v27050_v3 }
 0x88a   : > { %21315 = vmatmul.mubr.f32.gmra.mrb[60].mxu0 %v27018_v59  ;;  %21164 = vmatprep.mubr.f32.mxu1 %v27058_v10 }
 0x88b   : > { %21317 = vmatprep.mubr.f32.mxu0 %v27023_v44  ;;  %v25386_v44 = vld [vmem:[%s30278_s11 + $0x8] sm:$0xff]  }
 0x88c   : > { %21341 = vmatprep.subr.bf16.mxu1 %v25386_v44 }
 0x88d   : > { %21165 = vmatmul.mubr.f32.gmra.mrb[144].mxu1 %v27072_v47 }
 0x88e   : > { %21318 = vmatmul.mubr.f32.gmra.mrb[62].mxu0 %v27050_v3  ;;  %v30725_v3 = vld [vmem:[#allocation9_spill] sm:$0xff] }
 0x88f   : > { %21320 = vmatprep.mubr.f32.mxu0 %v27058_v10 }
 0x892   : > { %21321 = vmatmul.mubr.f32.gmra.mrb[64].mxu0 %v27072_v47 }
 0x944   : > { %v21145_v34 = vpop.f32.mrb[130].mxu1 }
 0x945   : > { %6978 = vperm.xlu1 %25288, %v21145_v34   ;;  %v5786_v38 = vpop.f32.mrb[131].mxu1 }
 0x946   : > { %6973 = vperm.xlu0 %25287, %v5786_v38  }
 0x948   : > { %v21148_v52 = vpop.f32.mrb[132].mxu1 }
 0x949   : > { %v21301_v60 = vpop.f32.mrb[50].mxu0  ;;  %6988 = vperm.xlu1 %25288, %v21148_v52   ;;  %v5798_v29 = vpop.f32.mrb[133].mxu1  ;;  %v27298_v52 = vld [vmem:[%s30278_s11 + $0x10] sm:$0xff]  }
 0x94a   : > { %v6877_v50 = vpop.f32.mrb[51].mxu0  ;;  %6983 = vperm.xlu0 %25287, %v5798_v29  }
 0x94c   : > { %v21151_v27 = vpop.f32.mrb[134].mxu1 }
 0x94d   : > { %v21304_v53 = vpop.f32.mrb[52].mxu0  ;;  %7074 = vperm.xlu1 %25288, %v21301_v60   ;;  %v5810_v7 = vpop.f32.mrb[135].mxu1 }
 0x94e   : > { %v6889_v43 = vpop.f32.mrb[53].mxu0  ;;  %7069 = vperm.xlu0 %25287, %v6877_v50   ;;  %v30729_v50 = vld [vmem:[#allocation17_spill] sm:$0xff] }
 0x950   : > { %v21154_v55 = vpop.f32.mrb[136].mxu1 }
 0x951   : > { %v21307_v9 = vpop.f32.mrb[54].mxu0  ;;  %7084 = vperm.xlu1 %25288, %v21304_v53   ;;  %v5822_v12 = vpop.f32.mrb[137].mxu1  ;;  %v30730_v53 = vld [vmem:[#allocation15_spill] sm:$0xff] }
 0x952   : > { %v6901_v56 = vpop.f32.mrb[55].mxu0  ;;  %7079 = vperm.xlu0 %25287, %v6889_v43  }
 0x954   : > { %v21157_v21 = vpop.f32.mrb[138].mxu1 }
 0x955   : > { %v21310_v2 = vpop.f32.mrb[56].mxu0  ;;  %6998 = vperm.xlu1 %25288, %v21151_v27   ;;  %v5834_v51 = vpop.f32.mrb[139].mxu1 }
 0x956   : > { %v6913_v28 = vpop.f32.mrb[57].mxu0  ;;  %6993 = vperm.xlu0 %25287, %v5810_v7  }
 0x958   : > { %v21160_v19 = vpop.f32.mrb[140].mxu1 }
 0x959   : > { %v21313_v48 = vpop.f32.mrb[58].mxu0  ;;  %7008 = vperm.xlu1 %25288, %v21154_v55   ;;  %v5846_v62 = vpop.f32.mrb[141].mxu1 }
 0x95a   : > { %v6925_v40 = vpop.f32.mrb[59].mxu0  ;;  %7003 = vperm.xlu0 %25287, %v5822_v12  }
 0x95c   : > { %v21163_v42 = vpop.f32.mrb[142].mxu1 }
 0x95d   : > { %v21316_v1 = vpop.f32.mrb[60].mxu0  ;;  %7094 = vperm.xlu1 %25288, %v21307_v9   ;;  %v5858_v8 = vpop.f32.mrb[143].mxu1 }
 0x95e   : > { %v6937_v18 = vpop.f32.mrb[61].mxu0  ;;  %7089 = vperm.xlu0 %25287, %v6901_v56   ;;  %v30731_v56 = vld [vmem:[#allocation16_spill] sm:$0xff] }
 0x960   : > { %v21166_v4 = vpop.f32.mrb[144].mxu1 }
 0x961   : > { %v21319_v31 = vpop.f32.mrb[62].mxu0  ;;  %7104 = vperm.xlu1 %25288, %v21310_v2   ;;  %v5870_v14 = vpop.f32.mrb[145].mxu1 }
 0x962   : > { %v6949_v6 = vpop.f32.mrb[63].mxu0  ;;  %7099 = vperm.xlu0 %25287, %v6913_v28  }
 0x965   : > { %v21322_v59 = vpop.f32.mrb[64].mxu0  ;;  %7018 = vperm.xlu1 %25288, %v21157_v21  }
 0x966   : > { %v6961_v16 = vpop.f32.mrb[65].mxu0  ;;  %7013 = vperm.xlu0 %25287, %v5834_v51   ;;  %v30732_v51 = vld [vmem:[#allocation12_spill] sm:$0xff] }
 0x969   : > { %7028 = vperm.xlu1 %25288, %v21160_v19  }
 0x96a   : > { %7023 = vperm.xlu0 %25287, %v5846_v62  }
 0x96d   : > { %7114 = vperm.xlu1 %25288, %v21313_v48  }
 0x96e   : > { %7109 = vperm.xlu0 %25287, %v6925_v40  }
 0x971   : > { %7124 = vperm.xlu1 %25288, %v21316_v1  }
 0x972   : > { %7119 = vperm.xlu0 %25287, %v6937_v18  }
 0x975   : > { %7038 = vperm.xlu1 %25288, %v21163_v42  }
 0x976   : > { %7033 = vperm.xlu0 %25287, %v5858_v8  }
 0x979   : > { %7048 = vperm.xlu1 %25288, %v21166_v4  }
 0x97a   : > { %7043 = vperm.xlu0 %25287, %v5870_v14  }
 0x97d   : > { %7134 = vperm.xlu1 %25288, %v21319_v31  }
 0x97e   : > { %7129 = vperm.xlu0 %25287, %v6949_v6  }
 0x981   : > { %7144 = vperm.xlu1 %25288, %v21322_v59  }
 0x982   : > { %7139 = vperm.xlu0 %25287, %v6961_v16  }
 0x9c4   : > { %v6979_v33 = vpop.permute.xlu1 %6978 }
 0x9c5   : > { %v6974_v22 = vpop.permute.xlu0 %6973  ;;  %v7052_v30 = vmul.f32 %v6979_v33, %v30725_v3 }
 0x9c6   : > { %v7051_v10 = vmul.f32 %v6974_v22, %v30726_v35  ;;  %v30733_v22 = vld [vmem:[#allocation25_spill] sm:$0xff] }
 0x9c8   : > { %v6989_v45 = vpop.permute.xlu1 %6988 }
 0x9c9   : > { %v6984_v25 = vpop.permute.xlu0 %6983  ;;  %v7054_v57 = vmul.f32 %v30727_v39, %v6989_v45  ;;  %v30736_v39 = vld [vmem:[#allocation20_spill] sm:$0xff] }
 0x9ca   : > { %v7053_v37 = vmul.f32 %v30728_v63, %v6984_v25  ;;  %v30734_v25 = vld [vmem:[#allocation23_spill] sm:$0xff] }
 0x9cc   : > { %v7075_v58 = vpop.permute.xlu1 %7074 }
 0x9cd   : > { %v7148_v49 = vadd.f32 %v7075_v58, %v7052_v30  ;;  %v7070_v54 = vpop.permute.xlu0 %7069 }
 0x9ce   : > { %v7147_v47 = vadd.f32 %v7070_v54, %v7051_v10 }
 0x9cf   : > { %vm7164_vm6 = vcmp.gt.f32.partialorder %v7148_v49, 0.0  ;;  %v7180_v41 = vmul.f32 0.2, %v7148_v49 }
 0x9d0   : > { %vm7163_vm7 = vcmp.gt.f32.partialorder %v7147_v47, 0.0  ;;  %v7179_v20 = vmul.f32 0.2, %v7147_v47  ;;  %v7085_v5 = vpop.permute.xlu1 %7084 }
 0x9d1   : > { %v7196_v13 = vsel %vm7164_vm6, %v7148_v49, %v7180_v41  ;;  %v7150_v46 = vadd.f32 %v7085_v5, %v7054_v57  ;;  %v7080_v23 = vpop.permute.xlu0 %7079  ;;  %v30735_v49 = vld [vmem:[#allocation24_spill] sm:$0xff] }
 0x9d2   : > { %v7195_v11 = vsel %vm7163_vm7, %v7147_v47, %v7179_v20  ;;  %v7149_v15 = vadd.f32 %v7080_v23, %v7053_v37 }
 0x9d3   : > { %v27289_v17 = vpack.c.bf16 %v7196_v13, %v7195_v11  ;;  %vm7166_vm8 = vcmp.gt.f32.partialorder %v7150_v46, 0.0  ;;  %v7182_v26 = vmul.f32 0.2, %v7150_v46 }
 0x9d4   : > { %vm7165_vm9 = vcmp.gt.f32.partialorder %v7149_v15, 0.0  ;;  %v7181_v32 = vmul.f32 0.2, %v7149_v15  ;;  %v6999_v0 = vpop.permute.xlu1 %6998 }
 0x9d5   : > { %v7198_v36 = vsel %vm7166_vm8, %v7150_v46, %v7182_v26  ;;  %21325 = vmatprep.mubr.msk.bf16.mxu1 %vm4724_vm3, %v27289_v17  ;;  %v6994_v24 = vpop.permute.xlu0 %6993  ;;  %v7056_v27 = vmul.f32 %v6999_v0, %v30729_v50 }
 0x9d6   : > { %v7197_v34 = vsel %vm7165_vm9, %v7149_v15, %v7181_v32  ;;  %v7055_v7 = vmul.f32 %v6994_v24, %v30730_v53 }
 0x9d7   : > { %v27293_v38 = vpack.c.bf16 %v7198_v36, %v7197_v34 }
 0x9d8   : > { %v7009_v60 = vpop.permute.xlu1 %7008 }
 0x9d9   : > { %21326 = vmatmul.mubr.msk.bf16.vlgmr.msra.gmra.mrb[148].mxu1 %vm4724_vm3, %v27293_v38  ;;  %v7004_v29 = vpop.permute.xlu0 %7003  ;;  %v7058_v21 = vmul.f32 %v30731_v56, %v7009_v60 }
 0x9da   : > { %21342 = vmatpush3.bf16.msra.mxu1 %v25386_v44  ;;  %v7057_v28 = vmul.f32 %v30732_v51, %v7004_v29  ;;  %v30737_v29 = vld [vmem:[#allocation33_spill] sm:$0xff] }
 0x9db   : > { %21423 = vmatprep.subr.bf16.mxu1 %v27298_v52 }
 0x9dc   : > { %v7095_v43 = vpop.permute.xlu1 %7094 }
 0x9dd   : > { %v7152_v55 = vadd.f32 %v7095_v43, %v7056_v27  ;;  %v7090_v9 = vpop.permute.xlu0 %7089  ;;  %v30738_v27 = vld [vmem:[#allocation31_spill] sm:$0xff] }
 0x9de   : > { %v7151_v12 = vadd.f32 %v7090_v9, %v7055_v7 }
 0x9df   : > { %vm7168_vm10 = vcmp.gt.f32.partialorder %v7152_v55, 0.0  ;;  %v7184_v2 = vmul.f32 0.2, %v7152_v55 }
 0x9e0   : > { %vm7167_vm11 = vcmp.gt.f32.partialorder %v7151_v12, 0.0  ;;  %v7183_v61 = vmul.f32 0.2, %v7151_v12  ;;  %v7105_v19 = vpop.permute.xlu1 %7104 }
 0x9e1   : > { %v7200_v48 = vsel %vm7168_vm10, %v7152_v55, %v7184_v2  ;;  %v7154_v62 = vadd.f32 %v7105_v19, %v7058_v21  ;;  %v7100_v40 = vpop.permute.xlu0 %7099  ;;  %v30740_v2 = vld [vmem:[#allocation28_spill] sm:$0xff] }
 0x9e2   : > { %v7199_v42 = vsel %vm7167_vm11, %v7151_v12, %v7183_v61  ;;  %v7153_v1 = vadd.f32 %v7100_v40, %v7057_v28  ;;  %v30739_v12 = vld [vmem:[#allocation32_spill] sm:$0xff] }
 0x9e3   : > { %v27307_v8 = vpack.c.bf16 %v7200_v48, %v7199_v42  ;;  %vm7170_vm12 = vcmp.gt.f32.partialorder %v7154_v62, 0.0  ;;  %v7186_v18 = vmul.f32 0.2, %v7154_v62 }
 0x9e4   : > { %vm7169_vm13 = vcmp.gt.f32.partialorder %v7153_v1, 0.0  ;;  %v7185_v4 = vmul.f32 0.2, %v7153_v1  ;;  %v7019_v31 = vpop.permute.xlu1 %7018 }
 0x9e5   : > { %v7202_v14 = vsel %vm7170_vm12, %v7154_v62, %v7186_v18  ;;  %21329 = vmatprep.mubr.msk.bf16.mxu1 %vm4724_vm3, %v27307_v8  ;;  %v7014_v6 = vpop.permute.xlu0 %7013  ;;  %v7060_v45 = vmul.f32 %v7019_v31, %v30733_v22 }
 0x9e6   : > { %v7201_v59 = vsel %vm7169_vm13, %v7153_v1, %v7185_v4  ;;  %v7059_v3 = vmul.f32 %v7014_v6, %v30734_v25 }
 0x9e7   : > { %v27311_v16 = vpack.c.bf16 %v7202_v14, %v7201_v59  ;;  %v25388_v59 = vld [vmem:[%s30278_s11 + $0x18] sm:$0xff]  }
 0x9e8   : > { %v7029_v44 = vpop.permute.xlu1 %7028 }
 0x9e9   : > { %21330 = vmatmul.mubr.msk.bf16.gmra.mrb[152].mxu1 %vm4724_vm3, %v27311_v16  ;;  %v7024_v33 = vpop.permute.xlu0 %7023  ;;  %v7062_v54 = vmul.f32 %v30735_v49, %v7029_v44 }
 0x9ea   : > { %v7061_v57 = vmul.f32 %v30736_v39, %v7024_v33 }
 0x9ec   : > { %v7115_v30 = vpop.permute.xlu1 %7114 }
 0x9ed   : > { %v7156_v35 = vadd.f32 %v7115_v30, %v7060_v45  ;;  %v7110_v10 = vpop.permute.xlu0 %7109 }
 0x9ee   : > { %v7155_v58 = vadd.f32 %v7110_v10, %v7059_v3 }
 0x9ef   : > { %vm7172_vm14 = vcmp.gt.f32.partialorder %v7156_v35, 0.0  ;;  %v7188_v47 = vmul.f32 0.2, %v7156_v35 }
 0x9f0   : > { %vm7171_vm15 = vcmp.gt.f32.partialorder %v7155_v58, 0.0  ;;  %v7187_v41 = vmul.f32 0.2, %v7155_v58  ;;  %v7125_v63 = vpop.permute.xlu1 %7124 }
 0x9f1   : > { %v7204_v37 = vsel %vm7172_vm14, %v7156_v35, %v7188_v47  ;;  %v7158_v20 = vadd.f32 %v7125_v63, %v7062_v54  ;;  %v7120_v5 = vpop.permute.xlu0 %7119 }
 0x9f2   : > { %v7203_v13 = vsel %vm7171_vm15, %v7155_v58, %v7187_v41  ;;  %v7157_v46 = vadd.f32 %v7120_v5, %v7061_v57 }
 0x9f3   : > { %v27319_v23 = vpack.c.bf16 %v7204_v37, %v7203_v13  ;;  %vm7174_vm0 = vcmp.gt.f32.partialorder %v7158_v20, 0.0  ;;  %v7190_v11 = vmul.f32 0.2, %v7158_v20 }
 0x9f4   : > { %vm7173_vm1 = vcmp.gt.f32.partialorder %v7157_v46, 0.0  ;;  %v7189_v15 = vmul.f32 0.2, %v7157_v46  ;;  %v7039_v26 = vpop.permute.xlu1 %7038 }
 0x9f5   : > { %v7206_v32 = vsel %vm7174_vm0, %v7158_v20, %v7190_v11  ;;  %21333 = vmatprep.mubr.msk.bf16.mxu1 %vm4724_vm3, %v27319_v23  ;;  %v7034_v0 = vpop.permute.xlu0 %7033  ;;  %v7064_v50 = vmul.f32 %v7039_v26, %v30737_v29 }
 0x9f6   : > { %v7205_v36 = vsel %vm7173_vm1, %v7157_v46, %v7189_v15  ;;  %v7063_v53 = vmul.f32 %v7034_v0, %v30738_v27 }
 0x9f7   : > { %v7216_v24 = vpack.c.bf16 %v7206_v32, %v7205_v36 }
 0x9f8   : > { %v7049_v34 = vpop.permute.xlu1 %7048 }
 0x9f9   : > { %21334 = vmatmul.mubr.msk.bf16.gmra.mrb[156].mxu1 %vm4724_vm3, %v7216_v24  ;;  %v7044_v60 = vpop.permute.xlu0 %7043  ;;  %v7066_v56 = vmul.f32 %v30739_v12, %v7049_v34 }
 0x9fa   : > { %v7065_v51 = vmul.f32 %v30740_v2, %v7044_v60 }
 0x9fc   : > { %v7135_v7 = vpop.permute.xlu1 %7134 }
 0x9fd   : > { %v7160_v43 = vadd.f32 %v7135_v7, %v7064_v50  ;;  %v7130_v55 = vpop.permute.xlu0 %7129 }
 0x9fe   : > { %v7159_v9 = vadd.f32 %v7130_v55, %v7063_v53 }
 0x9ff   : > { %vm7176_vm2 = vcmp.gt.f32.partialorder %v7160_v43, 0.0  ;;  %v7192_v21 = vmul.f32 0.2, %v7160_v43 }
 0xa00   : > { %vm7175_vm6 = vcmp.gt.f32.partialorder %v7159_v9, 0.0  ;;  %v7191_v28 = vmul.f32 0.2, %v7159_v9  ;;  %v7145_v61 = vpop.permute.xlu1 %7144 }
 0xa01   : > { %v7208_v19 = vsel %vm7176_vm2, %v7160_v43, %v7192_v21  ;;  %v7162_v48 = vadd.f32 %v7145_v61, %v7066_v56  ;;  %v7140_v62 = vpop.permute.xlu0 %7139 }
 0xa02   : > { %v7207_v40 = vsel %vm7175_vm6, %v7159_v9, %v7191_v28  ;;  %v7161_v42 = vadd.f32 %v7140_v62, %v7065_v51 }
 0xa03   : > { %v7217_v1 = vpack.c.bf16 %v7208_v19, %v7207_v40  ;;  %vm7178_vm7 = vcmp.gt.f32.partialorder %v7162_v48, 0.0  ;;  %v7194_v18 = vmul.f32 0.2, %v7162_v48  ;;  %v25390_v19 = vld [vmem:[%s30277_s10 + $0x48] sm:$0xff]   ;;  %v25391_v40 = vld [vmem:[%s30277_s10 + $0x50] sm:$0xff]  }
 0xa04   : > { %vm7177_vm8 = vcmp.gt.f32.partialorder %v7161_v42, 0.0  ;;  %v7193_v4 = vmul.f32 0.2, %v7161_v42 }
 0xa05   : > { %v7210_v31 = vsel %vm7178_vm7, %v7162_v48, %v7194_v18  ;;  %21337 = vmatprep.mubr.msk.bf16.mxu1 %vm4724_vm3, %v7217_v1 }
 0xa06   : > { %v7209_v14 = vsel %vm7177_vm8, %v7161_v42, %v7193_v4 }
 0xa07   : > { %v7218_v6 = vpack.c.bf16 %v7210_v31, %v7209_v14  ;;  %v25392_v31 = vld [vmem:[%s30277_s10 + $0x58] sm:$0xff]  }
 0xa09   : > { %21338 = vmatmul.mubr.msk.bf16.gmra.mrb[160].mxu1 %vm4724_vm3, %v7218_v6 }
 0xa0a   : > { %21343 = vmatprep.mubr.msk.bf16.mxu1 %vm4724_vm3, %v27289_v17 }
 0xa11   : > { %21344 = vmatmul.mubr.msk.bf16.vlgmr.msra.gmra.mrb[164].mxu1 %vm4724_vm3, %v27293_v38 }
 0xa12   : > { %21347 = vmatprep.mubr.msk.bf16.mxu1 %vm4724_vm3, %v27307_v8  ;;  %21424 = vmatpush3.bf16.msra.mxu1 %v27298_v52 }
 0xa13   : > { %21473 = vmatprep.subr.bf16.mxu1 %v25388_v59 }
 0xa19   : > { %21348 = vmatmul.mubr.msk.bf16.gmra.mrb[168].mxu1 %vm4724_vm3, %v27311_v16 }
 0xa1a   : > { %21351 = vmatprep.mubr.msk.bf16.mxu1 %vm4724_vm3, %v27319_v23 }
 0xa21   : > { %21352 = vmatmul.mubr.msk.bf16.gmra.mrb[172].mxu1 %vm4724_vm3, %v7216_v24 }
 0xa22   : > { %21355 = vmatprep.mubr.msk.bf16.mxu1 %vm4724_vm3, %v7217_v1 }
 0xa29   : > { %21356 = vmatmul.mubr.msk.bf16.gmra.mrb[176].mxu1 %vm4724_vm3, %v7218_v6 }
 0xa2a   : > { %21425 = vmatprep.mubr.msk.bf16.mxu1 %vm4724_vm3, %v27289_v17 }
 0xa31   : > { %21426 = vmatmul.mubr.msk.bf16.vlgmr.msra.gmra.mrb[180].mxu1 %vm4724_vm3, %v27293_v38 }
 0xa32   : > { %21429 = vmatprep.mubr.msk.bf16.mxu1 %vm4724_vm3, %v27307_v8  ;;  %21474 = vmatpush3.bf16.msra.mxu1 %v25388_v59  ;;  %v25393_v59 = vld [vmem:[%s30277_s10 + $0x60] sm:$0xff]  }
 0xa39   : > { %21430 = vmatmul.mubr.msk.bf16.gmra.mrb[184].mxu1 %vm4724_vm3, %v27311_v16 }
 0xa3a   : > { %21433 = vmatprep.mubr.msk.bf16.mxu1 %vm4724_vm3, %v27319_v23 }
 0xa41   : > { %21434 = vmatmul.mubr.msk.bf16.gmra.mrb[188].mxu1 %vm4724_vm3, %v7216_v24 }
 0xa42   : > { %21437 = vmatprep.mubr.msk.bf16.mxu1 %vm4724_vm3, %v7217_v1 }
 0xa49   : > { %21438 = vmatmul.mubr.msk.bf16.gmra.mrb[192].mxu1 %vm4724_vm3, %v7218_v6 }
 0xa4a   : > { %21475 = vmatprep.mubr.msk.bf16.mxu1 %vm4724_vm3, %v27289_v17  ;;  %v25389_v17 = vld [vmem:[%s30277_s10 + $0x40] sm:$0xff]  }
 0xa4b   : > { %21375 = vmatprep.mubr.bf16.mxu0 %v25389_v17 }
 0xa51   : > { %21476 = vmatmul.mubr.msk.bf16.vlgmr.msra.gmra.mrb[196].mxu1 %vm4724_vm3, %v27293_v38 }
 0xa52   : > { %21479 = vmatprep.mubr.msk.bf16.mxu1 %vm4724_vm3, %v27307_v8 }
 0xa59   : > { %21480 = vmatmul.mubr.msk.bf16.gmra.mrb[200].mxu1 %vm4724_vm3, %v27311_v16 }
 0xa5a   : > { %21483 = vmatprep.mubr.msk.bf16.mxu1 %vm4724_vm3, %v27319_v23 }
 0xa61   : > { %21484 = vmatmul.mubr.msk.bf16.gmra.mrb[204].mxu1 %vm4724_vm3, %v7216_v24 }
 0xa62   : > { %21487 = vmatprep.mubr.msk.bf16.mxu1 %vm4724_vm3, %v7217_v1 }
 0xa69   : > { %21488 = vmatmul.mubr.msk.bf16.gmra.mrb[208].mxu1 %vm4724_vm3, %v7218_v6 }
 0xaac   : > { %v21327_v38 = vpop.f32.mrb[148].mxu1 }
 0xaad   : > { %v7285_v52 = vpop.f32.mrb[149].mxu1 }
 0xaae   : > { %v21328_v8 = vpop.f32.mrb[150].mxu1 }
 0xaaf   : > { %v27376_v44 = vpack.c.bf16 %v21328_v8, %v21327_v38  ;;  %v7288_v16 = vpop.f32.mrb[151].mxu1 }
 0xab0   : > { %v27378_v33 = vpack.c.bf16 %v7288_v16, %v7285_v52 }
 0xabc   : > { %v21331_v22 = vpop.f32.mrb[152].mxu1 }
 0xabd   : > { %v7301_v45 = vpop.f32.mrb[153].mxu1 }
 0xabe   : > { %v21332_v25 = vpop.f32.mrb[154].mxu1 }
 0xabf   : > { %v27380_v3 = vpack.c.bf16 %v21332_v25, %v21331_v22  ;;  %v7304_v30 = vpop.f32.mrb[155].mxu1  ;;  %v25395_v22 = vld [vmem:[%s30277_s10 + $0x70] sm:$0xff]  }
 0xac0   : > { %v27382_v35 = vpack.c.bf16 %v7304_v30, %v7301_v45 }
 0xacc   : > { %v21335_v10 = vpop.f32.mrb[156].mxu1 }
 0xacd   : > { %v7317_v58 = vpop.f32.mrb[157].mxu1 }
 0xace   : > { %v21336_v49 = vpop.f32.mrb[158].mxu1 }
 0xacf   : > { %v27384_v54 = vpack.c.bf16 %v21336_v49, %v21335_v10  ;;  %v7320_v47 = vpop.f32.mrb[159].mxu1  ;;  %v25397_v49 = vld [vmem:[%s30277_s10] sm:$0xff]  }
 0xad0   : > { %v27386_v39 = vpack.c.bf16 %v7320_v47, %v7317_v58 }
 0xadc   : > { %v21339_v57 = vpop.f32.mrb[160].mxu1 }
 0xadd   : > { %v7333_v41 = vpop.f32.mrb[161].mxu1 }
 0xade   : > { %v21340_v63 = vpop.f32.mrb[162].mxu1 }
 0xadf   : > { %v27388_v37 = vpack.c.bf16 %v21340_v63, %v21339_v57  ;;  %v7336_v20 = vpop.f32.mrb[163].mxu1 }
 0xae0   : > { %v27390_v5 = vpack.c.bf16 %v7336_v20, %v7333_v41 }
 0xae4   : > { %v21345_v13 = vpop.f32.mrb[164].mxu1 }
 0xae5   : > { %v7415_v46 = vpop.f32.mrb[165].mxu1 }
 0xae6   : > { %v21346_v23 = vpop.f32.mrb[166].mxu1 }
 0xae7   : > { %v7496_v11 = vpack.c.bf16 %v21346_v23, %v21345_v13  ;;  %v7418_v15 = vpop.f32.mrb[167].mxu1  ;;  %v25399_v13 = vld [vmem:[%s30277_s10 + $0x10] sm:$0xff]  }
 0xae8   : > { %v7495_v26 = vpack.c.bf16 %v7418_v15, %v7415_v46  ;;  %v25400_v15 = vld [vmem:[%s30277_s10 + $0x18] sm:$0xff]  }
 0xaea   : > { %21359 = vmatprep.subr.bf16.mxu0 %v7495_v26 }
 0xaeb   : > { %21360 = vmatpush3.bf16.msra.mxu0 %v7495_v26 }
 0xaec   : > { %v21349_v32 = vpop.f32.mrb[168].mxu1  ;;  %21361 = vmatprep.subr.bf16.mxu0 %v7496_v11 }
 0xaed   : > { %v7431_v0 = vpop.f32.mrb[169].mxu1 }
 0xaee   : > { %v21350_v36 = vpop.f32.mrb[170].mxu1 }
 0xaef   : > { %v7498_v24 = vpack.c.bf16 %v21350_v36, %v21349_v32  ;;  %v7434_v34 = vpop.f32.mrb[171].mxu1  ;;  %21362 = vmatpush3.bf16.msra.mxu0 %v7496_v11  ;;  %v25401_v32 = vld [vmem:[%s30277_s10 + $0x20] sm:$0xff]  }
 0xaf0   : > { %v7497_v60 = vpack.c.bf16 %v7434_v34, %v7431_v0 }
 0xaf2   : > { %21363 = vmatprep.subr.bf16.mxu0 %v7497_v60 }
 0xaf3   : > { %21364 = vmatpush3.bf16.msra.mxu0 %v7497_v60  ;;  %v25402_v60 = vld [vmem:[%s30277_s10 + $0x28] sm:$0xff]  }
 0xaf4   : > { %v21353_v29 = vpop.f32.mrb[172].mxu1  ;;  %21365 = vmatprep.subr.bf16.mxu0 %v7498_v24 }
 0xaf5   : > { %v7447_v50 = vpop.f32.mrb[173].mxu1 }
 0xaf6   : > { %v21354_v27 = vpop.f32.mrb[174].mxu1 }
 0xaf7   : > { %v7500_v53 = vpack.c.bf16 %v21354_v27, %v21353_v29  ;;  %v7450_v7 = vpop.f32.mrb[175].mxu1  ;;  %21366 = vmatpush3.bf16.msra.mxu0 %v7498_v24  ;;  %v25403_v27 = vld [vmem:[%s30277_s10 + $0x30] sm:$0xff]  }
 0xaf8   : > { %v7499_v43 = vpack.c.bf16 %v7450_v7, %v7447_v50 }
 0xafa   : > { %21367 = vmatprep.subr.bf16.mxu0 %v7499_v43 }
 0xafb   : > { %21368 = vmatpush3.bf16.msra.mxu0 %v7499_v43 }
 0xafc   : > { %v21357_v55 = vpop.f32.mrb[176].mxu1  ;;  %21369 = vmatprep.subr.bf16.mxu0 %v7500_v53 }
 0xafd   : > { %v7463_v9 = vpop.f32.mrb[177].mxu1 }
 0xafe   : > { %v21358_v12 = vpop.f32.mrb[178].mxu1 }
 0xaff   : > { %v7502_v56 = vpack.c.bf16 %v21358_v12, %v21357_v55  ;;  %v7466_v21 = vpop.f32.mrb[179].mxu1  ;;  %21370 = vmatpush3.bf16.msra.mxu0 %v7500_v53 }
 0xb00   : > { %v7501_v2 = vpack.c.bf16 %v7466_v21, %v7463_v9  ;;  %v25404_v9 = vld [vmem:[%s30277_s10 + $0x38] sm:$0xff]   ;;  %v25405_v21 = vld [vmem:[%s30277_s10 + $0x80] sm:$0xff]  }
 0xb02   : > { %21371 = vmatprep.subr.bf16.mxu0 %v7501_v2 }
 0xb03   : > { %21372 = vmatpush3.bf16.msra.mxu0 %v7501_v2 }
 0xb04   : > { %21373 = vmatprep.subr.bf16.mxu0 %v7502_v56  ;;  %v21427_v51 = vpop.f32.mrb[180].mxu1 }
 0xb05   : > { %v7836_v28 = vpop.f32.mrb[181].mxu1 }
 0xb06   : > { %v21428_v61 = vpop.f32.mrb[182].mxu1 }
 0xb07   : > { %v27395_v48 = vpack.c.bf16 %v21428_v61, %v21427_v51  ;;  %21374 = vmatpush3.bf16.msra.mxu0 %v7502_v56  ;;  %v7839_v62 = vpop.f32.mrb[183].mxu1  ;;  %v25406_v51 = vld [vmem:[%s30277_s10 + $0x88] sm:$0xff]   ;;  %v25408_v61 = vld [vmem:[%s30277_s10 + $0x98] sm:$0xff]  }
 0xb08   : > { %v7916_v42 = vpack.c.bf16 %v7839_v62, %v7836_v28  ;;  %21391 = vmatprep.subr.bf16.mxu0 %v27378_v33  ;;  %v25407_v28 = vld [vmem:[%s30277_s10 + $0x90] sm:$0xff]  }
 0xb09   : > { %v25411_v62 = vld [vmem:[%s30277_s10 + $0xb0] sm:$0xff]  }
 0xb0a   : > { %21376 = vmatmul.mubr.bf16.vlgmr.msra.gmra.mrb[68].mxu0 %v25390_v19  ;;  %v25409_v19 = vld [vmem:[%s30277_s10 + $0xa0] sm:$0xff]  }
 0xb0b   : > { %21392 = vmatpush3.bf16.msra.mxu0 %v27378_v33  ;;  %21379 = vmatprep.mubr.bf16.mxu0 %v25391_v40  ;;  %v25412_v40 = vld [vmem:[%s30277_s10 + $0xb8] sm:$0xff]  }
 0xb0c   : > { %21393 = vmatprep.subr.bf16.mxu0 %v27376_v44  ;;  %v21431_v1 = vpop.f32.mrb[184].mxu1 }
 0xb0d   : > { %v7852_v18 = vpop.f32.mrb[185].mxu1 }
 0xb0e   : > { %v21432_v4 = vpop.f32.mrb[186].mxu1 }
 0xb0f   : > { %v27406_v14 = vpack.c.bf16 %v21432_v4, %v21431_v1  ;;  %21394 = vmatpush3.bf16.msra.mxu0 %v27376_v44  ;;  %v7855_v6 = vpop.f32.mrb[187].mxu1  ;;  %v25394_v44 = vld [vmem:[%s30277_s10 + $0x68] sm:$0xff]   ;;  %v25416_v4 = vld [vmem:[%s30277_s10 + $0xd8] sm:$0xff]  }
 0xb10   : > { %v7918_v17 = vpack.c.bf16 %v7855_v6, %v7852_v18  ;;  %21395 = vmatprep.subr.bf16.mxu0 %v27382_v35  ;;  %v25414_v1 = vld [vmem:[%s30277_s10 + $0xc8] sm:$0xff]   ;;  %v25415_v18 = vld [vmem:[%s30277_s10 + $0xd0] sm:$0xff]  }
 0xb11   : > { %v25419_v6 = vld [vmem:[%s30277_s10 + $0xf0] sm:$0xff]  }
 0xb12   : > { %21380 = vmatmul.mubr.bf16.gmra.mrb[72].mxu0 %v25392_v31  ;;  %v25417_v31 = vld [vmem:[%s30277_s10 + $0xe0] sm:$0xff]  }
 0xb13   : > { %21396 = vmatpush3.bf16.msra.mxu0 %v27382_v35  ;;  %21383 = vmatprep.mubr.bf16.mxu0 %v25393_v59  ;;  %v25420_v59 = vld [vmem:[%s30277_s10 + $0xf8] sm:$0xff]  }
 0xb14   : > { %21397 = vmatprep.subr.bf16.mxu0 %v27380_v3  ;;  %v21435_v38 = vpop.f32.mrb[188].mxu1 }
 0xb15   : > { %v7868_v52 = vpop.f32.mrb[189].mxu1 }
 0xb16   : > { %v21436_v8 = vpop.f32.mrb[190].mxu1 }
 0xb17   : > { %v27418_v16 = vpack.c.bf16 %v21436_v8, %v21435_v38  ;;  %21398 = vmatpush3.bf16.msra.mxu0 %v27380_v3  ;;  %v7871_v33 = vpop.f32.mrb[191].mxu1  ;;  %v25396_v3 = vld [vmem:[%s30277_s10 + $0x78] sm:$0xff]  }
 0xb18   : > { %v7920_v45 = vpack.c.bf16 %v7871_v33, %v7868_v52  ;;  %21399 = vmatprep.subr.bf16.mxu0 %v27386_v39  ;;  %v8382_v33 = vld [vmem:[%s30281_s14 + $0x8] sm:$0xff] }
 0xb1a   : > { %21384 = vmatmul.mubr.bf16.gmra.mrb[76].mxu0 %v25394_v44 }
 0xb1b   : > { %21400 = vmatpush3.bf16.msra.mxu0 %v27386_v39  ;;  %21387 = vmatprep.mubr.bf16.mxu0 %v25395_v22  ;;  %v27533_v22 = vand.u32 4294901760, %v8382_v33 }
 0xb1c   : > { %21401 = vmatprep.subr.bf16.mxu0 %v27384_v54  ;;  %v21439_v25 = vpop.f32.mrb[192].mxu1 }
 0xb1d   : > { %v7884_v30 = vpop.f32.mrb[193].mxu1 }
 0xb1e   : > { %v21440_v35 = vpop.f32.mrb[194].mxu1 }
 0xb1f   : > { %v27430_v10 = vpack.c.bf16 %v21440_v35, %v21439_v25  ;;  %21402 = vmatpush3.bf16.msra.mxu0 %v27384_v54  ;;  %v7887_v58 = vpop.f32.mrb[195].mxu1  ;;  %v25398_v54 = vld [vmem:[%s30277_s10 + $0x8] sm:$0xff]  }
 0xb20   : > { %v7922_v47 = vpack.c.bf16 %v7887_v58, %v7884_v30  ;;  %21403 = vmatprep.subr.bf16.mxu0 %v27390_v5 }
 0xb22   : > { %21388 = vmatmul.mubr.bf16.gmra.mrb[80].mxu0 %v25396_v3 }
 0xb23   : > { %21404 = vmatpush3.bf16.msra.mxu0 %v27390_v5  ;;  %21407 = vmatprep.mubr.bf16.mxu0 %v25397_v49 }
 0xb24   : > { %21405 = vmatprep.subr.bf16.mxu0 %v27388_v37  ;;  %v21477_v39 = vpop.f32.mrb[196].mxu1 }
 0xb25   : > { %v8128_v57 = vpop.f32.mrb[197].mxu1 }
 0xb26   : > { %v21478_v41 = vpop.f32.mrb[198].mxu1 }
 0xb27   : > { %v8209_v63 = vpack.c.bf16 %v21478_v41, %v21477_v39  ;;  %21406 = vmatpush3.bf16.msra.mxu0 %v27388_v37  ;;  %v8131_v20 = vpop.f32.mrb[199].mxu1 }
 0xb28   : > { %v8208_v46 = vpack.c.bf16 %v8131_v20, %v8128_v57  ;;  %21441 = vmatprep.subr.bf16.mxu0 %v7916_v42 }
 0xb2a   : > { %21408 = vmatmul.mubr.bf16.vlgmr.msra.gmra.mrb[68].mxu0 %v25398_v54 }
 0xb2b   : > { %21442 = vmatpush3.bf16.msra.mxu0 %v7916_v42  ;;  %21411 = vmatprep.mubr.bf16.mxu0 %v25399_v13  ;;  %v25413_v42 = vld [vmem:[%s30277_s10 + $0xc0] sm:$0xff]  }
 0xb2c   : > { %21443 = vmatprep.subr.bf16.mxu0 %v27395_v48  ;;  %v21481_v5 = vpop.f32.mrb[200].mxu1 }
 0xb2d   : > { %v8144_v23 = vpop.f32.mrb[201].mxu1 }
 0xb2e   : > { %v21482_v11 = vpop.f32.mrb[202].mxu1 }
 0xb2f   : > { %v8211_v37 = vpack.c.bf16 %v21482_v11, %v21481_v5  ;;  %21444 = vmatpush3.bf16.msra.mxu0 %v27395_v48  ;;  %v8147_v26 = vpop.f32.mrb[203].mxu1  ;;  %v25410_v48 = vld [vmem:[%s30277_s10 + $0xa8] sm:$0xff]  }
 0xb30   : > { %v8210_v0 = vpack.c.bf16 %v8147_v26, %v8144_v23  ;;  %21445 = vmatprep.subr.bf16.mxu0 %v7918_v17 }
 0xb32   : > { %21412 = vmatmul.mubr.bf16.gmra.mrb[72].mxu0 %v25400_v15 }
 0xb33   : > { %21446 = vmatpush3.bf16.msra.mxu0 %v7918_v17  ;;  %21415 = vmatprep.mubr.bf16.mxu0 %v25401_v32  ;;  %v8381_v17 = vld [vmem:[%s30281_s14] sm:$0xff] }
 0xb34   : > { %21447 = vmatprep.subr.bf16.mxu0 %v27406_v14  ;;  %v21485_v36 = vpop.f32.mrb[204].mxu1  ;;  %v27520_v38 = vand.u32 4294901760, %v8381_v17 }
 0xb35   : > { %v8160_v24 = vpop.f32.mrb[205].mxu1 }
 0xb36   : > { %v21486_v34 = vpop.f32.mrb[206].mxu1  ;;  %30741 = vst [vmem:[#allocation10_spill] sm:$0xff] %v27520_v38  ;;  %v27523_v52 = vsub.f32 %v8381_v17, %v27520_v38 }
 0xb37   : > { %v8213_v29 = vpack.c.bf16 %v21486_v34, %v21485_v36  ;;  %21448 = vmatpush3.bf16.msra.mxu0 %v27406_v14  ;;  %v8163_v50 = vpop.f32.mrb[207].mxu1  ;;  %v25418_v14 = vld [vmem:[%s30277_s10 + $0xe8] sm:$0xff]  }
 0xb38   : > { %v8212_v53 = vpack.c.bf16 %v8163_v50, %v8160_v24  ;;  %21449 = vmatprep.subr.bf16.mxu0 %v7920_v45  ;;  %30742 = vst [vmem:[#allocation13_spill] sm:$0xff] %v27523_v52  ;;  %v27526_v8 = vand.u32 4294901760, %v27523_v52 }
 0xb3a   : > { %21416 = vmatmul.mubr.bf16.gmra.mrb[76].mxu0 %v25402_v60  ;;  %30743 = vst [vmem:[#allocation11_spill] sm:$0xff] %v27526_v8  ;;  %v8483_v44 = vsub.f32 %v27523_v52, %v27526_v8 }
 0xb3b   : > { %21450 = vmatpush3.bf16.msra.mxu0 %v7920_v45  ;;  %21419 = vmatprep.mubr.bf16.mxu0 %v25403_v27  ;;  %v27536_v45 = vsub.f32 %v8382_v33, %v27533_v22 }
 0xb3c   : > { %21451 = vmatprep.subr.bf16.mxu0 %v27418_v16  ;;  %v21489_v7 = vpop.f32.mrb[208].mxu1 }
 0xb3d   : > { %v8176_v43 = vpop.f32.mrb[209].mxu1  ;;  %30744 = vst [vmem:[#allocation14_spill] sm:$0xff] %v27536_v45  ;;  %v27539_v25 = vand.u32 4294901760, %v27536_v45 }
 0xb3e   : > { %v21490_v55 = vpop.f32.mrb[210].mxu1 }
 0xb3f   : > { %v8215_v12 = vpack.c.bf16 %v21490_v55, %v21489_v7  ;;  %21452 = vmatpush3.bf16.msra.mxu0 %v27418_v16  ;;  %v8179_v56 = vpop.f32.mrb[211].mxu1  ;;  %v8484_v16 = vand.u32 4294901760, %v8483_v44  ;;  %30745 = vst [vmem:[#allocation18_spill] sm:$0xff] %v27539_v25  ;;  %v8493_v30 = vsub.f32 %v27536_v45, %v27539_v25 }
 0xb40   : > { %v8214_v2 = vpack.c.bf16 %v8179_v56, %v8176_v43  ;;  %21453 = vmatprep.subr.bf16.mxu0 %v7922_v47 }
 0xb41   : > { %21555 = vmatprep.mubr.f32.mxu1 %v8484_v16  ;;  %v27555_v57 = vand.u32 4294901760, %v8493_v30 }
 0xb42   : > { %21420 = vmatmul.mubr.bf16.gmra.mrb[80].mxu0 %v25404_v9 }
 0xb43   : > { %21454 = vmatpush3.bf16.msra.mxu0 %v7922_v47  ;;  %21457 = vmatprep.mubr.bf16.mxu0 %v25405_v21 }
 0xb44   : > { %21455 = vmatprep.subr.bf16.mxu0 %v27430_v10 }
 0xb47   : > { %21456 = vmatpush3.bf16.msra.mxu0 %v27430_v10 }
 0xb48   : > { %21491 = vmatprep.subr.bf16.mxu0 %v8208_v46 }
 0xb4a   : > { %21458 = vmatmul.mubr.bf16.vlgmr.msra.gmra.mrb[68].mxu0 %v25406_v51 }
 0xb4b   : > { %21492 = vmatpush3.bf16.msra.mxu0 %v8208_v46  ;;  %21461 = vmatprep.mubr.bf16.mxu0 %v25407_v28 }
 0xb4c   : > { %21493 = vmatprep.subr.bf16.mxu0 %v8209_v63 }
 0xb4f   : > { %21494 = vmatpush3.bf16.msra.mxu0 %v8209_v63 }
 0xb50   : > { %21495 = vmatprep.subr.bf16.mxu0 %v8210_v0 }
 0xb52   : > { %21462 = vmatmul.mubr.bf16.gmra.mrb[72].mxu0 %v25408_v61 }
 0xb53   : > { %21496 = vmatpush3.bf16.msra.mxu0 %v8210_v0  ;;  %21465 = vmatprep.mubr.bf16.mxu0 %v25409_v19 }
 0xb54   : > { %21497 = vmatprep.subr.bf16.mxu0 %v8211_v37 }
 0xb57   : > { %21498 = vmatpush3.bf16.msra.mxu0 %v8211_v37 }
 0xb58   : > { %21499 = vmatprep.subr.bf16.mxu0 %v8212_v53 }
 0xb5a   : > { %21466 = vmatmul.mubr.bf16.gmra.mrb[76].mxu0 %v25410_v48 }
 0xb5b   : > { %21500 = vmatpush3.bf16.msra.mxu0 %v8212_v53  ;;  %21469 = vmatprep.mubr.bf16.mxu0 %v25411_v62 }
 0xb5c   : > { %21501 = vmatprep.subr.bf16.mxu0 %v8213_v29 }
 0xb5f   : > { %21502 = vmatpush3.bf16.msra.mxu0 %v8213_v29 }
 0xb60   : > { %21503 = vmatprep.subr.bf16.mxu0 %v8214_v2 }
 0xb62   : > { %21470 = vmatmul.mubr.bf16.gmra.mrb[80].mxu0 %v25412_v40 }
 0xb63   : > { %21504 = vmatpush3.bf16.msra.mxu0 %v8214_v2  ;;  %21507 = vmatprep.mubr.bf16.mxu0 %v25413_v42 }
 0xb64   : > { %21505 = vmatprep.subr.bf16.mxu0 %v8215_v12 }
 0xb67   : > { %21506 = vmatpush3.bf16.msra.mxu0 %v8215_v12 }
 0xb6a   : > { %21508 = vmatmul.mubr.bf16.vlgmr.msra.gmra.mrb[68].mxu0 %v25414_v1 }
 0xb6b   : > { %21511 = vmatprep.mubr.bf16.mxu0 %v25415_v18 }
 0xb72   : > { %21512 = vmatmul.mubr.bf16.gmra.mrb[72].mxu0 %v25416_v4 }
 0xb73   : > { %21515 = vmatprep.mubr.bf16.mxu0 %v25417_v31 }
 0xb7a   : > { %21516 = vmatmul.mubr.bf16.gmra.mrb[76].mxu0 %v25418_v14 }
 0xb7b   : > { %21519 = vmatprep.mubr.bf16.mxu0 %v25419_v6 }
 0xb82   : > { %21520 = vmatmul.mubr.bf16.gmra.mrb[80].mxu0 %v25420_v59 }
 0xb83   : > { %21765 = vmatprep.mubr.f32.mxu0 %v8484_v16 }
 0xc3d   : > { %v27543_v35 = vpop.f32.mrb[68].mxu0 }
 0xc3e   : > { %30746 = vst [vmem:[#allocation21_spill] sm:$0xff] %v27543_v35  ;;  %v8406_v3 = vand.u32 4294901760, %v27543_v35  ;;  %v9085_v10 = vmul.f32 %v27543_v35, %v27543_v35  ;;  %v27548_v58 = vpop.f32.mrb[69].mxu0 }
 0xc3f   : > { %30747 = vst [vmem:[#allocation19_spill] sm:$0xff] %v27548_v58  ;;  %v8400_v49 = vand.u32 4294901760, %v27548_v58  ;;  %v9083_v47 = vmul.f32 %v27548_v58, %v27548_v58  ;;  %v27553_v39 = vpop.f32.mrb[70].mxu0 }
 0xc40   : > { %30748 = vst [vmem:[#allocation22_spill] sm:$0xff] %v27553_v39  ;;  %v27558_v41 = vsub.f32 %v27543_v35, %v8406_v3  ;;  %v9106_v54 = vand.u32 4294901760, %v9085_v10  ;;  %v8409_v63 = vand.u32 4294901760, %v27553_v39  ;;  %v9086_v20 = vmul.f32 %v27553_v39, %v27553_v39  ;;  %v27563_v13 = vpop.f32.mrb[71].mxu0 }
 0xc41   : > { %30749 = vst [vmem:[#allocation26_spill] sm:$0xff] %v27563_v13  ;;  %v27566_v46 = vsub.f32 %v27548_v58, %v8400_v49  ;;  %v9100_v5 = vand.u32 4294901760, %v9083_v47  ;;  %v8403_v23 = vand.u32 4294901760, %v27563_v13  ;;  %v9084_v11 = vmul.f32 %v27563_v13, %v27563_v13 }
 0xc42   : > { %v27571_v15 = vsub.f32 %v9085_v10, %v9106_v54  ;;  %v27573_v37 = vpack.c.bf16 %v8409_v63, %v8406_v3  ;;  %v27576_v26 = vsub.f32 %v27553_v39, %v8409_v63  ;;  %v9109_v32 = vand.u32 4294901760, %v9086_v20 }
 0xc43   : > { %v27578_v0 = vsub.f32 %v9083_v47, %v9100_v5  ;;  %v27580_v36 = vpack.c.bf16 %v8403_v23, %v8400_v49  ;;  %v27583_v24 = vsub.f32 %v27563_v13, %v8403_v23  ;;  %v9103_v34 = vand.u32 4294901760, %v9084_v11 }
 0xc44   : > { %30750 = vst [vmem:[#allocation29_spill] sm:$0xff] %v27573_v37  ;;  %v27585_v60 = vpack.c.bf16 %v9109_v32, %v9106_v54  ;;  %v27587_v29 = vsub.f32 %v9086_v20, %v9109_v32  ;;  %v30384_v50 = vand.u32 4294901760, %v27566_v46  ;;  %v30380_v27 = vand.u32 4294901760, %v27558_v41 }
 0xc45   : > { %30751 = vst [vmem:[#allocation27_spill] sm:$0xff] %v27580_v36  ;;  %v27591_v53 = vpack.c.bf16 %v9103_v34, %v9100_v5  ;;  %v27593_v7 = vsub.f32 %v9084_v11, %v9103_v34  ;;  %v27595_v43 = vpop.f32.mrb[72].mxu0  ;;  %23608 = vmatprep.subr.bf16.mxu1 %v27580_v36  ;;  %v30383_v55 = vand.u32 4294901760, %v27583_v24  ;;  %v30382_v9 = vand.u32 4294901760, %v27578_v0 }
 0xc46   : > { %30752 = vst [vmem:[#allocation30_spill] sm:$0xff] %v27585_v60  ;;  %30754 = vst [vmem:[#allocation37_spill] sm:$0xff] %v27595_v43  ;;  %v8418_v12 = vand.u32 4294901760, %v27595_v43  ;;  %v9089_v56 = vmul.f32 %v27595_v43, %v27595_v43  ;;  %v27603_v21 = vpop.f32.mrb[73].mxu0  ;;  %23610 = vmatpush3.bf16.msra.mxu1 %v27580_v36  ;;  %v8504_v2 = vsub.f32 %v27566_v46, %v30384_v50  ;;  %v30785_v8 = vand.u32 4294901760, %v27566_v46 }
 0xc47   : > { %30753 = vst [vmem:[#allocation35_spill] sm:$0xff] %v27591_v53  ;;  %30755 = vst [vmem:[#allocation36_spill] sm:$0xff] %v27603_v21  ;;  %v27612_v51 = vsub.f32 %v27558_v41, %v30380_v27  ;;  %v8412_v28 = vand.u32 4294901760, %v27603_v21  ;;  %v9087_v61 = vmul.f32 %v27603_v21, %v27603_v21  ;;  %v27617_v19 = vpop.f32.mrb[74].mxu0  ;;  %23612 = vmatprep.subr.bf16.mxu1 %v27573_v37  ;;  %23800 = vmatprep.subr.bf16.mxu0 %v27591_v53 }
 0xc48   : > { %30756 = vst [vmem:[#allocation38_spill] sm:$0xff] %v27617_v19  ;;  %v8511_v48 = vsub.f32 %v27583_v24, %v30383_v55  ;;  %v27627_v62 = vsub.f32 %v27578_v0, %v30382_v9  ;;  %v27630_v40 = vsub.f32 %v27595_v43, %v8418_v12  ;;  %v9118_v42 = vand.u32 4294901760, %v9089_v56  ;;  %v27635_v4 = vpop.f32.mrb[75].mxu0  ;;  %23802 = vmatpush3.bf16.msra.mxu0 %v27591_v53 }
 0xc49   : > { %v8421_v1 = vand.u32 4294901760, %v27617_v19  ;;  %v9090_v18 = vmul.f32 %v27617_v19, %v27617_v19  ;;  %30757 = vst [vmem:[#allocation5_spill] sm:$0xff] %v27635_v4  ;;  %v27639_v31 = vsub.f32 %v27603_v21, %v8412_v28  ;;  %v9112_v14 = vand.u32 4294901760, %v9087_v61  ;;  %23804 = vmatprep.subr.bf16.mxu0 %v27585_v60 }
 0xc4a   : > { %v8415_v6 = vand.u32 4294901760, %v27635_v4  ;;  %v9088_v59 = vmul.f32 %v27635_v4, %v27635_v4  ;;  %v27645_v17 = vsub.f32 %v9089_v56, %v9118_v42  ;;  %23614 = vmatpush3.bf16.msra.mxu1 %v27573_v37  ;;  %v8505_v63 = vand.u32 4294901760, %v8504_v2 }
 0xc4b   : > { %v27647_v44 = vpack.c.bf16 %v8421_v1, %v8418_v12  ;;  %v27650_v16 = vsub.f32 %v27617_v19, %v8421_v1  ;;  %v9121_v33 = vand.u32 4294901760, %v9090_v18  ;;  %v27653_v30 = vsub.f32 %v9087_v61, %v9112_v14 }
 0xc4c   : > { %v27655_v3 = vpack.c.bf16 %v8415_v6, %v8412_v28  ;;  %v27658_v10 = vsub.f32 %v27635_v4, %v8415_v6  ;;  %v9115_v49 = vand.u32 4294901760, %v9088_v59  ;;  %23806 = vmatpush3.bf16.msra.mxu0 %v27585_v60  ;;  %v8512_v20 = vand.u32 4294901760, %v8511_v48 }
 0xc4d   : > { %30758 = vst [vmem:[#allocation34_spill] sm:$0xff] %v27647_v44  ;;  %v27660_v47 = vpack.c.bf16 %v9121_v33, %v9118_v42  ;;  %v27662_v54 = vsub.f32 %v9090_v18, %v9121_v33  ;;  %v27669_v11 = vpop.f32.mrb[76].mxu0  ;;  %v9205_v32 = vand.u32 4294901760, %v27627_v62  ;;  %v30381_v34 = vand.u32 4294901760, %v27593_v7 }
 0xc4e   : > { %30759 = vst [vmem:[#allocation3_spill] sm:$0xff] %v27655_v3  ;;  %v27665_v5 = vpack.c.bf16 %v9115_v49, %v9112_v14  ;;  %v27667_v23 = vsub.f32 %v9088_v59, %v9115_v49  ;;  %30762 = vst [vmem:[#allocation7_spill] sm:$0xff] %v27669_v11  ;;  %23616 = vmatprep.subr.bf16.mxu1 %v27655_v3  ;;  %v8430_v12 = vand.u32 4294901760, %v27669_v11  ;;  %v27677_v28 = vpop.f32.mrb[77].mxu0  ;;  %v30775_v21 = vand.u32 4294901760, %v27587_v29 }
 0xc4f   : > { %30760 = vst [vmem:[#allocation4_spill] sm:$0xff] %v27660_v47  ;;  %v9093_v56 = vmul.f32 %v27669_v11, %v27669_v11  ;;  %30763 = vst [vmem:[#allocation8_spill] sm:$0xff] %v27677_v28  ;;  %23618 = vmatpush3.bf16.msra.mxu1 %v27655_v3  ;;  %v27680_v2 = vpack.c.bf16 %v8512_v20, %v8505_v63  ;;  %v8424_v48 = vand.u32 4294901760, %v27677_v28  ;;  %v27686_v42 = vpop.f32.mrb[78].mxu0  ;;  %v30787_v53 = vand.u32 4294901760, %v27578_v0 }
 0xc50   : > { %30761 = vst [vmem:[#allocation9_spill] sm:$0xff] %v27665_v5  ;;  %v9091_v62 = vmul.f32 %v27677_v28, %v27677_v28  ;;  %30764 = vst [vmem:[#allocation6_spill] sm:$0xff] %v27686_v42  ;;  %23620 = vmatprep.subr.bf16.mxu1 %v27647_v44  ;;  %23808 = vmatprep.subr.bf16.mxu0 %v27665_v5  ;;  %v9211_v1 = vsub.f32 %v27593_v7, %v30381_v34  ;;  %v8433_v59 = vand.u32 4294901760, %v27686_v42  ;;  %v27700_v49 = vpop.f32.mrb[79].mxu0 }
 0xc51   : > { %v27695_v14 = vsub.f32 %v27669_v11, %v8430_v12  ;;  %v9130_v6 = vand.u32 4294901760, %v9093_v56  ;;  %v9094_v33 = vmul.f32 %v27686_v42, %v27686_v42  ;;  %30765 = vst [vmem:[#allocation17_spill] sm:$0xff] %v27700_v49  ;;  %23810 = vmatpush3.bf16.msra.mxu0 %v27665_v5  ;;  %v27704_v63 = vsub.f32 %v27677_v28, %v8424_v48 }
 0xc52   : > { %v9124_v20 = vand.u32 4294901760, %v9091_v62  ;;  %v8427_v27 = vand.u32 4294901760, %v27700_v49  ;;  %v9092_v34 = vmul.f32 %v27700_v49, %v27700_v49  ;;  %23812 = vmatprep.subr.bf16.mxu0 %v27660_v47  ;;  %v27712_v55 = vpack.c.bf16 %v8433_v59, %v8430_v12 }
 0xc53   : > { %v27710_v9 = vsub.f32 %v9093_v56, %v9130_v6  ;;  %v27715_v50 = vsub.f32 %v27686_v42, %v8433_v59  ;;  %v9133_v61 = vand.u32 4294901760, %v9094_v33  ;;  %23622 = vmatpush3.bf16.msra.mxu1 %v27647_v44  ;;  %v9212_v12 = vand.u32 4294901760, %v9211_v1 }
 0xc54   : > { %30766 = vst [vmem:[#allocation15_spill] sm:$0xff] %v27712_v55  ;;  %v27718_v18 = vsub.f32 %v9091_v62, %v9124_v20  ;;  %v27720_v11 = vpack.c.bf16 %v8427_v27, %v8424_v48  ;;  %v27723_v28 = vsub.f32 %v27700_v49, %v8427_v27  ;;  %v9127_v19 = vand.u32 4294901760, %v9092_v34 }
 0xc55   : > { %v27725_v4 = vpack.c.bf16 %v9133_v61, %v9130_v6  ;;  %v27727_v56 = vsub.f32 %v9094_v33, %v9133_v61  ;;  %23814 = vmatpush3.bf16.msra.mxu0 %v27660_v47  ;;  %v30769_v59 = vand.u32 4294901760, %v27576_v26  ;;  %v27737_v48 = vpop.f32.mrb[80].mxu0  ;;  %v30774_v61 = vand.u32 4294901760, %v27571_v15 }
 0xc56   : > { %30767 = vst [vmem:[#allocation16_spill] sm:$0xff] %v27720_v11  ;;  %v27733_v43 = vpack.c.bf16 %v9127_v19, %v9124_v20  ;;  %v27735_v62 = vsub.f32 %v9092_v34, %v9127_v19  ;;  %30771 = vst [vmem:[#allocation23_spill] sm:$0xff] %v27737_v48  ;;  %23624 = vmatprep.subr.bf16.mxu1 %v27720_v11  ;;  %v8442_v6 = vand.u32 4294901760, %v27737_v48  ;;  %v27745_v33 = vpop.f32.mrb[81].mxu0  ;;  %v30788_v36 = vand.u32 4294901760, %v27593_v7 }
 0xc57   : > { %30768 = vst [vmem:[#allocation12_spill] sm:$0xff] %v27725_v4  ;;  %v8525_v42 = vsub.f32 %v27576_v26, %v30769_v59  ;;  %v9097_v1 = vmul.f32 %v27737_v48, %v27737_v48  ;;  %30772 = vst [vmem:[#allocation24_spill] sm:$0xff] %v27745_v33  ;;  %23626 = vmatpush3.bf16.msra.mxu1 %v27720_v11  ;;  %v27748_v20 = vpack.c.bf16 %v9212_v12, %v9205_v32  ;;  %v27753_v27 = vpop.f32.mrb[82].mxu0 }
 0xc58   : > { %30770 = vst [vmem:[#allocation25_spill] sm:$0xff] %v27733_v43  ;;  %v8436_v34 = vand.u32 4294901760, %v27745_v33  ;;  %v9095_v59 = vmul.f32 %v27745_v33, %v27745_v33  ;;  %30773 = vst [vmem:[#allocation20_spill] sm:$0xff] %v27753_v27  ;;  %23628 = vmatprep.subr.bf16.mxu1 %v27712_v55  ;;  %23816 = vmatprep.subr.bf16.mxu0 %v27733_v43  ;;  %v9218_v49 = vsub.f32 %v27571_v15, %v30774_v61  ;;  %v27769_v13 = vpop.f32.mrb[83].mxu0 }
 0xc59   : > { %v8526_v19 = vand.u32 4294901760, %v8525_v42  ;;  %v9225_v32 = vsub.f32 %v27587_v29, %v30775_v21  ;;  %v27764_v42 = vsub.f32 %v27737_v48, %v8442_v6  ;;  %v9142_v12 = vand.u32 4294901760, %v9097_v1  ;;  %30776 = vst [vmem:[#allocation33_spill] sm:$0xff] %v27769_v13  ;;  %23818 = vmatpush3.bf16.msra.mxu0 %v27733_v43 }
 0xc5a   : > { %v8445_v39 = vand.u32 4294901760, %v27753_v27  ;;  %v9098_v35 = vmul.f32 %v27753_v27, %v27753_v27  ;;  %v27773_v58 = vsub.f32 %v27745_v33, %v8436_v34  ;;  %v9136_v61 = vand.u32 4294901760, %v9095_v59  ;;  %23820 = vmatprep.subr.bf16.mxu0 %v27725_v4 }
 0xc5b   : > { %v8439_v25 = vand.u32 4294901760, %v27769_v13  ;;  %v9096_v21 = vmul.f32 %v27769_v13, %v27769_v13  ;;  %v27779_v48 = vsub.f32 %v9097_v1, %v9142_v12  ;;  %23630 = vmatpush3.bf16.msra.mxu1 %v27712_v55  ;;  %v30790_v52 = vand.u32 4294901760, %v27576_v26 }
 0xc5c   : > { %v27781_v11 = vpack.c.bf16 %v8445_v39, %v8442_v6  ;;  %v27784_v47 = vsub.f32 %v27753_v27, %v8445_v39  ;;  %v9145_v44 = vand.u32 4294901760, %v9098_v35  ;;  %v27787_v33 = vsub.f32 %v9095_v59, %v9136_v61 }
 0xc5d   : > { %v27789_v43 = vpack.c.bf16 %v8439_v25, %v8436_v34  ;;  %v27792_v5 = vsub.f32 %v27769_v13, %v8439_v25  ;;  %v9139_v3 = vand.u32 4294901760, %v9096_v21  ;;  %23822 = vmatpush3.bf16.msra.mxu0 %v27725_v4  ;;  %v30780_v39 = vand.u32 4294901760, %v27612_v51 }
 0xc5e   : > { %30777 = vst [vmem:[#allocation31_spill] sm:$0xff] %v27781_v11  ;;  %v27794_v60 = vpack.c.bf16 %v9145_v44, %v9142_v12  ;;  %v27796_v1 = vsub.f32 %v9098_v35, %v9145_v44  ;;  %v9219_v27 = vand.u32 4294901760, %v9218_v49  ;;  %v9226_v25 = vand.u32 4294901760, %v9225_v32 }
 0xc5f   : > { %30778 = vst [vmem:[#allocation32_spill] sm:$0xff] %v27789_v43  ;;  %v27801_v6 = vpack.c.bf16 %v8526_v19, %v30780_v39  ;;  %v27803_v55 = vpack.c.bf16 %v9139_v3, %v9136_v61  ;;  %v27805_v59 = vsub.f32 %v9096_v21, %v9139_v3  ;;  %23632 = vmatprep.subr.bf16.mxu1 %v27789_v43  ;;  %v30418_v34 = vand.u32 4294901760, %v27639_v31 }
 0xc60   : > { %30779 = vst [vmem:[#allocation28_spill] sm:$0xff] %v27794_v60  ;;  %23634 = vmatpush3.bf16.msra.mxu1 %v27789_v43  ;;  %v30419_v35 = vand.u32 4294901760, %v27658_v10  ;;  %v30420_v44 = vand.u32 4294901760, %v27653_v30  ;;  %v30421_v51 = vand.u32 4294901760, %v27667_v23  ;;  %v30427_v19 = vand.u32 4294901760, %v27630_v40 }
 0xc61   : > { %30781 = vst [vmem:[#allocation39_spill] sm:$0xff] %v27803_v55  ;;  %23636 = vmatprep.subr.bf16.mxu1 %v27781_v11  ;;  %23824 = vmatprep.subr.bf16.mxu0 %v27803_v55  ;;  %v27816_v3 = vpack.c.bf16 %v9226_v25, %v9219_v27  ;;  %v8532_v49 = vsub.f32 %v27639_v31, %v30418_v34  ;;  %v30428_v32 = vand.u32 4294901760, %v27650_v16  ;;  %v30431_v12 = vand.u32 4294901760, %v27645_v17 }
 0xc62   : > { %23826 = vmatpush3.bf16.msra.mxu0 %v27803_v55  ;;  %v8539_v61 = vsub.f32 %v27658_v10, %v30419_v35  ;;  %v9232_v21 = vsub.f32 %v27653_v30, %v30420_v44  ;;  %v9239_v27 = vsub.f32 %v27667_v23, %v30421_v51  ;;  %v8546_v39 = vsub.f32 %v27630_v40, %v30427_v19 }
 0xc63   : > { %23828 = vmatprep.subr.bf16.mxu0 %v27794_v60  ;;  %v8533_v25 = vand.u32 4294901760, %v8532_v49  ;;  %v8553_v34 = vsub.f32 %v27650_v16, %v30428_v32  ;;  %v9246_v35 = vsub.f32 %v27645_v17, %v30431_v12  ;;  %v30448_v44 = vand.u32 4294901760, %v27662_v54 }
 0xc64   : > { %23638 = vmatpush3.bf16.msra.mxu1 %v27781_v11  ;;  %v8540_v51 = vand.u32 4294901760, %v8539_v61  ;;  %v9233_v13 = vand.u32 4294901760, %v9232_v21  ;;  %v9240_v55 = vand.u32 4294901760, %v9239_v27  ;;  %v8547_v43 = vand.u32 4294901760, %v8546_v39 }
 0xc65   : > { %23640 = vmatprep.subr.bf16.mxu1 %v27680_v2  ;;  %v8554_v19 = vand.u32 4294901760, %v8553_v34  ;;  %v9247_v49 = vand.u32 4294901760, %v9246_v35  ;;  %v9253_v32 = vsub.f32 %v27662_v54, %v30448_v44  ;;  %v30441_v4 = vand.u32 4294901760, %v27704_v63 }
 0xc66   : > { %23830 = vmatpush3.bf16.msra.mxu0 %v27794_v60  ;;  %v23647_v12 = vpack.c.bf16 %v8540_v51, %v8533_v25  ;;  %v23839_v37 = vpack.c.bf16 %v9240_v55, %v9233_v13  ;;  %v30437_v11 = vand.u32 4294901760, %v27723_v28  ;;  %v30436_v61 = vand.u32 4294901760, %v27718_v18 }
 0xc67   : > { %23832 = vmatprep.subr.bf16.mxu0 %v27748_v20  ;;  %21556 = vmatmul.mubr.f32.vlgmr.msra.gmra.mrb[146].mxu1 %v27555_v57  ;;  %v27855_v34 = vpack.c.bf16 %v8554_v19, %v8547_v43  ;;  %v9254_v35 = vand.u32 4294901760, %v9253_v32  ;;  %v8560_v21 = vsub.f32 %v27704_v63, %v30441_v4  ;;  %v30440_v27 = vand.u32 4294901760, %v27735_v62 }
 0xc68   : > { %23642 = vmatpush3.bf16.msra.mxu1 %v27680_v2  ;;  %v8567_v13 = vsub.f32 %v27723_v28, %v30437_v11  ;;  %v9260_v55 = vsub.f32 %v27718_v18, %v30436_v61  ;;  %v30438_v43 = vand.u32 4294901760, %v27695_v14  ;;  %v30439_v51 = vand.u32 4294901760, %v27715_v50  ;;  %21590 = vmatprep.mubr.f32.mxu1 %v27520_v38 }
 0xc69   : > { %23644 = vmatprep.subr.bf16.mxu1 %v27801_v6  ;;  %21766 = vmatmul.mubr.f32.vlgmr.msra.gmra.mrb[66].mxu0 %v27555_v57  ;;  %v27873_v19 = vpack.c.bf16 %v9254_v35, %v9247_v49  ;;  %v8561_v2 = vand.u32 4294901760, %v8560_v21  ;;  %v9267_v32 = vsub.f32 %v27735_v62, %v30440_v27  ;;  %v30442_v39 = vand.u32 4294901760, %v27710_v9 }
 0xc6a   : > { %23834 = vmatpush3.bf16.msra.mxu0 %v27748_v20  ;;  %v8568_v25 = vand.u32 4294901760, %v8567_v13  ;;  %v9261_v61 = vand.u32 4294901760, %v9260_v55  ;;  %v8574_v11 = vsub.f32 %v27695_v14, %v30438_v43  ;;  %v8581_v57 = vsub.f32 %v27715_v50, %v30439_v51  ;;  %21800 = vmatprep.mubr.f32.mxu0 %v27520_v38 }
 0xc6b   : > { %23836 = vmatprep.subr.bf16.mxu0 %v27816_v3  ;;  %v9268_v49 = vand.u32 4294901760, %v9267_v32  ;;  %v9274_v35 = vsub.f32 %v27710_v9, %v30442_v39  ;;  %v30446_v20 = vand.u32 4294901760, %v27727_v56  ;;  %v30443_v21 = vand.u32 4294901760, %v27773_v58 }
 0xc6c   : > { %23646 = vmatpush3.bf16.msra.mxu1 %v27801_v6  ;;  %v23655_v13 = vpack.c.bf16 %v8568_v25, %v8561_v2  ;;  %v8575_v55 = vand.u32 4294901760, %v8574_v11  ;;  %v8582_v43 = vand.u32 4294901760, %v8581_v57  ;;  %v30445_v51 = vand.u32 4294901760, %v27792_v5 }
 0xc6d   : > { %23648 = vmatprep.subr.bf16.mxu1 %v23647_v12  ;;  %v27895_v27 = vpack.c.bf16 %v9268_v49, %v9261_v61  ;;  %v9275_v4 = vand.u32 4294901760, %v9274_v35  ;;  %v9281_v32 = vsub.f32 %v27727_v56, %v30446_v20  ;;  %v8588_v39 = vsub.f32 %v27773_v58, %v30443_v21 }
 0xc6e   : > { %23838 = vmatpush3.bf16.msra.mxu0 %v27816_v3  ;;  %v27904_v6 = vpack.c.bf16 %v8582_v43, %v8575_v55  ;;  %v8595_v11 = vsub.f32 %v27792_v5, %v30445_v51  ;;  %v30444_v61 = vand.u32 4294901760, %v27787_v33  ;;  %v30447_v2 = vand.u32 4294901760, %v27805_v59 }
 0xc6f   : > { %23840 = vmatprep.subr.bf16.mxu0 %v23839_v37  ;;  %v9282_v25 = vand.u32 4294901760, %v9281_v32  ;;  %v8589_v57 = vand.u32 4294901760, %v8588_v39  ;;  %v30449_v49 = vand.u32 4294901760, %v27764_v42  ;;  %v30450_v35 = vand.u32 4294901760, %v27784_v47 }
 0xc70   : > { %23650 = vmatpush3.bf16.msra.mxu1 %v23647_v12  ;;  %v8596_v21 = vand.u32 4294901760, %v8595_v11  ;;  %v9288_v3 = vsub.f32 %v27787_v33, %v30444_v61  ;;  %v9295_v43 = vsub.f32 %v27805_v59, %v30447_v2  ;;  %v9301_v55 = vand.u32 4294901760, %v27779_v48 }
 0xc71   : > { %23652 = vmatprep.subr.bf16.mxu1 %v27855_v34  ;;  %v23851_v32 = vpack.c.bf16 %v9282_v25, %v9275_v4  ;;  %v8602_v39 = vsub.f32 %v27764_v42, %v30449_v49  ;;  %v8609_v12 = vsub.f32 %v27784_v47, %v30450_v35  ;;  %v9308_v11 = vand.u32 4294901760, %v27796_v1 }
 0xc72   : > { %23842 = vmatpush3.bf16.msra.mxu0 %v23839_v37  ;;  %v23663_v61 = vpack.c.bf16 %v8596_v21, %v8589_v57  ;;  %v9289_v51 = vand.u32 4294901760, %v9288_v3  ;;  %v9296_v20 = vand.u32 4294901760, %v9295_v43  ;;  %v9302_v2 = vsub.f32 %v27779_v48, %v9301_v55 }
 0xc73   : > { %23844 = vmatprep.subr.bf16.mxu0 %v27873_v19  ;;  %v8603_v44 = vand.u32 4294901760, %v8602_v39  ;;  %v8610_v4 = vand.u32 4294901760, %v8609_v12  ;;  %v9309_v25 = vsub.f32 %v27796_v1, %v9308_v11  ;;  %v23671_v49 = vpack.c.bf16 %v27583_v24, %v27566_v46 }
 0xc74   : > { %23654 = vmatpush3.bf16.msra.mxu1 %v27855_v34  ;;  %v23855_v35 = vpack.c.bf16 %v9296_v20, %v9289_v51  ;;  %v9303_v38 = vand.u32 4294901760, %v9302_v2  ;;  %v23863_v37 = vpack.c.bf16 %v27593_v7, %v27578_v0  ;;  %v23675_v21 = vpack.c.bf16 %v27576_v26, %v27558_v41 }
 0xc75   : > { %23656 = vmatprep.subr.bf16.mxu1 %v23655_v13  ;;  %v23667_v57 = vpack.c.bf16 %v8610_v4, %v8603_v44  ;;  %v9310_v3 = vand.u32 4294901760, %v9309_v25  ;;  %v23867_v43 = vpack.c.bf16 %v27587_v29, %v27571_v15  ;;  %v23679_v39 = vpack.c.bf16 %v27658_v10, %v27639_v31 }
 0xc76   : > { %23846 = vmatpush3.bf16.msra.mxu0 %v27873_v19  ;;  %v23871_v34 = vpack.c.bf16 %v27667_v23, %v27653_v30  ;;  %v23683_v51 = vpack.c.bf16 %v27650_v16, %v27630_v40  ;;  %v23875_v20 = vpack.c.bf16 %v27662_v54, %v27645_v17  ;;  %v23687_v44 = vpack.c.bf16 %v27723_v28, %v27704_v63 }
 0xc77   : > { %23848 = vmatprep.subr.bf16.mxu0 %v27895_v27  ;;  %v23859_v2 = vpack.c.bf16 %v9310_v3, %v9303_v38  ;;  %v23879_v12 = vpack.c.bf16 %v27735_v62, %v27718_v18  ;;  %v23691_v19 = vpack.c.bf16 %v27715_v50, %v27695_v14  ;;  %v23883_v4 = vpack.c.bf16 %v27727_v56, %v27710_v9 }
 0xc78   : > { %23658 = vmatpush3.bf16.msra.mxu1 %v23655_v13  ;;  %v23695_v25 = vpack.c.bf16 %v27792_v5, %v27773_v58  ;;  %v27962_v60 = vpack.c.bf16 %v27805_v59, %v27787_v33  ;;  %v27966_v38 = vpack.c.bf16 %v27784_v47, %v27764_v42  ;;  %v27970_v3 = vpack.c.bf16 %v27796_v1, %v27779_v48 }
 0xc79   : > { %23660 = vmatprep.subr.bf16.mxu1 %v27904_v6  ;;  %v30786_v13 = vand.u32 4294901760, %v27583_v24  ;;  %v30791_v1 = vand.u32 4294901760, %v27571_v15  ;;  %v30792_v46 = vand.u32 4294901760, %v27587_v29  ;;  %v30794_v0 = vand.u32 4294901760, %v27658_v10 }
 0xc7a   : > { %30782 = vst [vmem:[#allocation40_spill] sm:$0xff] %v27962_v60  ;;  %30783 = vst [vmem:[#allocation41_spill] sm:$0xff] %v27966_v38  ;;  %v27983_v60 = vpack.c.bf16 %v30788_v36, %v30787_v53  ;;  %v30789_v38 = vand.u32 4294901760, %v27558_v41  ;;  %23850 = vmatpush3.bf16.msra.mxu0 %v27895_v27  ;;  %v30795_v41 = vand.u32 4294901760, %v27653_v30  ;;  %v30796_v26 = vand.u32 4294901760, %v27667_v23 }
 0xc7b   : > { %30784 = vst [vmem:[#allocation42_spill] sm:$0xff] %v27970_v3  ;;  %v27977_v45 = vpack.c.bf16 %v30786_v13, %v30785_v8  ;;  %v27995_v3 = vpack.c.bf16 %v30792_v46, %v30791_v1  ;;  %v30793_v8 = vand.u32 4294901760, %v27639_v31  ;;  %v30797_v15 = vand.u32 4294901760, %v27630_v40  ;;  %23852 = vmatprep.subr.bf16.mxu0 %v23851_v32 }
 0xc7c   : > { %v27989_v48 = vpack.c.bf16 %v30790_v52, %v30789_v38  ;;  %v28008_v52 = vpack.c.bf16 %v30796_v26, %v30795_v41  ;;  %v30798_v24 = vand.u32 4294901760, %v27650_v16  ;;  %v30799_v53 = vand.u32 4294901760, %v27645_v17  ;;  %23662 = vmatpush3.bf16.msra.mxu1 %v27904_v6  ;;  %v30821_v6 = vld [vmem:[#allocation14_spill] sm:$0xff] }
 0xc7d   : > { %v28002_v36 = vpack.c.bf16 %v30794_v0, %v30793_v8  ;;  %v30800_v7 = vand.u32 4294901760, %v27662_v54  ;;  %v30801_v10 = vand.u32 4294901760, %v27704_v63  ;;  %v30802_v30 = vand.u32 4294901760, %v27723_v28  ;;  %23664 = vmatprep.subr.bf16.mxu1 %v23663_v61 }
 0xc7e   : > { %v28014_v29 = vpack.c.bf16 %v30798_v24, %v30797_v15  ;;  %v30803_v27 = vand.u32 4294901760, %v27718_v18  ;;  %v30804_v40 = vand.u32 4294901760, %v27735_v62  ;;  %v30805_v38 = vand.u32 4294901760, %v27695_v14  ;;  %23854 = vmatpush3.bf16.msra.mxu0 %v23851_v32  ;;  %v30826_v32 = vld [vmem:[#allocation9_spill] sm:$0xff] }
 0xc7f   : > { %v28020_v31 = vpack.c.bf16 %v30800_v7, %v30799_v53  ;;  %v28026_v23 = vpack.c.bf16 %v30802_v30, %v30801_v10  ;;  %v30806_v17 = vand.u32 4294901760, %v27715_v50  ;;  %v30807_v13 = vand.u32 4294901760, %v27710_v9  ;;  %23856 = vmatprep.subr.bf16.mxu0 %v23855_v35  ;;  %v8384_v30 = vld [vmem:[%s30282_s15 + $0x8] sm:$0xff] }
 0xc80   : > { %v28032_v16 = vpack.c.bf16 %v30804_v40, %v30803_v27  ;;  %v30808_v63 = vand.u32 4294901760, %v27727_v56  ;;  %v30809_v28 = vand.u32 4294901760, %v27773_v58  ;;  %v30810_v18 = vand.u32 4294901760, %v27792_v5  ;;  %23666 = vmatpush3.bf16.msra.mxu1 %v23663_v61  ;;  %v30815_v58 = vld [vmem:[#allocation13_spill] sm:$0xff]  ;;  %v30822_v61 = vld [vmem:[#allocation11_spill] sm:$0xff] }
 0xc81   : > { %v28038_v54 = vpack.c.bf16 %v30806_v17, %v30805_v38  ;;  %v30811_v14 = vand.u32 4294901760, %v27787_v33  ;;  %v30812_v50 = vand.u32 4294901760, %v27805_v59  ;;  %v30813_v9 = vand.u32 4294901760, %v27764_v42  ;;  %23668 = vmatprep.subr.bf16.mxu1 %v23667_v57  ;;  %v30817_v5 = vld [vmem:[#allocation41_spill] sm:$0xff]  ;;  %v30819_v42 = vld [vmem:[#allocation27_spill] sm:$0xff] }
 0xc82   : > { %v28044_v1 = vpack.c.bf16 %v30808_v63, %v30807_v13  ;;  %v28051_v62 = vpack.c.bf16 %v30810_v18, %v30809_v28  ;;  %v30814_v56 = vand.u32 4294901760, %v27784_v47  ;;  %v28065_v0 = vpack.c.bf16 %v9308_v11, %v9301_v55  ;;  %23858 = vmatpush3.bf16.msra.mxu0 %v23855_v35  ;;  %v30816_v47 = vld [vmem:[#allocation40_spill] sm:$0xff]  ;;  %v30818_v33 = vld [vmem:[#allocation42_spill] sm:$0xff]  ;;  %v30820_v59 = vld [vmem:[#allocation35_spill] sm:$0xff] }
 0xc83   : > { %v28057_v46 = vpack.c.bf16 %v30812_v50, %v30811_v14  ;;  %23860 = vmatprep.subr.bf16.mxu0 %v23859_v2  ;;  %v30824_v35 = vld [vmem:[#allocation30_spill] sm:$0xff]  ;;  %v30825_v55 = vld [vmem:[#allocation3_spill] sm:$0xff]  ;;  %v9817_v17 = vsel %vm4724_vm3, %v8384_v30, 0 }
 0xc84   : > { %v28063_v8 = vpack.c.bf16 %v30814_v56, %v30813_v9  ;;  %23670 = vmatpush3.bf16.msra.mxu1 %v23667_v57  ;;  %v30827_v11 = vld [vmem:[#allocation34_spill] sm:$0xff]  ;;  %v30830_v57 = vld [vmem:[#allocation25_spill] sm:$0xff]  ;;  %v8388_v63 = vld [vmem:[%s30282_s15 + $0x28] sm:$0xff]  ;;  %v28226_v50 = vand.u32 4294901760, %v9817_v17 }
 0xc85   : > { %23672 = vmatprep.subr.bf16.mxu1 %v23671_v49  ;;  %v8387_v13 = vld [vmem:[%s30282_s15 + $0x20] sm:$0xff]  ;;  %v9829_v56 = vsel %vm4724_vm3, %v8388_v63, 0  ;;  %v8380_v30 = vld [vmem:[%s30280_s13 + $0x8] sm:$0xff] }
 0xc86   : > { %23862 = vmatpush3.bf16.msra.mxu0 %v23859_v2  ;;  %v30837_v2 = vld [vmem:[#allocation18_spill] sm:$0xff]  ;;  %v9826_v9 = vsel %vm4724_vm3, %v8387_v13, 0 }
 0xc87   : > { %23864 = vmatprep.subr.bf16.mxu0 %v23863_v37  ;;  %21591 = vmatmul.mubr.f32.vlgmr.msra.gmra.mrb[146].mxu1 %v27533_v22 }
 0xc88   : > { %23674 = vmatpush3.bf16.msra.mxu1 %v23671_v49  ;;  %21625 = vmatprep.mubr.f32.mxu1 %v30815_v58  ;;  %v30823_v49 = vld [vmem:[#allocation29_spill] sm:$0xff] }
 0xc89   : > { %23676 = vmatprep.subr.bf16.mxu1 %v23675_v21  ;;  %21801 = vmatmul.mubr.f32.vlgmr.msra.gmra.mrb[66].mxu0 %v27533_v22 }
 0xc8a   : > { %23866 = vmatpush3.bf16.msra.mxu0 %v23863_v37  ;;  %21835 = vmatprep.mubr.f32.mxu0 %v30815_v58  ;;  %v30828_v37 = vld [vmem:[#allocation4_spill] sm:$0xff] }
 0xc8b   : > { %23868 = vmatprep.subr.bf16.mxu0 %v23867_v43 }
 0xc8c   : > { %23678 = vmatpush3.bf16.msra.mxu1 %v23675_v21  ;;  %v30829_v21 = vld [vmem:[#allocation16_spill] sm:$0xff] }
 0xc8d   : > { %23680 = vmatprep.subr.bf16.mxu1 %v23679_v39 }
 0xc8e   : > { %23870 = vmatpush3.bf16.msra.mxu0 %v23867_v43  ;;  %v30831_v43 = vld [vmem:[#allocation15_spill] sm:$0xff] }
 0xc8f   : > { %23872 = vmatprep.subr.bf16.mxu0 %v23871_v34 }
 0xc90   : > { %23682 = vmatpush3.bf16.msra.mxu1 %v23679_v39  ;;  %v30832_v39 = vld [vmem:[#allocation12_spill] sm:$0xff] }
 0xc91   : > { %23684 = vmatprep.subr.bf16.mxu1 %v23683_v51 }
 0xc92   : > { %23874 = vmatpush3.bf16.msra.mxu0 %v23871_v34  ;;  %v30833_v34 = vld [vmem:[#allocation32_spill] sm:$0xff] }
 0xc93   : > { %23876 = vmatprep.subr.bf16.mxu0 %v23875_v20 }
 0xc94   : > { %23686 = vmatpush3.bf16.msra.mxu1 %v23683_v51  ;;  %v30834_v51 = vld [vmem:[#allocation39_spill] sm:$0xff] }
 0xc95   : > { %23688 = vmatprep.subr.bf16.mxu1 %v23687_v44 }
 0xc96   : > { %23878 = vmatpush3.bf16.msra.mxu0 %v23875_v20  ;;  %v30835_v20 = vld [vmem:[#allocation31_spill] sm:$0xff] }
 0xc97   : > { %23880 = vmatprep.subr.bf16.mxu0 %v23879_v12 }
 0xc98   : > { %23690 = vmatpush3.bf16.msra.mxu1 %v23687_v44  ;;  %v30836_v44 = vld [vmem:[#allocation28_spill] sm:$0xff] }
 0xc99   : > { %23692 = vmatprep.subr.bf16.mxu1 %v23691_v19 }
 0xc9a   : > { %23882 = vmatpush3.bf16.msra.mxu0 %v23879_v12  ;;  %v30838_v12 = vld [vmem:[#allocation10_spill] sm:$0xff] }
 0xc9b   : > { %23884 = vmatprep.subr.bf16.mxu0 %v23883_v4 }
 0xc9c   : > { %23694 = vmatpush3.bf16.msra.mxu1 %v23691_v19 }
 0xc9d   : > { %23696 = vmatprep.subr.bf16.mxu1 %v23695_v25 }
 0xc9e   : > { %23886 = vmatpush3.bf16.msra.mxu0 %v23883_v4 }
 0xc9f   : > { %23888 = vmatprep.subr.bf16.mxu0 %v30816_v47 }
 0xca0   : > { %23698 = vmatpush3.bf16.msra.mxu1 %v23695_v25 }
 0xca1   : > { %23700 = vmatprep.subr.bf16.mxu1 %v30817_v5 }
 0xca2   : > { %23890 = vmatpush3.bf16.msra.mxu0 %v30816_v47 }
 0xca3   : > { %23892 = vmatprep.subr.bf16.mxu0 %v30818_v33 }
 0xca4   : > { %23702 = vmatpush3.bf16.msra.mxu1 %v30817_v5  ;;  %v28235_v5 = vand.u32 4294901760, %v9826_v9 }
 0xca5   : > { %23704 = vmatprep.subr.bf16.mxu1 %v30819_v42 }
 0xca6   : > { %23894 = vmatpush3.bf16.msra.mxu0 %v30818_v33  ;;  %v28237_v33 = vand.u32 4294901760, %v9829_v56 }
 0xca7   : > { %23896 = vmatprep.subr.bf16.mxu0 %v30820_v59  ;;  %21626 = vmatmul.mubr.f32.vlgmr.msra.gmra.mrb[146].mxu1 %v30821_v6 }
 0xca8   : > { %23706 = vmatpush3.bf16.msra.mxu1 %v30819_v42  ;;  %21660 = vmatprep.mubr.f32.mxu1 %v30822_v61 }
 0xca9   : > { %23708 = vmatprep.subr.bf16.mxu1 %v30823_v49  ;;  %21836 = vmatmul.mubr.f32.vlgmr.msra.gmra.mrb[66].mxu0 %v30821_v6 }
 0xcaa   : > { %23898 = vmatpush3.bf16.msra.mxu0 %v30820_v59  ;;  %21870 = vmatprep.mubr.f32.mxu0 %v30822_v61  ;;  %v28249_v61 = vsub.f32 %v9826_v9, %v28235_v5 }
 0xcab   : > { %23900 = vmatprep.subr.bf16.mxu0 %v30824_v35 }
 0xcac   : > { %23710 = vmatpush3.bf16.msra.mxu1 %v30823_v49 }
 0xcad   : > { %23712 = vmatprep.subr.bf16.mxu1 %v30825_v55 }
 0xcae   : > { %23902 = vmatpush3.bf16.msra.mxu0 %v30824_v35 }
 0xcaf   : > { %23904 = vmatprep.subr.bf16.mxu0 %v30826_v32 }
 0xcb0   : > { %23714 = vmatpush3.bf16.msra.mxu1 %v30825_v55 }
 0xcb1   : > { %23716 = vmatprep.subr.bf16.mxu1 %v30827_v11 }
 0xcb2   : > { %23906 = vmatpush3.bf16.msra.mxu0 %v30826_v32 }
 0xcb3   : > { %23908 = vmatprep.subr.bf16.mxu0 %v30828_v37 }
 0xcb4   : > { %23718 = vmatpush3.bf16.msra.mxu1 %v30827_v11 }
 0xcb5   : > { %23720 = vmatprep.subr.bf16.mxu1 %v30829_v21 }
 0xcb6   : > { %23910 = vmatpush3.bf16.msra.mxu0 %v30828_v37 }
 0xcb7   : > { %23912 = vmatprep.subr.bf16.mxu0 %v30830_v57 }
 0xcb8   : > { %23722 = vmatpush3.bf16.msra.mxu1 %v30829_v21 }
 0xcb9   : > { %23724 = vmatprep.subr.bf16.mxu1 %v30831_v43 }
 0xcba   : > { %23914 = vmatpush3.bf16.msra.mxu0 %v30830_v57 }
 0xcbb   : > { %23916 = vmatprep.subr.bf16.mxu0 %v30832_v39 }
 0xcbc   : > { %23726 = vmatpush3.bf16.msra.mxu1 %v30831_v43 }
 0xcbd   : > { %23728 = vmatprep.subr.bf16.mxu1 %v30833_v34 }
 0xcbe   : > { %23918 = vmatpush3.bf16.msra.mxu0 %v30832_v39 }
 0xcbf   : > { %23920 = vmatprep.subr.bf16.mxu0 %v30834_v51 }
 0xcc0   : > { %23730 = vmatpush3.bf16.msra.mxu1 %v30833_v34 }
 0xcc1   : > { %23732 = vmatprep.subr.bf16.mxu1 %v30835_v20 }
 0xcc2   : > { %23922 = vmatpush3.bf16.msra.mxu0 %v30834_v51 }
 0xcc3   : > { %23924 = vmatprep.subr.bf16.mxu0 %v30836_v44 }
 0xcc4   : > { %23734 = vmatpush3.bf16.msra.mxu1 %v30835_v20 }
 0xcc5   : > { %23736 = vmatprep.subr.bf16.mxu1 %v27977_v45 }
 0xcc6   : > { %23926 = vmatpush3.bf16.msra.mxu0 %v30836_v44 }
 0xcc7   : > { %23928 = vmatprep.subr.bf16.mxu0 %v27983_v60  ;;  %21661 = vmatmul.mubr.f32.vlgmr.msra.gmra.mrb[146].mxu1 %v30837_v2 }
 0xcc8   : > { %23738 = vmatpush3.bf16.msra.mxu1 %v27977_v45  ;;  %21695 = vmatprep.mubr.f32.mxu1 %v30838_v12 }
 0xcc9   : > { %23740 = vmatprep.subr.bf16.mxu1 %v27989_v48  ;;  %21871 = vmatmul.mubr.f32.vlgmr.msra.gmra.mrb[66].mxu0 %v30837_v2 }
 0xcca   : > { %23930 = vmatpush3.bf16.msra.mxu0 %v27983_v60  ;;  %21905 = vmatprep.mubr.f32.mxu0 %v30838_v12 }
 0xccb   : > { %23932 = vmatprep.subr.bf16.mxu0 %v27995_v3 }
 0xccc   : > { %23742 = vmatpush3.bf16.msra.mxu1 %v27989_v48 }
 0xccd   : > { %23744 = vmatprep.subr.bf16.mxu1 %v28002_v36 }
 0xcce   : > { %23934 = vmatpush3.bf16.msra.mxu0 %v27995_v3 }
 0xccf   : > { %23936 = vmatprep.subr.bf16.mxu0 %v28008_v52 }
 0xcd0   : > { %23746 = vmatpush3.bf16.msra.mxu1 %v28002_v36 }
 0xcd1   : > { %23748 = vmatprep.subr.bf16.mxu1 %v28014_v29 }
 0xcd2   : > { %23938 = vmatpush3.bf16.msra.mxu0 %v28008_v52 }
 0xcd3   : > { %23940 = vmatprep.subr.bf16.mxu0 %v28020_v31 }
 0xcd4   : > { %23750 = vmatpush3.bf16.msra.mxu1 %v28014_v29 }
 0xcd5   : > { %23752 = vmatprep.subr.bf16.mxu1 %v28026_v23 }
 0xcd6   : > { %23942 = vmatpush3.bf16.msra.mxu0 %v28020_v31 }
 0xcd7   : > { %23944 = vmatprep.subr.bf16.mxu0 %v28032_v16 }
 0xcd8   : > { %23754 = vmatpush3.bf16.msra.mxu1 %v28026_v23 }
 0xcd9   : > { %23756 = vmatprep.subr.bf16.mxu1 %v28038_v54 }
 0xcda   : > { %23946 = vmatpush3.bf16.msra.mxu0 %v28032_v16  ;;  %v8385_v16 = vld [vmem:[%s30282_s15 + $0x10] sm:$0xff] }
 0xcdb   : > { %23948 = vmatprep.subr.bf16.mxu0 %v28044_v1  ;;  %v9820_v28 = vsel %vm4724_vm3, %v8385_v16, 0 }
 0xcdc   : > { %23758 = vmatpush3.bf16.msra.mxu1 %v28038_v54  ;;  %v8386_v54 = vld [vmem:[%s30282_s15 + $0x18] sm:$0xff] }
 0xcdd   : > { %23760 = vmatprep.subr.bf16.mxu1 %v28051_v62 }
 0xcde   : > { %23950 = vmatpush3.bf16.msra.mxu0 %v28044_v1 }
 0xcdf   : > { %23952 = vmatprep.subr.bf16.mxu0 %v28057_v46 }
 0xce0   : > { %23762 = vmatpush3.bf16.msra.mxu1 %v28051_v62 }
 0xce1   : > { %23764 = vmatprep.subr.bf16.mxu1 %v28063_v8 }
 0xce2   : > { %23954 = vmatpush3.bf16.msra.mxu0 %v28057_v46  ;;  %v9823_v46 = vsel %vm4724_vm3, %v8386_v54, 0 }
 0xce3   : > { %23956 = vmatprep.subr.bf16.mxu0 %v28065_v0  ;;  %v28233_v47 = vand.u32 4294901760, %v9823_v46 }
 0xce4   : > { %23766 = vmatpush3.bf16.msra.mxu1 %v28063_v8 }
 0xce5   : > { %23768 = vmatprep.subr.bf16.mxu1 %v30819_v42  ;;  %v28246_v6 = vsub.f32 %v9823_v46, %v28233_v47  ;;  %v8394_v46 = vld [vmem:[%s30282_s15 + $0x58] sm:$0xff] }
 0xce6   : > { %23958 = vmatpush3.bf16.msra.mxu0 %v28065_v0  ;;  %v28231_v0 = vand.u32 4294901760, %v9820_v28 }
 0xce7   : > { %23960 = vmatprep.subr.bf16.mxu0 %v30820_v59  ;;  %21696 = vmatmul.mubr.f32.vlgmr.msra.gmra.mrb[146].mxu1 %v27533_v22 }
 0xce8   : > { %23770 = vmatpush3.bf16.msra.mxu1 %v30819_v42  ;;  %21730 = vmatprep.mubr.f32.mxu1 %v30838_v12  ;;  %v28240_v42 = vsub.f32 %v9817_v17, %v28226_v50  ;;  %v8393_v17 = vld [vmem:[%s30282_s15 + $0x50] sm:$0xff] }
 0xce9   : > { %23772 = vmatprep.subr.bf16.mxu1 %v30823_v49  ;;  %21906 = vmatmul.mubr.f32.vlgmr.msra.gmra.mrb[66].mxu0 %v27533_v22 }
 0xcea   : > { %23962 = vmatpush3.bf16.msra.mxu0 %v30820_v59  ;;  %21940 = vmatprep.mubr.f32.mxu0 %v30838_v12  ;;  %v28243_v59 = vsub.f32 %v9820_v28, %v28231_v0  ;;  %v8379_v12 = vld [vmem:[%s30280_s13] sm:$0xff] }
 0xceb   : > { %23964 = vmatprep.subr.bf16.mxu0 %v30824_v35 }
 0xcec   : > { %23774 = vmatpush3.bf16.msra.mxu1 %v30823_v49  ;;  %v28252_v49 = vsub.f32 %v9829_v56, %v28237_v33 }
 0xced   : > { %23776 = vmatprep.subr.bf16.mxu1 %v30825_v55 }
 0xcee   : > { %23966 = vmatpush3.bf16.msra.mxu0 %v30824_v35  ;;  %v8389_v35 = vld [vmem:[%s30282_s15 + $0x30] sm:$0xff] }
 0xcef   : > { %23968 = vmatprep.subr.bf16.mxu0 %v30826_v32 }
 0xcf0   : > { %23778 = vmatpush3.bf16.msra.mxu1 %v30825_v55  ;;  %v28258_v55 = vand.u32 4294901760, %v28240_v42 }
 0xcf1   : > { %23780 = vmatprep.subr.bf16.mxu1 %v30827_v11 }
 0xcf2   : > { %23970 = vmatpush3.bf16.msra.mxu0 %v30826_v32  ;;  %v8377_v32 = vld [vmem:[%s30279_s12] sm:$0xff] }
 0xcf3   : > { %23972 = vmatprep.subr.bf16.mxu0 %v30828_v37 }
 0xcf4   : > { %23782 = vmatpush3.bf16.msra.mxu1 %v30827_v11  ;;  %v28264_v11 = vand.u32 4294901760, %v28243_v59 }
 0xcf5   : > { %23784 = vmatprep.subr.bf16.mxu1 %v30829_v21 }
 0xcf6   : > { %23974 = vmatpush3.bf16.msra.mxu0 %v30828_v37  ;;  %v8390_v37 = vld [vmem:[%s30282_s15 + $0x38] sm:$0xff] }
 0xcf7   : > { %23976 = vmatprep.subr.bf16.mxu0 %v30830_v57  ;;  %v9835_v2 = vsel %vm4724_vm3, %v8390_v37, 0 }
 0xcf8   : > { %23786 = vmatpush3.bf16.msra.mxu1 %v30829_v21  ;;  %v9832_v21 = vsel %vm4724_vm3, %v8389_v35, 0 }
 0xcf9   : > { %23788 = vmatprep.subr.bf16.mxu1 %v30831_v43 }
 0xcfa   : > { %23978 = vmatpush3.bf16.msra.mxu0 %v30830_v57 }
 0xcfb   : > { %23980 = vmatprep.subr.bf16.mxu0 %v30832_v39 }
 0xcfc   : > { %23790 = vmatpush3.bf16.msra.mxu1 %v30831_v43  ;;  %v28271_v43 = vand.u32 4294901760, %v28246_v6 }
 0xcfd   : > { %23792 = vmatprep.subr.bf16.mxu1 %v30833_v34 }
 0xcfe   : > { %23982 = vmatpush3.bf16.msra.mxu0 %v30832_v39  ;;  %v28274_v39 = vand.u32 4294901760, %v28249_v61 }
 0xcff   : > { %23984 = vmatprep.subr.bf16.mxu0 %v30834_v51 }
 0xd00   : > { %23794 = vmatpush3.bf16.msra.mxu1 %v30833_v34  ;;  %v28277_v34 = vand.u32 4294901760, %v28252_v49 }
 0xd01   : > { %23796 = vmatprep.subr.bf16.mxu1 %v30835_v20 }
 0xd02   : > { %23986 = vmatpush3.bf16.msra.mxu0 %v30834_v51  ;;  %v8391_v51 = vld [vmem:[%s30282_s15 + $0x40] sm:$0xff] }
 0xd03   : > { %23988 = vmatprep.subr.bf16.mxu0 %v30836_v44 }
 0xd04   : > { %23798 = vmatpush3.bf16.msra.mxu1 %v30835_v20 }
 0xd06   : > { %23990 = vmatpush3.bf16.msra.mxu0 %v30836_v44  ;;  %v9941_v44 = vsub.f32 %v28240_v42, %v28258_v55 }
 0xd07   : > { %21731 = vmatmul.mubr.f32.vlgmr.msra.gmra.mrb[146].mxu1 %v27533_v22 }
 0xd09   : > { %21941 = vmatmul.mubr.f32.vlgmr.msra.gmra.mrb[66].mxu0 %v27533_v22  ;;  %v8383_v22 = vld [vmem:[%s30282_s15] sm:$0xff] }
 0xd0a   : > { %v9814_v41 = vsel %vm4724_vm3, %v8383_v22, 0  ;;  %v9961_v22 = vsub.f32 %v28246_v6, %v28271_v43 }
 0xd0b   : > { %v28195_v26 = vand.u32 4294901760, %v9814_v41 }
 0xd0c   : > { %v28327_v28 = vand.u32 4294901760, %v9961_v22 }
 0xd0d   : > { %v28198_v52 = vsub.f32 %v9814_v41, %v28195_v26  ;;  %v9971_v41 = vsub.f32 %v28249_v61, %v28274_v39 }
 0xd0f   : > { %v28201_v15 = vand.u32 4294901760, %v28198_v52 }
 0xd11   : > { %v9931_v24 = vsub.f32 %v28198_v52, %v28201_v15 }
 0xd13   : > { %v9932_v29 = vand.u32 4294901760, %v9931_v24  ;;  %v9981_v24 = vsub.f32 %v28252_v49, %v28277_v34 }
 0xd15   : > { %21947 = vmatprep.mubr.f32.mxu1 %v9932_v29  ;;  %22115 = vmatprep.mubr.f32.mxu0 %v9932_v29  ;;  %v28305_v29 = vand.u32 4294901760, %v9835_v2 }
 0xdda   : > { %v21732_v45 = vpop.f32.mrb[146].mxu1 }
 0xddb   : > { %v9073_v60 = vpop.f32.mrb[147].mxu1  ;;  %v9786_v19 = vsel %vm4740_vm4, %v21732_v45, 0.0  ;;  %v8378_v45 = vld [vmem:[%s30279_s12 + $0x8] sm:$0xff] }
 0xddc   : > { %v21942_v4 = vpop.f32.mrb[66].mxu0  ;;  %9787 = vadd.xlane.f32.xlu1 %v9786_v19  ;;  %v9783_v25 = vsel %vm4740_vm4, %v9073_v60, 0.0  ;;  %v9951_v60 = vsub.f32 %v28243_v59, %v28264_v11  ;;  %v28293_v19 = vand.u32 4294901760, %v9832_v21 }
 0xddd   : > { %v9773_v3 = vpop.f32.mrb[67].mxu0  ;;  %9784 = vadd.xlane.f32.xlu0 %v9783_v25  ;;  %v9794_v36 = vsel %vm4740_vm4, %v21942_v4, 0.0 }
 0xdde   : > { %v9791_v48 = vsel %vm4740_vm4, %v9773_v3, 0.0  ;;  %v9838_v3 = vsel %vm4724_vm3, %v8391_v51, 0 }
 0xddf   : > { %v28319_v16 = vand.u32 4294901760, %v9838_v3 }
 0xde1   : > { %9792 = vadd.xlane.f32.xlu0 %v9791_v48  ;;  %v8392_v48 = vld [vmem:[%s30282_s15 + $0x48] sm:$0xff]  ;;  %v28351_v37 = vsub.f32 %v9838_v3, %v28319_v16 }
 0xde5   : > { %9795 = vadd.xlane.f32.xlu0 %v9794_v36 }
 0xe69   : > { %v9788_v31 = vpop.xlane.xlu1 %9787 }
 0xe6a   : > { %v9785_v53 = vpop.xlane.xlu0 %9784  ;;  %v28208_v23 = vmul.f32 0.015625, %v9788_v31  ;;  %v28307_v31 = vand.u32 4294901760, %v9941_v44  ;;  %v9847_v44 = vsel %vm4724_vm3, %v8394_v46, 0 }
 0xe6b   : > { %v9789_v7 = vmul.f32 0.015625, %v9785_v53 }
 0xe6c   : > { %v9800_v18 = vmul.f32 %v28208_v23, %v28208_v23 }
 0xe6d   : > { %v9799_v27 = vmul.f32 %v9789_v7, %v9789_v7 }
 0xe6e   : > { %v9793_v10 = vpop.xlane.xlu0 %9792 }
 0xe6f   : > { %v9797_v40 = vmul.f32 0.015625, %v9793_v10 }
 0xe71   : > { %v9801_v38 = vsub.f32 %v9797_v40, %v9799_v27  ;;  %v28314_v27 = vand.u32 4294901760, %v9951_v60  ;;  %v28317_v40 = vsub.f32 %v9832_v21, %v28293_v19 }
 0xe72   : > { %v9796_v1 = vpop.xlane.xlu0 %9795 }
 0xe73   : > { %v9803_v62 = vadd.f32 1e-05, %v9801_v38  ;;  %v9798_v14 = vmul.f32 0.015625, %v9796_v1  ;;  %v9841_v38 = vsel %vm4724_vm3, %v8392_v48, 0  ;;  %v8396_v48 = vld [vmem:[%s30282_s15 + $0x68] sm:$0xff] }
 0xe74   : > { %v28353_v21 = vand.u32 4294901760, %v9841_v38  ;;  %v9853_v46 = vsel %vm4724_vm3, %v8396_v48, 0 }
 0xe75   : > { %25455 = vrsqrt.f32 %v9803_v62  ;;  %v9802_v8 = vsub.f32 %v9798_v14, %v9800_v18  ;;  %v28329_v18 = vand.u32 4294901760, %v9971_v41  ;;  %v28331_v62 = vand.u32 4294901760, %v9981_v24 }
 0xe76   : > { %v28334_v14 = vsub.f32 %v9835_v2, %v28305_v29  ;;  %v28376_v41 = vand.u32 4294901760, %v28351_v37  ;;  %v28379_v24 = vsub.f32 %v9841_v38, %v28353_v21 }
 0xe77   : > { %v9804_v58 = vadd.f32 1e-05, %v9802_v8  ;;  %v9844_v8 = vsel %vm4724_vm3, %v8393_v17, 0 }
 0xe79   : > { %25457 = vrsqrt.f32 %v9804_v58  ;;  %v8395_v58 = vld [vmem:[%s30282_s15 + $0x60] sm:$0xff] }
 0xe7a   : > { %v9850_v60 = vsel %vm4724_vm3, %v8395_v58, 0 }
 0xe7f   : > { %v25456_v57 = vpop.eup %25455 }
 0xe80   : > { %v9807_v20 = vmul.f32 %v25456_v57, %v8377_v32  ;;  %v28348_v32 = vand.u32 4294901760, %v28317_v40 }
 0xe82   : > { %v9809_v4 = vmul.f32 %v9807_v20, %v9789_v7  ;;  %v9862_v25 = vand.u32 4294901760, %v9807_v20  ;;  %30839 = vst [vmem:[#allocation13_spill] sm:$0xff] %v28348_v32  ;;  %v9991_v22 = vsub.f32 %v28317_v40, %v28348_v32 }
 0xe83   : > { %v25458_v36 = vpop.eup %25457 }
 0xe84   : > { %v9811_v53 = vsub.f32 %v8379_v12, %v9809_v4  ;;  %v9808_v7 = vmul.f32 %v25458_v36, %v8378_v45  ;;  %v28309_v10 = vsub.f32 %v9807_v20, %v9862_v25  ;;  %v28361_v12 = vand.u32 4294901760, %v28334_v14 }
 0xe85   : > { %v28363_v45 = vand.u32 4294901760, %v9844_v8 }
 0xe86   : > { %v9810_v54 = vmul.f32 %v9808_v7, %v28208_v23  ;;  %v9865_v13 = vand.u32 4294901760, %v9808_v7  ;;  %v10966_v63 = vand.u32 4294901760, %v9811_v53  ;;  %v10091_v1 = vand.u32 4294901760, %v28309_v10  ;;  %30840 = vst [vmem:[#allocation40_spill] sm:$0xff] %v28361_v12 }
 0xe87   : > { %v10001_v38 = vsub.f32 %v28334_v14, %v28361_v12  ;;  %v10011_v12 = vsub.f32 %v28351_v37, %v28376_v41 }
 0xe88   : > { %v9812_v9 = vsub.f32 %v8380_v30, %v9810_v54  ;;  %v28339_v56 = vpack.c.bf16 %v9865_v13, %v9862_v25  ;;  %v10097_v23 = vsub.f32 %v9808_v7, %v9865_v13  ;;  %v28345_v35 = vsub.f32 %v9811_v53, %v10966_v63  ;;  %v8397_v7 = vld [vmem:[%s30282_s15 + $0x70] sm:$0xff] }
 0xe89   : > { %v10092_v51 = vsub.f32 %v28309_v10, %v10091_v1  ;;  %v28381_v53 = vand.u32 4294901760, %v9847_v44 }
 0xe8a   : > { %23992 = vmatprep.subr.bf16.mxu1 %v28339_v56  ;;  %v10969_v57 = vand.u32 4294901760, %v9812_v9  ;;  %v10098_v20 = vand.u32 4294901760, %v10097_v23  ;;  %v11195_v2 = vand.u32 4294901760, %v28345_v35  ;;  %v28415_v48 = vpack.c.bf16 %v10097_v23, %v28309_v10 }
 0xe8b   : > { %23994 = vmatpush3.bf16.msra.mxu1 %v28339_v56  ;;  %v10093_v30 = vand.u32 4294901760, %v10092_v51  ;;  %v8398_v51 = vld [vmem:[%s30282_s15 + $0x78] sm:$0xff]  ;;  %v28411_v32 = vsub.f32 %v9847_v44, %v28381_v53 }
 0xe8c   : > { %v28366_v4 = vpack.c.bf16 %v10969_v57, %v10966_v63  ;;  %v10099_v25 = vsub.f32 %v10097_v23, %v10098_v20  ;;  %v11201_v3 = vsub.f32 %v9812_v9, %v10969_v57  ;;  %v28371_v36 = vpack.c.bf16 %v10098_v20, %v10091_v1 }
 0xe8d   : > { %v11196_v54 = vsub.f32 %v28345_v35, %v11195_v2  ;;  %v28394_v63 = vsub.f32 %v9844_v8, %v28363_v45  ;;  %v28396_v1 = vand.u32 4294901760, %v9850_v60  ;;  %v9856_v57 = vsel %vm4724_vm3, %v8397_v7, 0 }
 0xe8e   : > { %21948 = vmatmul.mubr.f32.vlgmr.msra.gmra.mrb[212].mxu1 %v28307_v31  ;;  %24016 = vmatprep.subr.bf16.mxu0 %v28366_v4  ;;  %v10100_v17 = vand.u32 4294901760, %v10099_v25  ;;  %v11202_v13 = vand.u32 4294901760, %v11201_v3  ;;  %v9992_v25 = vand.u32 4294901760, %v9991_v22  ;;  %v28408_v8 = vand.u32 4294901760, %v28379_v24 }
 0xe8f   : > { %24018 = vmatpush3.bf16.msra.mxu0 %v28366_v4  ;;  %21950 = vmatprep.mubr.f32.mxu1 %v28314_v27  ;;  %v11197_v7 = vand.u32 4294901760, %v11196_v54  ;;  %v28421_v22 = vand.u32 4294901760, %v28394_v63  ;;  %v28426_v44 = vand.u32 4294901760, %v9856_v57  ;;  %v10002_v23 = vand.u32 4294901760, %v10001_v38 }
 0xe90   : > { %v23995_v9 = vpack.c.bf16 %v10100_v17, %v10093_v30  ;;  %v11203_v58 = vsub.f32 %v11201_v3, %v11202_v13  ;;  %v28403_v20 = vpack.c.bf16 %v11202_v13, %v11195_v2  ;;  %v28417_v2 = vand.u32 4294901760, %v9853_v46 }
 0xe91   : > { %v28424_v17 = vsub.f32 %v9850_v60, %v28396_v1  ;;  %v9859_v13 = vsel %vm4724_vm3, %v8398_v51, 0  ;;  %v10021_v60 = vsub.f32 %v28379_v24, %v28408_v8  ;;  %v28436_v54 = vand.u32 4294901760, %v28411_v32 }
 0xe92   : > { %21951 = vmatmul.mubr.f32.gmra.mrb[214].mxu1 %v28327_v28  ;;  %23996 = vmatprep.subr.bf16.mxu1 %v23995_v9  ;;  %v11204_v30 = vand.u32 4294901760, %v11203_v58  ;;  %v28441_v58 = vand.u32 4294901760, %v9859_v13  ;;  %v28451_v51 = vsub.f32 %v9856_v57, %v28426_v44  ;;  %vm12342_vm3 = vcmask 1043456  }
 0xe93   : > { %22116 = vmatmul.mubr.f32.vlgmr.msra.gmra.mrb[84].mxu0 %v28307_v31  ;;  %23998 = vmatpush3.bf16.msra.mxu1 %v23995_v9  ;;  %v10012_v31 = vand.u32 4294901760, %v10011_v12  ;;  %v28439_v9 = vsub.f32 %v9853_v46, %v28417_v2  ;;  %v10031_v12 = vsub.f32 %v28394_v63, %v28421_v22  ;;  %v28448_v38 = vand.u32 4294901760, %v28424_v17 }
 0xe94   : > { %24000 = vmatprep.subr.bf16.mxu1 %v28415_v48  ;;  %21953 = vmatprep.mubr.f32.mxu1 %v28329_v18  ;;  %v24019_v10 = vpack.c.bf16 %v11204_v30, %v11197_v7  ;;  %v10022_v46 = vand.u32 4294901760, %v10021_v60 }
 0xe95   : > { %22118 = vmatprep.mubr.f32.mxu0 %v28314_v27  ;;  %v24023_v27 = vpack.c.bf16 %v11201_v3, %v28345_v35  ;;  %v28457_v35 = vand.u32 4294901760, %v28439_v9  ;;  %v28460_v3 = vsub.f32 %v9859_v13, %v28441_v58  ;;  %v10032_v57 = vand.u32 4294901760, %v10031_v12 }
 0xe96   : > { %21954 = vmatmul.mubr.f32.gmra.mrb[216].mxu1 %v28331_v62  ;;  %24020 = vmatprep.subr.bf16.mxu0 %v24019_v10  ;;  %v10051_v7 = vsub.f32 %v28424_v17, %v28448_v38 }
 0xe97   : > { %22119 = vmatmul.mubr.f32.gmra.mrb[86].mxu0 %v28327_v28  ;;  %21956 = vmatprep.mubr.f32.mxu1 %v9992_v25  ;;  %v10041_v28 = vsub.f32 %v28411_v32, %v28436_v54  ;;  %30841 = vst [vmem:[#allocation41_spill] sm:$0xff] %v28457_v35  ;;  %v28471_v60 = vand.u32 4294901760, %v28460_v3 }
 0xe98   : > { %24022 = vmatpush3.bf16.msra.mxu0 %v24019_v10  ;;  %22121 = vmatprep.mubr.f32.mxu0 %v28329_v18  ;;  %v28466_v18 = vand.u32 4294901760, %v28451_v51  ;;  %v10061_v10 = vsub.f32 %v28439_v9, %v28457_v35 }
 0xe99   : > { %24024 = vmatprep.subr.bf16.mxu0 %v24023_v27  ;;  %v10042_v30 = vand.u32 4294901760, %v10041_v28 }
 0xe9a   : > { %21957 = vmatmul.mubr.f32.gmra.mrb[218].mxu1 %v10002_v23  ;;  %v10071_v13 = vsub.f32 %v28451_v51, %v28466_v18  ;;  %v10062_v12 = vand.u32 4294901760, %v10061_v10 }
 0xe9b   : > { %22122 = vmatmul.mubr.f32.gmra.mrb[88].mxu0 %v28331_v62  ;;  %21959 = vmatprep.mubr.f32.mxu1 %v10012_v31  ;;  %v10052_v62 = vand.u32 4294901760, %v10051_v7 }
 0xe9c   : > { %22124 = vmatprep.mubr.f32.mxu0 %v9992_v25  ;;  %v10081_v25 = vsub.f32 %v28460_v3, %v28471_v60  ;;  %v10072_v28 = vand.u32 4294901760, %v10071_v13 }
 0xe9e   : > { %21960 = vmatmul.mubr.f32.gmra.mrb[220].mxu1 %v10022_v46  ;;  %v10082_v35 = vand.u32 4294901760, %v10081_v25 }
 0xe9f   : > { %22125 = vmatmul.mubr.f32.gmra.mrb[90].mxu0 %v10002_v23  ;;  %21962 = vmatprep.mubr.f32.mxu1 %v10032_v57 }
 0xea0   : > { %22127 = vmatprep.mubr.f32.mxu0 %v10012_v31 }
 0xea2   : > { %21963 = vmatmul.mubr.f32.gmra.mrb[222].mxu1 %v10042_v30 }
 0xea3   : > { %22128 = vmatmul.mubr.f32.gmra.mrb[92].mxu0 %v10022_v46  ;;  %21965 = vmatprep.mubr.f32.mxu1 %v10052_v62 }
 0xea4   : > { %22130 = vmatprep.mubr.f32.mxu0 %v10032_v57 }
 0xea6   : > { %21966 = vmatmul.mubr.f32.gmra.mrb[224].mxu1 %v10062_v12 }
 0xea7   : > { %22131 = vmatmul.mubr.f32.gmra.mrb[94].mxu0 %v10042_v30  ;;  %21968 = vmatprep.mubr.f32.mxu1 %v10072_v28 }
 0xea8   : > { %22133 = vmatprep.mubr.f32.mxu0 %v10052_v62  ;;  %v30848_v62 = vld [vmem:[#allocation22_spill] sm:$0xff] }
 0xeaa   : > { %21969 = vmatmul.mubr.f32.gmra.mrb[226].mxu1 %v10082_v35 }
 0xeab   : > { %22134 = vmatmul.mubr.f32.gmra.mrb[96].mxu0 %v10062_v12  ;;  %21975 = vmatprep.mubr.f32.mxu1 %v28195_v26 }
 0xeac   : > { %22136 = vmatprep.mubr.f32.mxu0 %v10072_v28 }
 0xeae   : > { %21976 = vmatmul.mubr.f32.vlgmr.msra.gmra.mrb[212].mxu1 %v28226_v50 }
 0xeaf   : > { %24002 = vmatpush3.bf16.msra.mxu1 %v28415_v48  ;;  %22137 = vmatmul.mubr.f32.gmra.mrb[98].mxu0 %v10082_v35  ;;  %v18274_v48 = vld [vmem:[%s30284_s17 + $0x4] sm:$0xf] }
 0xeb0   : > { %24004 = vmatprep.subr.bf16.mxu1 %v28339_v56  ;;  %21978 = vmatprep.mubr.f32.mxu1 %v28231_v0 }
 0xeb1   : > { %22143 = vmatprep.mubr.f32.mxu0 %v28195_v26 }
 0xeb2   : > { %21979 = vmatmul.mubr.f32.gmra.mrb[214].mxu1 %v28233_v47 }
 0xeb3   : > { %22144 = vmatmul.mubr.f32.vlgmr.msra.gmra.mrb[84].mxu0 %v28226_v50  ;;  %21981 = vmatprep.mubr.f32.mxu1 %v28235_v5 }
 0xeb4   : > { %24026 = vmatpush3.bf16.msra.mxu0 %v24023_v27  ;;  %22146 = vmatprep.mubr.f32.mxu0 %v28231_v0 }
 0xeb5   : > { %24028 = vmatprep.subr.bf16.mxu0 %v28366_v4 }
 0xeb6   : > { %21982 = vmatmul.mubr.f32.gmra.mrb[216].mxu1 %v28237_v33 }
 0xeb7   : > { %22147 = vmatmul.mubr.f32.gmra.mrb[86].mxu0 %v28233_v47  ;;  %21984 = vmatprep.mubr.f32.mxu1 %v28293_v19 }
 0xeb8   : > { %22149 = vmatprep.mubr.f32.mxu0 %v28235_v5 }
 0xeba   : > { %21985 = vmatmul.mubr.f32.gmra.mrb[218].mxu1 %v28305_v29 }
 0xebb   : > { %22150 = vmatmul.mubr.f32.gmra.mrb[88].mxu0 %v28237_v33  ;;  %21987 = vmatprep.mubr.f32.mxu1 %v28319_v16 }
 0xebc   : > { %22152 = vmatprep.mubr.f32.mxu0 %v28293_v19 }
 0xebe   : > { %21988 = vmatmul.mubr.f32.gmra.mrb[220].mxu1 %v28353_v21 }
 0xebf   : > { %22153 = vmatmul.mubr.f32.gmra.mrb[90].mxu0 %v28305_v29  ;;  %21990 = vmatprep.mubr.f32.mxu1 %v28363_v45 }
 0xec0   : > { %22155 = vmatprep.mubr.f32.mxu0 %v28319_v16 }
 0xec2   : > { %21991 = vmatmul.mubr.f32.gmra.mrb[222].mxu1 %v28381_v53 }
 0xec3   : > { %22156 = vmatmul.mubr.f32.gmra.mrb[92].mxu0 %v28353_v21  ;;  %21993 = vmatprep.mubr.f32.mxu1 %v28396_v1 }
 0xec4   : > { %22158 = vmatprep.mubr.f32.mxu0 %v28363_v45 }
 0xec6   : > { %21994 = vmatmul.mubr.f32.gmra.mrb[224].mxu1 %v28417_v2 }
 0xec7   : > { %22159 = vmatmul.mubr.f32.gmra.mrb[94].mxu0 %v28381_v53  ;;  %21996 = vmatprep.mubr.f32.mxu1 %v28426_v44 }
 0xec8   : > { %22161 = vmatprep.mubr.f32.mxu0 %v28396_v1 }
 0xeca   : > { %21997 = vmatmul.mubr.f32.gmra.mrb[226].mxu1 %v28441_v58 }
 0xecb   : > { %22162 = vmatmul.mubr.f32.gmra.mrb[96].mxu0 %v28417_v2  ;;  %22003 = vmatprep.mubr.f32.mxu1 %v28198_v52 }
 0xecc   : > { %22164 = vmatprep.mubr.f32.mxu0 %v28426_v44 }
 0xece   : > { %22004 = vmatmul.mubr.f32.vlgmr.msra.gmra.mrb[212].mxu1 %v28240_v42 }
 0xecf   : > { %24006 = vmatpush3.bf16.msra.mxu1 %v28339_v56  ;;  %22165 = vmatmul.mubr.f32.gmra.mrb[98].mxu0 %v28441_v58 }
 0xed0   : > { %24008 = vmatprep.subr.bf16.mxu1 %v28371_v36  ;;  %22006 = vmatprep.mubr.f32.mxu1 %v28243_v59 }
 0xed1   : > { %22171 = vmatprep.mubr.f32.mxu0 %v28198_v52  ;;  %v30842_v52 = vld [vmem:[#allocation13_spill] sm:$0xff] }
 0xed2   : > { %22007 = vmatmul.mubr.f32.gmra.mrb[214].mxu1 %v28246_v6 }
 0xed3   : > { %22172 = vmatmul.mubr.f32.vlgmr.msra.gmra.mrb[84].mxu0 %v28240_v42  ;;  %22009 = vmatprep.mubr.f32.mxu1 %v28249_v61  ;;  %v30844_v42 = vld [vmem:[#allocation41_spill] sm:$0xff] }
 0xed4   : > { %24030 = vmatpush3.bf16.msra.mxu0 %v28366_v4  ;;  %22174 = vmatprep.mubr.f32.mxu0 %v28243_v59 }
 0xed5   : > { %24032 = vmatprep.subr.bf16.mxu0 %v28403_v20 }
 0xed6   : > { %22010 = vmatmul.mubr.f32.gmra.mrb[216].mxu1 %v28252_v49 }
 0xed7   : > { %22175 = vmatmul.mubr.f32.gmra.mrb[86].mxu0 %v28246_v6  ;;  %22012 = vmatprep.mubr.f32.mxu1 %v28317_v40 }
 0xed8   : > { %22177 = vmatprep.mubr.f32.mxu0 %v28249_v61 }
 0xeda   : > { %22013 = vmatmul.mubr.f32.gmra.mrb[218].mxu1 %v28334_v14 }
 0xedb   : > { %22178 = vmatmul.mubr.f32.gmra.mrb[88].mxu0 %v28252_v49  ;;  %22015 = vmatprep.mubr.f32.mxu1 %v28351_v37 }
 0xedc   : > { %22180 = vmatprep.mubr.f32.mxu0 %v28317_v40 }
 0xede   : > { %22016 = vmatmul.mubr.f32.gmra.mrb[220].mxu1 %v28379_v24 }
 0xedf   : > { %22181 = vmatmul.mubr.f32.gmra.mrb[90].mxu0 %v28334_v14  ;;  %22018 = vmatprep.mubr.f32.mxu1 %v28394_v63 }
 0xee0   : > { %22183 = vmatprep.mubr.f32.mxu0 %v28351_v37  ;;  %v12317_v37 = vld [vmem:[%s30284_s17] sm:$0xf] }
 0xee2   : > { %22019 = vmatmul.mubr.f32.gmra.mrb[222].mxu1 %v28411_v32 }
 0xee3   : > { %22184 = vmatmul.mubr.f32.gmra.mrb[92].mxu0 %v28379_v24  ;;  %22021 = vmatprep.mubr.f32.mxu1 %v28424_v17 }
 0xee4   : > { %22186 = vmatprep.mubr.f32.mxu0 %v28394_v63 }
 0xee6   : > { %22022 = vmatmul.mubr.f32.gmra.mrb[224].mxu1 %v28439_v9 }
 0xee7   : > { %22187 = vmatmul.mubr.f32.gmra.mrb[94].mxu0 %v28411_v32  ;;  %22024 = vmatprep.mubr.f32.mxu1 %v28451_v51 }
 0xee8   : > { %22189 = vmatprep.mubr.f32.mxu0 %v28424_v17  ;;  %v30845_v17 = vld [vmem:[#allocation19_spill] sm:$0xff] }
 0xeea   : > { %22025 = vmatmul.mubr.f32.gmra.mrb[226].mxu1 %v28460_v3 }
 0xeeb   : > { %22190 = vmatmul.mubr.f32.gmra.mrb[96].mxu0 %v28439_v9  ;;  %22031 = vmatprep.mubr.f32.mxu1 %v28201_v15  ;;  %v30846_v9 = vld [vmem:[#allocation26_spill] sm:$0xff] }
 0xeec   : > { %22192 = vmatprep.mubr.f32.mxu0 %v28451_v51 }
 0xeee   : > { %22032 = vmatmul.mubr.f32.vlgmr.msra.gmra.mrb[212].mxu1 %v28258_v55 }
 0xeef   : > { %24010 = vmatpush3.bf16.msra.mxu1 %v28371_v36  ;;  %22193 = vmatmul.mubr.f32.gmra.mrb[98].mxu0 %v28460_v3 }
 0xef0   : > { %24012 = vmatprep.subr.bf16.mxu1 %v28339_v56  ;;  %22034 = vmatprep.mubr.f32.mxu1 %v28264_v11 }
 0xef1   : > { %22199 = vmatprep.mubr.f32.mxu0 %v28201_v15  ;;  %v30843_v15 = vld [vmem:[#allocation40_spill] sm:$0xff] }
 0xef2   : > { %22035 = vmatmul.mubr.f32.gmra.mrb[214].mxu1 %v28271_v43 }
 0xef3   : > { %22200 = vmatmul.mubr.f32.vlgmr.msra.gmra.mrb[84].mxu0 %v28258_v55  ;;  %22037 = vmatprep.mubr.f32.mxu1 %v28274_v39 }
 0xef4   : > { %24034 = vmatpush3.bf16.msra.mxu0 %v28403_v20  ;;  %22202 = vmatprep.mubr.f32.mxu0 %v28264_v11 }
 0xef5   : > { %24036 = vmatprep.subr.bf16.mxu0 %v28366_v4 }
 0xef6   : > { %22038 = vmatmul.mubr.f32.gmra.mrb[216].mxu1 %v28277_v34 }
 0xef7   : > { %22203 = vmatmul.mubr.f32.gmra.mrb[86].mxu0 %v28271_v43  ;;  %22040 = vmatprep.mubr.f32.mxu1 %v30842_v52 }
 0xef8   : > { %22205 = vmatprep.mubr.f32.mxu0 %v28274_v39 }
 0xefa   : > { %22041 = vmatmul.mubr.f32.gmra.mrb[218].mxu1 %v30843_v15 }
 0xefb   : > { %22206 = vmatmul.mubr.f32.gmra.mrb[88].mxu0 %v28277_v34  ;;  %22043 = vmatprep.mubr.f32.mxu1 %v28376_v41 }
 0xefc   : > { %22208 = vmatprep.mubr.f32.mxu0 %v30842_v52 }
 0xefe   : > { %22044 = vmatmul.mubr.f32.gmra.mrb[220].mxu1 %v28408_v8 }
 0xeff   : > { %22209 = vmatmul.mubr.f32.gmra.mrb[90].mxu0 %v30843_v15  ;;  %22046 = vmatprep.mubr.f32.mxu1 %v28421_v22 }
 0xf00   : > { %22211 = vmatprep.mubr.f32.mxu0 %v28376_v41  ;;  %v12344_v41 = vsel %vm12342_vm3, %v12317_v37, 0 }
 0xf02   : > { %22047 = vmatmul.mubr.f32.gmra.mrb[222].mxu1 %v28436_v54 }
 0xf03   : > { %22212 = vmatmul.mubr.f32.gmra.mrb[92].mxu0 %v28408_v8  ;;  %22049 = vmatprep.mubr.f32.mxu1 %v28448_v38 }
 0xf04   : > { %22214 = vmatprep.mubr.f32.mxu0 %v28421_v22 }
 0xf06   : > { %22050 = vmatmul.mubr.f32.gmra.mrb[224].mxu1 %v30844_v42 }
 0xf07   : > { %22215 = vmatmul.mubr.f32.gmra.mrb[94].mxu0 %v28436_v54  ;;  %22052 = vmatprep.mubr.f32.mxu1 %v28466_v18 }
 0xf08   : > { %22217 = vmatprep.mubr.f32.mxu0 %v28448_v38 }
 0xf0a   : > { %22053 = vmatmul.mubr.f32.gmra.mrb[226].mxu1 %v28471_v60 }
 0xf0b   : > { %22218 = vmatmul.mubr.f32.gmra.mrb[96].mxu0 %v30844_v42  ;;  %22059 = vmatprep.mubr.f32.mxu1 %v28195_v26 }
 0xf0c   : > { %22220 = vmatprep.mubr.f32.mxu0 %v28466_v18  ;;  %v30847_v18 = vld [vmem:[#allocation21_spill] sm:$0xff] }
 0xf0e   : > { %22060 = vmatmul.mubr.f32.vlgmr.msra.gmra.mrb[212].mxu1 %v28226_v50 }
 0xf0f   : > { %24014 = vmatpush3.bf16.msra.mxu1 %v28339_v56  ;;  %22221 = vmatmul.mubr.f32.gmra.mrb[98].mxu0 %v28471_v60 }
 0xf10   : > { %22062 = vmatprep.mubr.f32.mxu1 %v28231_v0  ;;  %22227 = vmatprep.mubr.f32.mxu0 %v28195_v26 }
 0xf11   : > { %25271 = vmatprep.subr.msk.bf16.mxu1 %vm12342_vm3, %v12317_v37 }
 0xf12   : > { %22063 = vmatmul.mubr.f32.gmra.mrb[214].mxu1 %v28233_v47 }
 0xf13   : > { %22228 = vmatmul.mubr.f32.vlgmr.msra.gmra.mrb[84].mxu0 %v28226_v50  ;;  %22065 = vmatprep.mubr.f32.mxu1 %v28235_v5 }
 0xf14   : > { %24038 = vmatpush3.bf16.msra.mxu0 %v28366_v4  ;;  %22230 = vmatprep.mubr.f32.mxu0 %v28231_v0 }
 0xf16   : > { %22066 = vmatmul.mubr.f32.gmra.mrb[216].mxu1 %v28237_v33 }
 0xf17   : > { %22231 = vmatmul.mubr.f32.gmra.mrb[86].mxu0 %v28233_v47  ;;  %22068 = vmatprep.mubr.f32.mxu1 %v28293_v19 }
 0xf18   : > { %22233 = vmatprep.mubr.f32.mxu0 %v28235_v5 }
 0xf1a   : > { %22069 = vmatmul.mubr.f32.gmra.mrb[218].mxu1 %v28305_v29 }
 0xf1b   : > { %22234 = vmatmul.mubr.f32.gmra.mrb[88].mxu0 %v28237_v33  ;;  %22071 = vmatprep.mubr.f32.mxu1 %v28319_v16 }
 0xf1c   : > { %22236 = vmatprep.mubr.f32.mxu0 %v28293_v19 }
 0xf1e   : > { %22072 = vmatmul.mubr.f32.gmra.mrb[220].mxu1 %v28353_v21 }
 0xf1f   : > { %22237 = vmatmul.mubr.f32.gmra.mrb[90].mxu0 %v28305_v29  ;;  %22074 = vmatprep.mubr.f32.mxu1 %v28363_v45 }
 0xf20   : > { %22239 = vmatprep.mubr.f32.mxu0 %v28319_v16 }
 0xf22   : > { %22075 = vmatmul.mubr.f32.gmra.mrb[222].mxu1 %v28381_v53 }
 0xf23   : > { %22240 = vmatmul.mubr.f32.gmra.mrb[92].mxu0 %v28353_v21  ;;  %22077 = vmatprep.mubr.f32.mxu1 %v28396_v1 }
 0xf24   : > { %22242 = vmatprep.mubr.f32.mxu0 %v28363_v45 }
 0xf26   : > { %22078 = vmatmul.mubr.f32.gmra.mrb[224].mxu1 %v28417_v2 }
 0xf27   : > { %22243 = vmatmul.mubr.f32.gmra.mrb[94].mxu0 %v28381_v53  ;;  %22080 = vmatprep.mubr.f32.mxu1 %v28426_v44 }
 0xf28   : > { %22245 = vmatprep.mubr.f32.mxu0 %v28396_v1 }
 0xf2a   : > { %22081 = vmatmul.mubr.f32.gmra.mrb[226].mxu1 %v28441_v58 }
 0xf2b   : > { %22246 = vmatmul.mubr.f32.gmra.mrb[96].mxu0 %v28417_v2  ;;  %22087 = vmatprep.mubr.f32.mxu1 %v28195_v26 }
 0xf2c   : > { %22248 = vmatprep.mubr.f32.mxu0 %v28426_v44 }
 0xf2e   : > { %22088 = vmatmul.mubr.f32.vlgmr.msra.gmra.mrb[212].mxu1 %v28226_v50 }
 0xf2f   : > { %22249 = vmatmul.mubr.f32.gmra.mrb[98].mxu0 %v28441_v58  ;;  %22090 = vmatprep.mubr.f32.mxu1 %v28231_v0 }
 0xf30   : > { %22255 = vmatprep.mubr.f32.mxu0 %v28195_v26  ;;  %22280 = vmatpush3.bf16.msra.mxu1 %v12344_v41 }
 0xf31   : > { %25272 = vmatprep.subr.msk.bf16.mxu1 %vm12342_vm3, %v18274_v48 }
 0xf32   : > { %22091 = vmatmul.mubr.f32.gmra.mrb[214].mxu1 %v28233_v47 }
 0xf33   : > { %22256 = vmatmul.mubr.f32.vlgmr.msra.gmra.mrb[84].mxu0 %v28226_v50  ;;  %22093 = vmatprep.mubr.f32.mxu1 %v28235_v5 }
 0xf34   : > { %22258 = vmatprep.mubr.f32.mxu0 %v28231_v0 }
 0xf36   : > { %22094 = vmatmul.mubr.f32.gmra.mrb[216].mxu1 %v28237_v33 }
 0xf37   : > { %22259 = vmatmul.mubr.f32.gmra.mrb[86].mxu0 %v28233_v47  ;;  %22096 = vmatprep.mubr.f32.mxu1 %v28293_v19 }
 0xf38   : > { %22261 = vmatprep.mubr.f32.mxu0 %v28235_v5 }
 0xf3a   : > { %22097 = vmatmul.mubr.f32.gmra.mrb[218].mxu1 %v28305_v29 }
 0xf3b   : > { %22262 = vmatmul.mubr.f32.gmra.mrb[88].mxu0 %v28237_v33  ;;  %22099 = vmatprep.mubr.f32.mxu1 %v28319_v16 }
 0xf3c   : > { %22264 = vmatprep.mubr.f32.mxu0 %v28293_v19 }
 0xf3e   : > { %22100 = vmatmul.mubr.f32.gmra.mrb[220].mxu1 %v28353_v21 }
 0xf3f   : > { %22265 = vmatmul.mubr.f32.gmra.mrb[90].mxu0 %v28305_v29  ;;  %22102 = vmatprep.mubr.f32.mxu1 %v28363_v45 }
 0xf40   : > { %22267 = vmatprep.mubr.f32.mxu0 %v28319_v16 }
 0xf42   : > { %22103 = vmatmul.mubr.f32.gmra.mrb[222].mxu1 %v28381_v53 }
 0xf43   : > { %22268 = vmatmul.mubr.f32.gmra.mrb[92].mxu0 %v28353_v21  ;;  %22105 = vmatprep.mubr.f32.mxu1 %v28396_v1 }
 0xf44   : > { %22270 = vmatprep.mubr.f32.mxu0 %v28363_v45 }
 0xf46   : > { %22106 = vmatmul.mubr.f32.gmra.mrb[224].mxu1 %v28417_v2 }
 0xf47   : > { %22271 = vmatmul.mubr.f32.gmra.mrb[94].mxu0 %v28381_v53  ;;  %22108 = vmatprep.mubr.f32.mxu1 %v28426_v44 }
 0xf48   : > { %22273 = vmatprep.mubr.f32.mxu0 %v28396_v1 }
 0xf4a   : > { %22109 = vmatmul.mubr.f32.gmra.mrb[226].mxu1 %v28441_v58 }
 0xf4b   : > { %22274 = vmatmul.mubr.f32.gmra.mrb[96].mxu0 %v28417_v2 }
 0xf4c   : > { %22276 = vmatprep.mubr.f32.mxu0 %v28426_v44 }
 0xf4f   : > { %22277 = vmatmul.mubr.f32.gmra.mrb[98].mxu0 %v28441_v58 }
0x1001   : > { %v22089_v26 = vpop.f32.mrb[212].mxu1 }
0x1002   : > { %12076 = vperm.xlu0 %25287, %v22089_v26   ;;  %v10871_v50 = vpop.f32.mrb[213].mxu1 }
0x1003   : > { %12071 = vperm.xlu1 %25288, %v10871_v50  }
0x1005   : > { %v22092_v0 = vpop.f32.mrb[214].mxu1 }
0x1006   : > { %v22257_v47 = vpop.f32.mrb[84].mxu0  ;;  %v10883_v5 = vpop.f32.mrb[215].mxu1 }
0x1007   : > { %v11975_v33 = vpop.f32.mrb[85].mxu0  ;;  %12086 = vperm.xlu1 %25288, %v22092_v0  }
0x1008   : > { %12167 = vperm.xlu0 %25287, %v11975_v33   ;;  %v12470_v33 = vsel %vm12342_vm3, %v18274_v48, 0 }
0x1009   : > { %v22095_v59 = vpop.f32.mrb[216].mxu1 }
0x100a   : > { %v22260_v6 = vpop.f32.mrb[86].mxu0  ;;  %v10895_v61 = vpop.f32.mrb[217].mxu1 }
0x100b   : > { %v11987_v49 = vpop.f32.mrb[87].mxu0  ;;  %12172 = vperm.xlu1 %25288, %v22257_v47  }
0x100c   : > { %12177 = vperm.xlu0 %25287, %v11987_v49  }
0x100d   : > { %v22098_v55 = vpop.f32.mrb[218].mxu1 }
0x100e   : > { %v22263_v11 = vpop.f32.mrb[88].mxu0  ;;  %v10907_v43 = vpop.f32.mrb[219].mxu1 }
0x100f   : > { %v11999_v39 = vpop.f32.mrb[89].mxu0  ;;  %12081 = vperm.xlu1 %25288, %v10883_v5  }
0x1010   : > { %12091 = vperm.xlu0 %25287, %v10895_v61   ;;  %v28674_v61 = vld [vmem:[%s30284_s17 + $0x8] sm:$0xf] }
0x1011   : > { %v22101_v34 = vpop.f32.mrb[220].mxu1 }
0x1012   : > { %v22266_v19 = vpop.f32.mrb[90].mxu0  ;;  %v10919_v29 = vpop.f32.mrb[221].mxu1 }
0x1013   : > { %v12011_v40 = vpop.f32.mrb[91].mxu0  ;;  %12182 = vperm.xlu1 %25288, %v22260_v6  }
0x1014   : > { %12101 = vperm.xlu0 %25287, %v10907_v43   ;;  %v30850_v43 = vld [vmem:[#allocation37_spill] sm:$0xff] }
0x1015   : > { %v22104_v16 = vpop.f32.mrb[222].mxu1 }
0x1016   : > { %v22269_v14 = vpop.f32.mrb[92].mxu0  ;;  %v10931_v56 = vpop.f32.mrb[223].mxu1 }
0x1017   : > { %v12023_v32 = vpop.f32.mrb[93].mxu0  ;;  %12096 = vperm.xlu1 %25288, %v22095_v59   ;;  %v30849_v59 = vld [vmem:[#allocation36_spill] sm:$0xff] }
0x1018   : > { %12187 = vperm.xlu0 %25287, %v11999_v39  }
0x1019   : > { %v22107_v21 = vpop.f32.mrb[224].mxu1 }
0x101a   : > { %v22272_v45 = vpop.f32.mrb[94].mxu0  ;;  %v10943_v4 = vpop.f32.mrb[225].mxu1 }
0x101b   : > { %v12035_v36 = vpop.f32.mrb[95].mxu0  ;;  %12106 = vperm.xlu1 %25288, %v22098_v55  }
0x101c   : > { %12197 = vperm.xlu0 %25287, %v12011_v40  }
0x101d   : > { %v22110_v24 = vpop.f32.mrb[226].mxu1 }
0x101e   : > { %v22275_v53 = vpop.f32.mrb[96].mxu0  ;;  %v10955_v63 = vpop.f32.mrb[227].mxu1 }
0x101f   : > { %v12047_v1 = vpop.f32.mrb[97].mxu0  ;;  %12192 = vperm.xlu1 %25288, %v22263_v11  }
0x1020   : > { %12111 = vperm.xlu0 %25287, %v10919_v29  }
0x1022   : > { %v22278_v20 = vpop.f32.mrb[98].mxu0 }
0x1023   : > { %v12059_v8 = vpop.f32.mrb[99].mxu0  ;;  %12202 = vperm.xlu1 %25288, %v22266_v19  }
0x1024   : > { %12121 = vperm.xlu0 %25287, %v10931_v56  }
0x1027   : > { %12116 = vperm.xlu1 %25288, %v22101_v34   ;;  %v30851_v34 = vld [vmem:[#allocation5_spill] sm:$0xff] }
0x1028   : > { %12207 = vperm.xlu0 %25287, %v12023_v32   ;;  %v30852_v32 = vld [vmem:[#allocation38_spill] sm:$0xff] }
0x102b   : > { %12126 = vperm.xlu1 %25288, %v22104_v16  }
0x102c   : > { %12217 = vperm.xlu0 %25287, %v12035_v36  }
0x102f   : > { %12212 = vperm.xlu1 %25288, %v22269_v14  }
0x1030   : > { %12131 = vperm.xlu0 %25287, %v10943_v4  }
0x1033   : > { %12222 = vperm.xlu1 %25288, %v22272_v45  }
0x1034   : > { %12141 = vperm.xlu0 %25287, %v10955_v63  }
0x1037   : > { %12136 = vperm.xlu1 %25288, %v22107_v21  }
0x1038   : > { %12227 = vperm.xlu0 %25287, %v12047_v1  }
0x103b   : > { %12146 = vperm.xlu1 %25288, %v22110_v24  }
0x103c   : > { %12237 = vperm.xlu0 %25287, %v12059_v8  }
0x103f   : > { %12232 = vperm.xlu1 %25288, %v22275_v53  }
0x1043   : > { %12242 = vperm.xlu1 %25288, %v22278_v20  }
0x1081   : > { %v12077_v2 = vpop.permute.xlu0 %12076 }
0x1082   : > { %v12072_v22 = vpop.permute.xlu1 %12071  ;;  %v12150_v58 = vmul.f32 %v12077_v2, %v30846_v9  ;;  %v30854_v9 = vld [vmem:[#allocation7_spill] sm:$0xff] }
0x1083   : > { %v12149_v44 = vmul.f32 %v12072_v22, %v30845_v17  ;;  %v30853_v17 = vld [vmem:[#allocation8_spill] sm:$0xff] }
0x1086   : > { %v12087_v23 = vpop.permute.xlu1 %12086 }
0x1087   : > { %v12168_v31 = vpop.permute.xlu0 %12167  ;;  %v12152_v13 = vmul.f32 %v30848_v62, %v12087_v23 }
0x1088   : > { %v12245_v54 = vadd.f32 %v12168_v31, %v12149_v44 }
0x108a   : > { %v12173_v27 = vpop.permute.xlu1 %12172  ;;  %v12277_v38 = vmul.f32 0.2, %v12245_v54  ;;  %vm12261_vm9 = vcmp.gt.f32.partialorder %v12245_v54, 0.0 }
0x108b   : > { %v12246_v51 = vadd.f32 %v12173_v27, %v12150_v58  ;;  %v12178_v46 = vpop.permute.xlu0 %12177  ;;  %v30855_v27 = vld [vmem:[#allocation17_spill] sm:$0xff] }
0x108c   : > { %v12293_v57 = vsel %vm12261_vm9, %v12245_v54, %v12277_v38 }
0x108d   : > { %vm12262_vm10 = vcmp.gt.f32.partialorder %v12246_v51, 0.0  ;;  %v12278_v35 = vmul.f32 0.2, %v12246_v51 }
0x108e   : > { %v12082_v3 = vpop.permute.xlu1 %12081 }
0x108f   : > { %v12294_v7 = vsel %vm12262_vm10, %v12246_v51, %v12278_v35  ;;  %v12151_v30 = vmul.f32 %v30847_v18, %v12082_v3  ;;  %v12092_v10 = vpop.permute.xlu0 %12091 }
0x1090   : > { %v28662_v60 = vpack.c.bf16 %v12294_v7, %v12293_v57  ;;  %v12153_v6 = vmul.f32 %v12092_v10, %v30849_v59  ;;  %v30856_v7 = vld [vmem:[#allocation6_spill] sm:$0xff] }
0x1091   : > { %v12247_v12 = vadd.f32 %v12178_v46, %v12151_v30 }
0x1092   : > { %22281 = vmatprep.mubr.msk.bf16.mxu1 %vm4740_vm4, %v28662_v60  ;;  %v12183_v25 = vpop.permute.xlu1 %12182 }
0x1093   : > { %v12279_v28 = vmul.f32 0.2, %v12247_v12  ;;  %v12248_v52 = vadd.f32 %v12183_v25, %v12152_v13  ;;  %v12102_v15 = vpop.permute.xlu0 %12101  ;;  %vm12263_vm11 = vcmp.gt.f32.partialorder %v12247_v12, 0.0 }
0x1094   : > { %v12155_v39 = vmul.f32 %v30850_v43, %v12102_v15 }
0x1095   : > { %vm12264_vm12 = vcmp.gt.f32.partialorder %v12248_v52, 0.0  ;;  %v12280_v42 = vmul.f32 0.2, %v12248_v52  ;;  %v12295_v50 = vsel %vm12263_vm11, %v12247_v12, %v12279_v28 }
0x1096   : > { %v12097_v26 = vpop.permute.xlu1 %12096 }
0x1097   : > { %v12296_v0 = vsel %vm12264_vm12, %v12248_v52, %v12280_v42  ;;  %v12188_v47 = vpop.permute.xlu0 %12187  ;;  %v12154_v19 = vmul.f32 %v12097_v26, %v30851_v34 }
0x1098   : > { %v28667_v5 = vpack.c.bf16 %v12296_v0, %v12295_v50  ;;  %v12249_v55 = vadd.f32 %v12188_v47, %v12153_v6 }
0x109a   : > { %v12107_v49 = vpop.permute.xlu1 %12106  ;;  %22282 = vmatmul.mubr.msk.bf16.vlgmr.msra.gmra.mrb[228].mxu1 %vm4740_vm4, %v28667_v5  ;;  %v12281_v40 = vmul.f32 0.2, %v12249_v55  ;;  %vm12265_vm13 = vcmp.gt.f32.partialorder %v12249_v55, 0.0 }
0x109b   : > { %v12198_v11 = vpop.permute.xlu0 %12197  ;;  %22298 = vmatpush3.bf16.msra.mxu1 %v12470_v33  ;;  %v12156_v37 = vmul.f32 %v30852_v32, %v12107_v49  ;;  %v30857_v33 = vld [vmem:[#allocation24_spill] sm:$0xff] }
0x109c   : > { %25273 = vmatprep.subr.msk.bf16.mxu1 %vm12342_vm3, %v28674_v61  ;;  %v12251_v16 = vadd.f32 %v12198_v11, %v12155_v39  ;;  %v12297_v4 = vsel %vm12265_vm13, %v12249_v55, %v12281_v40  ;;  %v30858_v11 = vld [vmem:[#allocation23_spill] sm:$0xff]  ;;  %v30859_v39 = vld [vmem:[#allocation33_spill] sm:$0xff] }
0x109e   : > { %v12193_v29 = vpop.permute.xlu1 %12192  ;;  %v12283_v36 = vmul.f32 0.2, %v12251_v16  ;;  %vm12267_vm15 = vcmp.gt.f32.partialorder %v12251_v16, 0.0 }
0x109f   : > { %v12250_v14 = vadd.f32 %v12193_v29, %v12154_v19  ;;  %v12112_v56 = vpop.permute.xlu0 %12111 }
0x10a0   : > { %v12299_v8 = vsel %vm12267_vm15, %v12251_v16, %v12283_v36  ;;  %v12157_v44 = vmul.f32 %v12112_v56, %v30853_v17 }
0x10a1   : > { %vm12266_vm14 = vcmp.gt.f32.partialorder %v12250_v14, 0.0  ;;  %v12282_v21 = vmul.f32 0.2, %v12250_v14 }
0x10a2   : > { %v12203_v45 = vpop.permute.xlu1 %12202 }
0x10a3   : > { %v12298_v41 = vsel %vm12266_vm14, %v12250_v14, %v12282_v21  ;;  %v12252_v24 = vadd.f32 %v12203_v45, %v12156_v37  ;;  %v12122_v53 = vpop.permute.xlu0 %12121  ;;  %v30860_v14 = vld [vmem:[#allocation20_spill] sm:$0xff] }
0x10a4   : > { %v28683_v63 = vpack.c.bf16 %v12298_v41, %v12297_v4  ;;  %v12159_v58 = vmul.f32 %v30854_v9, %v12122_v53 }
0x10a5   : > { %vm12268_vm0 = vcmp.gt.f32.partialorder %v12252_v24, 0.0  ;;  %v12284_v1 = vmul.f32 0.2, %v12252_v24 }
0x10a6   : > { %22285 = vmatprep.mubr.msk.bf16.mxu1 %vm4740_vm4, %v28683_v63  ;;  %v12117_v20 = vpop.permute.xlu1 %12116 }
0x10a7   : > { %v12300_v48 = vsel %vm12268_vm0, %v12252_v24, %v12284_v1  ;;  %v12208_v2 = vpop.permute.xlu0 %12207  ;;  %v12158_v38 = vmul.f32 %v12117_v20, %v30855_v27 }
0x10a8   : > { %v28687_v22 = vpack.c.bf16 %v12300_v48, %v12299_v8  ;;  %v12253_v31 = vadd.f32 %v12208_v2, %v12157_v44  ;;  %v12887_v8 = vsel %vm12342_vm3, %v28674_v61, 0  ;;  %v18348_v48 = vld [vmem:[%s30284_s17 + $0xc] sm:$0xf] }
0x10a9   : > { %v13175_v61 = vsel %vm12342_vm3, %v18348_v48, 0 }
0x10aa   : > { %v12127_v23 = vpop.permute.xlu1 %12126  ;;  %22286 = vmatmul.mubr.msk.bf16.gmra.mrb[232].mxu1 %vm4740_vm4, %v28687_v22  ;;  %v12285_v46 = vmul.f32 0.2, %v12253_v31  ;;  %vm12269_vm1 = vcmp.gt.f32.partialorder %v12253_v31, 0.0 }
0x10ab   : > { %v12218_v54 = vpop.permute.xlu0 %12217  ;;  %v12160_v18 = vmul.f32 %v30856_v7, %v12127_v23 }
0x10ac   : > { %v12255_v35 = vadd.f32 %v12218_v54, %v12159_v58  ;;  %v12301_v62 = vsel %vm12269_vm1, %v12253_v31, %v12285_v46 }
0x10ae   : > { %v12213_v51 = vpop.permute.xlu1 %12212  ;;  %v12287_v13 = vmul.f32 0.2, %v12255_v35  ;;  %vm12271_vm6 = vcmp.gt.f32.partialorder %v12255_v35, 0.0 }
0x10af   : > { %v12254_v3 = vadd.f32 %v12213_v51, %v12158_v38  ;;  %v12132_v57 = vpop.permute.xlu0 %12131 }
0x10b0   : > { %v12303_v26 = vsel %vm12271_vm6, %v12255_v35, %v12287_v13  ;;  %v12161_v59 = vmul.f32 %v12132_v57, %v30857_v33 }
0x10b1   : > { %vm12270_vm2 = vcmp.gt.f32.partialorder %v12254_v3, 0.0  ;;  %v12286_v30 = vmul.f32 0.2, %v12254_v3 }
0x10b2   : > { %v12223_v10 = vpop.permute.xlu1 %12222 }
0x10b3   : > { %v12302_v12 = vsel %vm12270_vm2, %v12254_v3, %v12286_v30  ;;  %v12256_v25 = vadd.f32 %v12223_v10, %v12160_v18  ;;  %v12142_v28 = vpop.permute.xlu0 %12141 }
0x10b4   : > { %v28695_v52 = vpack.c.bf16 %v12302_v12, %v12301_v62  ;;  %v12163_v43 = vmul.f32 %v30858_v11, %v12142_v28 }
0x10b5   : > { %vm12272_vm7 = vcmp.gt.f32.partialorder %v12256_v25, 0.0  ;;  %v12288_v15 = vmul.f32 0.2, %v12256_v25 }
0x10b6   : > { %22289 = vmatprep.mubr.msk.bf16.mxu1 %vm4740_vm4, %v28695_v52  ;;  %v12137_v42 = vpop.permute.xlu1 %12136 }
0x10b7   : > { %v12304_v50 = vsel %vm12272_vm7, %v12256_v25, %v12288_v15  ;;  %v12228_v0 = vpop.permute.xlu0 %12227  ;;  %v12162_v34 = vmul.f32 %v12137_v42, %v30859_v39 }
0x10b8   : > { %v12314_v47 = vpack.c.bf16 %v12304_v50, %v12303_v26  ;;  %v12257_v49 = vadd.f32 %v12228_v0, %v12161_v59 }
0x10ba   : > { %v12147_v6 = vpop.permute.xlu1 %12146  ;;  %22290 = vmatmul.mubr.msk.bf16.gmra.mrb[236].mxu1 %vm4740_vm4, %v12314_v47  ;;  %v12289_v29 = vmul.f32 0.2, %v12257_v49  ;;  %vm12273_vm8 = vcmp.gt.f32.partialorder %v12257_v49, 0.0 }
0x10bb   : > { %v12238_v55 = vpop.permute.xlu0 %12237  ;;  %v12164_v56 = vmul.f32 %v30860_v14, %v12147_v6 }
0x10bc   : > { %v12259_v40 = vadd.f32 %v12238_v55, %v12163_v43  ;;  %v12305_v21 = vsel %vm12273_vm8, %v12257_v49, %v12289_v29 }
0x10be   : > { %v12233_v19 = vpop.permute.xlu1 %12232  ;;  %v12291_v45 = vmul.f32 0.2, %v12259_v40  ;;  %vm12275_vm10 = vcmp.gt.f32.partialorder %v12259_v40, 0.0 }
0x10bf   : > { %v12258_v16 = vadd.f32 %v12233_v19, %v12162_v34 }
0x10c0   : > { %v12307_v53 = vsel %vm12275_vm10, %v12259_v40, %v12291_v45 }
0x10c1   : > { %vm12274_vm9 = vcmp.gt.f32.partialorder %v12258_v16, 0.0  ;;  %v12290_v32 = vmul.f32 0.2, %v12258_v16 }
0x10c2   : > { %v12243_v37 = vpop.permute.xlu1 %12242 }
0x10c3   : > { %v12306_v4 = vsel %vm12274_vm9, %v12258_v16, %v12290_v32  ;;  %v12260_v36 = vadd.f32 %v12243_v37, %v12164_v56 }
0x10c4   : > { %v12315_v41 = vpack.c.bf16 %v12306_v4, %v12305_v21  ;;  %v25422_v21 = vld [vmem:[%s30283_s16 + $0x48] sm:$0xff]  }
0x10c5   : > { %vm12276_vm11 = vcmp.gt.f32.partialorder %v12260_v36, 0.0  ;;  %v12292_v24 = vmul.f32 0.2, %v12260_v36 }
0x10c6   : > { %22293 = vmatprep.mubr.msk.bf16.mxu1 %vm4740_vm4, %v12315_v41 }
0x10c7   : > { %v12308_v1 = vsel %vm12276_vm11, %v12260_v36, %v12292_v24  ;;  %v25423_v36 = vld [vmem:[%s30283_s16 + $0x50] sm:$0xff]  }
0x10c8   : > { %v12316_v20 = vpack.c.bf16 %v12308_v1, %v12307_v53 }
0x10ca   : > { %22294 = vmatmul.mubr.msk.bf16.gmra.mrb[240].mxu1 %vm4740_vm4, %v12316_v20 }
0x10cb   : > { %22299 = vmatprep.mubr.msk.bf16.mxu1 %vm4740_vm4, %v28662_v60 }
0x10d2   : > { %22300 = vmatmul.mubr.msk.bf16.vlgmr.msra.gmra.mrb[244].mxu1 %vm4740_vm4, %v28667_v5 }
0x10d3   : > { %22303 = vmatprep.mubr.msk.bf16.mxu1 %vm4740_vm4, %v28683_v63  ;;  %22380 = vmatpush3.bf16.msra.mxu1 %v12887_v8 }
0x10d4   : > { %25274 = vmatprep.subr.msk.bf16.mxu1 %vm12342_vm3, %v18348_v48 }
0x10da   : > { %22304 = vmatmul.mubr.msk.bf16.gmra.mrb[248].mxu1 %vm4740_vm4, %v28687_v22 }
0x10db   : > { %22307 = vmatprep.mubr.msk.bf16.mxu1 %vm4740_vm4, %v28695_v52 }
0x10e2   : > { %22308 = vmatmul.mubr.msk.bf16.gmra.mrb[252].mxu1 %vm4740_vm4, %v12314_v47 }
0x10e3   : > { %22311 = vmatprep.mubr.msk.bf16.mxu1 %vm4740_vm4, %v12315_v41 }
0x10ea   : > { %22312 = vmatmul.mubr.msk.bf16.gmra.mrb[0].mxu1 %vm4740_vm4, %v12316_v20 }
0x10eb   : > { %22381 = vmatprep.mubr.msk.bf16.mxu1 %vm4740_vm4, %v28662_v60 }
0x10f2   : > { %22382 = vmatmul.mubr.msk.bf16.vlgmr.msra.gmra.mrb[4].mxu1 %vm4740_vm4, %v28667_v5 }
0x10f3   : > { %22385 = vmatprep.mubr.msk.bf16.mxu1 %vm4740_vm4, %v28683_v63  ;;  %22430 = vmatpush3.bf16.msra.mxu1 %v13175_v61  ;;  %v25425_v61 = vld [vmem:[%s30283_s16 + $0x60] sm:$0xff]  }
0x10fa   : > { %22386 = vmatmul.mubr.msk.bf16.gmra.mrb[8].mxu1 %vm4740_vm4, %v28687_v22 }
0x10fb   : > { %22389 = vmatprep.mubr.msk.bf16.mxu1 %vm4740_vm4, %v28695_v52 }
0x1102   : > { %22390 = vmatmul.mubr.msk.bf16.gmra.mrb[12].mxu1 %vm4740_vm4, %v12314_v47 }
0x1103   : > { %22393 = vmatprep.mubr.msk.bf16.mxu1 %vm4740_vm4, %v12315_v41 }
0x110a   : > { %22394 = vmatmul.mubr.msk.bf16.gmra.mrb[16].mxu1 %vm4740_vm4, %v12316_v20 }
0x110b   : > { %22431 = vmatprep.mubr.msk.bf16.mxu1 %vm4740_vm4, %v28662_v60  ;;  %v25421_v60 = vld [vmem:[%s30283_s16 + $0x40] sm:$0xff]  }
0x110c   : > { %22331 = vmatprep.mubr.bf16.mxu0 %v25421_v60 }
0x1112   : > { %22432 = vmatmul.mubr.msk.bf16.vlgmr.msra.gmra.mrb[20].mxu1 %vm4740_vm4, %v28667_v5 }
0x1113   : > { %22435 = vmatprep.mubr.msk.bf16.mxu1 %vm4740_vm4, %v28683_v63 }
0x111a   : > { %22436 = vmatmul.mubr.msk.bf16.gmra.mrb[24].mxu1 %vm4740_vm4, %v28687_v22 }
0x111b   : > { %22439 = vmatprep.mubr.msk.bf16.mxu1 %vm4740_vm4, %v28695_v52 }
0x1122   : > { %22440 = vmatmul.mubr.msk.bf16.gmra.mrb[28].mxu1 %vm4740_vm4, %v12314_v47 }
0x1123   : > { %22443 = vmatprep.mubr.msk.bf16.mxu1 %vm4740_vm4, %v12315_v41 }
0x112a   : > { %22444 = vmatmul.mubr.msk.bf16.gmra.mrb[32].mxu1 %vm4740_vm4, %v12316_v20  ;;  %v25424_v20 = vld [vmem:[%s30283_s16 + $0x58] sm:$0xff]   ;;  %vm15044_vm4 = vcmask 31744  }
0x116d   : > { %v22283_v5 = vpop.f32.mrb[228].mxu1 }
0x116e   : > { %v12380_v2 = vpop.f32.mrb[229].mxu1 }
0x116f   : > { %v22284_v63 = vpop.f32.mrb[230].mxu1 }
0x1170   : > { %v28755_v17 = vpack.c.bf16 %v22284_v63, %v22283_v5  ;;  %v12383_v22 = vpop.f32.mrb[231].mxu1 }
0x1171   : > { %v28757_v44 = vpack.c.bf16 %v12383_v22, %v12380_v2 }
0x117d   : > { %v22287_v23 = vpop.f32.mrb[232].mxu1 }
0x117e   : > { %v12396_v31 = vpop.f32.mrb[233].mxu1 }
0x117f   : > { %v22288_v54 = vpop.f32.mrb[234].mxu1 }
0x1180   : > { %v28759_v9 = vpack.c.bf16 %v22288_v54, %v22287_v23  ;;  %v12399_v58 = vpop.f32.mrb[235].mxu1  ;;  %v25427_v23 = vld [vmem:[%s30283_s16 + $0x70] sm:$0xff]  }
0x1181   : > { %v28761_v27 = vpack.c.bf16 %v12399_v58, %v12396_v31 }
0x118d   : > { %v22291_v38 = vpop.f32.mrb[236].mxu1 }
0x118e   : > { %v12412_v51 = vpop.f32.mrb[237].mxu1 }
0x118f   : > { %v22292_v46 = vpop.f32.mrb[238].mxu1 }
0x1190   : > { %v28763_v35 = vpack.c.bf16 %v22292_v46, %v22291_v38  ;;  %v12415_v3 = vpop.f32.mrb[239].mxu1  ;;  %v25429_v46 = vld [vmem:[%s30283_s16] sm:$0xff]  }
0x1191   : > { %v28765_v57 = vpack.c.bf16 %v12415_v3, %v12412_v51 }
0x119d   : > { %v22295_v7 = vpop.f32.mrb[240].mxu1 }
0x119e   : > { %v12428_v18 = vpop.f32.mrb[241].mxu1 }
0x119f   : > { %v22296_v30 = vpop.f32.mrb[242].mxu1 }
0x11a0   : > { %v28767_v10 = vpack.c.bf16 %v22296_v30, %v22295_v7  ;;  %v12431_v62 = vpop.f32.mrb[243].mxu1 }
0x11a1   : > { %v28769_v13 = vpack.c.bf16 %v12431_v62, %v12428_v18 }
0x11a5   : > { %v22301_v12 = vpop.f32.mrb[244].mxu1 }
0x11a6   : > { %v12506_v25 = vpop.f32.mrb[245].mxu1 }
0x11a7   : > { %v22302_v28 = vpop.f32.mrb[246].mxu1 }
0x11a8   : > { %v12587_v52 = vpack.c.bf16 %v22302_v28, %v22301_v12  ;;  %v12509_v15 = vpop.f32.mrb[247].mxu1  ;;  %v25431_v12 = vld [vmem:[%s30283_s16 + $0x10] sm:$0xff]  }
0x11a9   : > { %v12586_v42 = vpack.c.bf16 %v12509_v15, %v12506_v25  ;;  %v25432_v15 = vld [vmem:[%s30283_s16 + $0x18] sm:$0xff]  }
0x11ab   : > { %22315 = vmatprep.subr.bf16.mxu0 %v12586_v42 }
0x11ac   : > { %22316 = vmatpush3.bf16.msra.mxu0 %v12586_v42 }
0x11ad   : > { %v22305_v26 = vpop.f32.mrb[248].mxu1  ;;  %22317 = vmatprep.subr.bf16.mxu0 %v12587_v52 }
0x11ae   : > { %v12522_v50 = vpop.f32.mrb[249].mxu1 }
0x11af   : > { %v22306_v0 = vpop.f32.mrb[250].mxu1 }
0x11b0   : > { %v12589_v47 = vpack.c.bf16 %v22306_v0, %v22305_v26  ;;  %v12525_v33 = vpop.f32.mrb[251].mxu1  ;;  %22318 = vmatpush3.bf16.msra.mxu0 %v12587_v52  ;;  %v25433_v26 = vld [vmem:[%s30283_s16 + $0x20] sm:$0xff]  }
0x11b1   : > { %v12588_v59 = vpack.c.bf16 %v12525_v33, %v12522_v50 }
0x11b3   : > { %22319 = vmatprep.subr.bf16.mxu0 %v12588_v59 }
0x11b4   : > { %22320 = vmatpush3.bf16.msra.mxu0 %v12588_v59  ;;  %v25434_v59 = vld [vmem:[%s30283_s16 + $0x28] sm:$0xff]  }
0x11b5   : > { %v22309_v6 = vpop.f32.mrb[252].mxu1  ;;  %22321 = vmatprep.subr.bf16.mxu0 %v12589_v47 }
0x11b6   : > { %v12538_v49 = vpop.f32.mrb[253].mxu1 }
0x11b7   : > { %v22310_v55 = vpop.f32.mrb[254].mxu1 }
0x11b8   : > { %v12591_v11 = vpack.c.bf16 %v22310_v55, %v22309_v6  ;;  %v12541_v43 = vpop.f32.mrb[255].mxu1  ;;  %22322 = vmatpush3.bf16.msra.mxu0 %v12589_v47  ;;  %v25435_v55 = vld [vmem:[%s30283_s16 + $0x30] sm:$0xff]  }
0x11b9   : > { %v12590_v39 = vpack.c.bf16 %v12541_v43, %v12538_v49 }
0x11bb   : > { %22323 = vmatprep.subr.bf16.mxu0 %v12590_v39 }
0x11bc   : > { %22324 = vmatpush3.bf16.msra.mxu0 %v12590_v39 }
0x11bd   : > { %v22313_v34 = vpop.f32.mrb[0].mxu1  ;;  %22325 = vmatprep.subr.bf16.mxu0 %v12591_v11 }
0x11be   : > { %v12554_v19 = vpop.f32.mrb[1].mxu1 }
0x11bf   : > { %v22314_v29 = vpop.f32.mrb[2].mxu1 }
0x11c0   : > { %v12593_v40 = vpack.c.bf16 %v22314_v29, %v22313_v34  ;;  %v12557_v16 = vpop.f32.mrb[3].mxu1  ;;  %22326 = vmatpush3.bf16.msra.mxu0 %v12591_v11 }
0x11c1   : > { %v12592_v14 = vpack.c.bf16 %v12557_v16, %v12554_v19  ;;  %v25436_v19 = vld [vmem:[%s30283_s16 + $0x38] sm:$0xff]   ;;  %v25437_v16 = vld [vmem:[%s30283_s16 + $0x80] sm:$0xff]  }
0x11c3   : > { %22327 = vmatprep.subr.bf16.mxu0 %v12592_v14 }
0x11c4   : > { %22328 = vmatpush3.bf16.msra.mxu0 %v12592_v14 }
0x11c5   : > { %22329 = vmatprep.subr.bf16.mxu0 %v12593_v40  ;;  %v22383_v56 = vpop.f32.mrb[4].mxu1 }
0x11c6   : > { %v12923_v32 = vpop.f32.mrb[5].mxu1 }
0x11c7   : > { %v22384_v37 = vpop.f32.mrb[6].mxu1 }
0x11c8   : > { %v28774_v45 = vpack.c.bf16 %v22384_v37, %v22383_v56  ;;  %22330 = vmatpush3.bf16.msra.mxu0 %v12593_v40  ;;  %v12926_v4 = vpop.f32.mrb[7].mxu1  ;;  %v25438_v56 = vld [vmem:[%s30283_s16 + $0x88] sm:$0xff]   ;;  %v25440_v37 = vld [vmem:[%s30283_s16 + $0x98] sm:$0xff]  }
0x11c9   : > { %v13003_v41 = vpack.c.bf16 %v12926_v4, %v12923_v32  ;;  %22347 = vmatprep.subr.bf16.mxu0 %v28757_v44  ;;  %v25439_v32 = vld [vmem:[%s30283_s16 + $0x90] sm:$0xff]  }
0x11ca   : > { %v25443_v4 = vld [vmem:[%s30283_s16 + $0xb0] sm:$0xff]  }
0x11cb   : > { %22332 = vmatmul.mubr.bf16.vlgmr.msra.gmra.mrb[100].mxu0 %v25422_v21  ;;  %v25441_v21 = vld [vmem:[%s30283_s16 + $0xa0] sm:$0xff]  }
0x11cc   : > { %22348 = vmatpush3.bf16.msra.mxu0 %v28757_v44  ;;  %22335 = vmatprep.mubr.bf16.mxu0 %v25423_v36  ;;  %v25444_v36 = vld [vmem:[%s30283_s16 + $0xb8] sm:$0xff]  }
0x11cd   : > { %22349 = vmatprep.subr.bf16.mxu0 %v28755_v17  ;;  %v22387_v24 = vpop.f32.mrb[8].mxu1 }
0x11ce   : > { %v12939_v53 = vpop.f32.mrb[9].mxu1 }
0x11cf   : > { %v22388_v1 = vpop.f32.mrb[10].mxu1 }
0x11d0   : > { %v28785_v8 = vpack.c.bf16 %v22388_v1, %v22387_v24  ;;  %22350 = vmatpush3.bf16.msra.mxu0 %v28755_v17  ;;  %v12942_v48 = vpop.f32.mrb[11].mxu1  ;;  %v25426_v17 = vld [vmem:[%s30283_s16 + $0x68] sm:$0xff]   ;;  %v25448_v1 = vld [vmem:[%s30283_s16 + $0xd8] sm:$0xff]  }
0x11d1   : > { %v13005_v60 = vpack.c.bf16 %v12942_v48, %v12939_v53  ;;  %22351 = vmatprep.subr.bf16.mxu0 %v28761_v27  ;;  %v25446_v24 = vld [vmem:[%s30283_s16 + $0xc8] sm:$0xff]   ;;  %v25447_v53 = vld [vmem:[%s30283_s16 + $0xd0] sm:$0xff]  }
0x11d2   : > { %v25451_v48 = vld [vmem:[%s30283_s16 + $0xf0] sm:$0xff]  }
0x11d3   : > { %22336 = vmatmul.mubr.bf16.gmra.mrb[104].mxu0 %v25424_v20  ;;  %v25449_v20 = vld [vmem:[%s30283_s16 + $0xe0] sm:$0xff]  }
0x11d4   : > { %22352 = vmatpush3.bf16.msra.mxu0 %v28761_v27  ;;  %22339 = vmatprep.mubr.bf16.mxu0 %v25425_v61  ;;  %v25452_v61 = vld [vmem:[%s30283_s16 + $0xf8] sm:$0xff]  }
0x11d5   : > { %22353 = vmatprep.subr.bf16.mxu0 %v28759_v9  ;;  %v22391_v5 = vpop.f32.mrb[12].mxu1 }
0x11d6   : > { %v12955_v2 = vpop.f32.mrb[13].mxu1 }
0x11d7   : > { %v22392_v63 = vpop.f32.mrb[14].mxu1 }
0x11d8   : > { %v28797_v22 = vpack.c.bf16 %v22392_v63, %v22391_v5  ;;  %22354 = vmatpush3.bf16.msra.mxu0 %v28759_v9  ;;  %v12958_v44 = vpop.f32.mrb[15].mxu1  ;;  %v25428_v9 = vld [vmem:[%s30283_s16 + $0x78] sm:$0xff]  }
0x11d9   : > { %v13007_v31 = vpack.c.bf16 %v12958_v44, %v12955_v2  ;;  %22355 = vmatprep.subr.bf16.mxu0 %v28765_v57  ;;  %v13469_v44 = vld [vmem:[%s30287_s20 + $0x8] sm:$0xff] }
0x11db   : > { %22340 = vmatmul.mubr.bf16.gmra.mrb[108].mxu0 %v25426_v17 }
0x11dc   : > { %22356 = vmatpush3.bf16.msra.mxu0 %v28765_v57  ;;  %22343 = vmatprep.mubr.bf16.mxu0 %v25427_v23  ;;  %v13470_v23 = vld [vmem:[%s30287_s20 + $0x10] sm:$0xff] }
0x11dd   : > { %22357 = vmatprep.subr.bf16.mxu0 %v28763_v35  ;;  %v22395_v54 = vpop.f32.mrb[16].mxu1 }
0x11de   : > { %v12971_v58 = vpop.f32.mrb[17].mxu1 }
0x11df   : > { %v22396_v27 = vpop.f32.mrb[18].mxu1 }
0x11e0   : > { %v28809_v38 = vpack.c.bf16 %v22396_v27, %v22395_v54  ;;  %22358 = vmatpush3.bf16.msra.mxu0 %v28763_v35  ;;  %v12974_v51 = vpop.f32.mrb[19].mxu1  ;;  %v25430_v35 = vld [vmem:[%s30283_s16 + $0x8] sm:$0xff]   ;;  %v28918_v54 = vand.u32 4294901760, %v13469_v44 }
0x11e1   : > { %v13009_v3 = vpack.c.bf16 %v12974_v51, %v12971_v58  ;;  %22359 = vmatprep.subr.bf16.mxu0 %v28769_v13  ;;  %v28920_v58 = vand.u32 4294901760, %v13470_v23 }
0x11e3   : > { %22344 = vmatmul.mubr.bf16.gmra.mrb[112].mxu0 %v25428_v9  ;;  %v28925_v9 = vsub.f32 %v13469_v44, %v28918_v54 }
0x11e4   : > { %22360 = vmatpush3.bf16.msra.mxu0 %v28769_v13  ;;  %22363 = vmatprep.mubr.bf16.mxu0 %v25429_v46 }
0x11e5   : > { %22361 = vmatprep.subr.bf16.mxu0 %v28767_v10  ;;  %v22433_v57 = vpop.f32.mrb[20].mxu1  ;;  %30863 = vst [vmem:[#allocation35_spill] sm:$0xff] %v28925_v9  ;;  %v28934_v46 = vand.u32 4294901760, %v28925_v9 }
0x11e6   : > { %v13211_v7 = vpop.f32.mrb[21].mxu1 }
0x11e7   : > { %v22434_v18 = vpop.f32.mrb[22].mxu1  ;;  %30866 = vst [vmem:[#allocation29_spill] sm:$0xff] %v28934_v46 }
0x11e8   : > { %v13292_v30 = vpack.c.bf16 %v22434_v18, %v22433_v57  ;;  %22362 = vmatpush3.bf16.msra.mxu0 %v28767_v10  ;;  %v13214_v62 = vpop.f32.mrb[23].mxu1 }
0x11e9   : > { %v13291_v25 = vpack.c.bf16 %v13214_v62, %v13211_v7  ;;  %22397 = vmatprep.subr.bf16.mxu0 %v13003_v41  ;;  %v13582_v7 = vsub.f32 %v28925_v9, %v28934_v46 }
0x11eb   : > { %22364 = vmatmul.mubr.bf16.vlgmr.msra.gmra.mrb[100].mxu0 %v25430_v35 }
0x11ec   : > { %22398 = vmatpush3.bf16.msra.mxu0 %v13003_v41  ;;  %22367 = vmatprep.mubr.bf16.mxu0 %v25431_v12  ;;  %v25445_v41 = vld [vmem:[%s30283_s16 + $0xc0] sm:$0xff]  }
0x11ed   : > { %22399 = vmatprep.subr.bf16.mxu0 %v28774_v45  ;;  %v22437_v13 = vpop.f32.mrb[24].mxu1 }
0x11ee   : > { %v13227_v28 = vpop.f32.mrb[25].mxu1 }
0x11ef   : > { %v22438_v52 = vpop.f32.mrb[26].mxu1 }
0x11f0   : > { %v13294_v10 = vpack.c.bf16 %v22438_v52, %v22437_v13  ;;  %22400 = vmatpush3.bf16.msra.mxu0 %v28774_v45  ;;  %v13230_v42 = vpop.f32.mrb[27].mxu1  ;;  %v25442_v45 = vld [vmem:[%s30283_s16 + $0xa8] sm:$0xff]   ;;  %v28955_v13 = vand.u32 4294901760, %v13582_v7 }
0x11f1   : > { %v13293_v50 = vpack.c.bf16 %v13230_v42, %v13227_v28  ;;  %22401 = vmatprep.subr.bf16.mxu0 %v13005_v60 }
0x11f3   : > { %22368 = vmatmul.mubr.bf16.gmra.mrb[104].mxu0 %v25432_v15 }
0x11f4   : > { %22402 = vmatpush3.bf16.msra.mxu0 %v13005_v60  ;;  %22371 = vmatprep.mubr.bf16.mxu0 %v25433_v26  ;;  %v13468_v60 = vld [vmem:[%s30287_s20] sm:$0xff] }
0x11f5   : > { %22403 = vmatprep.subr.bf16.mxu0 %v28785_v8  ;;  %v22441_v0 = vpop.f32.mrb[28].mxu1  ;;  %v28899_v5 = vand.u32 4294901760, %v13468_v60 }
0x11f6   : > { %v13243_v47 = vpop.f32.mrb[29].mxu1 }
0x11f7   : > { %v22442_v33 = vpop.f32.mrb[30].mxu1  ;;  %30861 = vst [vmem:[#allocation42_spill] sm:$0xff] %v28899_v5  ;;  %v28902_v2 = vsub.f32 %v13468_v60, %v28899_v5 }
0x11f8   : > { %v13296_v6 = vpack.c.bf16 %v22442_v33, %v22441_v0  ;;  %22404 = vmatpush3.bf16.msra.mxu0 %v28785_v8  ;;  %v13246_v49 = vpop.f32.mrb[31].mxu1  ;;  %v25450_v8 = vld [vmem:[%s30283_s16 + $0xe8] sm:$0xff]  }
0x11f9   : > { %v13295_v11 = vpack.c.bf16 %v13246_v49, %v13243_v47  ;;  %22405 = vmatprep.subr.bf16.mxu0 %v13007_v31  ;;  %v28905_v63 = vand.u32 4294901760, %v28902_v2 }
0x11fb   : > { %22372 = vmatmul.mubr.bf16.gmra.mrb[108].mxu0 %v25434_v59  ;;  %30862 = vst [vmem:[#allocation27_spill] sm:$0xff] %v28905_v63  ;;  %v13572_v17 = vsub.f32 %v28902_v2, %v28905_v63 }
0x11fc   : > { %22406 = vmatpush3.bf16.msra.mxu0 %v13007_v31  ;;  %22375 = vmatprep.mubr.bf16.mxu0 %v25435_v55  ;;  %v13471_v31 = vld [vmem:[%s30287_s20 + $0x18] sm:$0xff] }
0x11fd   : > { %22407 = vmatprep.subr.bf16.mxu0 %v28797_v22  ;;  %v22445_v43 = vpop.f32.mrb[32].mxu1  ;;  %v28922_v27 = vand.u32 4294901760, %v13471_v31 }
0x11fe   : > { %v13259_v39 = vpop.f32.mrb[33].mxu1 }
0x11ff   : > { %v22446_v34 = vpop.f32.mrb[34].mxu1  ;;  %v28931_v51 = vsub.f32 %v13471_v31, %v28922_v27 }
0x1200   : > { %v13298_v29 = vpack.c.bf16 %v22446_v34, %v22445_v43  ;;  %22408 = vmatpush3.bf16.msra.mxu0 %v28797_v22  ;;  %v13262_v40 = vpop.f32.mrb[35].mxu1  ;;  %v13573_v22 = vand.u32 4294901760, %v13572_v17 }
0x1201   : > { %v13297_v14 = vpack.c.bf16 %v13262_v40, %v13259_v39  ;;  %22409 = vmatprep.subr.bf16.mxu0 %v13009_v3  ;;  %30865 = vst [vmem:[#allocation11_spill] sm:$0xff] %v28931_v51  ;;  %v28940_v57 = vand.u32 4294901760, %v28931_v51 }
0x1202   : > { %22511 = vmatprep.mubr.f32.mxu1 %v13573_v22 }
0x1203   : > { %22376 = vmatmul.mubr.bf16.gmra.mrb[112].mxu0 %v25436_v19  ;;  %30868 = vst [vmem:[#allocation3_spill] sm:$0xff] %v28940_v57  ;;  %v13602_v35 = vsub.f32 %v28931_v51, %v28940_v57 }
0x1204   : > { %22410 = vmatpush3.bf16.msra.mxu0 %v13009_v3  ;;  %22413 = vmatprep.mubr.bf16.mxu0 %v25437_v16 }
0x1205   : > { %22411 = vmatprep.subr.bf16.mxu0 %v28809_v38  ;;  %v28964_v42 = vand.u32 4294901760, %v13602_v35 }
0x1208   : > { %22412 = vmatpush3.bf16.msra.mxu0 %v28809_v38  ;;  %v28928_v38 = vsub.f32 %v13470_v23, %v28920_v58 }
0x1209   : > { %22447 = vmatprep.subr.bf16.mxu0 %v13291_v25 }
0x120a   : > { %30864 = vst [vmem:[#allocation14_spill] sm:$0xff] %v28928_v38  ;;  %v28937_v3 = vand.u32 4294901760, %v28928_v38 }
0x120b   : > { %22414 = vmatmul.mubr.bf16.vlgmr.msra.gmra.mrb[100].mxu0 %v25438_v56 }
0x120c   : > { %22448 = vmatpush3.bf16.msra.mxu0 %v13291_v25  ;;  %22417 = vmatprep.mubr.bf16.mxu0 %v25439_v32  ;;  %30867 = vst [vmem:[#allocation30_spill] sm:$0xff] %v28937_v3  ;;  %v13592_v18 = vsub.f32 %v28928_v38, %v28937_v3 }
0x120d   : > { %22449 = vmatprep.subr.bf16.mxu0 %v13292_v30 }
0x1210   : > { %22450 = vmatpush3.bf16.msra.mxu0 %v13292_v30 }
0x1211   : > { %22451 = vmatprep.subr.bf16.mxu0 %v13293_v50 }
0x1213   : > { %22418 = vmatmul.mubr.bf16.gmra.mrb[104].mxu0 %v25440_v37 }
0x1214   : > { %22452 = vmatpush3.bf16.msra.mxu0 %v13293_v50  ;;  %22421 = vmatprep.mubr.bf16.mxu0 %v25441_v21 }
0x1215   : > { %22453 = vmatprep.subr.bf16.mxu0 %v13294_v10 }
0x1218   : > { %22454 = vmatpush3.bf16.msra.mxu0 %v13294_v10  ;;  %v28962_v10 = vand.u32 4294901760, %v13592_v18 }
0x1219   : > { %22455 = vmatprep.subr.bf16.mxu0 %v13295_v11 }
0x121b   : > { %22422 = vmatmul.mubr.bf16.gmra.mrb[108].mxu0 %v25442_v45 }
0x121c   : > { %22456 = vmatpush3.bf16.msra.mxu0 %v13295_v11  ;;  %22425 = vmatprep.mubr.bf16.mxu0 %v25443_v4 }
0x121d   : > { %22457 = vmatprep.subr.bf16.mxu0 %v13296_v6 }
0x1220   : > { %22458 = vmatpush3.bf16.msra.mxu0 %v13296_v6 }
0x1221   : > { %22459 = vmatprep.subr.bf16.mxu0 %v13297_v14 }
0x1223   : > { %22426 = vmatmul.mubr.bf16.gmra.mrb[112].mxu0 %v25444_v36 }
0x1224   : > { %22460 = vmatpush3.bf16.msra.mxu0 %v13297_v14  ;;  %22463 = vmatprep.mubr.bf16.mxu0 %v25445_v41 }
0x1225   : > { %22461 = vmatprep.subr.bf16.mxu0 %v13298_v29 }
0x1228   : > { %22462 = vmatpush3.bf16.msra.mxu0 %v13298_v29 }
0x122b   : > { %22464 = vmatmul.mubr.bf16.vlgmr.msra.gmra.mrb[100].mxu0 %v25446_v24 }
0x122c   : > { %22467 = vmatprep.mubr.bf16.mxu0 %v25447_v53 }
0x1233   : > { %22468 = vmatmul.mubr.bf16.gmra.mrb[104].mxu0 %v25448_v1 }
0x1234   : > { %22471 = vmatprep.mubr.bf16.mxu0 %v25449_v20 }
0x123b   : > { %22472 = vmatmul.mubr.bf16.gmra.mrb[108].mxu0 %v25450_v8 }
0x123c   : > { %22475 = vmatprep.mubr.bf16.mxu0 %v25451_v48 }
0x1243   : > { %22476 = vmatmul.mubr.bf16.gmra.mrb[112].mxu0 %v25452_v61 }
0x1244   : > { %22739 = vmatprep.mubr.f32.mxu0 %v13573_v22 }
0x12fe   : > { %v28948_v30 = vpop.f32.mrb[100].mxu0 }
0x12ff   : > { %30869 = vst [vmem:[#allocation9_spill] sm:$0xff] %v28948_v30  ;;  %v13495_v62 = vand.u32 4294901760, %v28948_v30  ;;  %v14260_v12 = vmul.f32 %v28948_v30, %v28948_v30  ;;  %v28953_v25 = vpop.f32.mrb[101].mxu0 }
0x1300   : > { %30870 = vst [vmem:[#allocation34_spill] sm:$0xff] %v28953_v25  ;;  %v13489_v28 = vand.u32 4294901760, %v28953_v25  ;;  %v14258_v52 = vmul.f32 %v28953_v25, %v28953_v25  ;;  %v28960_v15 = vpop.f32.mrb[102].mxu0 }
0x1301   : > { %30871 = vst [vmem:[#allocation4_spill] sm:$0xff] %v28960_v15  ;;  %v28967_v26 = vsub.f32 %v28948_v30, %v13495_v62  ;;  %v14281_v50 = vand.u32 4294901760, %v14260_v12  ;;  %v13498_v0 = vand.u32 4294901760, %v28960_v15  ;;  %v14261_v47 = vmul.f32 %v28960_v15, %v28960_v15  ;;  %v28972_v33 = vpop.f32.mrb[103].mxu0 }
0x1302   : > { %30872 = vst [vmem:[#allocation16_spill] sm:$0xff] %v28972_v33  ;;  %v28975_v59 = vsub.f32 %v28953_v25, %v13489_v28  ;;  %v14275_v6 = vand.u32 4294901760, %v14258_v52  ;;  %v13492_v49 = vand.u32 4294901760, %v28972_v33  ;;  %v14259_v55 = vmul.f32 %v28972_v33, %v28972_v33 }
0x1303   : > { %v28980_v11 = vsub.f32 %v14260_v12, %v14281_v50  ;;  %v28982_v43 = vpack.c.bf16 %v13498_v0, %v13495_v62  ;;  %v28985_v39 = vsub.f32 %v28960_v15, %v13498_v0  ;;  %v14284_v34 = vand.u32 4294901760, %v14261_v47 }
0x1304   : > { %v28987_v19 = vsub.f32 %v14258_v52, %v14275_v6  ;;  %v28989_v29 = vpack.c.bf16 %v13492_v49, %v13489_v28  ;;  %v28992_v40 = vsub.f32 %v28972_v33, %v13492_v49  ;;  %v14278_v16 = vand.u32 4294901760, %v14259_v55 }
0x1305   : > { %30873 = vst [vmem:[#allocation25_spill] sm:$0xff] %v28982_v43  ;;  %v28994_v14 = vpack.c.bf16 %v14284_v34, %v14281_v50  ;;  %v28996_v56 = vsub.f32 %v14261_v47, %v14284_v34  ;;  %v30477_v32 = vand.u32 4294901760, %v28975_v59  ;;  %v30474_v37 = vand.u32 4294901760, %v28967_v26 }
0x1306   : > { %30874 = vst [vmem:[#allocation15_spill] sm:$0xff] %v28989_v29  ;;  %v29000_v21 = vpack.c.bf16 %v14278_v16, %v14275_v6  ;;  %v29002_v45 = vsub.f32 %v14259_v55, %v14278_v16  ;;  %v29004_v4 = vpop.f32.mrb[104].mxu0  ;;  %24040 = vmatprep.subr.bf16.mxu1 %v28989_v29  ;;  %v30476_v36 = vand.u32 4294901760, %v28992_v40  ;;  %v30475_v41 = vand.u32 4294901760, %v28987_v19 }
0x1307   : > { %30875 = vst [vmem:[#allocation12_spill] sm:$0xff] %v28994_v14  ;;  %30877 = vst [vmem:[#allocation39_spill] sm:$0xff] %v29004_v4  ;;  %v13507_v24 = vand.u32 4294901760, %v29004_v4  ;;  %v14264_v53 = vmul.f32 %v29004_v4, %v29004_v4  ;;  %v29012_v1 = vpop.f32.mrb[105].mxu0  ;;  %24042 = vmatpush3.bf16.msra.mxu1 %v28989_v29  ;;  %v13613_v20 = vsub.f32 %v28975_v59, %v30477_v32 }
0x1308   : > { %30876 = vst [vmem:[#allocation32_spill] sm:$0xff] %v29000_v21  ;;  %30878 = vst [vmem:[#allocation31_spill] sm:$0xff] %v29012_v1  ;;  %v29021_v8 = vsub.f32 %v28967_v26, %v30474_v37  ;;  %v13501_v48 = vand.u32 4294901760, %v29012_v1  ;;  %v14262_v61 = vmul.f32 %v29012_v1, %v29012_v1  ;;  %v29026_v60 = vpop.f32.mrb[106].mxu0  ;;  %24044 = vmatprep.subr.bf16.mxu1 %v28982_v43  ;;  %24232 = vmatprep.subr.bf16.mxu0 %v29000_v21 }
0x1309   : > { %30879 = vst [vmem:[#allocation28_spill] sm:$0xff] %v29026_v60  ;;  %v13620_v17 = vsub.f32 %v28992_v40, %v30476_v36  ;;  %v29036_v22 = vsub.f32 %v28987_v19, %v30475_v41  ;;  %v29039_v44 = vsub.f32 %v29004_v4, %v13507_v24  ;;  %v14293_v23 = vand.u32 4294901760, %v14264_v53  ;;  %v29044_v18 = vpop.f32.mrb[107].mxu0  ;;  %24234 = vmatpush3.bf16.msra.mxu0 %v29000_v21 }
0x130a   : > { %v13510_v31 = vand.u32 4294901760, %v29026_v60  ;;  %v14265_v7 = vmul.f32 %v29026_v60, %v29026_v60  ;;  %30880 = vst [vmem:[#allocation18_spill] sm:$0xff] %v29044_v18  ;;  %v29048_v35 = vsub.f32 %v29012_v1, %v13501_v48  ;;  %v14287_v62 = vand.u32 4294901760, %v14262_v61  ;;  %24236 = vmatprep.subr.bf16.mxu0 %v28994_v14 }
0x130b   : > { %v13504_v12 = vand.u32 4294901760, %v29044_v18  ;;  %v14263_v28 = vmul.f32 %v29044_v18, %v29044_v18  ;;  %v29054_v52 = vsub.f32 %v14264_v53, %v14293_v23  ;;  %24046 = vmatpush3.bf16.msra.mxu1 %v28982_v43 }
0x130c   : > { %v29056_v50 = vpack.c.bf16 %v13510_v31, %v13507_v24  ;;  %v29059_v0 = vsub.f32 %v29026_v60, %v13510_v31  ;;  %v14296_v47 = vand.u32 4294901760, %v14265_v7  ;;  %v29062_v6 = vsub.f32 %v14262_v61, %v14287_v62 }
0x130d   : > { %v29064_v49 = vpack.c.bf16 %v13504_v12, %v13501_v48  ;;  %v29067_v55 = vsub.f32 %v29044_v18, %v13504_v12  ;;  %v14290_v34 = vand.u32 4294901760, %v14263_v28  ;;  %24238 = vmatpush3.bf16.msra.mxu0 %v28994_v14  ;;  %v13614_v24 = vand.u32 4294901760, %v13613_v20 }
0x130e   : > { %30881 = vst [vmem:[#allocation10_spill] sm:$0xff] %v29056_v50  ;;  %v29069_v16 = vpack.c.bf16 %v14296_v47, %v14293_v23  ;;  %v29071_v53 = vsub.f32 %v14265_v7, %v14296_v47  ;;  %v13621_v31 = vand.u32 4294901760, %v13620_v17  ;;  %v29078_v61 = vpop.f32.mrb[108].mxu0  ;;  %v14400_v48 = vand.u32 4294901760, %v29036_v22 }
0x130f   : > { %30882 = vst [vmem:[#allocation13_spill] sm:$0xff] %v29064_v49  ;;  %v29074_v37 = vpack.c.bf16 %v14290_v34, %v14287_v62  ;;  %v29076_v41 = vsub.f32 %v14263_v28, %v14290_v34  ;;  %30885 = vst [vmem:[#allocation19_spill] sm:$0xff] %v29078_v61  ;;  %24048 = vmatprep.subr.bf16.mxu1 %v29064_v49  ;;  %v30481_v12 = vand.u32 4294901760, %v29002_v45  ;;  %v13519_v23 = vand.u32 4294901760, %v29078_v61  ;;  %v29086_v47 = vpop.f32.mrb[109].mxu0 }
0x1310   : > { %30883 = vst [vmem:[#allocation40_spill] sm:$0xff] %v29069_v16  ;;  %v14268_v7 = vmul.f32 %v29078_v61, %v29078_v61  ;;  %30886 = vst [vmem:[#allocation26_spill] sm:$0xff] %v29086_v47  ;;  %24050 = vmatpush3.bf16.msra.mxu1 %v29064_v49  ;;  %v29089_v20 = vpack.c.bf16 %v13621_v31, %v13614_v24  ;;  %v13513_v62 = vand.u32 4294901760, %v29086_v47  ;;  %v29095_v28 = vpop.f32.mrb[110].mxu0 }
0x1311   : > { %30884 = vst [vmem:[#allocation41_spill] sm:$0xff] %v29074_v37  ;;  %v14266_v22 = vmul.f32 %v29086_v47, %v29086_v47  ;;  %30887 = vst [vmem:[#allocation21_spill] sm:$0xff] %v29095_v28  ;;  %24052 = vmatprep.subr.bf16.mxu1 %v29056_v50  ;;  %24240 = vmatprep.subr.bf16.mxu0 %v29074_v37  ;;  %v14406_v34 = vsub.f32 %v29002_v45, %v30481_v12  ;;  %v13522_v32 = vand.u32 4294901760, %v29095_v28  ;;  %v29109_v60 = vpop.f32.mrb[111].mxu0 }
0x1312   : > { %v29104_v31 = vsub.f32 %v29078_v61, %v13519_v23  ;;  %v14305_v36 = vand.u32 4294901760, %v14268_v7  ;;  %v14269_v17 = vmul.f32 %v29095_v28, %v29095_v28  ;;  %30888 = vst [vmem:[#allocation22_spill] sm:$0xff] %v29109_v60  ;;  %24242 = vmatpush3.bf16.msra.mxu0 %v29074_v37  ;;  %v29113_v4 = vsub.f32 %v29086_v47, %v13513_v62 }
0x1313   : > { %v14299_v18 = vand.u32 4294901760, %v14266_v22  ;;  %v13516_v12 = vand.u32 4294901760, %v29109_v60  ;;  %v14267_v24 = vmul.f32 %v29109_v60, %v29109_v60  ;;  %24244 = vmatprep.subr.bf16.mxu0 %v29069_v16  ;;  %v29121_v1 = vpack.c.bf16 %v13522_v32, %v13519_v23 }
0x1314   : > { %v29119_v61 = vsub.f32 %v14268_v7, %v14305_v36  ;;  %v29124_v15 = vsub.f32 %v29095_v28, %v13522_v32  ;;  %v14308_v30 = vand.u32 4294901760, %v14269_v17  ;;  %24054 = vmatpush3.bf16.msra.mxu1 %v29056_v50  ;;  %v14407_v23 = vand.u32 4294901760, %v14406_v34 }
0x1315   : > { %30889 = vst [vmem:[#allocation36_spill] sm:$0xff] %v29121_v1  ;;  %v29127_v47 = vsub.f32 %v14266_v22, %v14299_v18  ;;  %v29129_v33 = vpack.c.bf16 %v13516_v12, %v13513_v62  ;;  %v29132_v25 = vsub.f32 %v29109_v60, %v13516_v12  ;;  %v14302_v57 = vand.u32 4294901760, %v14267_v24 }
0x1316   : > { %v29134_v3 = vpack.c.bf16 %v14308_v30, %v14305_v36  ;;  %v29136_v7 = vsub.f32 %v14269_v17, %v14308_v30  ;;  %24246 = vmatpush3.bf16.msra.mxu0 %v29069_v16  ;;  %v30892_v32 = vand.u32 4294901760, %v28985_v39  ;;  %v29146_v62 = vpop.f32.mrb[112].mxu0  ;;  %v30897_v30 = vand.u32 4294901760, %v28980_v11 }
0x1317   : > { %30890 = vst [vmem:[#allocation37_spill] sm:$0xff] %v29129_v33  ;;  %v29142_v46 = vpack.c.bf16 %v14302_v57, %v14299_v18  ;;  %v29144_v22 = vsub.f32 %v14267_v24, %v14302_v57  ;;  %30894 = vst [vmem:[#allocation8_spill] sm:$0xff] %v29146_v62  ;;  %24056 = vmatprep.subr.bf16.mxu1 %v29129_v33  ;;  %v13531_v12 = vand.u32 4294901760, %v29146_v62  ;;  %v29154_v34 = vpop.f32.mrb[113].mxu0 }
0x1318   : > { %30891 = vst [vmem:[#allocation5_spill] sm:$0xff] %v29134_v3  ;;  %v13634_v28 = vsub.f32 %v28985_v39, %v30892_v32  ;;  %v14272_v17 = vmul.f32 %v29146_v62, %v29146_v62  ;;  %30895 = vst [vmem:[#allocation7_spill] sm:$0xff] %v29154_v34  ;;  %24058 = vmatpush3.bf16.msra.mxu1 %v29129_v33  ;;  %v29157_v18 = vpack.c.bf16 %v14407_v23, %v14400_v48  ;;  %v29162_v36 = vpop.f32.mrb[114].mxu0 }
0x1319   : > { %30893 = vst [vmem:[#allocation38_spill] sm:$0xff] %v29142_v46  ;;  %v13525_v24 = vand.u32 4294901760, %v29154_v34  ;;  %v14270_v32 = vmul.f32 %v29154_v34, %v29154_v34  ;;  %30896 = vst [vmem:[#allocation17_spill] sm:$0xff] %v29162_v36  ;;  %24060 = vmatprep.subr.bf16.mxu1 %v29121_v1  ;;  %24248 = vmatprep.subr.bf16.mxu0 %v29142_v46  ;;  %v14413_v60 = vsub.f32 %v28980_v11, %v30897_v30  ;;  %v29178_v37 = vpop.f32.mrb[115].mxu0 }
0x131a   : > { %v13635_v57 = vand.u32 4294901760, %v13634_v28  ;;  %v30898_v33 = vand.u32 4294901760, %v28996_v56  ;;  %v29173_v28 = vsub.f32 %v29146_v62, %v13531_v12  ;;  %v14317_v23 = vand.u32 4294901760, %v14272_v17  ;;  %30899 = vst [vmem:[#allocation6_spill] sm:$0xff] %v29178_v37  ;;  %24250 = vmatpush3.bf16.msra.mxu0 %v29142_v46 }
0x131b   : > { %v13534_v16 = vand.u32 4294901760, %v29162_v36  ;;  %v14273_v50 = vmul.f32 %v29162_v36, %v29162_v36  ;;  %v29182_v49 = vsub.f32 %v29154_v34, %v13525_v24  ;;  %v14311_v30 = vand.u32 4294901760, %v14270_v32  ;;  %24252 = vmatprep.subr.bf16.mxu0 %v29134_v3 }
0x131c   : > { %v14420_v48 = vsub.f32 %v28996_v56, %v30898_v33  ;;  %v13528_v63 = vand.u32 4294901760, %v29178_v37  ;;  %v14271_v33 = vmul.f32 %v29178_v37, %v29178_v37  ;;  %v29188_v62 = vsub.f32 %v14272_v17, %v14317_v23  ;;  %24062 = vmatpush3.bf16.msra.mxu1 %v29121_v1 }
0x131d   : > { %v29190_v51 = vpack.c.bf16 %v13534_v16, %v13531_v12  ;;  %v29193_v14 = vsub.f32 %v29162_v36, %v13534_v16  ;;  %v14320_v43 = vand.u32 4294901760, %v14273_v50  ;;  %v29196_v34 = vsub.f32 %v14270_v32, %v14311_v30 }
0x131e   : > { %v29198_v46 = vpack.c.bf16 %v13528_v63, %v13525_v24  ;;  %v29201_v38 = vsub.f32 %v29178_v37, %v13528_v63  ;;  %v14314_v9 = vand.u32 4294901760, %v14271_v33  ;;  %24254 = vmatpush3.bf16.msra.mxu0 %v29134_v3  ;;  %v30903_v16 = vand.u32 4294901760, %v29021_v8 }
0x131f   : > { %30900 = vst [vmem:[#allocation24_spill] sm:$0xff] %v29190_v51  ;;  %v29203_v21 = vpack.c.bf16 %v14320_v43, %v14317_v23  ;;  %v29205_v17 = vsub.f32 %v14273_v50, %v14320_v43  ;;  %v14414_v36 = vand.u32 4294901760, %v14413_v60  ;;  %v14421_v63 = vand.u32 4294901760, %v14420_v48 }
0x1320   : > { %30901 = vst [vmem:[#allocation23_spill] sm:$0xff] %v29198_v46  ;;  %v29210_v12 = vpack.c.bf16 %v13635_v57, %v30903_v16  ;;  %v29212_v1 = vpack.c.bf16 %v14314_v9, %v14311_v30  ;;  %v29214_v32 = vsub.f32 %v14271_v33, %v14314_v9  ;;  %24064 = vmatprep.subr.bf16.mxu1 %v29198_v46  ;;  %v30528_v24 = vand.u32 4294901760, %v29048_v35 }
0x1321   : > { %30902 = vst [vmem:[#allocation33_spill] sm:$0xff] %v29203_v21  ;;  %24066 = vmatpush3.bf16.msra.mxu1 %v29198_v46  ;;  %v30529_v43 = vand.u32 4294901760, %v29067_v55  ;;  %v30530_v50 = vand.u32 4294901760, %v29062_v6  ;;  %v30531_v8 = vand.u32 4294901760, %v29076_v41  ;;  %v30537_v57 = vand.u32 4294901760, %v29039_v44 }
0x1322   : > { %30904 = vst [vmem:[#allocation20_spill] sm:$0xff] %v29212_v1  ;;  %24068 = vmatprep.subr.bf16.mxu1 %v29190_v51  ;;  %24256 = vmatprep.subr.bf16.mxu0 %v29212_v1  ;;  %v29225_v9 = vpack.c.bf16 %v14421_v63, %v14414_v36  ;;  %v13641_v60 = vsub.f32 %v29048_v35, %v30528_v24  ;;  %v30538_v48 = vand.u32 4294901760, %v29059_v0  ;;  %v30541_v23 = vand.u32 4294901760, %v29054_v52 }
0x1323   : > { %24258 = vmatpush3.bf16.msra.mxu0 %v29212_v1  ;;  %v13648_v30 = vsub.f32 %v29067_v55, %v30529_v43  ;;  %v14427_v33 = vsub.f32 %v29062_v6, %v30530_v50  ;;  %v14434_v36 = vsub.f32 %v29076_v41, %v30531_v8  ;;  %v13655_v16 = vsub.f32 %v29039_v44, %v30537_v57 }
0x1324   : > { %24260 = vmatprep.subr.bf16.mxu0 %v29203_v21  ;;  %v13642_v63 = vand.u32 4294901760, %v13641_v60  ;;  %v13662_v24 = vsub.f32 %v29059_v0, %v30538_v48  ;;  %v14441_v43 = vsub.f32 %v29054_v52, %v30541_v23  ;;  %v30558_v50 = vand.u32 4294901760, %v29071_v53 }
0x1325   : > { %24070 = vmatpush3.bf16.msra.mxu1 %v29190_v51  ;;  %v13649_v8 = vand.u32 4294901760, %v13648_v30  ;;  %v14428_v37 = vand.u32 4294901760, %v14427_v33  ;;  %v14435_v1 = vand.u32 4294901760, %v14434_v36  ;;  %v13656_v46 = vand.u32 4294901760, %v13655_v16 }
0x1326   : > { %24072 = vmatprep.subr.bf16.mxu1 %v29089_v20  ;;  %v13663_v57 = vand.u32 4294901760, %v13662_v24  ;;  %v14442_v60 = vand.u32 4294901760, %v14441_v43  ;;  %v14448_v48 = vsub.f32 %v29071_v53, %v30558_v50  ;;  %v30546_v3 = vand.u32 4294901760, %v29113_v4 }
0x1327   : > { %24262 = vmatpush3.bf16.msra.mxu0 %v29203_v21  ;;  %v24079_v23 = vpack.c.bf16 %v13649_v8, %v13642_v63  ;;  %v29260_v29 = vpack.c.bf16 %v14435_v1, %v14428_v37  ;;  %v30545_v30 = vand.u32 4294901760, %v29132_v25  ;;  %v30544_v33 = vand.u32 4294901760, %v29127_v47 }
0x1328   : > { %24264 = vmatprep.subr.bf16.mxu0 %v29157_v18  ;;  %22512 = vmatmul.mubr.f32.vlgmr.msra.gmra.mrb[36].mxu1 %v28955_v13  ;;  %v29266_v24 = vpack.c.bf16 %v13663_v57, %v13656_v46  ;;  %v14449_v43 = vand.u32 4294901760, %v14448_v48  ;;  %v13669_v36 = vsub.f32 %v29113_v4, %v30546_v3  ;;  %v30550_v16 = vand.u32 4294901760, %v29144_v22 }
0x1329   : > { %24074 = vmatpush3.bf16.msra.mxu1 %v29089_v20  ;;  %v13676_v37 = vsub.f32 %v29132_v25, %v30545_v30  ;;  %v14455_v1 = vsub.f32 %v29127_v47, %v30544_v33  ;;  %v30548_v46 = vand.u32 4294901760, %v29104_v31  ;;  %v30547_v8 = vand.u32 4294901760, %v29124_v15  ;;  %22514 = vmatprep.mubr.f32.mxu1 %v28962_v10 }
0x132a   : > { %24076 = vmatprep.subr.bf16.mxu1 %v29210_v12  ;;  %22740 = vmatmul.mubr.f32.vlgmr.msra.gmra.mrb[116].mxu0 %v28955_v13  ;;  %v29284_v57 = vpack.c.bf16 %v14449_v43, %v14442_v60  ;;  %v13670_v20 = vand.u32 4294901760, %v13669_v36  ;;  %v14462_v48 = vsub.f32 %v29144_v22, %v30550_v16  ;;  %v30549_v63 = vand.u32 4294901760, %v29119_v61 }
0x132b   : > { %24266 = vmatpush3.bf16.msra.mxu0 %v29157_v18  ;;  %v13677_v33 = vand.u32 4294901760, %v13676_v37  ;;  %v14456_v30 = vand.u32 4294901760, %v14455_v1  ;;  %v13683_v3 = vsub.f32 %v29104_v31, %v30548_v46  ;;  %v13690_v13 = vsub.f32 %v29124_v15, %v30547_v8  ;;  %22742 = vmatprep.mubr.f32.mxu0 %v28962_v10 }
0x132c   : > { %24268 = vmatprep.subr.bf16.mxu0 %v29225_v9  ;;  %v14463_v60 = vand.u32 4294901760, %v14462_v48  ;;  %v14469_v43 = vsub.f32 %v29119_v61, %v30549_v63  ;;  %v30555_v18 = vand.u32 4294901760, %v29136_v7  ;;  %v30554_v36 = vand.u32 4294901760, %v29182_v49  ;;  %22515 = vmatmul.mubr.f32.gmra.mrb[38].mxu1 %v28964_v42 }
0x132d   : > { %24078 = vmatpush3.bf16.msra.mxu1 %v29210_v12  ;;  %v24087_v37 = vpack.c.bf16 %v13677_v33, %v13670_v20  ;;  %v13684_v1 = vand.u32 4294901760, %v13683_v3  ;;  %v13691_v8 = vand.u32 4294901760, %v13690_v13  ;;  %v30552_v10 = vand.u32 4294901760, %v29201_v38  ;;  %22549 = vmatprep.mubr.f32.mxu1 %v28899_v5 }
0x132e   : > { %24080 = vmatprep.subr.bf16.mxu1 %v24079_v23  ;;  %v29308_v48 = vpack.c.bf16 %v14463_v60, %v14456_v30  ;;  %v14470_v46 = vand.u32 4294901760, %v14469_v43  ;;  %v14476_v63 = vsub.f32 %v29136_v7, %v30555_v18  ;;  %v13697_v16 = vsub.f32 %v29182_v49, %v30554_v36  ;;  %22743 = vmatmul.mubr.f32.gmra.mrb[118].mxu0 %v28964_v42 }
0x132f   : > { %24270 = vmatpush3.bf16.msra.mxu0 %v29225_v9  ;;  %v29318_v3 = vpack.c.bf16 %v13691_v8, %v13684_v1  ;;  %v13704_v12 = vsub.f32 %v29201_v38, %v30552_v10  ;;  %v30551_v30 = vand.u32 4294901760, %v29196_v34  ;;  %v30553_v33 = vand.u32 4294901760, %v29214_v32  ;;  %22777 = vmatprep.mubr.f32.mxu0 %v28899_v5 }
0x1330   : > { %24272 = vmatprep.subr.bf16.mxu0 %v29260_v29  ;;  %v14477_v20 = vand.u32 4294901760, %v14476_v63  ;;  %v13698_v13 = vand.u32 4294901760, %v13697_v16  ;;  %v30556_v42 = vand.u32 4294901760, %v29173_v28  ;;  %v30557_v9 = vand.u32 4294901760, %v29193_v14 }
0x1331   : > { %24082 = vmatpush3.bf16.msra.mxu1 %v24079_v23  ;;  %v13705_v8 = vand.u32 4294901760, %v13704_v12  ;;  %v14483_v60 = vsub.f32 %v29196_v34, %v30551_v30  ;;  %v14490_v43 = vsub.f32 %v29214_v32, %v30553_v33  ;;  %v14496_v1 = vand.u32 4294901760, %v29188_v62 }
0x1332   : > { %24084 = vmatprep.subr.bf16.mxu1 %v29266_v24  ;;  %v24283_v63 = vpack.c.bf16 %v14477_v20, %v14470_v46  ;;  %v13711_v16 = vsub.f32 %v29173_v28, %v30556_v42  ;;  %v13718_v23 = vsub.f32 %v29193_v14, %v30557_v9  ;;  %v14503_v12 = vand.u32 4294901760, %v29205_v17 }
0x1333   : > { %24274 = vmatpush3.bf16.msra.mxu0 %v29260_v29  ;;  %v24095_v30 = vpack.c.bf16 %v13705_v8, %v13698_v13  ;;  %v14484_v10 = vand.u32 4294901760, %v14483_v60  ;;  %v14491_v33 = vand.u32 4294901760, %v14490_v43  ;;  %v14497_v36 = vsub.f32 %v29188_v62, %v14496_v1 }
0x1334   : > { %24276 = vmatprep.subr.bf16.mxu0 %v29284_v57  ;;  %v13712_v46 = vand.u32 4294901760, %v13711_v16  ;;  %v13719_v20 = vand.u32 4294901760, %v13718_v23  ;;  %v14504_v18 = vsub.f32 %v29205_v17, %v14503_v12  ;;  %v24103_v42 = vpack.c.bf16 %v28992_v40, %v28975_v59 }
0x1335   : > { %24086 = vmatpush3.bf16.msra.mxu1 %v29266_v24  ;;  %v24287_v9 = vpack.c.bf16 %v14491_v33, %v14484_v10  ;;  %v14498_v50 = vand.u32 4294901760, %v14497_v36  ;;  %v24295_v29 = vpack.c.bf16 %v29002_v45, %v28987_v19  ;;  %v24107_v13 = vpack.c.bf16 %v28985_v39, %v28967_v26 }
0x1336   : > { %24088 = vmatprep.subr.bf16.mxu1 %v24087_v37  ;;  %v24099_v8 = vpack.c.bf16 %v13719_v20, %v13712_v46  ;;  %v14505_v60 = vand.u32 4294901760, %v14504_v18  ;;  %v24299_v43 = vpack.c.bf16 %v28996_v56, %v28980_v11  ;;  %v24111_v16 = vpack.c.bf16 %v29067_v55, %v29048_v35 }
0x1337   : > { %24278 = vmatpush3.bf16.msra.mxu0 %v29284_v57  ;;  %v24303_v24 = vpack.c.bf16 %v29076_v41, %v29062_v6  ;;  %v29364_v36 = vpack.c.bf16 %v29059_v0, %v29039_v44  ;;  %v29368_v10 = vpack.c.bf16 %v29071_v53, %v29054_v52  ;;  %v29372_v18 = vpack.c.bf16 %v29132_v25, %v29113_v4 }
0x1338   : > { %24280 = vmatprep.subr.bf16.mxu0 %v29308_v48  ;;  %v24291_v33 = vpack.c.bf16 %v14505_v60, %v14498_v50  ;;  %v29377_v57 = vpack.c.bf16 %v29144_v22, %v29127_v47  ;;  %v29381_v23 = vpack.c.bf16 %v29124_v15, %v29104_v31  ;;  %v29385_v46 = vpack.c.bf16 %v29136_v7, %v29119_v61 }
0x1339   : > { %24090 = vmatpush3.bf16.msra.mxu1 %v24087_v37  ;;  %v29389_v20 = vpack.c.bf16 %v29201_v38, %v29182_v49  ;;  %v29393_v50 = vpack.c.bf16 %v29214_v32, %v29196_v34  ;;  %v29397_v60 = vpack.c.bf16 %v29193_v14, %v29173_v28  ;;  %v29401_v5 = vpack.c.bf16 %v29205_v17, %v29188_v62 }
0x133a   : > { %30905 = vst [vmem:[#allocation43_spill] sm:$0xff] %v29381_v23  ;;  %30906 = vst [vmem:[#allocation44_spill] sm:$0xff] %v29385_v46  ;;  %24092 = vmatprep.subr.bf16.mxu1 %v29318_v3  ;;  %v30911_v37 = vand.u32 4294901760, %v28975_v59  ;;  %v30912_v21 = vand.u32 4294901760, %v28992_v40  ;;  %v30916_v23 = vand.u32 4294901760, %v28985_v39  ;;  %v30917_v17 = vand.u32 4294901760, %v28980_v11 }
0x133b   : > { %30907 = vst [vmem:[#allocation45_spill] sm:$0xff] %v29389_v20  ;;  %30908 = vst [vmem:[#allocation46_spill] sm:$0xff] %v29393_v50  ;;  %v30913_v20 = vand.u32 4294901760, %v28987_v19  ;;  %v30914_v50 = vand.u32 4294901760, %v29002_v45  ;;  %v30918_v59 = vand.u32 4294901760, %v28996_v56  ;;  %24282 = vmatpush3.bf16.msra.mxu0 %v29308_v48  ;;  %v30919_v19 = vand.u32 4294901760, %v29048_v35 }
0x133c   : > { %30909 = vst [vmem:[#allocation47_spill] sm:$0xff] %v29397_v60  ;;  %30910 = vst [vmem:[#allocation48_spill] sm:$0xff] %v29401_v5  ;;  %v29408_v51 = vpack.c.bf16 %v30912_v21, %v30911_v37  ;;  %v30915_v60 = vand.u32 4294901760, %v28967_v26  ;;  %v30920_v40 = vand.u32 4294901760, %v29067_v55  ;;  %v30921_v26 = vand.u32 4294901760, %v29062_v6  ;;  %24284 = vmatprep.subr.bf16.mxu0 %v24283_v63 }
0x133d   : > { %v29414_v46 = vpack.c.bf16 %v30914_v50, %v30913_v20  ;;  %v29426_v5 = vpack.c.bf16 %v30918_v59, %v30917_v17  ;;  %v30922_v39 = vand.u32 4294901760, %v29076_v41  ;;  %v30923_v11 = vand.u32 4294901760, %v29039_v44  ;;  %24094 = vmatpush3.bf16.msra.mxu1 %v29318_v3  ;;  %v30948_v3 = vld [vmem:[#allocation32_spill] sm:$0xff] }
0x133e   : > { %v29420_v62 = vpack.c.bf16 %v30916_v23, %v30915_v60  ;;  %v29433_v21 = vpack.c.bf16 %v30920_v40, %v30919_v19  ;;  %v30924_v56 = vand.u32 4294901760, %v29059_v0  ;;  %v30925_v48 = vand.u32 4294901760, %v29054_v52  ;;  %24096 = vmatprep.subr.bf16.mxu1 %v24095_v30 }
0x133f   : > { %v29439_v45 = vpack.c.bf16 %v30922_v39, %v30921_v26  ;;  %v30926_v35 = vand.u32 4294901760, %v29071_v53  ;;  %v30927_v55 = vand.u32 4294901760, %v29113_v4  ;;  %v30928_v6 = vand.u32 4294901760, %v29132_v25  ;;  %24286 = vmatpush3.bf16.msra.mxu0 %v24283_v63  ;;  %v30953_v63 = vld [vmem:[#allocation11_spill] sm:$0xff]  ;;  %v30966_v26 = vld [vmem:[#allocation33_spill] sm:$0xff] }
0x1340   : > { %v29445_v23 = vpack.c.bf16 %v30924_v56, %v30923_v11  ;;  %v30929_v50 = vand.u32 4294901760, %v29127_v47  ;;  %v30930_v44 = vand.u32 4294901760, %v29144_v22  ;;  %v30931_v60 = vand.u32 4294901760, %v29104_v31  ;;  %24288 = vmatprep.subr.bf16.mxu0 %v24287_v9  ;;  %v30967_v39 = vld [vmem:[#allocation29_spill] sm:$0xff]  ;;  %v30968_v11 = vld [vmem:[#allocation30_spill] sm:$0xff]  ;;  %v30969_v56 = vld [vmem:[#allocation3_spill] sm:$0xff] }
0x1341   : > { %v29451_v20 = vpack.c.bf16 %v30926_v35, %v30925_v48  ;;  %v29457_v41 = vpack.c.bf16 %v30928_v6, %v30927_v55  ;;  %v30932_v52 = vand.u32 4294901760, %v29124_v15  ;;  %v30933_v37 = vand.u32 4294901760, %v29119_v61  ;;  %24098 = vmatpush3.bf16.msra.mxu1 %v24095_v30  ;;  %v30949_v30 = vld [vmem:[#allocation35_spill] sm:$0xff]  ;;  %v30970_v48 = vld [vmem:[#allocation42_spill] sm:$0xff] }
0x1342   : > { %v29463_v0 = vpack.c.bf16 %v30930_v44, %v30929_v50  ;;  %v30934_v4 = vand.u32 4294901760, %v29136_v7  ;;  %v30935_v25 = vand.u32 4294901760, %v29182_v49  ;;  %v30936_v47 = vand.u32 4294901760, %v29201_v38  ;;  %24100 = vmatprep.subr.bf16.mxu1 %v24099_v8  ;;  %v30941_v38 = vld [vmem:[#allocation43_spill] sm:$0xff]  ;;  %v30944_v49 = vld [vmem:[#allocation46_spill] sm:$0xff] }
0x1343   : > { %v29469_v53 = vpack.c.bf16 %v30932_v52, %v30931_v60  ;;  %v30937_v31 = vand.u32 4294901760, %v29196_v34  ;;  %v30938_v15 = vand.u32 4294901760, %v29214_v32  ;;  %v30939_v61 = vand.u32 4294901760, %v29173_v28  ;;  %24290 = vmatpush3.bf16.msra.mxu0 %v24287_v9  ;;  %v30945_v34 = vld [vmem:[#allocation47_spill] sm:$0xff]  ;;  %v30946_v28 = vld [vmem:[#allocation48_spill] sm:$0xff]  ;;  %v30951_v9 = vld [vmem:[#allocation25_spill] sm:$0xff] }
0x1344   : > { %v29475_v17 = vpack.c.bf16 %v30934_v4, %v30933_v37  ;;  %v29482_v22 = vpack.c.bf16 %v30936_v47, %v30935_v25  ;;  %v30940_v7 = vand.u32 4294901760, %v29193_v14  ;;  %v29496_v40 = vpack.c.bf16 %v14503_v12, %v14496_v1  ;;  %24292 = vmatprep.subr.bf16.mxu0 %v24291_v33  ;;  %v30943_v14 = vld [vmem:[#allocation45_spill] sm:$0xff]  ;;  %v30947_v32 = vld [vmem:[#allocation15_spill] sm:$0xff]  ;;  %v30952_v1 = vld [vmem:[#allocation12_spill] sm:$0xff] }
0x1345   : > { %v29488_v59 = vpack.c.bf16 %v30938_v15, %v30937_v31  ;;  %24102 = vmatpush3.bf16.msra.mxu1 %v24099_v8  ;;  %v30954_v12 = vld [vmem:[#allocation27_spill] sm:$0xff]  ;;  %v30957_v8 = vld [vmem:[#allocation10_spill] sm:$0xff]  ;;  %v13474_v31 = vld [vmem:[%s30288_s21 + $0x10] sm:$0xff] }
0x1346   : > { %v29494_v19 = vpack.c.bf16 %v30940_v7, %v30939_v61  ;;  %24104 = vmatprep.subr.bf16.mxu1 %v24103_v42  ;;  %v13472_v44 = vld [vmem:[%s30288_s21] sm:$0xff]  ;;  %v13475_v15 = vld [vmem:[%s30288_s21 + $0x18] sm:$0xff] }
0x1347   : > { %24294 = vmatpush3.bf16.msra.mxu0 %v24291_v33  ;;  %v30964_v33 = vld [vmem:[#allocation20_spill] sm:$0xff] }
0x1348   : > { %24296 = vmatprep.subr.bf16.mxu0 %v24295_v29  ;;  %22550 = vmatmul.mubr.f32.vlgmr.msra.gmra.mrb[36].mxu1 %v28918_v54 }
0x1349   : > { %24106 = vmatpush3.bf16.msra.mxu1 %v24103_v42  ;;  %22552 = vmatprep.mubr.f32.mxu1 %v28920_v58  ;;  %v30950_v42 = vld [vmem:[#allocation14_spill] sm:$0xff] }
0x134a   : > { %24108 = vmatprep.subr.bf16.mxu1 %v24107_v13  ;;  %22778 = vmatmul.mubr.f32.vlgmr.msra.gmra.mrb[116].mxu0 %v28918_v54 }
0x134b   : > { %24298 = vmatpush3.bf16.msra.mxu0 %v24295_v29  ;;  %22780 = vmatprep.mubr.f32.mxu0 %v28920_v58  ;;  %v30955_v29 = vld [vmem:[#allocation13_spill] sm:$0xff] }
0x134c   : > { %24300 = vmatprep.subr.bf16.mxu0 %v24299_v43  ;;  %22553 = vmatmul.mubr.f32.gmra.mrb[38].mxu1 %v28922_v27 }
0x134d   : > { %24110 = vmatpush3.bf16.msra.mxu1 %v24107_v13  ;;  %22587 = vmatprep.mubr.f32.mxu1 %v28902_v2  ;;  %v30956_v13 = vld [vmem:[#allocation41_spill] sm:$0xff] }
0x134e   : > { %24112 = vmatprep.subr.bf16.mxu1 %v24111_v16  ;;  %22781 = vmatmul.mubr.f32.gmra.mrb[118].mxu0 %v28922_v27 }
0x134f   : > { %24302 = vmatpush3.bf16.msra.mxu0 %v24299_v43  ;;  %22815 = vmatprep.mubr.f32.mxu0 %v28902_v2  ;;  %v30942_v2 = vld [vmem:[#allocation44_spill] sm:$0xff] }
0x1350   : > { %24304 = vmatprep.subr.bf16.mxu0 %v24303_v24  ;;  %v30958_v43 = vld [vmem:[#allocation40_spill] sm:$0xff] }
0x1351   : > { %24114 = vmatpush3.bf16.msra.mxu1 %v24111_v16  ;;  %v30959_v16 = vld [vmem:[#allocation37_spill] sm:$0xff] }
0x1352   : > { %24116 = vmatprep.subr.bf16.mxu1 %v29364_v36 }
0x1353   : > { %24306 = vmatpush3.bf16.msra.mxu0 %v24303_v24  ;;  %v30960_v24 = vld [vmem:[#allocation38_spill] sm:$0xff] }
0x1354   : > { %24308 = vmatprep.subr.bf16.mxu0 %v29368_v10 }
0x1355   : > { %24118 = vmatpush3.bf16.msra.mxu1 %v29364_v36  ;;  %v30961_v36 = vld [vmem:[#allocation36_spill] sm:$0xff] }
0x1356   : > { %24120 = vmatprep.subr.bf16.mxu1 %v29372_v18 }
0x1357   : > { %24310 = vmatpush3.bf16.msra.mxu0 %v29368_v10  ;;  %v30962_v10 = vld [vmem:[#allocation5_spill] sm:$0xff] }
0x1358   : > { %24312 = vmatprep.subr.bf16.mxu0 %v29377_v57 }
0x1359   : > { %24122 = vmatpush3.bf16.msra.mxu1 %v29372_v18  ;;  %v30963_v18 = vld [vmem:[#allocation23_spill] sm:$0xff] }
0x135a   : > { %24124 = vmatprep.subr.bf16.mxu1 %v30941_v38 }
0x135b   : > { %24314 = vmatpush3.bf16.msra.mxu0 %v29377_v57  ;;  %v30965_v57 = vld [vmem:[#allocation24_spill] sm:$0xff] }
0x135c   : > { %24316 = vmatprep.subr.bf16.mxu0 %v30942_v2 }
0x135d   : > { %24126 = vmatpush3.bf16.msra.mxu1 %v30941_v38 }
0x135e   : > { %24128 = vmatprep.subr.bf16.mxu1 %v30943_v14 }
0x135f   : > { %24318 = vmatpush3.bf16.msra.mxu0 %v30942_v2 }
0x1360   : > { %24320 = vmatprep.subr.bf16.mxu0 %v30944_v49 }
0x1361   : > { %24130 = vmatpush3.bf16.msra.mxu1 %v30943_v14 }
0x1362   : > { %24132 = vmatprep.subr.bf16.mxu1 %v30945_v34 }
0x1363   : > { %24322 = vmatpush3.bf16.msra.mxu0 %v30944_v49  ;;  %v15115_v49 = vsel %vm2232_vm5, %v13475_v15, 0 }
0x1364   : > { %24324 = vmatprep.subr.bf16.mxu0 %v30946_v28 }
0x1365   : > { %24134 = vmatpush3.bf16.msra.mxu1 %v30945_v34 }
0x1366   : > { %24136 = vmatprep.subr.bf16.mxu1 %v30947_v32 }
0x1367   : > { %24326 = vmatpush3.bf16.msra.mxu0 %v30946_v28 }
0x1368   : > { %24328 = vmatprep.subr.bf16.mxu0 %v30948_v3  ;;  %22588 = vmatmul.mubr.f32.vlgmr.msra.gmra.mrb[36].mxu1 %v30949_v30 }
0x1369   : > { %24138 = vmatpush3.bf16.msra.mxu1 %v30947_v32  ;;  %22590 = vmatprep.mubr.f32.mxu1 %v30950_v42 }
0x136a   : > { %24140 = vmatprep.subr.bf16.mxu1 %v30951_v9  ;;  %22816 = vmatmul.mubr.f32.vlgmr.msra.gmra.mrb[116].mxu0 %v30949_v30 }
0x136b   : > { %24330 = vmatpush3.bf16.msra.mxu0 %v30948_v3  ;;  %22818 = vmatprep.mubr.f32.mxu0 %v30950_v42 }
0x136c   : > { %24332 = vmatprep.subr.bf16.mxu0 %v30952_v1  ;;  %22591 = vmatmul.mubr.f32.gmra.mrb[38].mxu1 %v30953_v63 }
0x136d   : > { %24142 = vmatpush3.bf16.msra.mxu1 %v30951_v9  ;;  %22625 = vmatprep.mubr.f32.mxu1 %v30954_v12 }
0x136e   : > { %24144 = vmatprep.subr.bf16.mxu1 %v30955_v29  ;;  %22819 = vmatmul.mubr.f32.gmra.mrb[118].mxu0 %v30953_v63 }
0x136f   : > { %24334 = vmatpush3.bf16.msra.mxu0 %v30952_v1  ;;  %22853 = vmatprep.mubr.f32.mxu0 %v30954_v12 }
0x1370   : > { %24336 = vmatprep.subr.bf16.mxu0 %v30956_v13 }
0x1371   : > { %24146 = vmatpush3.bf16.msra.mxu1 %v30955_v29 }
0x1372   : > { %24148 = vmatprep.subr.bf16.mxu1 %v30957_v8 }
0x1373   : > { %24338 = vmatpush3.bf16.msra.mxu0 %v30956_v13 }
0x1374   : > { %24340 = vmatprep.subr.bf16.mxu0 %v30958_v43 }
0x1375   : > { %24150 = vmatpush3.bf16.msra.mxu1 %v30957_v8 }
0x1376   : > { %24152 = vmatprep.subr.bf16.mxu1 %v30959_v16 }
0x1377   : > { %24342 = vmatpush3.bf16.msra.mxu0 %v30958_v43 }
0x1378   : > { %24344 = vmatprep.subr.bf16.mxu0 %v30960_v24 }
0x1379   : > { %24154 = vmatpush3.bf16.msra.mxu1 %v30959_v16 }
0x137a   : > { %24156 = vmatprep.subr.bf16.mxu1 %v30961_v36 }
0x137b   : > { %24346 = vmatpush3.bf16.msra.mxu0 %v30960_v24 }
0x137c   : > { %24348 = vmatprep.subr.bf16.mxu0 %v30962_v10 }
0x137d   : > { %24158 = vmatpush3.bf16.msra.mxu1 %v30961_v36 }
0x137e   : > { %24160 = vmatprep.subr.bf16.mxu1 %v30963_v18 }
0x137f   : > { %24350 = vmatpush3.bf16.msra.mxu0 %v30962_v10 }
0x1380   : > { %24352 = vmatprep.subr.bf16.mxu0 %v30964_v33 }
0x1381   : > { %24162 = vmatpush3.bf16.msra.mxu1 %v30963_v18 }
0x1382   : > { %24164 = vmatprep.subr.bf16.mxu1 %v30965_v57 }
0x1383   : > { %24354 = vmatpush3.bf16.msra.mxu0 %v30964_v33 }
0x1384   : > { %24356 = vmatprep.subr.bf16.mxu0 %v30966_v26 }
0x1385   : > { %24166 = vmatpush3.bf16.msra.mxu1 %v30965_v57 }
0x1386   : > { %24168 = vmatprep.subr.bf16.mxu1 %v29408_v51 }
0x1387   : > { %24358 = vmatpush3.bf16.msra.mxu0 %v30966_v26 }
0x1388   : > { %24360 = vmatprep.subr.bf16.mxu0 %v29414_v46  ;;  %22626 = vmatmul.mubr.f32.vlgmr.msra.gmra.mrb[36].mxu1 %v30967_v39 }
0x1389   : > { %24170 = vmatpush3.bf16.msra.mxu1 %v29408_v51  ;;  %22628 = vmatprep.mubr.f32.mxu1 %v30968_v11 }
0x138a   : > { %24172 = vmatprep.subr.bf16.mxu1 %v29420_v62  ;;  %22854 = vmatmul.mubr.f32.vlgmr.msra.gmra.mrb[116].mxu0 %v30967_v39 }
0x138b   : > { %24362 = vmatpush3.bf16.msra.mxu0 %v29414_v46  ;;  %22856 = vmatprep.mubr.f32.mxu0 %v30968_v11 }
0x138c   : > { %24364 = vmatprep.subr.bf16.mxu0 %v29426_v5  ;;  %22629 = vmatmul.mubr.f32.gmra.mrb[38].mxu1 %v30969_v56 }
0x138d   : > { %24174 = vmatpush3.bf16.msra.mxu1 %v29420_v62  ;;  %22663 = vmatprep.mubr.f32.mxu1 %v30970_v48 }
0x138e   : > { %24176 = vmatprep.subr.bf16.mxu1 %v29433_v21  ;;  %22857 = vmatmul.mubr.f32.gmra.mrb[118].mxu0 %v30969_v56 }
0x138f   : > { %24366 = vmatpush3.bf16.msra.mxu0 %v29426_v5  ;;  %22891 = vmatprep.mubr.f32.mxu0 %v30970_v48 }
0x1390   : > { %24368 = vmatprep.subr.bf16.mxu0 %v29439_v45 }
0x1391   : > { %24178 = vmatpush3.bf16.msra.mxu1 %v29433_v21 }
0x1392   : > { %24180 = vmatprep.subr.bf16.mxu1 %v29445_v23 }
0x1393   : > { %24370 = vmatpush3.bf16.msra.mxu0 %v29439_v45 }
0x1394   : > { %24372 = vmatprep.subr.bf16.mxu0 %v29451_v20 }
0x1395   : > { %24182 = vmatpush3.bf16.msra.mxu1 %v29445_v23 }
0x1396   : > { %24184 = vmatprep.subr.bf16.mxu1 %v29457_v41 }
0x1397   : > { %24374 = vmatpush3.bf16.msra.mxu0 %v29451_v20 }
0x1398   : > { %24376 = vmatprep.subr.bf16.mxu0 %v29463_v0 }
0x1399   : > { %24186 = vmatpush3.bf16.msra.mxu1 %v29457_v41 }
0x139a   : > { %24188 = vmatprep.subr.bf16.mxu1 %v29469_v53 }
0x139b   : > { %24378 = vmatpush3.bf16.msra.mxu0 %v29463_v0  ;;  %v15106_v0 = vsel %vm2232_vm5, %v13472_v44, 0 }
0x139c   : > { %24380 = vmatprep.subr.bf16.mxu0 %v29475_v17  ;;  %v29664_v60 = vand.u32 4294901760, %v15106_v0 }
0x139d   : > { %24190 = vmatpush3.bf16.msra.mxu1 %v29469_v53 }
0x139e   : > { %24192 = vmatprep.subr.bf16.mxu1 %v29482_v22  ;;  %v29667_v52 = vsub.f32 %v15106_v0, %v29664_v60  ;;  %v13480_v0 = vld [vmem:[%s30288_s21 + $0x40] sm:$0xff] }
0x139f   : > { %24382 = vmatpush3.bf16.msra.mxu0 %v29475_v17 }
0x13a0   : > { %24384 = vmatprep.subr.bf16.mxu0 %v29488_v59  ;;  %v29670_v53 = vand.u32 4294901760, %v29667_v52 }
0x13a1   : > { %24194 = vmatpush3.bf16.msra.mxu1 %v29482_v22  ;;  %v13473_v22 = vld [vmem:[%s30288_s21 + $0x8] sm:$0xff] }
0x13a2   : > { %24196 = vmatprep.subr.bf16.mxu1 %v29494_v19  ;;  %30971 = vst [vmem:[#allocation43_spill] sm:$0xff] %v29670_v53  ;;  %v15225_v37 = vsub.f32 %v29667_v52, %v29670_v53 }
0x13a3   : > { %24386 = vmatpush3.bf16.msra.mxu0 %v29488_v59 }
0x13a4   : > { %24388 = vmatprep.subr.bf16.mxu0 %v29496_v40  ;;  %v15226_v4 = vand.u32 4294901760, %v15225_v37 }
0x13a5   : > { %24198 = vmatpush3.bf16.msra.mxu1 %v29494_v19  ;;  %v15109_v19 = vsel %vm2232_vm5, %v13473_v22, 0 }
0x13a6   : > { %24200 = vmatprep.subr.bf16.mxu1 %v30947_v32  ;;  %v29696_v30 = vand.u32 4294901760, %v15109_v19 }
0x13a7   : > { %24390 = vmatpush3.bf16.msra.mxu0 %v29496_v40  ;;  %v15112_v40 = vsel %vm2232_vm5, %v13474_v31, 0 }
0x13a8   : > { %24392 = vmatprep.subr.bf16.mxu0 %v30948_v3  ;;  %22664 = vmatmul.mubr.f32.vlgmr.msra.gmra.mrb[36].mxu1 %v28918_v54  ;;  %v29698_v42 = vand.u32 4294901760, %v15112_v40 }
0x13a9   : > { %24202 = vmatpush3.bf16.msra.mxu1 %v30947_v32  ;;  %22666 = vmatprep.mubr.f32.mxu1 %v28920_v58 }
0x13aa   : > { %24204 = vmatprep.subr.bf16.mxu1 %v30951_v9  ;;  %22892 = vmatmul.mubr.f32.vlgmr.msra.gmra.mrb[116].mxu0 %v28918_v54 }
0x13ab   : > { %24394 = vmatpush3.bf16.msra.mxu0 %v30948_v3  ;;  %22894 = vmatprep.mubr.f32.mxu0 %v28920_v58 }
0x13ac   : > { %24396 = vmatprep.subr.bf16.mxu0 %v30952_v1  ;;  %22667 = vmatmul.mubr.f32.gmra.mrb[38].mxu1 %v28922_v27 }
0x13ad   : > { %24206 = vmatpush3.bf16.msra.mxu1 %v30951_v9  ;;  %22701 = vmatprep.mubr.f32.mxu1 %v30970_v48  ;;  %v29700_v9 = vand.u32 4294901760, %v15115_v49 }
0x13ae   : > { %24208 = vmatprep.subr.bf16.mxu1 %v30955_v29  ;;  %22895 = vmatmul.mubr.f32.gmra.mrb[118].mxu0 %v28922_v27 }
0x13af   : > { %24398 = vmatpush3.bf16.msra.mxu0 %v30952_v1  ;;  %22929 = vmatprep.mubr.f32.mxu0 %v30970_v48 }
0x13b0   : > { %24400 = vmatprep.subr.bf16.mxu0 %v30956_v13 }
0x13b1   : > { %24210 = vmatpush3.bf16.msra.mxu1 %v30955_v29 }
0x13b2   : > { %24212 = vmatprep.subr.bf16.mxu1 %v30957_v8 }
0x13b3   : > { %24402 = vmatpush3.bf16.msra.mxu0 %v30956_v13  ;;  %v13476_v13 = vld [vmem:[%s30288_s21 + $0x20] sm:$0xff] }
0x13b4   : > { %24404 = vmatprep.subr.bf16.mxu0 %v30958_v43 }
0x13b5   : > { %24214 = vmatpush3.bf16.msra.mxu1 %v30957_v8  ;;  %v13477_v8 = vld [vmem:[%s30288_s21 + $0x28] sm:$0xff] }
0x13b6   : > { %24216 = vmatprep.subr.bf16.mxu1 %v30959_v16  ;;  %v15121_v11 = vsel %vm2232_vm5, %v13477_v8, 0 }
0x13b7   : > { %24406 = vmatpush3.bf16.msra.mxu0 %v30958_v43 }
0x13b8   : > { %24408 = vmatprep.subr.bf16.mxu0 %v30960_v24 }
0x13b9   : > { %24218 = vmatpush3.bf16.msra.mxu1 %v30959_v16 }
0x13ba   : > { %24220 = vmatprep.subr.bf16.mxu1 %v30961_v36 }
0x13bb   : > { %24410 = vmatpush3.bf16.msra.mxu0 %v30960_v24 }
0x13bc   : > { %24412 = vmatprep.subr.bf16.mxu0 %v30962_v10 }
0x13bd   : > { %24222 = vmatpush3.bf16.msra.mxu1 %v30961_v36  ;;  %v29711_v36 = vsub.f32 %v15109_v19, %v29696_v30 }
0x13be   : > { %24224 = vmatprep.subr.bf16.mxu1 %v30963_v18 }
0x13bf   : > { %24414 = vmatpush3.bf16.msra.mxu0 %v30962_v10  ;;  %v29714_v10 = vsub.f32 %v15112_v40, %v29698_v42  ;;  %v15130_v40 = vsel %vm2232_vm5, %v13480_v0, 0 }
0x13c0   : > { %24416 = vmatprep.subr.bf16.mxu0 %v30964_v33 }
0x13c1   : > { %24226 = vmatpush3.bf16.msra.mxu1 %v30963_v18  ;;  %v29717_v18 = vsub.f32 %v15115_v49, %v29700_v9 }
0x13c2   : > { %24228 = vmatprep.subr.bf16.mxu1 %v30965_v57 }
0x13c3   : > { %24418 = vmatpush3.bf16.msra.mxu0 %v30964_v33  ;;  %v15118_v33 = vsel %vm2232_vm5, %v13476_v13, 0 }
0x13c4   : > { %24420 = vmatprep.subr.bf16.mxu0 %v30966_v26  ;;  %v29723_v56 = vand.u32 4294901760, %v15118_v33 }
0x13c5   : > { %24230 = vmatpush3.bf16.msra.mxu1 %v30965_v57 }
0x13c7   : > { %24422 = vmatpush3.bf16.msra.mxu0 %v30966_v26 }
0x13c8   : > { %22702 = vmatmul.mubr.f32.vlgmr.msra.gmra.mrb[36].mxu1 %v28918_v54 }
0x13c9   : > { %22704 = vmatprep.mubr.f32.mxu1 %v28920_v58 }
0x13ca   : > { %22930 = vmatmul.mubr.f32.vlgmr.msra.gmra.mrb[116].mxu0 %v28918_v54 }
0x13cb   : > { %22932 = vmatprep.mubr.f32.mxu0 %v28920_v58 }
0x13cc   : > { %22705 = vmatmul.mubr.f32.gmra.mrb[38].mxu1 %v28922_v27 }
0x13cd   : > { %22943 = vmatprep.mubr.f32.mxu1 %v15226_v4 }
0x13ce   : > { %22933 = vmatmul.mubr.f32.gmra.mrb[118].mxu0 %v28922_v27 }
0x13cf   : > { %23135 = vmatprep.mubr.f32.mxu0 %v15226_v4 }
0x149b   : > { %v22703_v5 = vpop.f32.mrb[36].mxu1 }
0x149c   : > { %v14236_v51 = vpop.f32.mrb[37].mxu1  ;;  %v15048_v46 = vsel %vm15044_vm4, %v22703_v5, 0.0  ;;  %v29726_v5 = vand.u32 4294901760, %v29711_v36 }
0x149d   : > { %v22931_v62 = vpop.f32.mrb[116].mxu0  ;;  %15049 = vadd.xlane.f32.xlu1 %v15048_v46  ;;  %v15045_v21 = vsel %vm15044_vm4, %v14236_v51, 0.0  ;;  %v29728_v51 = vand.u32 4294901760, %v15121_v11 }
0x149e   : > { %v15022_v45 = vpop.f32.mrb[117].mxu0  ;;  %15046 = vadd.xlane.f32.xlu0 %v15045_v21  ;;  %v15064_v58 = vsel %vm15044_vm4, %v22931_v62, 0.0  ;;  %30972 = vst [vmem:[#allocation44_spill] sm:$0xff] %v29726_v5  ;;  %v29733_v21 = vand.u32 4294901760, %v29714_v10 }
0x149f   : > { %v22706_v23 = vpop.f32.mrb[38].mxu1  ;;  %v15061_v27 = vsel %vm15044_vm4, %v15022_v45, 0.0  ;;  %v29736_v45 = vand.u32 4294901760, %v29717_v18 }
0x14a0   : > { %v14248_v35 = vpop.f32.mrb[39].mxu1  ;;  %v15054_v41 = vsel %vm15044_vm4, %v22706_v23, 0.0  ;;  %30973 = vst [vmem:[#allocation45_spill] sm:$0xff] %v29733_v21  ;;  %v13461_v23 = vld [vmem:[%s30285_s18 + $0x8] sm:$0xff] }
0x14a1   : > { %v22934_v54 = vpop.f32.mrb[118].mxu0  ;;  %v15051_v20 = vsel %vm15044_vm4, %v14248_v35, 0.0  ;;  %30974 = vst [vmem:[#allocation46_spill] sm:$0xff] %v29736_v45  ;;  %v15255_v44 = vsub.f32 %v29717_v18, %v29736_v45  ;;  %v13485_v45 = vld [vmem:[%s30288_s21 + $0x68] sm:$0xff] }
0x14a2   : > { %v15034_v55 = vpop.f32.mrb[119].mxu0  ;;  %15065 = vadd.xlane.f32.xlu0 %v15064_v58  ;;  %15052 = vadd.xlane.f32.xlu1 %v15051_v20  ;;  %v15070_v50 = vsel %vm15044_vm4, %v22934_v54, 0.0  ;;  %v29742_v54 = vsub.f32 %v15118_v33, %v29723_v56  ;;  %v13478_v58 = vld [vmem:[%s30288_s21 + $0x30] sm:$0xff]  ;;  %v29748_v20 = vsub.f32 %v15121_v11, %v29728_v51 }
0x14a3   : > { %v15067_v6 = vsel %vm15044_vm4, %v15034_v55, 0.0  ;;  %v13479_v55 = vld [vmem:[%s30288_s21 + $0x38] sm:$0xff]  ;;  %v15124_v4 = vsel %vm2232_vm5, %v13478_v58, 0 }
0x14a4   : > { %v29770_v22 = vand.u32 4294901760, %v29742_v54  ;;  %v15127_v31 = vsel %vm2232_vm5, %v13479_v55, 0  ;;  %v29778_v19 = vand.u32 4294901760, %v29748_v20 }
0x14a6   : > { %15062 = vadd.xlane.f32.xlu0 %v15061_v27  ;;  %15068 = vadd.xlane.f32.xlu1 %v15067_v6  ;;  %30975 = vst [vmem:[#allocation47_spill] sm:$0xff] %v29770_v22  ;;  %30976 = vst [vmem:[#allocation48_spill] sm:$0xff] %v29778_v19  ;;  %v15265_v8 = vsub.f32 %v29742_v54, %v29770_v22  ;;  %v15275_v11 = vsub.f32 %v29748_v20, %v29778_v19 }
0x14aa   : > { %15055 = vadd.xlane.f32.xlu0 %v15054_v41  ;;  %v15235_v41 = vsub.f32 %v29711_v36, %v29726_v5 }
0x14ac   : > { %v29784_v49 = vand.u32 4294901760, %v15235_v41 }
0x14ae   : > { %15071 = vadd.xlane.f32.xlu0 %v15070_v50  ;;  %v15245_v50 = vsub.f32 %v29714_v10, %v29733_v21 }
0x152a   : > { %v15050_v17 = vpop.xlane.xlu1 %15049 }
0x152b   : > { %v15047_v25 = vpop.xlane.xlu0 %15046  ;;  %v29674_v47 = vmul.f32 0.0625, %v15050_v17  ;;  %v13465_v17 = vld [vmem:[%s30286_s19 + $0x8] sm:$0xff] }
0x152c   : > { %v29685_v59 = vmul.f32 0.0625, %v15047_v25  ;;  %v13460_v25 = vld [vmem:[%s30285_s18] sm:$0xff] }
0x152d   : > { %v15078_v38 = vmul.f32 %v29674_v47, %v29674_v47 }
0x152e   : > { %v15077_v28 = vmul.f32 %v29685_v59, %v29685_v59 }
0x152f   : > { %v15066_v61 = vpop.xlane.xlu0 %15065  ;;  %v15053_v7 = vpop.xlane.xlu1 %15052 }
0x1530   : > { %v15074_v2 = vmul.f32 0.0625, %v15066_v61  ;;  %v29691_v14 = vmul.f32 0.0625, %v15053_v7  ;;  %v13462_v7 = vld [vmem:[%s30285_s18 + $0x10] sm:$0xff] }
0x1532   : > { %v15082_v34 = vsub.f32 %v15074_v2, %v15078_v38  ;;  %v15079_v63 = vmul.f32 %v29691_v14, %v29691_v14  ;;  %v13481_v38 = vld [vmem:[%s30288_s21 + $0x48] sm:$0xff] }
0x1533   : > { %v15063_v32 = vpop.xlane.xlu0 %15062  ;;  %v15069_v3 = vpop.xlane.xlu1 %15068 }
0x1534   : > { %v15086_v1 = vadd.f32 1e-05, %v15082_v34  ;;  %v15073_v12 = vmul.f32 0.0625, %v15063_v32  ;;  %v15075_v29 = vmul.f32 0.0625, %v15069_v3  ;;  %v29786_v34 = vand.u32 4294901760, %v15245_v50 }
0x1536   : > { %25459 = vrsqrt.f32 %v15086_v1  ;;  %v15081_v43 = vsub.f32 %v15073_v12, %v15077_v28  ;;  %v15083_v16 = vsub.f32 %v15075_v29, %v15079_v63  ;;  %v29790_v28 = vand.u32 4294901760, %v15124_v4  ;;  %v13464_v29 = vld [vmem:[%s30286_s19] sm:$0xff] }
0x1537   : > { %v15056_v24 = vpop.xlane.xlu0 %15055  ;;  %v29794_v12 = vand.u32 4294901760, %v15127_v31 }
0x1538   : > { %v15085_v57 = vadd.f32 1e-05, %v15081_v43  ;;  %v15087_v26 = vadd.f32 1e-05, %v15083_v16  ;;  %v29720_v39 = vmul.f32 0.0625, %v15056_v24  ;;  %v29801_v43 = vand.u32 4294901760, %v15130_v40 }
0x1539   : > { %v29804_v16 = vsel %vm2232_vm5, %v13481_v38, 0 }
0x153a   : > { %25461 = vrsqrt.f32 %v15085_v57  ;;  %v15080_v46 = vmul.f32 %v29720_v39, %v29720_v39  ;;  %v13466_v57 = vld [vmem:[%s30286_s19 + $0x10] sm:$0xff]  ;;  %v29833_v50 = vsub.f32 %v15130_v40, %v29801_v43 }
0x153b   : > { %25463 = vrsqrt.f32 %v15087_v26  ;;  %v15072_v48 = vpop.xlane.xlu0 %15071 }
0x153c   : > { %v15076_v62 = vmul.f32 0.0625, %v15072_v48  ;;  %30978 = vst [vmem:[#allocation32_spill] sm:$0xff] %v29833_v50 }
0x153e   : > { %v15084_v35 = vsub.f32 %v15076_v62, %v15080_v46 }
0x1540   : > { %v25460_v27 = vpop.eup %25459  ;;  %v15088_v6 = vadd.f32 1e-05, %v15084_v35 }
0x1541   : > { %v15094_v37 = vmul.f32 %v25460_v27, %v13461_v23  ;;  %v29815_v23 = vsub.f32 %v15124_v4, %v29790_v28  ;;  %v29825_v27 = vsub.f32 %v15127_v31, %v29794_v12  ;;  %v29840_v4 = vand.u32 4294901760, %v15265_v8 }
0x1542   : > { %25465 = vrsqrt.f32 %v15088_v6 }
0x1543   : > { %v15098_v15 = vmul.f32 %v15094_v37, %v29674_v47  ;;  %v15157_v61 = vand.u32 4294901760, %v15094_v37  ;;  %v29788_v47 = vand.u32 4294901760, %v15255_v44  ;;  %30977 = vst [vmem:[#allocation15_spill] sm:$0xff] %v29825_v27  ;;  %v29836_v44 = vand.u32 4294901760, %v29804_v16 }
0x1544   : > { %v25462_v2 = vpop.eup %25461  ;;  %v29861_v8 = vand.u32 4294901760, %v29815_v23 }
0x1545   : > { %v25464_v32 = vpop.eup %25463  ;;  %v15102_v3 = vsub.f32 %v13465_v17, %v15098_v15  ;;  %v15093_v1 = vmul.f32 %v25462_v2, %v13460_v25  ;;  %v29792_v63 = vsub.f32 %v15094_v37, %v15157_v61 }
0x1546   : > { %v15095_v13 = vmul.f32 %v25464_v32, %v13462_v7  ;;  %30979 = vst [vmem:[#allocation35_spill] sm:$0xff] %v29861_v8 }
0x1547   : > { %v15097_v24 = vmul.f32 %v15093_v1, %v29685_v59  ;;  %v15154_v33 = vand.u32 4294901760, %v15093_v1  ;;  %v16287_v26 = vand.u32 4294901760, %v15102_v3  ;;  %v15392_v62 = vand.u32 4294901760, %v29792_v63  ;;  %v13482_v59 = vld [vmem:[%s30288_s21 + $0x50] sm:$0xff] }
0x1548   : > { %v15099_v48 = vmul.f32 %v15095_v13, %v29691_v14  ;;  %v15160_v46 = vand.u32 4294901760, %v15095_v13  ;;  %v13463_v14 = vld [vmem:[%s30285_s18 + $0x18] sm:$0xff]  ;;  %v15136_v17 = vsel %vm2232_vm5, %v13482_v59, 0 }
0x1549   : > { %v15101_v35 = vsub.f32 %v13464_v29, %v15097_v24  ;;  %v29820_v58 = vpack.c.bf16 %v15157_v61, %v15154_v33  ;;  %v29822_v55 = vsub.f32 %v15093_v1, %v15154_v33  ;;  %v29830_v41 = vsub.f32 %v15102_v3, %v16287_v26  ;;  %v13467_v3 = vld [vmem:[%s30286_s19 + $0x18] sm:$0xff] }
0x154a   : > { %v15103_v6 = vsub.f32 %v13466_v57, %v15099_v48  ;;  %v15393_v31 = vsub.f32 %v29792_v63, %v15392_v62  ;;  %v29846_v7 = vsub.f32 %v15095_v13, %v15160_v46  ;;  %v29856_v1 = vand.u32 4294901760, %v15275_v11  ;;  %v13483_v11 = vld [vmem:[%s30288_s21 + $0x58] sm:$0xff] }
0x154b   : > { %24424 = vmatprep.subr.bf16.mxu1 %v29820_v58  ;;  %v16284_v0 = vand.u32 4294901760, %v15101_v35  ;;  %v15385_v37 = vand.u32 4294901760, %v29822_v55  ;;  %v16522_v61 = vand.u32 4294901760, %v29830_v41 }
0x154c   : > { %v25466_v25 = vpop.eup %25465  ;;  %24426 = vmatpush3.bf16.msra.mxu1 %v29820_v58  ;;  %v16290_v15 = vand.u32 4294901760, %v15103_v6  ;;  %v15394_v48 = vand.u32 4294901760, %v15393_v31  ;;  %v15399_v59 = vand.u32 4294901760, %v29846_v7  ;;  %v15139_v31 = vsel %vm2232_vm5, %v13483_v11, 0 }
0x154d   : > { %v15096_v40 = vmul.f32 %v25466_v25, %v13463_v14  ;;  %v29848_v38 = vpack.c.bf16 %v16287_v26, %v16284_v0  ;;  %v15386_v2 = vsub.f32 %v29822_v55, %v15385_v37  ;;  %v29851_v32 = vsub.f32 %v15101_v35, %v16284_v0 }
0x154e   : > { %v29858_v29 = vsub.f32 %v15103_v6, %v16290_v15  ;;  %v29863_v13 = vpack.c.bf16 %v15392_v62, %v15385_v37  ;;  %v29874_v62 = vand.u32 4294901760, %v29825_v27  ;;  %v16523_v0 = vsub.f32 %v29830_v41, %v16522_v61 }
0x154f   : > { %v15100_v24 = vmul.f32 %v15096_v40, %v29720_v39  ;;  %v15163_v33 = vand.u32 4294901760, %v15096_v40  ;;  %24472 = vmatprep.subr.bf16.mxu0 %v29848_v38  ;;  %v15387_v57 = vand.u32 4294901760, %v15386_v2  ;;  %v16515_v26 = vand.u32 4294901760, %v29851_v32  ;;  %v13484_v2 = vld [vmem:[%s30288_s21 + $0x60] sm:$0xff] }
0x1550   : > { %24474 = vmatpush3.bf16.msra.mxu0 %v29848_v38  ;;  %30980 = vst [vmem:[#allocation14_spill] sm:$0xff] %v29874_v62  ;;  %v29877_v39 = vand.u32 4294901760, %v29833_v50  ;;  %v29885_v25 = vand.u32 4294901760, %v15136_v17  ;;  %v16529_v22 = vand.u32 4294901760, %v29858_v29  ;;  %v15285_v11 = vsub.f32 %v29815_v23, %v29861_v8 }
0x1551   : > { %v15104_v35 = vsub.f32 %v13467_v3, %v15100_v24  ;;  %v29879_v6 = vpack.c.bf16 %v15163_v33, %v15160_v46  ;;  %v16516_v14 = vsub.f32 %v29851_v32, %v16515_v26  ;;  %v29883_v37 = vsub.f32 %v15096_v40, %v15163_v33 }
0x1552   : > { %30981 = vst [vmem:[#allocation25_spill] sm:$0xff] %v29877_v39  ;;  %v29891_v19 = vpack.c.bf16 %v16522_v61, %v16515_v26  ;;  %v24431_v46 = vpack.c.bf16 %v15394_v48, %v15387_v57  ;;  %v15400_v40 = vsub.f32 %v29846_v7, %v15399_v59  ;;  %v29902_v61 = vsub.f32 %v29804_v16, %v29836_v44  ;;  %v13486_v16 = vld [vmem:[%s30288_s21 + $0x70] sm:$0xff] }
0x1553   : > { %24428 = vmatprep.subr.bf16.mxu1 %v29879_v6  ;;  %v16293_v3 = vand.u32 4294901760, %v15104_v35  ;;  %v16517_v24 = vand.u32 4294901760, %v16516_v14  ;;  %v15406_v33 = vand.u32 4294901760, %v29883_v37  ;;  %v16524_v57 = vand.u32 4294901760, %v16523_v0 }
0x1554   : > { %30982 = vst [vmem:[#allocation12_spill] sm:$0xff] %v29891_v19  ;;  %24430 = vmatpush3.bf16.msra.mxu1 %v29879_v6  ;;  %v15142_v14 = vsel %vm2232_vm5, %v13484_v2, 0  ;;  %v15295_v8 = vsub.f32 %v29825_v27, %v29874_v62  ;;  %v29915_v5 = vand.u32 4294901760, %v15139_v31  ;;  %v16530_v0 = vsub.f32 %v29858_v29, %v16529_v22 }
0x1555   : > { %24432 = vmatprep.subr.bf16.mxu1 %v24431_v46  ;;  %v29904_v26 = vpack.c.bf16 %v16293_v3, %v16290_v15  ;;  %v29906_v48 = vsub.f32 %v15104_v35, %v16293_v3  ;;  %v15407_v21 = vsub.f32 %v29883_v37, %v15406_v33  ;;  %v29920_v15 = vpack.c.bf16 %v15406_v33, %v15399_v59 }
0x1556   : > { %v24479_v35 = vpack.c.bf16 %v16524_v57, %v16517_v24  ;;  %v29927_v3 = vsub.f32 %v15136_v17, %v29885_v25  ;;  %v15401_v62 = vand.u32 4294901760, %v15400_v40  ;;  %v29930_v27 = vand.u32 4294901760, %v15142_v14 }
0x1557   : > { %30983 = vst [vmem:[#allocation11_spill] sm:$0xff] %v29920_v15  ;;  %22944 = vmatmul.mubr.f32.vlgmr.msra.gmra.mrb[40].mxu1 %v29784_v49  ;;  %24476 = vmatprep.subr.bf16.mxu0 %v29904_v26  ;;  %v16536_v2 = vand.u32 4294901760, %v29906_v48  ;;  %v15408_v53 = vand.u32 4294901760, %v15407_v21  ;;  %v15145_v59 = vsel %vm2232_vm5, %v13485_v45, 0  ;;  %v15305_v33 = vsub.f32 %v29833_v50, %v29877_v39 }
0x1558   : > { %24434 = vmatpush3.bf16.msra.mxu1 %v24431_v46  ;;  %24478 = vmatpush3.bf16.msra.mxu0 %v29904_v26  ;;  %v15148_v17 = vsel %vm2232_vm5, %v13486_v16, 0  ;;  %v13487_v46 = vld [vmem:[%s30288_s21 + $0x78] sm:$0xff]  ;;  %v15286_v57 = vand.u32 4294901760, %v15285_v11  ;;  %v29944_v45 = vand.u32 4294901760, %v29902_v61  ;;  %v29947_v15 = vsub.f32 %v15139_v31, %v29915_v5 }
0x1559   : > { %24480 = vmatprep.subr.bf16.mxu0 %v24479_v35  ;;  %22946 = vmatprep.mubr.f32.mxu1 %v29786_v34  ;;  %v16537_v24 = vsub.f32 %v29906_v48, %v16536_v2  ;;  %v29941_v40 = vpack.c.bf16 %v16536_v2, %v16529_v22  ;;  %v24435_v21 = vpack.c.bf16 %v15408_v53, %v15401_v62  ;;  %v16531_v39 = vand.u32 4294901760, %v16530_v0 }
0x155a   : > { %v29952_v50 = vand.u32 4294901760, %v29927_v3  ;;  %v29954_v19 = vand.u32 4294901760, %v15145_v59  ;;  %v29958_v53 = vpack.c.bf16 %v29792_v63, %v29822_v55  ;;  %v29961_v22 = vsub.f32 %v15142_v14, %v29930_v27 }
0x155b   : > { %22947 = vmatmul.mubr.f32.gmra.mrb[42].mxu1 %v29788_v47  ;;  %23136 = vmatmul.mubr.f32.vlgmr.msra.gmra.mrb[120].mxu0 %v29784_v49  ;;  %v16538_v16 = vand.u32 4294901760, %v16537_v24  ;;  %v29963_v62 = vand.u32 4294901760, %v15148_v17  ;;  %v15151_v49 = vsel %vm2232_vm5, %v13487_v46, 0  ;;  %v15296_v11 = vand.u32 4294901760, %v15295_v8 }
0x155c   : > { %24436 = vmatprep.subr.bf16.mxu1 %v24435_v21  ;;  %24482 = vmatpush3.bf16.msra.mxu0 %v24479_v35  ;;  %v15306_v35 = vand.u32 4294901760, %v15305_v33  ;;  %v15315_v63 = vsub.f32 %v29902_v61, %v29944_v45  ;;  %v29974_v55 = vand.u32 4294901760, %v29947_v15  ;;  %v29977_v14 = vsub.f32 %v15145_v59, %v29954_v19 }
0x155d   : > { %24438 = vmatpush3.bf16.msra.mxu1 %v24435_v21  ;;  %22949 = vmatprep.mubr.f32.mxu1 %v29840_v4  ;;  %v24483_v31 = vpack.c.bf16 %v16538_v16, %v16531_v39  ;;  %v29979_v39 = vand.u32 4294901760, %v15151_v49  ;;  %v15325_v8 = vsub.f32 %v29927_v3, %v29952_v50  ;;  %v29989_v0 = vsub.f32 %v15148_v17, %v29963_v62 }
0x155e   : > { %24440 = vmatprep.subr.bf16.mxu1 %v29958_v53  ;;  %23138 = vmatprep.mubr.f32.mxu0 %v29786_v34  ;;  %v24487_v34 = vpack.c.bf16 %v29830_v41, %v29851_v32  ;;  %v15316_v2 = vand.u32 4294901760, %v15315_v63  ;;  %v15335_v41 = vsub.f32 %v29947_v15, %v29974_v55  ;;  %v29996_v32 = vand.u32 4294901760, %v29977_v14 }
0x155f   : > { %22950 = vmatmul.mubr.f32.gmra.mrb[44].mxu1 %v29856_v1  ;;  %23139 = vmatmul.mubr.f32.gmra.mrb[122].mxu0 %v29788_v47  ;;  %v29986_v47 = vand.u32 4294901760, %v29961_v22  ;;  %v29999_v59 = vsub.f32 %v15151_v49, %v29979_v39  ;;  %v15326_v24 = vand.u32 4294901760, %v15325_v8  ;;  %v30004_v33 = vand.u32 4294901760, %v29989_v0 }
0x1560   : > { %24484 = vmatprep.subr.bf16.mxu0 %v24483_v31  ;;  %22952 = vmatprep.mubr.f32.mxu1 %v15286_v57  ;;  %v15355_v17 = vsub.f32 %v29977_v14, %v29996_v32  ;;  %v24491_v63 = vpack.c.bf16 %v29906_v48, %v29858_v29  ;;  %v30992_v29 = vld [vmem:[#allocation47_spill] sm:$0xff]  ;;  %v30996_v48 = vld [vmem:[#allocation25_spill] sm:$0xff] }
0x1561   : > { %24486 = vmatpush3.bf16.msra.mxu0 %v24483_v31  ;;  %23141 = vmatprep.mubr.f32.mxu0 %v29840_v4  ;;  %v15345_v4 = vsub.f32 %v29961_v22, %v29986_v47  ;;  %v30009_v46 = vand.u32 4294901760, %v29999_v59 }
0x1562   : > { %24488 = vmatprep.subr.bf16.mxu0 %v24487_v34  ;;  %v15356_v16 = vand.u32 4294901760, %v15355_v17 }
0x1563   : > { %22953 = vmatmul.mubr.f32.gmra.mrb[46].mxu1 %v15296_v11  ;;  %23142 = vmatmul.mubr.f32.gmra.mrb[124].mxu0 %v29856_v1  ;;  %v15336_v1 = vand.u32 4294901760, %v15335_v41  ;;  %v15346_v21 = vand.u32 4294901760, %v15345_v4  ;;  %v15375_v49 = vsub.f32 %v29999_v59, %v30009_v46  ;;  %v30997_v41 = vld [vmem:[#allocation34_spill] sm:$0xff] }
0x1564   : > { %22955 = vmatprep.mubr.f32.mxu1 %v15306_v35  ;;  %23144 = vmatprep.mubr.f32.mxu0 %v15286_v57  ;;  %v15365_v57 = vsub.f32 %v29989_v0, %v30004_v33 }
0x1566   : > { %v15366_v31 = vand.u32 4294901760, %v15365_v57 }
0x1567   : > { %22956 = vmatmul.mubr.f32.gmra.mrb[48].mxu1 %v15316_v2  ;;  %23145 = vmatmul.mubr.f32.gmra.mrb[126].mxu0 %v15296_v11  ;;  %v15376_v11 = vand.u32 4294901760, %v15375_v49  ;;  %v18385_v49 = vld [vmem:[%s30289_s22] sm:$0xff]  }
0x1568   : > { %22958 = vmatprep.mubr.f32.mxu1 %v15326_v24  ;;  %23147 = vmatprep.mubr.f32.mxu0 %v15306_v35  ;;  %v24443_v35 = vpack.c.bf16 %v29883_v37, %v29846_v7  ;;  %v30986_v7 = vld [vmem:[#allocation32_spill] sm:$0xff]  ;;  %v30994_v37 = vld [vmem:[#allocation35_spill] sm:$0xff] }
0x156b   : > { %22959 = vmatmul.mubr.f32.gmra.mrb[50].mxu1 %v15336_v1  ;;  %23148 = vmatmul.mubr.f32.gmra.mrb[128].mxu0 %v15316_v2 }
0x156c   : > { %22961 = vmatprep.mubr.f32.mxu1 %v15346_v21  ;;  %23150 = vmatprep.mubr.f32.mxu0 %v15326_v24 }
0x156f   : > { %22962 = vmatmul.mubr.f32.gmra.mrb[52].mxu1 %v15356_v16  ;;  %23151 = vmatmul.mubr.f32.gmra.mrb[130].mxu0 %v15336_v1 }
0x1570   : > { %22964 = vmatprep.mubr.f32.mxu1 %v15366_v31  ;;  %23153 = vmatprep.mubr.f32.mxu0 %v15346_v21 }
0x1573   : > { %22965 = vmatmul.mubr.f32.gmra.mrb[54].mxu1 %v15376_v11  ;;  %23154 = vmatmul.mubr.f32.gmra.mrb[132].mxu0 %v15356_v16 }
0x1574   : > { %22975 = vmatprep.mubr.f32.mxu1 %v29664_v60  ;;  %23156 = vmatprep.mubr.f32.mxu0 %v15366_v31 }
0x1577   : > { %22976 = vmatmul.mubr.f32.vlgmr.msra.gmra.mrb[40].mxu1 %v29696_v30  ;;  %23157 = vmatmul.mubr.f32.gmra.mrb[134].mxu0 %v15376_v11 }
0x1578   : > { %24442 = vmatpush3.bf16.msra.mxu1 %v29958_v53  ;;  %22978 = vmatprep.mubr.f32.mxu1 %v29698_v42 }
0x1579   : > { %24444 = vmatprep.subr.bf16.mxu1 %v24443_v35  ;;  %23167 = vmatprep.mubr.f32.mxu0 %v29664_v60 }
0x157b   : > { %22979 = vmatmul.mubr.f32.gmra.mrb[42].mxu1 %v29700_v9  ;;  %23168 = vmatmul.mubr.f32.vlgmr.msra.gmra.mrb[120].mxu0 %v29696_v30 }
0x157c   : > { %24446 = vmatpush3.bf16.msra.mxu1 %v24443_v35  ;;  %24490 = vmatpush3.bf16.msra.mxu0 %v24487_v34 }
0x157d   : > { %24448 = vmatprep.subr.bf16.mxu1 %v29820_v58  ;;  %24492 = vmatprep.subr.bf16.mxu0 %v24491_v63 }
0x157e   : > { %22981 = vmatprep.mubr.f32.mxu1 %v29723_v56  ;;  %23170 = vmatprep.mubr.f32.mxu0 %v29698_v42 }
0x157f   : > { %22982 = vmatmul.mubr.f32.gmra.mrb[44].mxu1 %v29728_v51  ;;  %23171 = vmatmul.mubr.f32.gmra.mrb[122].mxu0 %v29700_v9 }
0x1580   : > { %24494 = vmatpush3.bf16.msra.mxu0 %v24491_v63  ;;  %22984 = vmatprep.mubr.f32.mxu1 %v29790_v28 }
0x1581   : > { %24496 = vmatprep.subr.bf16.mxu0 %v29848_v38  ;;  %23173 = vmatprep.mubr.f32.mxu0 %v29723_v56 }
0x1583   : > { %22985 = vmatmul.mubr.f32.gmra.mrb[46].mxu1 %v29794_v12  ;;  %23174 = vmatmul.mubr.f32.gmra.mrb[124].mxu0 %v29728_v51 }
0x1584   : > { %22987 = vmatprep.mubr.f32.mxu1 %v29801_v43  ;;  %23176 = vmatprep.mubr.f32.mxu0 %v29790_v28 }
0x1587   : > { %22988 = vmatmul.mubr.f32.gmra.mrb[48].mxu1 %v29836_v44  ;;  %23177 = vmatmul.mubr.f32.gmra.mrb[126].mxu0 %v29794_v12 }
0x1588   : > { %22990 = vmatprep.mubr.f32.mxu1 %v29885_v25  ;;  %23179 = vmatprep.mubr.f32.mxu0 %v29801_v43 }
0x158b   : > { %22991 = vmatmul.mubr.f32.gmra.mrb[50].mxu1 %v29915_v5  ;;  %23180 = vmatmul.mubr.f32.gmra.mrb[128].mxu0 %v29836_v44 }
0x158c   : > { %22993 = vmatprep.mubr.f32.mxu1 %v29930_v27  ;;  %23182 = vmatprep.mubr.f32.mxu0 %v29885_v25 }
0x158f   : > { %22994 = vmatmul.mubr.f32.gmra.mrb[52].mxu1 %v29954_v19  ;;  %23183 = vmatmul.mubr.f32.gmra.mrb[130].mxu0 %v29915_v5 }
0x1590   : > { %22996 = vmatprep.mubr.f32.mxu1 %v29963_v62  ;;  %23185 = vmatprep.mubr.f32.mxu0 %v29930_v27 }
0x1593   : > { %22997 = vmatmul.mubr.f32.gmra.mrb[54].mxu1 %v29979_v39  ;;  %23186 = vmatmul.mubr.f32.gmra.mrb[132].mxu0 %v29954_v19 }
0x1594   : > { %23007 = vmatprep.mubr.f32.mxu1 %v29667_v52  ;;  %23188 = vmatprep.mubr.f32.mxu0 %v29963_v62 }
0x1597   : > { %23008 = vmatmul.mubr.f32.vlgmr.msra.gmra.mrb[40].mxu1 %v29711_v36  ;;  %23189 = vmatmul.mubr.f32.gmra.mrb[134].mxu0 %v29979_v39 }
0x1598   : > { %24450 = vmatpush3.bf16.msra.mxu1 %v29820_v58  ;;  %23010 = vmatprep.mubr.f32.mxu1 %v29714_v10 }
0x1599   : > { %24452 = vmatprep.subr.bf16.mxu1 %v29879_v6  ;;  %23199 = vmatprep.mubr.f32.mxu0 %v29667_v52  ;;  %v30984_v52 = vld [vmem:[#allocation12_spill] sm:$0xff] }
0x159b   : > { %23011 = vmatmul.mubr.f32.gmra.mrb[42].mxu1 %v29717_v18  ;;  %23200 = vmatmul.mubr.f32.vlgmr.msra.gmra.mrb[120].mxu0 %v29711_v36  ;;  %v30985_v36 = vld [vmem:[#allocation15_spill] sm:$0xff] }
0x159c   : > { %24454 = vmatpush3.bf16.msra.mxu1 %v29879_v6  ;;  %24498 = vmatpush3.bf16.msra.mxu0 %v29848_v38 }
0x159d   : > { %24456 = vmatprep.subr.bf16.mxu1 %v29863_v13  ;;  %24500 = vmatprep.subr.bf16.mxu0 %v29904_v26 }
0x159e   : > { %23013 = vmatprep.mubr.f32.mxu1 %v29742_v54  ;;  %23202 = vmatprep.mubr.f32.mxu0 %v29714_v10  ;;  %v30987_v10 = vld [vmem:[#allocation43_spill] sm:$0xff] }
0x159f   : > { %23014 = vmatmul.mubr.f32.gmra.mrb[44].mxu1 %v29748_v20  ;;  %23203 = vmatmul.mubr.f32.gmra.mrb[122].mxu0 %v29717_v18  ;;  %v30988_v18 = vld [vmem:[#allocation44_spill] sm:$0xff] }
0x15a0   : > { %24502 = vmatpush3.bf16.msra.mxu0 %v29904_v26  ;;  %23016 = vmatprep.mubr.f32.mxu1 %v29815_v23 }
0x15a1   : > { %24504 = vmatprep.subr.bf16.mxu0 %v30984_v52  ;;  %23205 = vmatprep.mubr.f32.mxu0 %v29742_v54  ;;  %v30989_v54 = vld [vmem:[#allocation45_spill] sm:$0xff] }
0x15a3   : > { %23017 = vmatmul.mubr.f32.gmra.mrb[46].mxu1 %v30985_v36  ;;  %23206 = vmatmul.mubr.f32.gmra.mrb[124].mxu0 %v29748_v20  ;;  %v30990_v20 = vld [vmem:[#allocation11_spill] sm:$0xff] }
0x15a4   : > { %23019 = vmatprep.mubr.f32.mxu1 %v30986_v7  ;;  %23208 = vmatprep.mubr.f32.mxu0 %v29815_v23  ;;  %v30991_v23 = vld [vmem:[#allocation46_spill] sm:$0xff] }
0x15a7   : > { %23020 = vmatmul.mubr.f32.gmra.mrb[48].mxu1 %v29902_v61  ;;  %23209 = vmatmul.mubr.f32.gmra.mrb[126].mxu0 %v30985_v36 }
0x15a8   : > { %23022 = vmatprep.mubr.f32.mxu1 %v29927_v3  ;;  %23211 = vmatprep.mubr.f32.mxu0 %v30986_v7 }
0x15ab   : > { %23023 = vmatmul.mubr.f32.gmra.mrb[50].mxu1 %v29947_v15  ;;  %23212 = vmatmul.mubr.f32.gmra.mrb[128].mxu0 %v29902_v61  ;;  %v30995_v61 = vld [vmem:[#allocation14_spill] sm:$0xff] }
0x15ac   : > { %23025 = vmatprep.mubr.f32.mxu1 %v29961_v22  ;;  %23214 = vmatprep.mubr.f32.mxu0 %v29927_v3 }
0x15af   : > { %23026 = vmatmul.mubr.f32.gmra.mrb[52].mxu1 %v29977_v14  ;;  %23215 = vmatmul.mubr.f32.gmra.mrb[130].mxu0 %v29947_v15 }
0x15b0   : > { %23028 = vmatprep.mubr.f32.mxu1 %v29989_v0  ;;  %23217 = vmatprep.mubr.f32.mxu0 %v29961_v22 }
0x15b3   : > { %23029 = vmatmul.mubr.f32.gmra.mrb[54].mxu1 %v29999_v59  ;;  %23218 = vmatmul.mubr.f32.gmra.mrb[132].mxu0 %v29977_v14 }
0x15b4   : > { %23039 = vmatprep.mubr.f32.mxu1 %v30987_v10  ;;  %23220 = vmatprep.mubr.f32.mxu0 %v29989_v0 }
0x15b7   : > { %23040 = vmatmul.mubr.f32.vlgmr.msra.gmra.mrb[40].mxu1 %v30988_v18  ;;  %23221 = vmatmul.mubr.f32.gmra.mrb[134].mxu0 %v29999_v59 }
0x15b8   : > { %24458 = vmatpush3.bf16.msra.mxu1 %v29863_v13  ;;  %23042 = vmatprep.mubr.f32.mxu1 %v30989_v54  ;;  %v30993_v13 = vld [vmem:[#allocation48_spill] sm:$0xff] }
0x15b9   : > { %24460 = vmatprep.subr.bf16.mxu1 %v30990_v20  ;;  %23231 = vmatprep.mubr.f32.mxu0 %v30987_v10  ;;  %v18387_v10 = vunpack.c.h.bf16 %v18385_v49 }
0x15bb   : > { %23043 = vmatmul.mubr.f32.gmra.mrb[42].mxu1 %v30991_v23  ;;  %23232 = vmatmul.mubr.f32.vlgmr.msra.gmra.mrb[120].mxu0 %v30988_v18  ;;  %v18386_v18 = vunpack.c.l.bf16 %v18385_v49 }
0x15bc   : > { %24462 = vmatpush3.bf16.msra.mxu1 %v30990_v20  ;;  %24506 = vmatpush3.bf16.msra.mxu0 %v30984_v52  ;;  %v30999_v52 = vld [vmem:[#allocation9_spill] sm:$0xff] }
0x15bd   : > { %24464 = vmatprep.subr.bf16.mxu1 %v29820_v58  ;;  %24508 = vmatprep.subr.bf16.mxu0 %v29941_v40 }
0x15be   : > { %23045 = vmatprep.mubr.f32.mxu1 %v30992_v29  ;;  %23234 = vmatprep.mubr.f32.mxu0 %v30989_v54  ;;  %v31000_v54 = vld [vmem:[#allocation4_spill] sm:$0xff] }
0x15bf   : > { %23046 = vmatmul.mubr.f32.gmra.mrb[44].mxu1 %v30993_v13  ;;  %23235 = vmatmul.mubr.f32.gmra.mrb[122].mxu0 %v30991_v23 }
0x15c0   : > { %24510 = vmatpush3.bf16.msra.mxu0 %v29941_v40  ;;  %23048 = vmatprep.mubr.f32.mxu1 %v30994_v37 }
0x15c1   : > { %24512 = vmatprep.subr.bf16.mxu0 %v29848_v38  ;;  %23237 = vmatprep.mubr.f32.mxu0 %v30992_v29 }
0x15c3   : > { %23049 = vmatmul.mubr.f32.gmra.mrb[46].mxu1 %v30995_v61  ;;  %23238 = vmatmul.mubr.f32.gmra.mrb[124].mxu0 %v30993_v13 }
0x15c4   : > { %23051 = vmatprep.mubr.f32.mxu1 %v30996_v48  ;;  %23240 = vmatprep.mubr.f32.mxu0 %v30994_v37 }
0x15c7   : > { %23052 = vmatmul.mubr.f32.gmra.mrb[48].mxu1 %v29944_v45  ;;  %23241 = vmatmul.mubr.f32.gmra.mrb[126].mxu0 %v30995_v61 }
0x15c8   : > { %23054 = vmatprep.mubr.f32.mxu1 %v29952_v50  ;;  %23243 = vmatprep.mubr.f32.mxu0 %v30996_v48 }
0x15cb   : > { %23055 = vmatmul.mubr.f32.gmra.mrb[50].mxu1 %v29974_v55  ;;  %23244 = vmatmul.mubr.f32.gmra.mrb[128].mxu0 %v29944_v45 }
0x15cc   : > { %23057 = vmatprep.mubr.f32.mxu1 %v29986_v47  ;;  %23246 = vmatprep.mubr.f32.mxu0 %v29952_v50 }
0x15cf   : > { %23058 = vmatmul.mubr.f32.gmra.mrb[52].mxu1 %v29996_v32  ;;  %23247 = vmatmul.mubr.f32.gmra.mrb[130].mxu0 %v29974_v55 }
0x15d0   : > { %23060 = vmatprep.mubr.f32.mxu1 %v30004_v33  ;;  %23249 = vmatprep.mubr.f32.mxu0 %v29986_v47 }
0x15d3   : > { %23061 = vmatmul.mubr.f32.gmra.mrb[54].mxu1 %v30009_v46  ;;  %23250 = vmatmul.mubr.f32.gmra.mrb[132].mxu0 %v29996_v32 }
0x15d4   : > { %23071 = vmatprep.mubr.f32.mxu1 %v29664_v60  ;;  %23252 = vmatprep.mubr.f32.mxu0 %v30004_v33  ;;  %v30998_v33 = vld [vmem:[#allocation16_spill] sm:$0xff] }
0x15d7   : > { %23072 = vmatmul.mubr.f32.vlgmr.msra.gmra.mrb[40].mxu1 %v29696_v30  ;;  %23253 = vmatmul.mubr.f32.gmra.mrb[134].mxu0 %v30009_v46 }
0x15d8   : > { %24466 = vmatpush3.bf16.msra.mxu1 %v29820_v58  ;;  %23074 = vmatprep.mubr.f32.mxu1 %v29698_v42 }
0x15d9   : > { %24468 = vmatprep.subr.bf16.mxu1 %v29879_v6  ;;  %23263 = vmatprep.mubr.f32.mxu0 %v29664_v60 }
0x15db   : > { %23075 = vmatmul.mubr.f32.gmra.mrb[42].mxu1 %v29700_v9  ;;  %23264 = vmatmul.mubr.f32.vlgmr.msra.gmra.mrb[120].mxu0 %v29696_v30 }
0x15dc   : > { %24470 = vmatpush3.bf16.msra.mxu1 %v29879_v6  ;;  %24514 = vmatpush3.bf16.msra.mxu0 %v29848_v38 }
0x15dd   : > { %24516 = vmatprep.subr.bf16.mxu0 %v29904_v26  ;;  %23077 = vmatprep.mubr.f32.mxu1 %v29723_v56 }
0x15de   : > { %23266 = vmatprep.mubr.f32.mxu0 %v29698_v42 }
0x15df   : > { %23078 = vmatmul.mubr.f32.gmra.mrb[44].mxu1 %v29728_v51  ;;  %23267 = vmatmul.mubr.f32.gmra.mrb[122].mxu0 %v29700_v9 }
0x15e0   : > { %24518 = vmatpush3.bf16.msra.mxu0 %v29904_v26  ;;  %23080 = vmatprep.mubr.f32.mxu1 %v29790_v28 }
0x15e1   : > { %23269 = vmatprep.mubr.f32.mxu0 %v29723_v56 }
0x15e3   : > { %23081 = vmatmul.mubr.f32.gmra.mrb[46].mxu1 %v29794_v12  ;;  %23270 = vmatmul.mubr.f32.gmra.mrb[124].mxu0 %v29728_v51 }
0x15e4   : > { %23083 = vmatprep.mubr.f32.mxu1 %v29801_v43  ;;  %23272 = vmatprep.mubr.f32.mxu0 %v29790_v28 }
0x15e7   : > { %23084 = vmatmul.mubr.f32.gmra.mrb[48].mxu1 %v29836_v44  ;;  %23273 = vmatmul.mubr.f32.gmra.mrb[126].mxu0 %v29794_v12 }
0x15e8   : > { %23086 = vmatprep.mubr.f32.mxu1 %v29885_v25  ;;  %23275 = vmatprep.mubr.f32.mxu0 %v29801_v43 }
0x15eb   : > { %23087 = vmatmul.mubr.f32.gmra.mrb[50].mxu1 %v29915_v5  ;;  %23276 = vmatmul.mubr.f32.gmra.mrb[128].mxu0 %v29836_v44 }
0x15ec   : > { %23089 = vmatprep.mubr.f32.mxu1 %v29930_v27  ;;  %23278 = vmatprep.mubr.f32.mxu0 %v29885_v25 }
0x15ef   : > { %23090 = vmatmul.mubr.f32.gmra.mrb[52].mxu1 %v29954_v19  ;;  %23279 = vmatmul.mubr.f32.gmra.mrb[130].mxu0 %v29915_v5 }
0x15f0   : > { %23092 = vmatprep.mubr.f32.mxu1 %v29963_v62  ;;  %23281 = vmatprep.mubr.f32.mxu0 %v29930_v27 }
0x15f3   : > { %23093 = vmatmul.mubr.f32.gmra.mrb[54].mxu1 %v29979_v39  ;;  %23282 = vmatmul.mubr.f32.gmra.mrb[132].mxu0 %v29954_v19 }
0x15f4   : > { %23103 = vmatprep.mubr.f32.mxu1 %v29664_v60  ;;  %23284 = vmatprep.mubr.f32.mxu0 %v29963_v62 }
0x15f7   : > { %23104 = vmatmul.mubr.f32.vlgmr.msra.gmra.mrb[40].mxu1 %v29696_v30  ;;  %23285 = vmatmul.mubr.f32.gmra.mrb[134].mxu0 %v29979_v39 }
0x15f8   : > { %23106 = vmatprep.mubr.f32.mxu1 %v29698_v42  ;;  %23295 = vmatprep.mubr.f32.mxu0 %v29664_v60 }
0x15fb   : > { %23107 = vmatmul.mubr.f32.gmra.mrb[42].mxu1 %v29700_v9  ;;  %23296 = vmatmul.mubr.f32.vlgmr.msra.gmra.mrb[120].mxu0 %v29696_v30 }
0x15fc   : > { %23109 = vmatprep.mubr.f32.mxu1 %v29723_v56  ;;  %23298 = vmatprep.mubr.f32.mxu0 %v29698_v42 }
0x15ff   : > { %23110 = vmatmul.mubr.f32.gmra.mrb[44].mxu1 %v29728_v51  ;;  %23299 = vmatmul.mubr.f32.gmra.mrb[122].mxu0 %v29700_v9 }
0x1600   : > { %23112 = vmatprep.mubr.f32.mxu1 %v29790_v28  ;;  %23301 = vmatprep.mubr.f32.mxu0 %v29723_v56 }
0x1603   : > { %23113 = vmatmul.mubr.f32.gmra.mrb[46].mxu1 %v29794_v12  ;;  %23302 = vmatmul.mubr.f32.gmra.mrb[124].mxu0 %v29728_v51 }
0x1604   : > { %23115 = vmatprep.mubr.f32.mxu1 %v29801_v43  ;;  %23304 = vmatprep.mubr.f32.mxu0 %v29790_v28 }
0x1607   : > { %23116 = vmatmul.mubr.f32.gmra.mrb[48].mxu1 %v29836_v44  ;;  %23305 = vmatmul.mubr.f32.gmra.mrb[126].mxu0 %v29794_v12 }
0x1608   : > { %23118 = vmatprep.mubr.f32.mxu1 %v29885_v25  ;;  %23307 = vmatprep.mubr.f32.mxu0 %v29801_v43 }
0x160b   : > { %23119 = vmatmul.mubr.f32.gmra.mrb[50].mxu1 %v29915_v5  ;;  %23308 = vmatmul.mubr.f32.gmra.mrb[128].mxu0 %v29836_v44 }
0x160c   : > { %23121 = vmatprep.mubr.f32.mxu1 %v29930_v27  ;;  %23310 = vmatprep.mubr.f32.mxu0 %v29885_v25 }
0x160f   : > { %23122 = vmatmul.mubr.f32.gmra.mrb[52].mxu1 %v29954_v19  ;;  %23311 = vmatmul.mubr.f32.gmra.mrb[130].mxu0 %v29915_v5 }
0x1610   : > { %23124 = vmatprep.mubr.f32.mxu1 %v29963_v62  ;;  %23313 = vmatprep.mubr.f32.mxu0 %v29930_v27 }
0x1613   : > { %23125 = vmatmul.mubr.f32.gmra.mrb[54].mxu1 %v29979_v39  ;;  %23314 = vmatmul.mubr.f32.gmra.mrb[132].mxu0 %v29954_v19 }
0x1614   : > { %23316 = vmatprep.mubr.f32.mxu0 %v29963_v62 }
0x1617   : > { %23317 = vmatmul.mubr.f32.gmra.mrb[134].mxu0 %v29979_v39 }
0x16ca   : > { %v23105_v60 = vpop.f32.mrb[40].mxu1 }
0x16cb   : > { %17420 = vperm.xlu0 %25287, %v23105_v60   ;;  %v16189_v30 = vpop.f32.mrb[41].mxu1 }
0x16cc   : > { %17415 = vperm.xlu1 %25288, %v16189_v30  }
0x16ce   : > { %v23108_v42 = vpop.f32.mrb[42].mxu1  ;;  %v23297_v9 = vpop.f32.mrb[120].mxu0 }
0x16cf   : > { %v16201_v56 = vpop.f32.mrb[43].mxu1  ;;  %v17319_v5 = vpop.f32.mrb[121].mxu0 }
0x16d0   : > { %17430 = vperm.xlu1 %25288, %v23108_v42   ;;  %17511 = vperm.xlu0 %25287, %v17319_v5  }
0x16d2   : > { %v23111_v51 = vpop.f32.mrb[44].mxu1  ;;  %v23300_v28 = vpop.f32.mrb[122].mxu0 }
0x16d3   : > { %v16213_v12 = vpop.f32.mrb[45].mxu1  ;;  %v17331_v43 = vpop.f32.mrb[123].mxu0 }
0x16d4   : > { %17516 = vperm.xlu1 %25288, %v23297_v9   ;;  %17521 = vperm.xlu0 %25287, %v17331_v43   ;;  %v31001_v9 = vld [vmem:[#allocation31_spill] sm:$0xff] }
0x16d6   : > { %v23114_v19 = vpop.f32.mrb[46].mxu1  ;;  %v23303_v58 = vpop.f32.mrb[124].mxu0 }
0x16d7   : > { %v16225_v27 = vpop.f32.mrb[47].mxu1  ;;  %v17343_v50 = vpop.f32.mrb[125].mxu0 }
0x16d8   : > { %17425 = vperm.xlu1 %25288, %v16201_v56   ;;  %17435 = vperm.xlu0 %25287, %v16213_v12  }
0x16da   : > { %v23117_v44 = vpop.f32.mrb[48].mxu1  ;;  %v23306_v38 = vpop.f32.mrb[126].mxu0 }
0x16db   : > { %v16237_v6 = vpop.f32.mrb[49].mxu1  ;;  %v17355_v25 = vpop.f32.mrb[127].mxu0 }
0x16dc   : > { %17526 = vperm.xlu1 %25288, %v23300_v28   ;;  %17531 = vperm.xlu0 %25287, %v17343_v50  }
0x16de   : > { %v23120_v26 = vpop.f32.mrb[50].mxu1  ;;  %v23309_v15 = vpop.f32.mrb[128].mxu0 }
0x16df   : > { %v16249_v3 = vpop.f32.mrb[51].mxu1  ;;  %v17367_v40 = vpop.f32.mrb[129].mxu0 }
0x16e0   : > { %17440 = vperm.xlu1 %25288, %v23111_v51   ;;  %17445 = vperm.xlu0 %25287, %v16225_v27   ;;  %v18416_v51 = vld [vmem:[%s30289_s22 + $0x8] sm:$0xff]  }
0x16e2   : > { %v23123_v45 = vpop.f32.mrb[52].mxu1  ;;  %v23312_v53 = vpop.f32.mrb[130].mxu0 }
0x16e3   : > { %v16261_v22 = vpop.f32.mrb[53].mxu1  ;;  %v17379_v62 = vpop.f32.mrb[131].mxu0 }
0x16e4   : > { %17536 = vperm.xlu1 %25288, %v23303_v58   ;;  %17541 = vperm.xlu0 %25287, %v17355_v25  }
0x16e6   : > { %v23126_v55 = vpop.f32.mrb[54].mxu1  ;;  %v23315_v14 = vpop.f32.mrb[132].mxu0 }
0x16e7   : > { %v16273_v39 = vpop.f32.mrb[55].mxu1  ;;  %v17391_v34 = vpop.f32.mrb[133].mxu0 }
0x16e8   : > { %17450 = vperm.xlu1 %25288, %v23114_v19   ;;  %17455 = vperm.xlu0 %25287, %v16237_v6   ;;  %v31002_v6 = vld [vmem:[#allocation18_spill] sm:$0xff] }
0x16ea   : > { %v23318_v8 = vpop.f32.mrb[134].mxu0 }
0x16eb   : > { %v17403_v47 = vpop.f32.mrb[135].mxu0 }
0x16ec   : > { %17546 = vperm.xlu1 %25288, %v23306_v38   ;;  %17551 = vperm.xlu0 %25287, %v17367_v40   ;;  %v18390_v38 = vunpack.c.l.bf16 %v18416_v51  ;;  %v18391_v40 = vunpack.c.h.bf16 %v18416_v51 }
0x16f0   : > { %17460 = vperm.xlu1 %25288, %v23117_v44   ;;  %17465 = vperm.xlu0 %25287, %v16249_v3  }
0x16f4   : > { %17556 = vperm.xlu1 %25288, %v23309_v15   ;;  %17561 = vperm.xlu0 %25287, %v17379_v62  }
0x16f8   : > { %17470 = vperm.xlu1 %25288, %v23120_v26   ;;  %17475 = vperm.xlu0 %25287, %v16261_v22  }
0x16fc   : > { %17566 = vperm.xlu1 %25288, %v23312_v53   ;;  %17571 = vperm.xlu0 %25287, %v17391_v34   ;;  %v18417_v34 = vld [vmem:[%s30289_s22 + $0x10] sm:$0xff]  }
0x1700   : > { %17480 = vperm.xlu1 %25288, %v23123_v45   ;;  %17485 = vperm.xlu0 %25287, %v16273_v39  }
0x1704   : > { %17576 = vperm.xlu1 %25288, %v23315_v14   ;;  %17581 = vperm.xlu0 %25287, %v17403_v47  }
0x1708   : > { %17490 = vperm.xlu1 %25288, %v23126_v55   ;;  %v31003_v55 = vld [vmem:[#allocation39_spill] sm:$0xff] }
0x170c   : > { %17586 = vperm.xlu1 %25288, %v23318_v8  }
0x174a   : > { %v17421_v0 = vpop.permute.xlu0 %17420 }
0x174b   : > { %v17416_v2 = vpop.permute.xlu1 %17415  ;;  %v17494_v1 = vmul.f32 %v17421_v0, %v30998_v33  ;;  %v18395_v33 = vunpack.c.h.bf16 %v18417_v34 }
0x174c   : > { %v17493_v32 = vmul.f32 %v17416_v2, %v30997_v41 }
0x174f   : > { %v17431_v59 = vpop.permute.xlu1 %17430  ;;  %v17512_v24 = vpop.permute.xlu0 %17511 }
0x1750   : > { %v17589_v4 = vadd.f32 %v17512_v24, %v17493_v32  ;;  %v17496_v20 = vmul.f32 %v31000_v54, %v17431_v59 }
0x1752   : > { %v17621_v21 = vmul.f32 0.2, %v17589_v4  ;;  %vm17605_vm5 = vcmp.gt.f32.partialorder %v17589_v4, 0.0 }
0x1753   : > { %v17517_v17 = vpop.permute.xlu1 %17516  ;;  %v17522_v46 = vpop.permute.xlu0 %17521 }
0x1754   : > { %v17590_v57 = vadd.f32 %v17517_v17, %v17494_v1  ;;  %v17637_v35 = vsel %vm17605_vm5, %v17589_v4, %v17621_v21  ;;  %v18394_v4 = vunpack.c.l.bf16 %v18417_v34  ;;  %v31004_v1 = vld [vmem:[#allocation28_spill] sm:$0xff] }
0x1756   : > { %vm17606_vm3 = vcmp.gt.f32.partialorder %v17590_v57, 0.0  ;;  %v17622_v16 = vmul.f32 0.2, %v17590_v57 }
0x1757   : > { %v17426_v31 = vpop.permute.xlu1 %17425  ;;  %v17436_v11 = vpop.permute.xlu0 %17435 }
0x1758   : > { %v17638_v63 = vsel %vm17606_vm3, %v17590_v57, %v17622_v16  ;;  %v17495_v36 = vmul.f32 %v30999_v52, %v17426_v31  ;;  %v17497_v56 = vmul.f32 %v17436_v11, %v31001_v9  ;;  %v31005_v52 = vld [vmem:[#allocation26_spill] sm:$0xff] }
0x1759   : > { %v17686_v7 = vpack.c.bf16 %v17638_v63, %v17637_v35 }
0x175a   : > { %v17591_v23 = vadd.f32 %v17522_v46, %v17495_v36 }
0x175b   : > { %v17527_v29 = vpop.permute.xlu1 %17526  ;;  %v17532_v13 = vpop.permute.xlu0 %17531  ;;  %v17695_v37 = vunpack.c.h.bf16 %v17686_v7  ;;  %v17694_v61 = vunpack.c.l.bf16 %v17686_v7 }
0x175c   : > { %v17623_v48 = vmul.f32 0.2, %v17591_v23  ;;  %v17592_v60 = vadd.f32 %v17527_v29, %v17496_v20  ;;  %vm17607_vm12 = vcmp.gt.f32.partialorder %v17591_v23, 0.0  ;;  %v17593_v50 = vadd.f32 %v17532_v13, %v17497_v56 }
0x175d   : > { %v17711_v30 = vmul.f32 %v18387_v10, %v17695_v37  ;;  %v17710_v42 = vmul.f32 %v18386_v18, %v17694_v61  ;;  %v18418_v10 = vld [vmem:[%s30289_s22 + $0x18] sm:$0xff]  }
0x175e   : > { %vm17608_vm13 = vcmp.gt.f32.partialorder %v17592_v60, 0.0  ;;  %v17624_v5 = vmul.f32 0.2, %v17592_v60  ;;  %v17639_v58 = vsel %vm17607_vm12, %v17591_v23, %v17623_v48  ;;  %v17625_v53 = vmul.f32 0.2, %v17593_v50 }
0x175f   : > { %v17441_v28 = vpop.permute.xlu1 %17440  ;;  %v17446_v12 = vpop.permute.xlu0 %17445  ;;  %v17729_v43 = vsel %vm15044_vm4, %v17711_v30, 0.0  ;;  %v17726_v19 = vsel %vm15044_vm4, %v17710_v42, 0.0  ;;  %vm17609_vm14 = vcmp.gt.f32.partialorder %v17593_v50, 0.0  ;;  %v18398_v48 = vunpack.c.l.bf16 %v18418_v10  ;;  %v31006_v30 = vld [vmem:[#allocation22_spill] sm:$0xff] }
0x1760   : > { %v17640_v27 = vsel %vm17608_vm13, %v17592_v60, %v17624_v5  ;;  %17730 = vadd.xlane.f32.xlu1 %v17729_v43  ;;  %17727 = vadd.xlane.f32.xlu0 %v17726_v19  ;;  %v17498_v25 = vmul.f32 %v17441_v28, %v31002_v6  ;;  %v17499_v14 = vmul.f32 %v31003_v55, %v17446_v12  ;;  %v18399_v60 = vunpack.c.h.bf16 %v18418_v10 }
0x1761   : > { %v17687_v44 = vpack.c.bf16 %v17640_v27, %v17639_v58  ;;  %v17641_v41 = vsel %vm17609_vm14, %v17593_v50, %v17625_v53  ;;  %v31007_v58 = vld [vmem:[#allocation19_spill] sm:$0xff] }
0x1763   : > { %v17537_v26 = vpop.permute.xlu1 %17536  ;;  %v17542_v15 = vpop.permute.xlu0 %17541  ;;  %v17696_v3 = vunpack.c.l.bf16 %v17687_v44  ;;  %v17697_v45 = vunpack.c.h.bf16 %v17687_v44  ;;  %v18419_v44 = vld [vmem:[%s30289_s22 + $0x20] sm:$0xff]  }
0x1764   : > { %v17594_v22 = vadd.f32 %v17537_v26, %v17498_v25  ;;  %v17595_v59 = vadd.f32 %v17542_v15, %v17499_v14  ;;  %v18402_v53 = vunpack.c.l.bf16 %v18419_v44 }
0x1765   : > { %v17712_v62 = vmul.f32 %v18390_v38, %v17696_v3  ;;  %v17713_v2 = vmul.f32 %v18391_v40, %v17697_v45 }
0x1766   : > { %vm17610_vm15 = vcmp.gt.f32.partialorder %v17594_v22, 0.0  ;;  %v17626_v39 = vmul.f32 0.2, %v17594_v22  ;;  %v17627_v31 = vmul.f32 0.2, %v17595_v59  ;;  %vm17611_vm0 = vcmp.gt.f32.partialorder %v17595_v59, 0.0 }
0x1767   : > { %v17451_v8 = vpop.permute.xlu1 %17450  ;;  %v17456_v47 = vpop.permute.xlu0 %17455  ;;  %v17732_v0 = vsel %vm15044_vm4, %v17712_v62, 0.0  ;;  %v17735_v57 = vsel %vm15044_vm4, %v17713_v2, 0.0  ;;  %v31008_v62 = vld [vmem:[#allocation21_spill] sm:$0xff] }
0x1768   : > { %v17642_v32 = vsel %vm17610_vm15, %v17594_v22, %v17626_v39  ;;  %17733 = vadd.xlane.f32.xlu0 %v17732_v0  ;;  %v17500_v17 = vmul.f32 %v31004_v1, %v17451_v8  ;;  %v17501_v36 = vmul.f32 %v17456_v47, %v31005_v52  ;;  %v17643_v29 = vsel %vm17611_vm0, %v17595_v59, %v17627_v31 }
0x1769   : > { %v17688_v24 = vpack.c.bf16 %v17642_v32, %v17641_v41  ;;  %v18403_v22 = vunpack.c.h.bf16 %v18419_v44  ;;  %v31009_v32 = vld [vmem:[#allocation7_spill] sm:$0xff] }
0x176b   : > { %v17547_v46 = vpop.permute.xlu1 %17546  ;;  %v17552_v21 = vpop.permute.xlu0 %17551  ;;  %v17698_v16 = vunpack.c.l.bf16 %v17688_v24  ;;  %v17699_v49 = vunpack.c.h.bf16 %v17688_v24 }
0x176c   : > { %v17596_v11 = vadd.f32 %v17547_v46, %v17500_v17  ;;  %17736 = vadd.xlane.f32.xlu0 %v17735_v57  ;;  %v17597_v37 = vadd.f32 %v17552_v21, %v17501_v36 }
0x176d   : > { %v17714_v35 = vmul.f32 %v18394_v4, %v17698_v16  ;;  %v17715_v63 = vmul.f32 %v18395_v33, %v17699_v49  ;;  %v18420_v4 = vld [vmem:[%s30289_s22 + $0x28] sm:$0xff]  }
0x176e   : > { %vm17612_vm1 = vcmp.gt.f32.partialorder %v17596_v11, 0.0  ;;  %v17628_v7 = vmul.f32 0.2, %v17596_v11  ;;  %v17629_v28 = vmul.f32 0.2, %v17597_v37  ;;  %vm17613_vm2 = vcmp.gt.f32.partialorder %v17597_v37, 0.0 }
0x176f   : > { %v17461_v18 = vpop.permute.xlu1 %17460  ;;  %v17466_v54 = vpop.permute.xlu0 %17465  ;;  %v17738_v20 = vsel %vm15044_vm4, %v17714_v35, 0.0  ;;  %v17741_v23 = vsel %vm15044_vm4, %v17715_v63, 0.0  ;;  %v18406_v31 = vunpack.c.l.bf16 %v18420_v4  ;;  %v31010_v35 = vld [vmem:[#allocation6_spill] sm:$0xff] }
0x1770   : > { %v17644_v13 = vsel %vm17612_vm1, %v17596_v11, %v17628_v7  ;;  %17739 = vadd.xlane.f32.xlu1 %v17738_v20  ;;  %17742 = vadd.xlane.f32.xlu0 %v17741_v23  ;;  %v17502_v42 = vmul.f32 %v17461_v18, %v31006_v30  ;;  %v17503_v27 = vmul.f32 %v31007_v58, %v17466_v54  ;;  %v18407_v11 = vunpack.c.h.bf16 %v18420_v4 }
0x1771   : > { %v17689_v61 = vpack.c.bf16 %v17644_v13, %v17643_v29  ;;  %v17645_v15 = vsel %vm17613_vm2, %v17597_v37, %v17629_v28  ;;  %v31011_v29 = vld [vmem:[#allocation8_spill] sm:$0xff] }
0x1773   : > { %v17557_v9 = vpop.permute.xlu1 %17556  ;;  %v17562_v56 = vpop.permute.xlu0 %17561  ;;  %v17700_v5 = vunpack.c.l.bf16 %v17689_v61  ;;  %v17701_v51 = vunpack.c.h.bf16 %v17689_v61  ;;  %v18421_v61 = vld [vmem:[%s30289_s22 + $0x30] sm:$0xff]  }
0x1774   : > { %v17598_v12 = vadd.f32 %v17557_v9, %v17502_v42  ;;  %v17599_v40 = vadd.f32 %v17562_v56, %v17503_v27  ;;  %v18411_v28 = vunpack.c.h.bf16 %v18421_v61 }
0x1775   : > { %v17716_v43 = vmul.f32 %v18398_v48, %v17700_v5  ;;  %v17717_v19 = vmul.f32 %v18399_v60, %v17701_v51  ;;  %v18410_v51 = vunpack.c.l.bf16 %v18421_v61 }
0x1776   : > { %vm17614_vm6 = vcmp.gt.f32.partialorder %v17598_v12, 0.0  ;;  %v17630_v50 = vmul.f32 0.2, %v17598_v12  ;;  %v17631_v47 = vmul.f32 0.2, %v17599_v40  ;;  %vm17615_vm7 = vcmp.gt.f32.partialorder %v17599_v40, 0.0 }
0x1777   : > { %v17471_v38 = vpop.permute.xlu1 %17470  ;;  %v17476_v6 = vpop.permute.xlu0 %17475  ;;  %v17744_v25 = vsel %vm15044_vm4, %v17716_v43, 0.0  ;;  %v17747_v26 = vsel %vm15044_vm4, %v17717_v19, 0.0 }
0x1778   : > { %v17646_v3 = vsel %vm17614_vm6, %v17598_v12, %v17630_v50  ;;  %17745 = vadd.xlane.f32.xlu1 %v17744_v25  ;;  %17748 = vadd.xlane.f32.xlu0 %v17747_v26  ;;  %v17504_v55 = vmul.f32 %v31008_v62, %v17471_v38  ;;  %v17505_v59 = vmul.f32 %v17476_v6, %v31009_v32  ;;  %v31012_v12 = vld [vmem:[#allocation17_spill] sm:$0xff] }
0x1779   : > { %v17690_v45 = vpack.c.bf16 %v17646_v3, %v17645_v15  ;;  %v17647_v21 = vsel %vm17615_vm7, %v17599_v40, %v17631_v47  ;;  %v18422_v26 = vld [vmem:[%s30289_s22 + $0x38] sm:$0xff]  }
0x177a   : > { %v18414_v62 = vunpack.c.l.bf16 %v18422_v26 }
0x177b   : > { %v17567_v14 = vpop.permute.xlu1 %17566  ;;  %v17572_v39 = vpop.permute.xlu0 %17571  ;;  %v17702_v34 = vunpack.c.l.bf16 %v17690_v45  ;;  %v17703_v8 = vunpack.c.h.bf16 %v17690_v45 }
0x177c   : > { %v17600_v0 = vadd.f32 %v17567_v14, %v17504_v55  ;;  %v17601_v16 = vadd.f32 %v17572_v39, %v17505_v59 }
0x177d   : > { %v17718_v2 = vmul.f32 %v18402_v53, %v17702_v34  ;;  %v17719_v41 = vmul.f32 %v18403_v22, %v17703_v8  ;;  %v18415_v22 = vunpack.c.h.bf16 %v18422_v26 }
0x177e   : > { %vm17616_vm8 = vcmp.gt.f32.partialorder %v17600_v0, 0.0  ;;  %v17632_v24 = vmul.f32 0.2, %v17600_v0  ;;  %v17633_v10 = vmul.f32 0.2, %v17601_v16  ;;  %vm17617_vm9 = vcmp.gt.f32.partialorder %v17601_v16, 0.0 }
0x177f   : > { %v17481_v33 = vpop.permute.xlu1 %17480  ;;  %v17486_v1 = vpop.permute.xlu0 %17485  ;;  %v17750_v17 = vsel %vm15044_vm4, %v17718_v2, 0.0  ;;  %v17753_v46 = vsel %vm15044_vm4, %v17719_v41, 0.0 }
0x1780   : > { %v17648_v57 = vsel %vm17616_vm8, %v17600_v0, %v17632_v24  ;;  %17751 = vadd.xlane.f32.xlu1 %v17750_v17  ;;  %17754 = vadd.xlane.f32.xlu0 %v17753_v46  ;;  %v17506_v63 = vmul.f32 %v17481_v33, %v31010_v35  ;;  %v17507_v13 = vmul.f32 %v31011_v29, %v17486_v1 }
0x1781   : > { %v17691_v49 = vpack.c.bf16 %v17648_v57, %v17647_v21  ;;  %v17649_v42 = vsel %vm17617_vm9, %v17601_v16, %v17633_v10 }
0x1783   : > { %v17577_v52 = vpop.permute.xlu1 %17576  ;;  %v17704_v36 = vunpack.c.l.bf16 %v17691_v49  ;;  %v17705_v7 = vunpack.c.h.bf16 %v17691_v49  ;;  %v17582_v54 = vpop.permute.xlu0 %17581 }
0x1784   : > { %v17602_v18 = vadd.f32 %v17577_v52, %v17506_v63  ;;  %v17603_v56 = vadd.f32 %v17582_v54, %v17507_v13 }
0x1785   : > { %v17720_v20 = vmul.f32 %v18406_v31, %v17704_v36  ;;  %v17721_v23 = vmul.f32 %v18407_v11, %v17705_v7 }
0x1786   : > { %vm17618_vm10 = vcmp.gt.f32.partialorder %v17602_v18, 0.0  ;;  %v17634_v37 = vmul.f32 0.2, %v17602_v18  ;;  %v17635_v50 = vmul.f32 0.2, %v17603_v56  ;;  %vm17619_vm11 = vcmp.gt.f32.partialorder %v17603_v56, 0.0 }
0x1787   : > { %v17491_v48 = vpop.permute.xlu1 %17490  ;;  %v17756_v60 = vsel %vm15044_vm4, %v17720_v20, 0.0  ;;  %v17759_v30 = vsel %vm15044_vm4, %v17721_v23, 0.0 }
0x1788   : > { %v17650_v9 = vsel %vm17618_vm10, %v17602_v18, %v17634_v37  ;;  %17757 = vadd.xlane.f32.xlu1 %v17756_v60  ;;  %17760 = vadd.xlane.f32.xlu0 %v17759_v30  ;;  %v17508_v43 = vmul.f32 %v31012_v12, %v17491_v48  ;;  %v17651_v40 = vsel %vm17619_vm11, %v17603_v56, %v17635_v50  ;;  %v17685_v56 = vld [vmem:[#allocation2] sm:$0x1] }
0x1789   : > { %v17692_v5 = vpack.c.bf16 %v17650_v9, %v17649_v42 }
0x178b   : > { %v17587_v19 = vpop.permute.xlu1 %17586  ;;  %v17706_v58 = vunpack.c.l.bf16 %v17692_v5  ;;  %v17707_v27 = vunpack.c.h.bf16 %v17692_v5 }
0x178c   : > { %v17604_v44 = vadd.f32 %v17587_v19, %v17508_v43 }
0x178d   : > { %v17722_v38 = vmul.f32 %v18410_v51, %v17706_v58  ;;  %v17723_v6 = vmul.f32 %v18411_v28, %v17707_v27 }
0x178e   : > { %vm17620_vm5 = vcmp.gt.f32.partialorder %v17604_v44, 0.0  ;;  %v17636_v25 = vmul.f32 0.2, %v17604_v44 }
0x178f   : > { %v17762_v15 = vsel %vm15044_vm4, %v17722_v38, 0.0  ;;  %v17765_v3 = vsel %vm15044_vm4, %v17723_v6, 0.0 }
0x1790   : > { %v17652_v45 = vsel %vm17620_vm5, %v17604_v44, %v17636_v25  ;;  %17763 = vadd.xlane.f32.xlu1 %v17762_v15  ;;  %17766 = vadd.xlane.f32.xlu0 %v17765_v3 }
0x1791   : > { %v17693_v53 = vpack.c.bf16 %v17652_v45, %v17651_v40 }
0x1793   : > { %v17709_v55 = vunpack.c.h.bf16 %v17693_v53  ;;  %v17708_v14 = vunpack.c.l.bf16 %v17693_v53 }
0x1795   : > { %v17725_v39 = vmul.f32 %v18415_v22, %v17709_v55  ;;  %v17724_v34 = vmul.f32 %v18414_v62, %v17708_v14 }
0x1797   : > { %v17771_v8 = vsel %vm15044_vm4, %v17725_v39, 0.0  ;;  %v17768_v47 = vsel %vm15044_vm4, %v17724_v34, 0.0  ;;  %vm17796_vm4 = vcmask 0  }
0x1798   : > { %17772 = vadd.xlane.f32.xlu0 %v17771_v8  ;;  %17769 = vadd.xlane.f32.xlu1 %v17768_v47 }
0x17ed   : > { %v17728_v0 = vpop.xlane.xlu0 %17727  ;;  %v17731_v41 = vpop.xlane.xlu1 %17730 }
0x17ee   : > { %v17774_v32 = vadd.f32 %v17731_v41, %v17728_v0 }
0x17f5   : > { %v17734_v2 = vpop.xlane.xlu0 %17733 }
0x17f6   : > { %v17775_v24 = vadd.f32 %v17774_v32, %v17734_v2 }
0x17f9   : > { %v17737_v59 = vpop.xlane.xlu0 %17736 }
0x17fa   : > { %v17776_v33 = vadd.f32 %v17775_v24, %v17737_v59 }
0x17fd   : > { %v17740_v4 = vpop.xlane.xlu1 %17739  ;;  %v17743_v17 = vpop.xlane.xlu0 %17742 }
0x17fe   : > { %v17777_v1 = vadd.f32 %v17776_v33, %v17740_v4 }
0x1800   : > { %v17778_v21 = vadd.f32 %v17777_v1, %v17743_v17 }
0x1805   : > { %v17746_v46 = vpop.xlane.xlu1 %17745  ;;  %v17749_v16 = vpop.xlane.xlu0 %17748 }
0x1806   : > { %v17779_v57 = vadd.f32 %v17778_v21, %v17746_v46 }
0x1808   : > { %v17780_v31 = vadd.f32 %v17779_v57, %v17749_v16 }
0x180d   : > { %v17752_v49 = vpop.xlane.xlu1 %17751  ;;  %v17755_v35 = vpop.xlane.xlu0 %17754 }
0x180e   : > { %v17781_v11 = vadd.f32 %v17780_v31, %v17752_v49 }
0x1810   : > { %v17782_v52 = vadd.f32 %v17781_v11, %v17755_v35 }
0x1815   : > { %v17758_v63 = vpop.xlane.xlu1 %17757  ;;  %v17761_v7 = vpop.xlane.xlu0 %17760 }
0x1816   : > { %v17783_v36 = vadd.f32 %v17782_v52, %v17758_v63 }
0x1818   : > { %v17784_v18 = vadd.f32 %v17783_v36, %v17761_v7 }
0x181d   : > { %v17764_v10 = vpop.xlane.xlu1 %17763  ;;  %v17767_v20 = vpop.xlane.xlu0 %17766 }
0x181e   : > { %v17785_v54 = vadd.f32 %v17784_v18, %v17764_v10 }
0x1820   : > { %v17786_v23 = vadd.f32 %v17785_v54, %v17767_v20 }
0x1825   : > { %v17770_v29 = vpop.xlane.xlu1 %17769  ;;  %v17773_v37 = vpop.xlane.xlu0 %17772 }
0x1826   : > { %v17787_v13 = vadd.f32 %v17786_v23, %v17770_v29 }
0x1828   : > { %v17788_v61 = vadd.f32 %v17787_v13, %v17773_v37 }
0x182a   : > { %v17789_v48 = vrot.slane %v17788_v61, 4 }
0x182c   : > { %v17790_v60 = vadd.f32 %v17789_v48, %v17788_v61 }
0x182e   : > { %v17791_v30 = vrot.slane %v17790_v60, 2 }
0x1830   : > { %v17792_v42 = vadd.f32 %v17791_v30, %v17790_v60 }
0x1832   : > { %v17793_v9 = vrot.slane %v17792_v42, 1 }
0x1834   : > { %v17794_v5 = vadd.f32 %v17793_v9, %v17792_v42 }
0x1836   : > { %v17795_v51 = vadd.f32 %v17794_v5, %v17685_v56 }
0x1838   : > { %17797 = vst.msk [vmem:[%s735_s5] sm:$0x1] %vm17796_vm4, %v17795_v51 }
0x1839 PF: > { %s36_s27 = sadd.s32 1, %s25473_s27  }
0x183a   : > { %p33_p4 = scmp.ge.s32.totalorder %s36_s27, 4  }
0x183c   :  { %35 = sbr.rel (!%p33_p4) target bundleno = 10 (0xa), region = 170 }

</bundles_post_ra>
